<compile_context>
chip_gen: v6e
topology: v6e:2x2x1
jax: 0.10.0
libtpu: 0.0.40
codegen_flags: <defaults>
</compile_context>

<pallas_src>
import functools

import jax
import jax.numpy as jnp
from jax.experimental import pallas as pl
from jax.experimental.pallas import tpu as pltpu

NGF = 64
KSIZE = 4
EPS = 1e-5


# --------------------------- in-kernel BN helper ----------------------------

def _bn_scale_shift(ys, gamma, beta, count):
    """Train-mode BatchNorm affine params from per-phase GEMM outputs.

    ys: list of (M, C) f32 blocks (one per stride phase).  Per-channel stats
    over rows x phases (== N*H*W for BatchNorm2d, == N for BatchNorm1d),
    biased variance, computed in one sum / sum-of-squares pass (no centred
    temp).  All math stays f32 (v5e has no bf16 VALU/EUP); magnitudes here are
    O(1) so the E[y^2]-mean^2 cancellation error is << EPS.
    """
    s = jnp.sum(ys[0], axis=0, keepdims=True)
    ss = jnp.sum(ys[0] * ys[0], axis=0, keepdims=True)
    for y in ys[1:]:
        s = s + jnp.sum(y, axis=0, keepdims=True)
        ss = ss + jnp.sum(y * y, axis=0, keepdims=True)
    inv = 1.0 / float(count)
    mean = s * inv
    var = ss * inv - mean * mean
    scale = jax.lax.rsqrt(var + EPS) * gamma
    shift = beta - mean * scale
    return scale, shift


# ------------------------------ Pallas kernels -------------------------------

def _proj_bn_relu_kernel(z_ref, w_ref, g_ref, b_ref, o_ref):
    """o = relu(BN1d_train(z @ w)); columns already permuted to (h, w, c)."""
    y = jnp.dot(z_ref[...], w_ref[...], preferred_element_type=jnp.float32)
    scale, shift = _bn_scale_shift([y], g_ref[...], b_ref[...], y.shape[0])
    o_ref[...] = jnp.maximum(y * scale + shift, 0.0).astype(o_ref.dtype)


def _dconv_s2_bn_relu_kernel(a_ref, w_ref, g_ref, b_ref, o_ref, *, nph):
    """Stride-2 ConvTranspose (dense per-phase 2x2 GEMMs) + BN2d + ReLU.

    a:(P, M, 4*Ci) bf16 per-phase patches, w:(P, 4*Ci, Co) bf16 dense weights,
    o:(M, P*Co) bf16 phase-packed (phase major, channel fast).
    """
    ys = [jnp.dot(a_ref[p], w_ref[p], preferred_element_type=jnp.float32)
          for p in range(nph)]
    scale, shift = _bn_scale_shift(ys, g_ref[...], b_ref[...],
                                   ys[0].shape[0] * nph)
    o_ref[...] = jnp.concatenate(
        [jnp.maximum(y * scale + shift, 0.0) for y in ys], axis=-1
    ).astype(o_ref.dtype)


def _dconv_s2_bn_relu_head_kernel(a_ref, w_ref, g_ref, b_ref, w3_ref, o_ref,
                                  *, nph):
    """dconv2 + BN2 + ReLU fused with the dconv3 head.

    Since dconv3 has stride == K and pad 0, each h2 pixel maps to one 4x4x3
    output patch: out_p = relu(bn(y_p)) @ w3 with w3:(Ci, K*K*4) (out channels
    zero-padded 3->4 so the store is lane-dense).  o:(M, P*64) f32.
    """
    ys = [jnp.dot(a_ref[p], w_ref[p], preferred_element_type=jnp.float32)
          for p in range(nph)]
    scale, shift = _bn_scale_shift(ys, g_ref[...], b_ref[...],
                                   ys[0].shape[0] * nph)
    outs = [jnp.dot(jnp.maximum(y * scale + shift, 0.0).astype(jnp.bfloat16),
                    w3_ref[...], preferred_element_type=jnp.float32)
            for y in ys]
    o_ref[...] = jnp.concatenate(outs, axis=-1)


# ---------------------------- pallas_call wrappers ---------------------------

def proj_bn_relu(z, w, gamma, beta):
    M, K = z.shape
    _, N = w.shape
    return pl.pallas_call(
        _proj_bn_relu_kernel,
        out_shape=jax.ShapeDtypeStruct((M, N), jnp.bfloat16),
        grid=(1,),
        in_specs=[
            pl.BlockSpec((M, K), lambda i: (0, 0)),
            pl.BlockSpec((K, N), lambda i: (0, 0)),
            pl.BlockSpec((1, N), lambda i: (0, 0)),
            pl.BlockSpec((1, N), lambda i: (0, 0)),
        ],
        out_specs=pl.BlockSpec((M, N), lambda i: (0, 0)),
        compiler_params=pltpu.CompilerParams(dimension_semantics=("arbitrary",)),
    )(z, w, gamma, beta)


def dconv_s2_bn_relu(a, w, gamma, beta):
    P, M, K = a.shape
    Co = w.shape[-1]
    kernel = functools.partial(_dconv_s2_bn_relu_kernel, nph=P)
    return pl.pallas_call(
        kernel,
        out_shape=jax.ShapeDtypeStruct((M, P * Co), jnp.bfloat16),
        grid=(1,),
        in_specs=[
            pl.BlockSpec((P, M, K), lambda i: (0, 0, 0)),
            pl.BlockSpec((P, K, Co), lambda i: (0, 0, 0)),
            pl.BlockSpec((1, Co), lambda i: (0, 0)),
            pl.BlockSpec((1, Co), lambda i: (0, 0)),
        ],
        out_specs=pl.BlockSpec((M, P * Co), lambda i: (0, 0)),
        compiler_params=pltpu.CompilerParams(dimension_semantics=("arbitrary",)),
    )(a, w, gamma, beta)


def dconv_s2_bn_relu_head(a, w, gamma, beta, w3):
    P, M, K = a.shape
    Co = w.shape[-1]
    N3 = w3.shape[-1]
    kernel = functools.partial(_dconv_s2_bn_relu_head_kernel, nph=P)
    return pl.pallas_call(
        kernel,
        out_shape=jax.ShapeDtypeStruct((M, P * N3), jnp.float32),
        grid=(1,),
        in_specs=[
            pl.BlockSpec((P, M, K), lambda i: (0, 0, 0)),
            pl.BlockSpec((P, K, Co), lambda i: (0, 0, 0)),
            pl.BlockSpec((1, Co), lambda i: (0, 0)),
            pl.BlockSpec((1, Co), lambda i: (0, 0)),
            pl.BlockSpec((Co, N3), lambda i: (0, 0)),
        ],
        out_specs=pl.BlockSpec((M, P * N3), lambda i: (0, 0)),
        compiler_params=pltpu.CompilerParams(dimension_semantics=("arbitrary",)),
    )(a, w, gamma, beta, w3)


# ------------------- one-time weight packing (outside jit) -------------------
#
# Stride-2, K=4, pad=1 ConvTranspose:  out[2q + r] = sum_{d in {0,1}}
#   x_pad[q + r + d] * w[3 - r - 2d]   (per spatial axis), so each phase
# (rh, rw) is a dense 2x2 conv over a shifted window of the 1-padded input.

def pack_dconv_s2_weight(w):
    """w:(Ci, Co, 4, 4) torch ConvTranspose2d -> (4, 4*Ci, Co) bf16 dense.

    Phase index p = 2*rh + rw; rows ordered (dh, dw, ci), ci fastest.
    """
    Ci, Co = w.shape[0], w.shape[1]
    wp = jnp.zeros((4, 2, 2, Ci, Co), jnp.float32)
    for rh in (0, 1):
        for rw in (0, 1):
            p = 2 * rh + rw
            for dh in (0, 1):
                for dw in (0, 1):
                    wp = wp.at[p, dh, dw].set(
                        w[:, :, 3 - rh - 2 * dh, 3 - rw - 2 * dw])
    return wp.reshape(4, 4 * Ci, Co).astype(jnp.bfloat16)


def pack_dconv3_weight(w3):
    """w3:(Ci, 3, 4, 4), stride 4 == K, pad 0 -> (Ci, 4*4*4) bf16.

    Columns ordered (kh, kw, co4) with the output channel zero-padded 3 -> 4
    so the fused kernel's store is lane-dense (4 phases * 64 = 256 columns).
    """
    Ci = w3.shape[0]
    w = jnp.transpose(w3, (0, 2, 3, 1))               # (ci, kh, kw, co)
    w = jnp.pad(w, ((0, 0), (0, 0), (0, 0), (0, 1)))  # co 3 -> 4
    return w.reshape(Ci, KSIZE * KSIZE * 4).astype(jnp.bfloat16)


def pack_params(params):
    """Run ONCE.  Produces bf16 GEMM-ready weights + f32 BN params."""
    C0 = NGF * 4
    hidden = C0 * 4 * 4
    # (c,h,w) -> (h,w,c) column permutation so the proj GEMM emits NHWC order
    # directly.  b_proj is cancelled exactly by the train-mode BN0 mean
    # subtraction and is therefore never applied.
    perm = jnp.arange(hidden).reshape(C0, 4, 4).transpose(1, 2, 0).reshape(-1)
    return {
        "w0": params["w_proj"][perm, :].T.astype(jnp.bfloat16),   # (in, 4096)
        "g0": params["g0"][perm].reshape(1, hidden).astype(jnp.float32),
        "be0": params["be0"][perm].reshape(1, hidden).astype(jnp.float32),
        "w1": pack_dconv_s2_weight(params["w1"]),                 # (4,1024,128)
        "g1": params["g1"].reshape(1, -1).astype(jnp.float32),
        "be1": params["be1"].reshape(1, -1).astype(jnp.float32),
        "w2": pack_dconv_s2_weight(params["w2"]),                 # (4, 512, 64)
        "g2": params["g2"].reshape(1, -1).astype(jnp.float32),
        "be2": params["be2"].reshape(1, -1).astype(jnp.float32),
        "w3": pack_dconv3_weight(params["w3"]),                   # (64, 64)
    }


# --------------------------- XLA glue (tiny tensors) --------------------------

def phase_patch_stack(x):
    """x:(N,H,W,Ci) NHWC -> (4, N*H*W, 4*Ci) dense per-phase 2x2 patches."""
    N, H, W, Ci = x.shape
    xp = jnp.pad(x, ((0, 0), (1, 1), (1, 1), (0, 0)))
    phases = []
    for rh in (0, 1):
        for rw in (0, 1):
            cols = [xp[:, rh + dh:rh + dh + H, rw + dw:rw + dw + W, :]
                    for dh in (0, 1) for dw in (0, 1)]
            phases.append(jnp.concatenate(cols, axis=-1).reshape(N * H * W, 4 * Ci))
    return jnp.stack(phases, axis=0)


def deinterleave_s2(y, N, H, W, Co):
    """(N*H*W, 4*Co) phase-packed GEMM output -> (N, 2H, 2W, Co) NHWC."""
    return (y.reshape(N, H, W, 2, 2, Co)
             .transpose(0, 1, 3, 2, 4, 5)
             .reshape(N, 2 * H, 2 * W, Co))


# ------------------------------ Decoder forward -------------------------------

def decoder_forward(z, pk):
    B = z.shape[0]
    C0 = NGF * 4

    # proj -> BN1d(train) -> ReLU, emitted directly in (h, w, c) column order.
    h0 = proj_bn_relu(z.astype(jnp.bfloat16), pk["w0"], pk["g0"], pk["be0"])
    h0 = h0.reshape(B, 4, 4, C0)                       # NHWC, bf16

    # dconv1 (s=2, p=1) -> BN2d -> ReLU : 4x4x256 -> 8x8x128.
    y1 = dconv_s2_bn_relu(phase_patch_stack(h0), pk["w1"], pk["g1"], pk["be1"])
    h1 = deinterleave_s2(y1, B, 4, 4, NGF * 2)         # (B, 8, 8, 128) bf16

    # dconv2 (s=2, p=1) -> BN2d -> ReLU -> dconv3 (s=4, p=0), all in one kernel.
    y3 = dconv_s2_bn_relu_head(phase_patch_stack(h1), pk["w2"], pk["g2"],
                               pk["be2"], pk["w3"])    # (B*64, 256) f32

    # Assemble final NCHW output; spatial y = 8*q2h + 4*rh2 + kh (likewise x).
    out = (y3.reshape(B, 8, 8, 2, 2, KSIZE, KSIZE, 4)[..., :3]
             .transpose(0, 7, 1, 3, 5, 2, 4, 6)
             .reshape(B, 3, 64, 64))
    return out


# ----------------------------------- main -------------------------------------

if __name__ == "__main__":
    input_dim = 32
    B = 2
    key = jax.random.PRNGKey(0)
    ks = jax.random.split(key, 6)

    hidden = NGF * 4 * 4 * 4  # 4096
    params = {
        # nn.Linear(input_dim, ngf*4*4*4): weight (out, in), bias (out,)
        "w_proj": 0.05 * jax.random.normal(ks[0], (hidden, input_dim), jnp.float32),
        # b_proj exists in the module but is exactly cancelled by the
        # train-mode BN0 that follows, so it is never read by the kernels.
        "b_proj": 0.05 * jax.random.normal(ks[1], (hidden,), jnp.float32),
        # BatchNorm affine params at PyTorch defaults (gamma=1, beta=0)
        "g0": jnp.ones((hidden,), jnp.float32),
        "be0": jnp.zeros((hidden,), jnp.float32),
        # ConvTranspose2d weights: (Cin, Cout, K, K), bias=False per module
        "w1": 0.05 * jax.random.normal(ks[2], (NGF * 4, NGF * 2, KSIZE, KSIZE), jnp.float32),
        "g1": jnp.ones((NGF * 2,), jnp.float32),
        "be1": jnp.zeros((NGF * 2,), jnp.float32),
        "w2": 0.05 * jax.random.normal(ks[3], (NGF * 2, NGF, KSIZE, KSIZE), jnp.float32),
        "g2": jnp.ones((NGF,), jnp.float32),
        "be2": jnp.zeros((NGF,), jnp.float32),
        "w3": 0.05 * jax.random.normal(ks[4], (NGF, 3, KSIZE, KSIZE), jnp.float32),
    }

    z = jax.random.normal(ks[5], (B, input_dim), jnp.float32)

    # One-time weight packing (hoisted out of the per-step graph).
    packed = jax.tree_util.tree_map(jax.block_until_ready, pack_params(params))

    fwd = jax.jit(decoder_forward)
    out = fwd(z, packed)
    jax.block_until_ready(out)

    assert out.shape == (B, 3, 64, 64), out.shape
    assert out.dtype == jnp.float32
    assert bool(jnp.all(jnp.isfinite(out)))
    print("KERNEL_OK")
</pallas_src>

<mosaic_0001>
module attributes {stable_mosaic.version = 11 : i64} {
  func.func @_proj_bn_relu_kernel(%arg0: i32, %arg1: memref<2x32xbf16, #tpu.memory_space<vmem>>, %arg2: memref<32x4096xbf16, #tpu.memory_space<vmem>>, %arg3: memref<1x4096xf32, #tpu.memory_space<vmem>>, %arg4: memref<1x4096xf32, #tpu.memory_space<vmem>>, %arg5: memref<2x4096xbf16, #tpu.memory_space<vmem>>) attributes {dimension_semantics = [#tpu.dimension_semantics<arbitrary>], iteration_bounds = array<i64: 1>, scalar_prefetch = 0 : i64, scratch_operands = 0 : i64, tpu.core_type = #tpu.core_type<tc>, window_params = [{pipeline_mode = #tpu.pipeline_mode<synchronous>, transform_indices = @transform_0, window_bounds = array<i64: 2, 32>}, {pipeline_mode = #tpu.pipeline_mode<synchronous>, transform_indices = @transform_1, window_bounds = array<i64: 32, 4096>}, {pipeline_mode = #tpu.pipeline_mode<synchronous>, transform_indices = @transform_2, window_bounds = array<i64: 1, 4096>}, {pipeline_mode = #tpu.pipeline_mode<synchronous>, transform_indices = @transform_3, window_bounds = array<i64: 1, 4096>}, {pipeline_mode = #tpu.pipeline_mode<synchronous>, transform_indices = @transform_4, window_bounds = array<i64: 2, 4096>}]} {
    %c0 = arith.constant 0 : index
    %c0_0 = arith.constant 0 : index
    %0 = vector.load %arg1[%c0, %c0_0] : memref<2x32xbf16, #tpu.memory_space<vmem>>, vector<2x32xbf16>
    %c0_1 = arith.constant 0 : index
    %c0_2 = arith.constant 0 : index
    %1 = vector.load %arg2[%c0_1, %c0_2] : memref<32x4096xbf16, #tpu.memory_space<vmem>>, vector<32x4096xbf16>
    %cst = arith.constant dense<0.000000e+00> : vector<2x4096xf32>
    %2 = tpu.matmul %0, %1, %cst {dimension_numbers = #tpu.dot_dimension_numbers<[1], [0], [0], [1], [0, 0, 1, 1], [], []>} : vector<2x32xbf16>, vector<32x4096xbf16>, vector<2x4096xf32> -> vector<2x4096xf32>
    %c0_3 = arith.constant 0 : index
    %c0_4 = arith.constant 0 : index
    %3 = vector.load %arg3[%c0_3, %c0_4] : memref<1x4096xf32, #tpu.memory_space<vmem>>, vector<1x4096xf32>
    %c0_5 = arith.constant 0 : index
    %c0_6 = arith.constant 0 : index
    %4 = vector.load %arg4[%c0_5, %c0_6] : memref<1x4096xf32, #tpu.memory_space<vmem>>, vector<1x4096xf32>
    %cst_7 = arith.constant dense<0.000000e+00> : vector<4096xf32>
    %5 = vector.multi_reduction <add>, %2, %cst_7 [0] : vector<2x4096xf32> to vector<4096xf32>
    %6 = vector.shape_cast %5 : vector<4096xf32> to vector<1x4096xf32>
    %7 = arith.mulf %2, %2 : vector<2x4096xf32>
    %cst_8 = arith.constant dense<0.000000e+00> : vector<4096xf32>
    %8 = vector.multi_reduction <add>, %7, %cst_8 [0] : vector<2x4096xf32> to vector<4096xf32>
    %9 = vector.shape_cast %8 : vector<4096xf32> to vector<1x4096xf32>
    %cst_9 = arith.constant 5.000000e-01 : f32
    %10 = vector.broadcast %cst_9 : f32 to vector<1x4096xf32>
    %11 = arith.mulf %6, %10 : vector<1x4096xf32>
    %cst_10 = arith.constant 5.000000e-01 : f32
    %12 = vector.broadcast %cst_10 : f32 to vector<1x4096xf32>
    %13 = arith.mulf %9, %12 : vector<1x4096xf32>
    %14 = arith.mulf %11, %11 : vector<1x4096xf32>
    %15 = arith.subf %13, %14 : vector<1x4096xf32>
    %cst_11 = arith.constant 9.99999974E-6 : f32
    %16 = vector.broadcast %cst_11 : f32 to vector<1x4096xf32>
    %17 = arith.addf %15, %16 : vector<1x4096xf32>
    %18 = math.rsqrt %17 : vector<1x4096xf32>
    %19 = arith.mulf %18, %3 : vector<1x4096xf32>
    %20 = arith.mulf %11, %19 : vector<1x4096xf32>
    %21 = arith.subf %4, %20 : vector<1x4096xf32>
    %22 = vector.broadcast %19 : vector<1x4096xf32> to vector<2x4096xf32>
    %23 = arith.mulf %2, %22 : vector<2x4096xf32>
    %24 = vector.broadcast %21 : vector<1x4096xf32> to vector<2x4096xf32>
    %25 = arith.addf %23, %24 : vector<2x4096xf32>
    %cst_12 = arith.constant 0.000000e+00 : f32
    %26 = vector.broadcast %cst_12 : f32 to vector<2x4096xf32>
    %27 = arith.maximumf %25, %26 : vector<2x4096xf32>
    %28 = arith.truncf %27 : vector<2x4096xf32> to vector<2x4096xbf16>
    %c0_13 = arith.constant 0 : index
    %c0_14 = arith.constant 0 : index
    %29 = vector.load %arg5[%c0_13, %c0_14] : memref<2x4096xbf16, #tpu.memory_space<vmem>>, vector<2x4096xbf16>
    tpu.vector_store %arg5[%c0_13, %c0_14], %28 {strides = array<i32>} : memref<2x4096xbf16, #tpu.memory_space<vmem>>, vector<2x4096xbf16>,
    return
  }
  func.func @transform_0(%arg0: i32) -> (i32, i32) {
    %c0_i32 = arith.constant 0 : i32
    %c0_i32_0 = arith.constant 0 : i32
    %c0_i32_1 = arith.constant 0 : i32
    return %c0_i32, %c0_i32_0 : i32, i32
  }
  func.func @transform_1(%arg0: i32) -> (i32, i32) {
    %c0_i32 = arith.constant 0 : i32
    %c0_i32_0 = arith.constant 0 : i32
    %c0_i32_1 = arith.constant 0 : i32
    return %c0_i32, %c0_i32_0 : i32, i32
  }
  func.func @transform_2(%arg0: i32) -> (i32, i32) {
    %c0_i32 = arith.constant 0 : i32
    %c0_i32_0 = arith.constant 0 : i32
    %c0_i32_1 = arith.constant 0 : i32
    return %c0_i32, %c0_i32_0 : i32, i32
  }
  func.func @transform_3(%arg0: i32) -> (i32, i32) {
    %c0_i32 = arith.constant 0 : i32
    %c0_i32_0 = arith.constant 0 : i32
    %c0_i32_1 = arith.constant 0 : i32
    return %c0_i32, %c0_i32_0 : i32, i32
  }
  func.func @transform_4(%arg0: i32) -> (i32, i32) {
    %c0_i32 = arith.constant 0 : i32
    %c0_i32_0 = arith.constant 0 : i32
    %c0_i32_1 = arith.constant 0 : i32
    return %c0_i32, %c0_i32_0 : i32, i32
  }
}

module attributes {stable_mosaic.version = 11 : i64} {
  func.func @_dconv_s2_bn_relu_kernel(%arg0: i32, %arg1: memref<4x32x1024xbf16, #tpu.memory_space<vmem>>, %arg2: memref<4x1024x128xbf16, #tpu.memory_space<vmem>>, %arg3: memref<1x128xf32, #tpu.memory_space<vmem>>, %arg4: memref<1x128xf32, #tpu.memory_space<vmem>>, %arg5: memref<32x512xbf16, #tpu.memory_space<vmem>>) attributes {dimension_semantics = [#tpu.dimension_semantics<arbitrary>], iteration_bounds = array<i64: 1>, scalar_prefetch = 0 : i64, scratch_operands = 0 : i64, tpu.core_type = #tpu.core_type<tc>, window_params = [{pipeline_mode = #tpu.pipeline_mode<synchronous>, transform_indices = @transform_0, window_bounds = array<i64: 4, 32, 1024>}, {pipeline_mode = #tpu.pipeline_mode<synchronous>, transform_indices = @transform_1, window_bounds = array<i64: 4, 1024, 128>}, {pipeline_mode = #tpu.pipeline_mode<synchronous>, transform_indices = @transform_2, window_bounds = array<i64: 1, 128>}, {pipeline_mode = #tpu.pipeline_mode<synchronous>, transform_indices = @transform_3, window_bounds = array<i64: 1, 128>}, {pipeline_mode = #tpu.pipeline_mode<synchronous>, transform_indices = @transform_4, window_bounds = array<i64: 32, 512>}]} {
    %c0 = arith.constant 0 : index
    %c0_0 = arith.constant 0 : index
    %c0_1 = arith.constant 0 : index
    %0 = vector.load %arg1[%c0, %c0_0, %c0_1] : memref<4x32x1024xbf16, #tpu.memory_space<vmem>>, vector<1x32x1024xbf16>
    %1 = vector.shape_cast %0 : vector<1x32x1024xbf16> to vector<32x1024xbf16>
    %c0_2 = arith.constant 0 : index
    %c0_3 = arith.constant 0 : index
    %c0_4 = arith.constant 0 : index
    %2 = vector.load %arg2[%c0_2, %c0_3, %c0_4] : memref<4x1024x128xbf16, #tpu.memory_space<vmem>>, vector<1x1024x128xbf16>
    %3 = vector.shape_cast %2 : vector<1x1024x128xbf16> to vector<1024x128xbf16>
    %cst = arith.constant dense<0.000000e+00> : vector<32x128xf32>
    %4 = tpu.matmul %1, %3, %cst {dimension_numbers = #tpu.dot_dimension_numbers<[1], [0], [0], [1], [0, 0, 1, 1], [], []>} : vector<32x1024xbf16>, vector<1024x128xbf16>, vector<32x128xf32> -> vector<32x128xf32>
    %c1 = arith.constant 1 : index
    %c0_5 = arith.constant 0 : index
    %c0_6 = arith.constant 0 : index
    %5 = vector.load %arg1[%c1, %c0_5, %c0_6] : memref<4x32x1024xbf16, #tpu.memory_space<vmem>>, vector<1x32x1024xbf16>
    %6 = vector.shape_cast %5 : vector<1x32x1024xbf16> to vector<32x1024xbf16>
    %c1_7 = arith.constant 1 : index
    %c0_8 = arith.constant 0 : index
    %c0_9 = arith.constant 0 : index
    %7 = vector.load %arg2[%c1_7, %c0_8, %c0_9] : memref<4x1024x128xbf16, #tpu.memory_space<vmem>>, vector<1x1024x128xbf16>
    %8 = vector.shape_cast %7 : vector<1x1024x128xbf16> to vector<1024x128xbf16>
    %cst_10 = arith.constant dense<0.000000e+00> : vector<32x128xf32>
    %9 = tpu.matmul %6, %8, %cst_10 {dimension_numbers = #tpu.dot_dimension_numbers<[1], [0], [0], [1], [0, 0, 1, 1], [], []>} : vector<32x1024xbf16>, vector<1024x128xbf16>, vector<32x128xf32> -> vector<32x128xf32>
    %c2 = arith.constant 2 : index
    %c0_11 = arith.constant 0 : index
    %c0_12 = arith.constant 0 : index
    %10 = vector.load %arg1[%c2, %c0_11, %c0_12] : memref<4x32x1024xbf16, #tpu.memory_space<vmem>>, vector<1x32x1024xbf16>
    %11 = vector.shape_cast %10 : vector<1x32x1024xbf16> to vector<32x1024xbf16>
    %c2_13 = arith.constant 2 : index
    %c0_14 = arith.constant 0 : index
    %c0_15 = arith.constant 0 : index
    %12 = vector.load %arg2[%c2_13, %c0_14, %c0_15] : memref<4x1024x128xbf16, #tpu.memory_space<vmem>>, vector<1x1024x128xbf16>
    %13 = vector.shape_cast %12 : vector<1x1024x128xbf16> to vector<1024x128xbf16>
    %cst_16 = arith.constant dense<0.000000e+00> : vector<32x128xf32>
    %14 = tpu.matmul %11, %13, %cst_16 {dimension_numbers = #tpu.dot_dimension_numbers<[1], [0], [0], [1], [0, 0, 1, 1], [], []>} : vector<32x1024xbf16>, vector<1024x128xbf16>, vector<32x128xf32> -> vector<32x128xf32>
    %c3 = arith.constant 3 : index
    %c0_17 = arith.constant 0 : index
    %c0_18 = arith.constant 0 : index
    %15 = vector.load %arg1[%c3, %c0_17, %c0_18] : memref<4x32x1024xbf16, #tpu.memory_space<vmem>>, vector<1x32x1024xbf16>
    %16 = vector.shape_cast %15 : vector<1x32x1024xbf16> to vector<32x1024xbf16>
    %c3_19 = arith.constant 3 : index
    %c0_20 = arith.constant 0 : index
    %c0_21 = arith.constant 0 : index
    %17 = vector.load %arg2[%c3_19, %c0_20, %c0_21] : memref<4x1024x128xbf16, #tpu.memory_space<vmem>>, vector<1x1024x128xbf16>
    %18 = vector.shape_cast %17 : vector<1x1024x128xbf16> to vector<1024x128xbf16>
    %cst_22 = arith.constant dense<0.000000e+00> : vector<32x128xf32>
    %19 = tpu.matmul %16, %18, %cst_22 {dimension_numbers = #tpu.dot_dimension_numbers<[1], [0], [0], [1], [0, 0, 1, 1], [], []>} : vector<32x1024xbf16>, vector<1024x128xbf16>, vector<32x128xf32> -> vector<32x128xf32>
    %c0_23 = arith.constant 0 : index
    %c0_24 = arith.constant 0 : index
    %20 = vector.load %arg3[%c0_23, %c0_24] : memref<1x128xf32, #tpu.memory_space<vmem>>, vector<1x128xf32>
    %c0_25 = arith.constant 0 : index
    %c0_26 = arith.constant 0 : index
    %21 = vector.load %arg4[%c0_25, %c0_26] : memref<1x128xf32, #tpu.memory_space<vmem>>, vector<1x128xf32>
    %cst_27 = arith.constant dense<0.000000e+00> : vector<128xf32>
    %22 = vector.multi_reduction <add>, %4, %cst_27 [0] : vector<32x128xf32> to vector<128xf32>
    %23 = vector.shape_cast %22 : vector<128xf32> to vector<1x128xf32>
    %24 = arith.mulf %4, %4 : vector<32x128xf32>
    %cst_28 = arith.constant dense<0.000000e+00> : vector<128xf32>
    %25 = vector.multi_reduction <add>, %24, %cst_28 [0] : vector<32x128xf32> to vector<128xf32>
    %26 = vector.shape_cast %25 : vector<128xf32> to vector<1x128xf32>
    %cst_29 = arith.constant dense<0.000000e+00> : vector<128xf32>
    %27 = vector.multi_reduction <add>, %9, %cst_29 [0] : vector<32x128xf32> to vector<128xf32>
    %28 = vector.shape_cast %27 : vector<128xf32> to vector<1x128xf32>
    %29 = arith.addf %23, %28 : vector<1x128xf32>
    %30 = arith.mulf %9, %9 : vector<32x128xf32>
    %cst_30 = arith.constant dense<0.000000e+00> : vector<128xf32>
    %31 = vector.multi_reduction <add>, %30, %cst_30 [0] : vector<32x128xf32> to vector<128xf32>
    %32 = vector.shape_cast %31 : vector<128xf32> to vector<1x128xf32>
    %33 = arith.addf %26, %32 : vector<1x128xf32>
    %cst_31 = arith.constant dense<0.000000e+00> : vector<128xf32>
    %34 = vector.multi_reduction <add>, %14, %cst_31 [0] : vector<32x128xf32> to vector<128xf32>
    %35 = vector.shape_cast %34 : vector<128xf32> to vector<1x128xf32>
    %36 = arith.addf %29, %35 : vector<1x128xf32>
    %37 = arith.mulf %14, %14 : vector<32x128xf32>
    %cst_32 = arith.constant dense<0.000000e+00> : vector<128xf32>
    %38 = vector.multi_reduction <add>, %37, %cst_32 [0] : vector<32x128xf32> to vector<128xf32>
    %39 = vector.shape_cast %38 : vector<128xf32> to vector<1x128xf32>
    %40 = arith.addf %33, %39 : vector<1x128xf32>
    %cst_33 = arith.constant dense<0.000000e+00> : vector<128xf32>
    %41 = vector.multi_reduction <add>, %19, %cst_33 [0] : vector<32x128xf32> to vector<128xf32>
    %42 = vector.shape_cast %41 : vector<128xf32> to vector<1x128xf32>
    %43 = arith.addf %36, %42 : vector<1x128xf32>
    %44 = arith.mulf %19, %19 : vector<32x128xf32>
    %cst_34 = arith.constant dense<0.000000e+00> : vector<128xf32>
    %45 = vector.multi_reduction <add>, %44, %cst_34 [0] : vector<32x128xf32> to vector<128xf32>
    %46 = vector.shape_cast %45 : vector<128xf32> to vector<1x128xf32>
    %47 = arith.addf %40, %46 : vector<1x128xf32>
    %cst_35 = arith.constant 7.812500e-03 : f32
    %48 = vector.broadcast %cst_35 : f32 to vector<1x128xf32>
    %49 = arith.mulf %43, %48 : vector<1x128xf32>
    %cst_36 = arith.constant 7.812500e-03 : f32
    %50 = vector.broadcast %cst_36 : f32 to vector<1x128xf32>
    %51 = arith.mulf %47, %50 : vector<1x128xf32>
    %52 = arith.mulf %49, %49 : vector<1x128xf32>
    %53 = arith.subf %51, %52 : vector<1x128xf32>
    %cst_37 = arith.constant 9.99999974E-6 : f32
    %54 = vector.broadcast %cst_37 : f32 to vector<1x128xf32>
    %55 = arith.addf %53, %54 : vector<1x128xf32>
    %56 = math.rsqrt %55 : vector<1x128xf32>
    %57 = arith.mulf %56, %20 : vector<1x128xf32>
    %58 = arith.mulf %49, %57 : vector<1x128xf32>
    %59 = arith.subf %21, %58 : vector<1x128xf32>
    %60 = vector.broadcast %57 : vector<1x128xf32> to vector<32x128xf32>
    %61 = arith.mulf %4, %60 : vector<32x128xf32>
    %62 = vector.broadcast %59 : vector<1x128xf32> to vector<32x128xf32>
    %63 = arith.addf %61, %62 : vector<32x128xf32>
    %cst_38 = arith.constant 0.000000e+00 : f32
    %64 = vector.broadcast %cst_38 : f32 to vector<32x128xf32>
    %65 = arith.maximumf %63, %64 : vector<32x128xf32>
    %66 = vector.broadcast %57 : vector<1x128xf32> to vector<32x128xf32>
    %67 = arith.mulf %9, %66 : vector<32x128xf32>
    %68 = vector.broadcast %59 : vector<1x128xf32> to vector<32x128xf32>
    %69 = arith.addf %67, %68 : vector<32x128xf32>
    %cst_39 = arith.constant 0.000000e+00 : f32
    %70 = vector.broadcast %cst_39 : f32 to vector<32x128xf32>
    %71 = arith.maximumf %69, %70 : vector<32x128xf32>
    %72 = vector.broadcast %57 : vector<1x128xf32> to vector<32x128xf32>
    %73 = arith.mulf %14, %72 : vector<32x128xf32>
    %74 = vector.broadcast %59 : vector<1x128xf32> to vector<32x128xf32>
    %75 = arith.addf %73, %74 : vector<32x128xf32>
    %cst_40 = arith.constant 0.000000e+00 : f32
    %76 = vector.broadcast %cst_40 : f32 to vector<32x128xf32>
    %77 = arith.maximumf %75, %76 : vector<32x128xf32>
    %78 = vector.broadcast %57 : vector<1x128xf32> to vector<32x128xf32>
    %79 = arith.mulf %19, %78 : vector<32x128xf32>
    %80 = vector.broadcast %59 : vector<1x128xf32> to vector<32x128xf32>
    %81 = arith.addf %79, %80 : vector<32x128xf32>
    %cst_41 = arith.constant 0.000000e+00 : f32
    %82 = vector.broadcast %cst_41 : f32 to vector<32x128xf32>
    %83 = arith.maximumf %81, %82 : vector<32x128xf32>
    %84 = tpu.concatenate %65, %71, %77, %83 in 1 : vector<32x128xf32>, vector<32x128xf32>, vector<32x128xf32>, vector<32x128xf32> -> vector<32x512xf32>
    %85 = arith.truncf %84 : vector<32x512xf32> to vector<32x512xbf16>
    %c0_42 = arith.constant 0 : index
    %c0_43 = arith.constant 0 : index
    %86 = vector.load %arg5[%c0_42, %c0_43] : memref<32x512xbf16, #tpu.memory_space<vmem>>, vector<32x512xbf16>
    tpu.vector_store %arg5[%c0_42, %c0_43], %85 {strides = array<i32>} : memref<32x512xbf16, #tpu.memory_space<vmem>>, vector<32x512xbf16>,
    return
  }
  func.func @transform_0(%arg0: i32) -> (i32, i32, i32) {
    %c0_i32 = arith.constant 0 : i32
    %c0_i32_0 = arith.constant 0 : i32
    %c0_i32_1 = arith.constant 0 : i32
    %c0_i32_2 = arith.constant 0 : i32
    return %c0_i32, %c0_i32_0, %c0_i32_1 : i32, i32, i32
  }
  func.func @transform_1(%arg0: i32) -> (i32, i32, i32) {
    %c0_i32 = arith.constant 0 : i32
    %c0_i32_0 = arith.constant 0 : i32
    %c0_i32_1 = arith.constant 0 : i32
    %c0_i32_2 = arith.constant 0 : i32
    return %c0_i32, %c0_i32_0, %c0_i32_1 : i32, i32, i32
  }
  func.func @transform_2(%arg0: i32) -> (i32, i32) {
    %c0_i32 = arith.constant 0 : i32
    %c0_i32_0 = arith.constant 0 : i32
    %c0_i32_1 = arith.constant 0 : i32
    return %c0_i32, %c0_i32_0 : i32, i32
  }
  func.func @transform_3(%arg0: i32) -> (i32, i32) {
    %c0_i32 = arith.constant 0 : i32
    %c0_i32_0 = arith.constant 0 : i32
    %c0_i32_1 = arith.constant 0 : i32
    return %c0_i32, %c0_i32_0 : i32, i32
  }
  func.func @transform_4(%arg0: i32) -> (i32, i32) {
    %c0_i32 = arith.constant 0 : i32
    %c0_i32_0 = arith.constant 0 : i32
    %c0_i32_1 = arith.constant 0 : i32
    return %c0_i32, %c0_i32_0 : i32, i32
  }
}

module attributes {stable_mosaic.version = 11 : i64} {
  func.func @_dconv_s2_bn_relu_head_kernel(%arg0: i32, %arg1: memref<4x128x512xbf16, #tpu.memory_space<vmem>>, %arg2: memref<4x512x64xbf16, #tpu.memory_space<vmem>>, %arg3: memref<1x64xf32, #tpu.memory_space<vmem>>, %arg4: memref<1x64xf32, #tpu.memory_space<vmem>>, %arg5: memref<64x64xbf16, #tpu.memory_space<vmem>>, %arg6: memref<128x256xf32, #tpu.memory_space<vmem>>) attributes {dimension_semantics = [#tpu.dimension_semantics<arbitrary>], iteration_bounds = array<i64: 1>, scalar_prefetch = 0 : i64, scratch_operands = 0 : i64, tpu.core_type = #tpu.core_type<tc>, window_params = [{pipeline_mode = #tpu.pipeline_mode<synchronous>, transform_indices = @transform_0, window_bounds = array<i64: 4, 128, 512>}, {pipeline_mode = #tpu.pipeline_mode<synchronous>, transform_indices = @transform_1, window_bounds = array<i64: 4, 512, 64>}, {pipeline_mode = #tpu.pipeline_mode<synchronous>, transform_indices = @transform_2, window_bounds = array<i64: 1, 64>}, {pipeline_mode = #tpu.pipeline_mode<synchronous>, transform_indices = @transform_3, window_bounds = array<i64: 1, 64>}, {pipeline_mode = #tpu.pipeline_mode<synchronous>, transform_indices = @transform_4, window_bounds = array<i64: 64, 64>}, {pipeline_mode = #tpu.pipeline_mode<synchronous>, transform_indices = @transform_5, window_bounds = array<i64: 128, 256>}]} {
    %c0 = arith.constant 0 : index
    %c0_0 = arith.constant 0 : index
    %c0_1 = arith.constant 0 : index
    %0 = vector.load %arg1[%c0, %c0_0, %c0_1] : memref<4x128x512xbf16, #tpu.memory_space<vmem>>, vector<1x128x512xbf16>
    %1 = vector.shape_cast %0 : vector<1x128x512xbf16> to vector<128x512xbf16>
    %c0_2 = arith.constant 0 : index
    %c0_3 = arith.constant 0 : index
    %c0_4 = arith.constant 0 : index
    %2 = vector.load %arg2[%c0_2, %c0_3, %c0_4] : memref<4x512x64xbf16, #tpu.memory_space<vmem>>, vector<1x512x64xbf16>
    %3 = vector.shape_cast %2 : vector<1x512x64xbf16> to vector<512x64xbf16>
    %cst = arith.constant dense<0.000000e+00> : vector<128x64xf32>
    %4 = tpu.matmul %1, %3, %cst {dimension_numbers = #tpu.dot_dimension_numbers<[1], [0], [0], [1], [0, 0, 1, 1], [], []>} : vector<128x512xbf16>, vector<512x64xbf16>, vector<128x64xf32> -> vector<128x64xf32>
    %c1 = arith.constant 1 : index
    %c0_5 = arith.constant 0 : index
    %c0_6 = arith.constant 0 : index
    %5 = vector.load %arg1[%c1, %c0_5, %c0_6] : memref<4x128x512xbf16, #tpu.memory_space<vmem>>, vector<1x128x512xbf16>
    %6 = vector.shape_cast %5 : vector<1x128x512xbf16> to vector<128x512xbf16>
    %c1_7 = arith.constant 1 : index
    %c0_8 = arith.constant 0 : index
    %c0_9 = arith.constant 0 : index
    %7 = vector.load %arg2[%c1_7, %c0_8, %c0_9] : memref<4x512x64xbf16, #tpu.memory_space<vmem>>, vector<1x512x64xbf16>
    %8 = vector.shape_cast %7 : vector<1x512x64xbf16> to vector<512x64xbf16>
    %cst_10 = arith.constant dense<0.000000e+00> : vector<128x64xf32>
    %9 = tpu.matmul %6, %8, %cst_10 {dimension_numbers = #tpu.dot_dimension_numbers<[1], [0], [0], [1], [0, 0, 1, 1], [], []>} : vector<128x512xbf16>, vector<512x64xbf16>, vector<128x64xf32> -> vector<128x64xf32>
    %c2 = arith.constant 2 : index
    %c0_11 = arith.constant 0 : index
    %c0_12 = arith.constant 0 : index
    %10 = vector.load %arg1[%c2, %c0_11, %c0_12] : memref<4x128x512xbf16, #tpu.memory_space<vmem>>, vector<1x128x512xbf16>
    %11 = vector.shape_cast %10 : vector<1x128x512xbf16> to vector<128x512xbf16>
    %c2_13 = arith.constant 2 : index
    %c0_14 = arith.constant 0 : index
    %c0_15 = arith.constant 0 : index
    %12 = vector.load %arg2[%c2_13, %c0_14, %c0_15] : memref<4x512x64xbf16, #tpu.memory_space<vmem>>, vector<1x512x64xbf16>
    %13 = vector.shape_cast %12 : vector<1x512x64xbf16> to vector<512x64xbf16>
    %cst_16 = arith.constant dense<0.000000e+00> : vector<128x64xf32>
    %14 = tpu.matmul %11, %13, %cst_16 {dimension_numbers = #tpu.dot_dimension_numbers<[1], [0], [0], [1], [0, 0, 1, 1], [], []>} : vector<128x512xbf16>, vector<512x64xbf16>, vector<128x64xf32> -> vector<128x64xf32>
    %c3 = arith.constant 3 : index
    %c0_17 = arith.constant 0 : index
    %c0_18 = arith.constant 0 : index
    %15 = vector.load %arg1[%c3, %c0_17, %c0_18] : memref<4x128x512xbf16, #tpu.memory_space<vmem>>, vector<1x128x512xbf16>
    %16 = vector.shape_cast %15 : vector<1x128x512xbf16> to vector<128x512xbf16>
    %c3_19 = arith.constant 3 : index
    %c0_20 = arith.constant 0 : index
    %c0_21 = arith.constant 0 : index
    %17 = vector.load %arg2[%c3_19, %c0_20, %c0_21] : memref<4x512x64xbf16, #tpu.memory_space<vmem>>, vector<1x512x64xbf16>
    %18 = vector.shape_cast %17 : vector<1x512x64xbf16> to vector<512x64xbf16>
    %cst_22 = arith.constant dense<0.000000e+00> : vector<128x64xf32>
    %19 = tpu.matmul %16, %18, %cst_22 {dimension_numbers = #tpu.dot_dimension_numbers<[1], [0], [0], [1], [0, 0, 1, 1], [], []>} : vector<128x512xbf16>, vector<512x64xbf16>, vector<128x64xf32> -> vector<128x64xf32>
    %c0_23 = arith.constant 0 : index
    %c0_24 = arith.constant 0 : index
    %20 = vector.load %arg3[%c0_23, %c0_24] : memref<1x64xf32, #tpu.memory_space<vmem>>, vector<1x64xf32>
    %c0_25 = arith.constant 0 : index
    %c0_26 = arith.constant 0 : index
    %21 = vector.load %arg4[%c0_25, %c0_26] : memref<1x64xf32, #tpu.memory_space<vmem>>, vector<1x64xf32>
    %cst_27 = arith.constant dense<0.000000e+00> : vector<64xf32>
    %22 = vector.multi_reduction <add>, %4, %cst_27 [0] : vector<128x64xf32> to vector<64xf32>
    %23 = vector.shape_cast %22 : vector<64xf32> to vector<1x64xf32>
    %24 = arith.mulf %4, %4 : vector<128x64xf32>
    %cst_28 = arith.constant dense<0.000000e+00> : vector<64xf32>
    %25 = vector.multi_reduction <add>, %24, %cst_28 [0] : vector<128x64xf32> to vector<64xf32>
    %26 = vector.shape_cast %25 : vector<64xf32> to vector<1x64xf32>
    %cst_29 = arith.constant dense<0.000000e+00> : vector<64xf32>
    %27 = vector.multi_reduction <add>, %9, %cst_29 [0] : vector<128x64xf32> to vector<64xf32>
    %28 = vector.shape_cast %27 : vector<64xf32> to vector<1x64xf32>
    %29 = arith.addf %23, %28 : vector<1x64xf32>
    %30 = arith.mulf %9, %9 : vector<128x64xf32>
    %cst_30 = arith.constant dense<0.000000e+00> : vector<64xf32>
    %31 = vector.multi_reduction <add>, %30, %cst_30 [0] : vector<128x64xf32> to vector<64xf32>
    %32 = vector.shape_cast %31 : vector<64xf32> to vector<1x64xf32>
    %33 = arith.addf %26, %32 : vector<1x64xf32>
    %cst_31 = arith.constant dense<0.000000e+00> : vector<64xf32>
    %34 = vector.multi_reduction <add>, %14, %cst_31 [0] : vector<128x64xf32> to vector<64xf32>
    %35 = vector.shape_cast %34 : vector<64xf32> to vector<1x64xf32>
    %36 = arith.addf %29, %35 : vector<1x64xf32>
    %37 = arith.mulf %14, %14 : vector<128x64xf32>
    %cst_32 = arith.constant dense<0.000000e+00> : vector<64xf32>
    %38 = vector.multi_reduction <add>, %37, %cst_32 [0] : vector<128x64xf32> to vector<64xf32>
    %39 = vector.shape_cast %38 : vector<64xf32> to vector<1x64xf32>
    %40 = arith.addf %33, %39 : vector<1x64xf32>
    %cst_33 = arith.constant dense<0.000000e+00> : vector<64xf32>
    %41 = vector.multi_reduction <add>, %19, %cst_33 [0] : vector<128x64xf32> to vector<64xf32>
    %42 = vector.shape_cast %41 : vector<64xf32> to vector<1x64xf32>
    %43 = arith.addf %36, %42 : vector<1x64xf32>
    %44 = arith.mulf %19, %19 : vector<128x64xf32>
    %cst_34 = arith.constant dense<0.000000e+00> : vector<64xf32>
    %45 = vector.multi_reduction <add>, %44, %cst_34 [0] : vector<128x64xf32> to vector<64xf32>
    %46 = vector.shape_cast %45 : vector<64xf32> to vector<1x64xf32>
    %47 = arith.addf %40, %46 : vector<1x64xf32>
    %cst_35 = arith.constant 0.001953125 : f32
    %48 = vector.broadcast %cst_35 : f32 to vector<1x64xf32>
    %49 = arith.mulf %43, %48 : vector<1x64xf32>
    %cst_36 = arith.constant 0.001953125 : f32
    %50 = vector.broadcast %cst_36 : f32 to vector<1x64xf32>
    %51 = arith.mulf %47, %50 : vector<1x64xf32>
    %52 = arith.mulf %49, %49 : vector<1x64xf32>
    %53 = arith.subf %51, %52 : vector<1x64xf32>
    %cst_37 = arith.constant 9.99999974E-6 : f32
    %54 = vector.broadcast %cst_37 : f32 to vector<1x64xf32>
    %55 = arith.addf %53, %54 : vector<1x64xf32>
    %56 = math.rsqrt %55 : vector<1x64xf32>
    %57 = arith.mulf %56, %20 : vector<1x64xf32>
    %58 = arith.mulf %49, %57 : vector<1x64xf32>
    %59 = arith.subf %21, %58 : vector<1x64xf32>
    %60 = vector.broadcast %57 : vector<1x64xf32> to vector<128x64xf32>
    %61 = arith.mulf %4, %60 : vector<128x64xf32>
    %62 = vector.broadcast %59 : vector<1x64xf32> to vector<128x64xf32>
    %63 = arith.addf %61, %62 : vector<128x64xf32>
    %cst_38 = arith.constant 0.000000e+00 : f32
    %64 = vector.broadcast %cst_38 : f32 to vector<128x64xf32>
    %65 = arith.maximumf %63, %64 : vector<128x64xf32>
    %66 = arith.truncf %65 : vector<128x64xf32> to vector<128x64xbf16>
    %c0_39 = arith.constant 0 : index
    %c0_40 = arith.constant 0 : index
    %67 = vector.load %arg5[%c0_39, %c0_40] : memref<64x64xbf16, #tpu.memory_space<vmem>>, vector<64x64xbf16>
    %cst_41 = arith.constant dense<0.000000e+00> : vector<128x64xf32>
    %68 = tpu.matmul %66, %67, %cst_41 {dimension_numbers = #tpu.dot_dimension_numbers<[1], [0], [0], [1], [0, 0, 1, 1], [], []>} : vector<128x64xbf16>, vector<64x64xbf16>, vector<128x64xf32> -> vector<128x64xf32>
    %69 = vector.broadcast %57 : vector<1x64xf32> to vector<128x64xf32>
    %70 = arith.mulf %9, %69 : vector<128x64xf32>
    %71 = vector.broadcast %59 : vector<1x64xf32> to vector<128x64xf32>
    %72 = arith.addf %70, %71 : vector<128x64xf32>
    %cst_42 = arith.constant 0.000000e+00 : f32
    %73 = vector.broadcast %cst_42 : f32 to vector<128x64xf32>
    %74 = arith.maximumf %72, %73 : vector<128x64xf32>
    %75 = arith.truncf %74 : vector<128x64xf32> to vector<128x64xbf16>
    %c0_43 = arith.constant 0 : index
    %c0_44 = arith.constant 0 : index
    %76 = vector.load %arg5[%c0_43, %c0_44] : memref<64x64xbf16, #tpu.memory_space<vmem>>, vector<64x64xbf16>
    %cst_45 = arith.constant dense<0.000000e+00> : vector<128x64xf32>
    %77 = tpu.matmul %75, %76, %cst_45 {dimension_numbers = #tpu.dot_dimension_numbers<[1], [0], [0], [1], [0, 0, 1, 1], [], []>} : vector<128x64xbf16>, vector<64x64xbf16>, vector<128x64xf32> -> vector<128x64xf32>
    %78 = vector.broadcast %57 : vector<1x64xf32> to vector<128x64xf32>
    %79 = arith.mulf %14, %78 : vector<128x64xf32>
    %80 = vector.broadcast %59 : vector<1x64xf32> to vector<128x64xf32>
    %81 = arith.addf %79, %80 : vector<128x64xf32>
    %cst_46 = arith.constant 0.000000e+00 : f32
    %82 = vector.broadcast %cst_46 : f32 to vector<128x64xf32>
    %83 = arith.maximumf %81, %82 : vector<128x64xf32>
    %84 = arith.truncf %83 : vector<128x64xf32> to vector<128x64xbf16>
    %c0_47 = arith.constant 0 : index
    %c0_48 = arith.constant 0 : index
    %85 = vector.load %arg5[%c0_47, %c0_48] : memref<64x64xbf16, #tpu.memory_space<vmem>>, vector<64x64xbf16>
    %cst_49 = arith.constant dense<0.000000e+00> : vector<128x64xf32>
    %86 = tpu.matmul %84, %85, %cst_49 {dimension_numbers = #tpu.dot_dimension_numbers<[1], [0], [0], [1], [0, 0, 1, 1], [], []>} : vector<128x64xbf16>, vector<64x64xbf16>, vector<128x64xf32> -> vector<128x64xf32>
    %87 = vector.broadcast %57 : vector<1x64xf32> to vector<128x64xf32>
    %88 = arith.mulf %19, %87 : vector<128x64xf32>
    %89 = vector.broadcast %59 : vector<1x64xf32> to vector<128x64xf32>
    %90 = arith.addf %88, %89 : vector<128x64xf32>
    %cst_50 = arith.constant 0.000000e+00 : f32
    %91 = vector.broadcast %cst_50 : f32 to vector<128x64xf32>
    %92 = arith.maximumf %90, %91 : vector<128x64xf32>
    %93 = arith.truncf %92 : vector<128x64xf32> to vector<128x64xbf16>
    %c0_51 = arith.constant 0 : index
    %c0_52 = arith.constant 0 : index
    %94 = vector.load %arg5[%c0_51, %c0_52] : memref<64x64xbf16, #tpu.memory_space<vmem>>, vector<64x64xbf16>
    %cst_53 = arith.constant dense<0.000000e+00> : vector<128x64xf32>
    %95 = tpu.matmul %93, %94, %cst_53 {dimension_numbers = #tpu.dot_dimension_numbers<[1], [0], [0], [1], [0, 0, 1, 1], [], []>} : vector<128x64xbf16>, vector<64x64xbf16>, vector<128x64xf32> -> vector<128x64xf32>
    %96 = tpu.concatenate %68, %77, %86, %95 in 1 : vector<128x64xf32>, vector<128x64xf32>, vector<128x64xf32>, vector<128x64xf32> -> vector<128x256xf32>
    %c0_54 = arith.constant 0 : index
    %c0_55 = arith.constant 0 : index
    %97 = vector.load %arg6[%c0_54, %c0_55] : memref<128x256xf32, #tpu.memory_space<vmem>>, vector<128x256xf32>
    tpu.vector_store %arg6[%c0_54, %c0_55], %96 {strides = array<i32>} : memref<128x256xf32, #tpu.memory_space<vmem>>, vector<128x256xf32>,
    return
  }
  func.func @transform_0(%arg0: i32) -> (i32, i32, i32) {
    %c0_i32 = arith.constant 0 : i32
    %c0_i32_0 = arith.constant 0 : i32
    %c0_i32_1 = arith.constant 0 : i32
    %c0_i32_2 = arith.constant 0 : i32
    return %c0_i32, %c0_i32_0, %c0_i32_1 : i32, i32, i32
  }
  func.func @transform_1(%arg0: i32) -> (i32, i32, i32) {
    %c0_i32 = arith.constant 0 : i32
    %c0_i32_0 = arith.constant 0 : i32
    %c0_i32_1 = arith.constant 0 : i32
    %c0_i32_2 = arith.constant 0 : i32
    return %c0_i32, %c0_i32_0, %c0_i32_1 : i32, i32, i32
  }
  func.func @transform_2(%arg0: i32) -> (i32, i32) {
    %c0_i32 = arith.constant 0 : i32
    %c0_i32_0 = arith.constant 0 : i32
    %c0_i32_1 = arith.constant 0 : i32
    return %c0_i32, %c0_i32_0 : i32, i32
  }
  func.func @transform_3(%arg0: i32) -> (i32, i32) {
    %c0_i32 = arith.constant 0 : i32
    %c0_i32_0 = arith.constant 0 : i32
    %c0_i32_1 = arith.constant 0 : i32
    return %c0_i32, %c0_i32_0 : i32, i32
  }
  func.func @transform_4(%arg0: i32) -> (i32, i32) {
    %c0_i32 = arith.constant 0 : i32
    %c0_i32_0 = arith.constant 0 : i32
    %c0_i32_1 = arith.constant 0 : i32
    return %c0_i32, %c0_i32_0 : i32, i32
  }
  func.func @transform_5(%arg0: i32) -> (i32, i32) {
    %c0_i32 = arith.constant 0 : i32
    %c0_i32_0 = arith.constant 0 : i32
    %c0_i32_1 = arith.constant 0 : i32
    return %c0_i32, %c0_i32_0 : i32, i32
  }
}

</mosaic_0001>

<bundles_post_ra>
// kernel: decoder_forward.3
= control target key start
LH: loop header
LB: loop body
LE: loop exit
PB: predicated region body
PF: predicated region fallthrough
CT: control target
= control target key end

     0   :  { %9 = vsyncpa [#allocation3], 0  ;;  %s4008_s0 = inlined_call_operand.vmem [shape: bf16[2,32], index: 0, kind: input, shape index: {}]   ;;  %s4009_s1 = inlined_call_operand.hbm [shape: bf16[32,4096], index: 1, kind: input, shape index: {}]   ;;  %s4010_s2 = inlined_call_operand.hbm [shape: f32[1,4096], index: 2, kind: input, shape index: {}]   ;;  %s4011_s3 = inlined_call_operand.hbm [shape: f32[1,4096], index: 3, kind: input, shape index: {}]   ;;  %s4012_s4 = inlined_call_operand.vmem [shape: bf16[2,4096], index: 4, kind: output, shape index: {}]  }
   0x1   :  { %10 = vsyncpa [#allocation5], 0  ;;  %s3138_s15 = smov [#allocation4]   ;;  %s3139_s17 = smov [#allocation2]  }
   0x2   :  { %s31_s16 = sshll.u32 %s3138_s15, 4  ;;  %s18_s18 = sshll.u32 %s3139_s17, 4  ;;  %s32_s16 = int_to_ptr.vmem [resolvable:$true] %s31_s16  ;;  %s19_s18 = int_to_ptr.vmem [resolvable:$true] %s18_s18 }
   0x3   :  { %s3082_s19 = scalar_lea.vmem %s32_s16, 512  ;;  %p3087_p1 = scmp.lt.s32.totalorder %s32_s16, %s32_s16 }
   0x4   :  { %p3083_p0 = scmp.ne.s32.totalorder %s32_s16, %s3082_s19  ;;  %p3088_p2 = scmp.lt.s32.totalorder %s3082_s19, %s3082_s19 }
   0x6   :  { %p3089_p3 = por %p3088_p2, %p3087_p1 }
   0x8   :  { %p3090_p4 = pnand %p3089_p3, %p3083_p0 }
   0xa   :  { %3093 = shalt.err (!%p3090_p4)
}
   0xb   :  { %34 = dma.hbm_to_vmem [thread:$0]  %s4010_s2, 512, %s32_s16, [#allocation5]  }
   0xc   :  { %s3102_s22 = scalar_lea.vmem %s19_s18, 8192  ;;  %p3107_p6 = scmp.lt.s32.totalorder %s19_s18, %s19_s18 }
   0xd   :  { %p3103_p5 = scmp.ne.s32.totalorder %s19_s18, %s3102_s22  ;;  %p3108_p7 = scmp.lt.s32.totalorder %s3102_s22, %s3102_s22 }
   0xf   :  { %p3109_p8 = por %p3108_p7, %p3107_p6 }
  0x11   :  { %p3110_p9 = pnand %p3109_p8, %p3103_p5 }
  0x13   :  { %3113 = shalt.err (!%p3110_p9)
}
  0x14   :  { %s3140_s23 = smov 2048   ;;  %s3141_s24 = smov 128  }
  0x15   :  { %24 = dma.hbm_to_vmem [thread:$0]  %s4009_s1, 8192, %s19_s18, [#allocation3], %s3140_s23, %s3140_s23, %s3141_s24  }
  0x16   :  { %s3142_s27 = smov [#allocation6]  }
  0x17   :  { %s41_s28 = sshll.u32 %s3142_s27, 4  ;;  %s42_s28 = int_to_ptr.vmem [resolvable:$true] %s41_s28 }
  0x18   :  { %s3122_s29 = scalar_lea.vmem %s42_s28, 512  ;;  %p3127_p11 = scmp.lt.s32.totalorder %s42_s28, %s42_s28 }
  0x19   :  { %p3123_p10 = scmp.ne.s32.totalorder %s42_s28, %s3122_s29  ;;  %p3128_p12 = scmp.lt.s32.totalorder %s3122_s29, %s3122_s29 }
  0x1b   :  { %p3129_p13 = por %p3128_p12, %p3127_p11 }
  0x1d   :  { %p3130_p0 = pnand %p3129_p13, %p3123_p10 }
  0x1f   :  { %3133 = shalt.err (!%p3130_p0)
}
  0x20   :  { %44 = dma.hbm_to_vmem [thread:$0]  %s4011_s3, 512, %s42_s28, [#allocation5]  }
  0x21   :  { %3134 = dma.done.wait [#allocation3], 8192  }
  0x22   :  { %3135 = vsyncadd [#allocation3], 4294959104 }
  0x23   :  { %3136 = dma.done.wait [#allocation5], 1024  }
  0x24   :  { %3137 = vsyncadd [#allocation5], 4294966272  ;;  %v3143_v0 = vmov 0   ;;  %v88_v1 = vld [vmem:[#allocation2 + $0x100] sm:$0xff]  ;;  %v89_v3 = vld [vmem:[#allocation2 + $0x108] sm:$0xff]  ;;  %vm440_vm0 = vcmask 261120  }
  0x25   :  { %476 = vmatprep.mubr.bf16.mxu0 %v3143_v0  ;;  %517 = vmatprep.mubr.bf16.mxu1 %v3143_v0  ;;  %v104_v2 = vld [vmem:[#allocation2 + $0x180] sm:$0xff]  ;;  %v105_v5 = vld [vmem:[#allocation2 + $0x188] sm:$0xff]  ;;  %v90_v15 = vld [vmem:[#allocation2 + $0x110] sm:$0xff]  ;;  %vm1108_vm1 = vcmask 1041408  }
  0x26   :  { %v2940_v4 = vcombine.high %v88_v1, %v104_v2  ;;  %v2939_v6 = vcombine.low %v88_v1, %v104_v2  ;;  %v56_v7 = vld [vmem:[#allocation2] sm:$0xff]  ;;  %v2942_v9 = vcombine.high %v89_v3, %v105_v5  ;;  %v2941_v10 = vcombine.low %v89_v3, %v105_v5  ;;  %v57_v12 = vld [vmem:[#allocation2 + $0x8] sm:$0xff]  ;;  %v106_v16 = vld [vmem:[#allocation2 + $0x190] sm:$0xff] }
  0x27   :  { %v72_v8 = vld [vmem:[#allocation2 + $0x80] sm:$0xff]  ;;  %v73_v13 = vld [vmem:[#allocation2 + $0x88] sm:$0xff]  ;;  %v91_v17 = vld [vmem:[#allocation2 + $0x118] sm:$0xff]  ;;  %v2944_v21 = vcombine.high %v90_v15, %v106_v16  ;;  %v2943_v28 = vcombine.low %v90_v15, %v106_v16 }
  0x28   :  { %v2908_v11 = vcombine.high %v56_v7, %v72_v8  ;;  %456 = vmatprep.subr.bf16.mxu0 %v2940_v4  ;;  %v2910_v14 = vcombine.high %v57_v12, %v73_v13  ;;  %497 = vmatprep.subr.bf16.mxu1 %v2942_v9  ;;  %v2907_v18 = vcombine.low %v56_v7, %v72_v8  ;;  %v107_v19 = vld [vmem:[#allocation2 + $0x198] sm:$0xff]  ;;  %v58_v23 = vld [vmem:[#allocation2 + $0x10] sm:$0xff]  ;;  %v3184_v27 = vld [vmem:[%s4008_s0] sm:$0x1] }
  0x29   :  { %457 = vmatpush1.bf16.msra.mxu0 %v2939_v6  ;;  %498 = vmatpush1.bf16.msra.mxu1 %v2941_v10  ;;  %v2909_v20 = vcombine.low %v57_v12, %v73_v13  ;;  %v2946_v22 = vcombine.high %v91_v17, %v107_v19  ;;  %v74_v24 = vld [vmem:[#allocation2 + $0x90] sm:$0xff]  ;;  %v59_v25 = vld [vmem:[#allocation2 + $0x18] sm:$0xff]  ;;  %v2945_v29 = vcombine.low %v91_v17, %v107_v19  ;;  %v92_v32 = vld [vmem:[#allocation2 + $0x120] sm:$0xff] }
  0x2a   :  { %458 = vmatprep.subr.bf16.mxu0 %v2908_v11  ;;  %499 = vmatprep.subr.bf16.mxu1 %v2910_v14  ;;  %v75_v26 = vld [vmem:[#allocation2 + $0x98] sm:$0xff]  ;;  %v2912_v30 = vcombine.high %v58_v23, %v74_v24  ;;  %v108_v33 = vld [vmem:[#allocation2 + $0x1a0] sm:$0xff]  ;;  %v93_v34 = vld [vmem:[#allocation2 + $0x128] sm:$0xff]  ;;  %v2911_v36 = vcombine.low %v58_v23, %v74_v24 }
  0x2b   :  { %v2914_v31 = vcombine.high %v59_v25, %v75_v26  ;;  %v109_v35 = vld [vmem:[#allocation2 + $0x1a8] sm:$0xff]  ;;  %v2913_v37 = vcombine.low %v59_v25, %v75_v26  ;;  %v2948_v38 = vcombine.high %v92_v32, %v108_v33  ;;  %v60_v40 = vld [vmem:[#allocation2 + $0x20] sm:$0xff]  ;;  %v2947_v44 = vcombine.low %v92_v32, %v108_v33  ;;  %v94_v48 = vld [vmem:[#allocation2 + $0x130] sm:$0xff] }
  0x2c   :  { %v2950_v39 = vcombine.high %v93_v34, %v109_v35  ;;  %v76_v41 = vld [vmem:[#allocation2 + $0xa0] sm:$0xff]  ;;  %v61_v42 = vld [vmem:[#allocation2 + $0x28] sm:$0xff]  ;;  %v2949_v45 = vcombine.low %v93_v34, %v109_v35  ;;  %v110_v49 = vld [vmem:[#allocation2 + $0x1b0] sm:$0xff] }
  0x2d   :  { %459 = vmatpush1.bf16.msra.mxu0 %v2907_v18  ;;  %500 = vmatpush1.bf16.msra.mxu1 %v2909_v20  ;;  %v77_v43 = vld [vmem:[#allocation2 + $0xa8] sm:$0xff]  ;;  %v2916_v46 = vcombine.high %v60_v40, %v76_v41  ;;  %v95_v50 = vld [vmem:[#allocation2 + $0x138] sm:$0xff]  ;;  %v2915_v52 = vcombine.low %v60_v40, %v76_v41  ;;  %v2952_v54 = vcombine.high %v94_v48, %v110_v49  ;;  %v62_v56 = vld [vmem:[#allocation2 + $0x30] sm:$0xff] }
  0x2e   :  { %538 = vmatprep.subr.bf16.mxu0 %v2944_v21  ;;  %579 = vmatprep.subr.bf16.mxu1 %v2946_v22  ;;  %v2918_v47 = vcombine.high %v61_v42, %v77_v43  ;;  %v111_v51 = vld [vmem:[#allocation2 + $0x1b8] sm:$0xff]  ;;  %v2917_v53 = vcombine.low %v61_v42, %v77_v43  ;;  %v78_v57 = vld [vmem:[#allocation2 + $0xb0] sm:$0xff]  ;;  %v2951_v60 = vcombine.low %v94_v48, %v110_v49  ;;  %v96_v1 = vld [vmem:[#allocation2 + $0x140] sm:$0xff] }
  0x2f   :  { %v2954_v55 = vcombine.high %v95_v50, %v111_v51  ;;  %v63_v58 = vld [vmem:[#allocation2 + $0x38] sm:$0xff]  ;;  %v2953_v61 = vcombine.low %v95_v50, %v111_v51  ;;  %v2920_v62 = vcombine.high %v62_v56, %v78_v57  ;;  %v112_v2 = vld [vmem:[#allocation2 + $0x1c0] sm:$0xff]  ;;  %v97_v3 = vld [vmem:[#allocation2 + $0x148] sm:$0xff]  ;;  %v2919_v5 = vcombine.low %v62_v56, %v78_v57 }
  0x30   :  { %2971 = vmatmul.mubr.msk.bf16.vlgmr.msra.gmra.mxu0 %vm440_vm0, %v3184_v27  ;;  %2972 = vmatmul.mubr.msk.bf16.vlgmr.msra.gmra.mxu1 %vm440_vm0, %v3184_v27  ;;  %v79_v59 = vld [vmem:[#allocation2 + $0xb8] sm:$0xff]  ;;  %v113_v4 = vld [vmem:[#allocation2 + $0x1c8] sm:$0xff]  ;;  %v2956_v7 = vcombine.high %v96_v1, %v112_v2  ;;  %v64_v9 = vld [vmem:[#allocation2 + $0x40] sm:$0xff]  ;;  %v2955_v13 = vcombine.low %v96_v1, %v112_v2 }
  0x31   :  { %539 = vmatpush1.bf16.msra.mxu0 %v2943_v28  ;;  %580 = vmatpush1.bf16.msra.mxu1 %v2945_v29  ;;  %v2922_v63 = vcombine.high %v63_v58, %v79_v59  ;;  %v2921_v6 = vcombine.low %v63_v58, %v79_v59  ;;  %v2958_v8 = vcombine.high %v97_v3, %v113_v4  ;;  %v80_v10 = vld [vmem:[#allocation2 + $0xc0] sm:$0xff]  ;;  %v65_v11 = vld [vmem:[#allocation2 + $0x48] sm:$0xff]  ;;  %v98_v17 = vld [vmem:[#allocation2 + $0x150] sm:$0xff] }
  0x32   :  { %540 = vmatprep.subr.bf16.mxu0 %v2912_v30  ;;  %581 = vmatprep.subr.bf16.mxu1 %v2914_v31  ;;  %v81_v12 = vld [vmem:[#allocation2 + $0xc8] sm:$0xff]  ;;  %v2957_v14 = vcombine.low %v97_v3, %v113_v4  ;;  %v2924_v15 = vcombine.high %v64_v9, %v80_v10  ;;  %v114_v18 = vld [vmem:[#allocation2 + $0x1d0] sm:$0xff]  ;;  %v99_v19 = vld [vmem:[#allocation2 + $0x158] sm:$0xff]  ;;  %v2923_v21 = vcombine.low %v64_v9, %v80_v10 }
  0x33   :  { %558 = vmatprep.mubr.bf16.mxu0 %v3143_v0  ;;  %599 = vmatprep.mubr.bf16.mxu1 %v3143_v0  ;;  %v2926_v16 = vcombine.high %v65_v11, %v81_v12  ;;  %v115_v20 = vld [vmem:[#allocation2 + $0x1d8] sm:$0xff]  ;;  %v2925_v22 = vcombine.low %v65_v11, %v81_v12  ;;  %v2960_v23 = vcombine.high %v98_v17, %v114_v18  ;;  %v66_v25 = vld [vmem:[#allocation2 + $0x50] sm:$0xff]  ;;  %v100_v34 = vld [vmem:[#allocation2 + $0x160] sm:$0xff] }
  0x34   :  { %v2962_v24 = vcombine.high %v99_v19, %v115_v20  ;;  %v82_v26 = vld [vmem:[#allocation2 + $0xd0] sm:$0xff]  ;;  %v67_v28 = vld [vmem:[#allocation2 + $0x58] sm:$0xff]  ;;  %v2959_v30 = vcombine.low %v98_v17, %v114_v18  ;;  %v2961_v31 = vcombine.low %v99_v19, %v115_v20  ;;  %v116_v35 = vld [vmem:[#allocation2 + $0x1e0] sm:$0xff] }
  0x35   :  { %541 = vmatpush1.bf16.msra.mxu0 %v2911_v36  ;;  %582 = vmatpush1.bf16.msra.mxu1 %v2913_v37  ;;  %v83_v29 = vld [vmem:[#allocation2 + $0xd8] sm:$0xff]  ;;  %v2928_v32 = vcombine.high %v66_v25, %v82_v26  ;;  %v101_v36 = vld [vmem:[#allocation2 + $0x168] sm:$0xff]  ;;  %v2964_v40 = vcombine.high %v100_v34, %v116_v35  ;;  %v68_v42 = vld [vmem:[#allocation2 + $0x60] sm:$0xff] }
  0x36   :  { %620 = vmatprep.subr.bf16.mxu0 %v2948_v38  ;;  %661 = vmatprep.subr.bf16.mxu1 %v2950_v39  ;;  %v2930_v33 = vcombine.high %v67_v28, %v83_v29  ;;  %v117_v37 = vld [vmem:[#allocation2 + $0x1e8] sm:$0xff]  ;;  %v2927_v38 = vcombine.low %v66_v25, %v82_v26  ;;  %v2929_v39 = vcombine.low %v67_v28, %v83_v29  ;;  %v84_v43 = vld [vmem:[#allocation2 + $0xe0] sm:$0xff]  ;;  %v102_v50 = vld [vmem:[#allocation2 + $0x170] sm:$0xff] }
  0x37   :  { %v2966_v41 = vcombine.high %v101_v36, %v117_v37  ;;  %v2932_v48 = vcombine.high %v68_v42, %v84_v43  ;;  %v118_v51 = vld [vmem:[#allocation2 + $0x1f0] sm:$0xff] }
  0x38   :  { %2973 = vmatmul.mubr.msk.bf16.vlgmr.msra.gmra.mxu0 %vm440_vm0, %v3184_v27  ;;  %2974 = vmatmul.mubr.msk.bf16.vlgmr.msra.gmra.mxu1 %vm440_vm0, %v3184_v27  ;;  %v2968_v56 = vcombine.high %v102_v50, %v118_v51  ;;  %v70_v58 = vld [vmem:[#allocation2 + $0x70] sm:$0xff] }
  0x39   :  { %621 = vmatpush1.bf16.msra.mxu0 %v2947_v44  ;;  %662 = vmatpush1.bf16.msra.mxu1 %v2949_v45  ;;  %v69_v44 = vld [vmem:[#allocation2 + $0x68] sm:$0xff]  ;;  %v86_v59 = vld [vmem:[#allocation2 + $0xf0] sm:$0xff] }
  0x3a   :  { %622 = vmatprep.subr.bf16.mxu0 %v2916_v46  ;;  %663 = vmatprep.subr.bf16.mxu1 %v2918_v47  ;;  %v85_v45 = vld [vmem:[#allocation2 + $0xe8] sm:$0xff]  ;;  %v2963_v46 = vcombine.low %v100_v34, %v116_v35  ;;  %v2965_v47 = vcombine.low %v101_v36, %v117_v37  ;;  %v2936_v1 = vcombine.high %v70_v58, %v86_v59 }
  0x3b   :  { %640 = vmatprep.mubr.bf16.mxu0 %v3143_v0  ;;  %681 = vmatprep.mubr.bf16.mxu1 %v3143_v0  ;;  %v2934_v49 = vcombine.high %v69_v44, %v85_v45  ;;  %v2935_v3 = vcombine.low %v70_v58, %v86_v59 }
  0x3d   :  { %623 = vmatpush1.bf16.msra.mxu0 %v2915_v52  ;;  %664 = vmatpush1.bf16.msra.mxu1 %v2917_v53  ;;  %v103_v52 = vld [vmem:[#allocation2 + $0x178] sm:$0xff] }
  0x3e   :  { %702 = vmatprep.subr.bf16.mxu0 %v2952_v54  ;;  %743 = vmatprep.subr.bf16.mxu1 %v2954_v55  ;;  %v119_v53 = vld [vmem:[#allocation2 + $0x1f8] sm:$0xff]  ;;  %v2931_v54 = vcombine.low %v68_v42, %v84_v43  ;;  %v2933_v55 = vcombine.low %v69_v44, %v85_v45 }
  0x3f   :  { %v2970_v57 = vcombine.high %v103_v52, %v119_v53 }
  0x40   :  { %2975 = vmatmul.mubr.msk.bf16.vlgmr.msra.gmra.mxu0 %vm440_vm0, %v3184_v27  ;;  %2976 = vmatmul.mubr.msk.bf16.vlgmr.msra.gmra.mxu1 %vm440_vm0, %v3184_v27 }
  0x41   :  { %703 = vmatpush1.bf16.msra.mxu0 %v2951_v60  ;;  %744 = vmatpush1.bf16.msra.mxu1 %v2953_v61  ;;  %v71_v60 = vld [vmem:[#allocation2 + $0x78] sm:$0xff] }
  0x42   :  { %704 = vmatprep.subr.bf16.mxu0 %v2920_v62  ;;  %745 = vmatprep.subr.bf16.mxu1 %v2922_v63  ;;  %v87_v61 = vld [vmem:[#allocation2 + $0xf8] sm:$0xff]  ;;  %v2967_v62 = vcombine.low %v102_v50, %v118_v51  ;;  %v2969_v63 = vcombine.low %v103_v52, %v119_v53 }
  0x43   :  { %722 = vmatprep.mubr.bf16.mxu0 %v3143_v0  ;;  %763 = vmatprep.mubr.bf16.mxu1 %v3143_v0  ;;  %v2938_v2 = vcombine.high %v71_v60, %v87_v61  ;;  %v2937_v4 = vcombine.low %v71_v60, %v87_v61 }
  0x45   :  { %705 = vmatpush1.bf16.msra.mxu0 %v2919_v5  ;;  %746 = vmatpush1.bf16.msra.mxu1 %v2921_v6  ;;  %v1785_v5 = vlaneseq }
  0x46   :  { %784 = vmatprep.subr.bf16.mxu0 %v2956_v7  ;;  %825 = vmatprep.subr.bf16.mxu1 %v2958_v8 }
  0x47   :  { %v3240_v10 = vshrl.u32 %v1785_v5, 7 }
  0x48   :  { %2977 = vmatmul.mubr.msk.bf16.vlgmr.msra.gmra.mxu0 %vm440_vm0, %v3184_v27  ;;  %2978 = vmatmul.mubr.msk.bf16.vlgmr.msra.gmra.mxu1 %vm440_vm0, %v3184_v27 }
  0x49   :  { %785 = vmatpush1.bf16.msra.mxu0 %v2955_v13  ;;  %826 = vmatpush1.bf16.msra.mxu1 %v2957_v14 }
  0x4a   :  { %786 = vmatprep.subr.bf16.mxu0 %v2924_v15  ;;  %827 = vmatprep.subr.bf16.mxu1 %v2926_v16 }
  0x4b   :  { %804 = vmatprep.mubr.bf16.mxu0 %v3143_v0  ;;  %845 = vmatprep.mubr.bf16.mxu1 %v3143_v0 }
  0x4d   :  { %787 = vmatpush1.bf16.msra.mxu0 %v2923_v21  ;;  %828 = vmatpush1.bf16.msra.mxu1 %v2925_v22 }
  0x4e   :  { %866 = vmatprep.subr.bf16.mxu0 %v2960_v23  ;;  %907 = vmatprep.subr.bf16.mxu1 %v2962_v24 }
  0x50   :  { %2979 = vmatmul.mubr.msk.bf16.vlgmr.msra.gmra.mxu0 %vm440_vm0, %v3184_v27  ;;  %2980 = vmatmul.mubr.msk.bf16.vlgmr.msra.gmra.mxu1 %vm440_vm0, %v3184_v27 }
  0x51   :  { %867 = vmatpush1.bf16.msra.mxu0 %v2959_v30  ;;  %908 = vmatpush1.bf16.msra.mxu1 %v2961_v31 }
  0x52   :  { %868 = vmatprep.subr.bf16.mxu0 %v2928_v32  ;;  %909 = vmatprep.subr.bf16.mxu1 %v2930_v33 }
  0x53   :  { %886 = vmatprep.mubr.bf16.mxu0 %v3143_v0  ;;  %927 = vmatprep.mubr.bf16.mxu1 %v3143_v0 }
  0x55   :  { %869 = vmatpush1.bf16.msra.mxu0 %v2927_v38  ;;  %910 = vmatpush1.bf16.msra.mxu1 %v2929_v39 }
  0x56   :  { %948 = vmatprep.subr.bf16.mxu0 %v2964_v40  ;;  %989 = vmatprep.subr.bf16.mxu1 %v2966_v41 }
  0x58   :  { %2981 = vmatmul.mubr.msk.bf16.vlgmr.msra.gmra.mxu0 %vm440_vm0, %v3184_v27  ;;  %2982 = vmatmul.mubr.msk.bf16.vlgmr.msra.gmra.mxu1 %vm440_vm0, %v3184_v27 }
  0x59   :  { %949 = vmatpush1.bf16.msra.mxu0 %v2963_v46  ;;  %990 = vmatpush1.bf16.msra.mxu1 %v2965_v47 }
  0x5a   :  { %950 = vmatprep.subr.bf16.mxu0 %v2932_v48  ;;  %991 = vmatprep.subr.bf16.mxu1 %v2934_v49 }
  0x5b   :  { %968 = vmatprep.mubr.bf16.mxu0 %v3143_v0  ;;  %1009 = vmatprep.mubr.bf16.mxu1 %v3143_v0 }
  0x5d   :  { %951 = vmatpush1.bf16.msra.mxu0 %v2931_v54  ;;  %992 = vmatpush1.bf16.msra.mxu1 %v2933_v55 }
  0x5e   :  { %1030 = vmatprep.subr.bf16.mxu0 %v2968_v56  ;;  %1071 = vmatprep.subr.bf16.mxu1 %v2970_v57 }
  0x60   :  { %2983 = vmatmul.mubr.msk.bf16.vlgmr.msra.gmra.mxu0 %vm440_vm0, %v3184_v27  ;;  %2984 = vmatmul.mubr.msk.bf16.vlgmr.msra.gmra.mxu1 %vm440_vm0, %v3184_v27 }
  0x61   :  { %1031 = vmatpush1.bf16.msra.mxu0 %v2967_v62  ;;  %1072 = vmatpush1.bf16.msra.mxu1 %v2969_v63 }
  0x62   :  { %1032 = vmatprep.subr.bf16.mxu0 %v2936_v1  ;;  %1073 = vmatprep.subr.bf16.mxu1 %v2938_v2 }
  0x63   :  { %1050 = vmatprep.mubr.bf16.mxu0 %v3143_v0  ;;  %1091 = vmatprep.mubr.bf16.mxu1 %v3143_v0 }
  0x65   :  { %1033 = vmatpush1.bf16.msra.mxu0 %v2935_v3  ;;  %1074 = vmatpush1.bf16.msra.mxu1 %v2937_v4 }
  0x68   :  { %2985 = vmatmul.mubr.msk.bf16.vlgmr.msra.gmra.mxu0 %vm440_vm0, %v3184_v27  ;;  %2986 = vmatmul.mubr.msk.bf16.vlgmr.msra.gmra.mxu1 %vm440_vm0, %v3184_v27 }
  0xf0   :  { %v3232_v6 = vpop.f32.mrf.mxu0  ;;  %v3238_v9 = vpop.f32.mrf.mxu1 }
  0xf1   :  { %v1109_v7 = vsel %vm1108_vm1, %v3232_v6, 0.0  ;;  %v1333_v8 = vmul.f32 %v3232_v6, %v3232_v6  ;;  %v1123_v11 = vsel %vm1108_vm1, %v3238_v9, 0.0  ;;  %v1335_v27 = vmul.f32 %v3238_v9, %v3238_v9 }
  0xf2   :  { %v1110_v0 = vrot.slane %v1109_v7, 4  ;;  %v3246_v12 = vpop.f32.mrf.mxu0  ;;  %v1124_v14 = vrot.slane %v1123_v11, 4  ;;  %v3253_v17 = vpop.f32.mrf.mxu1 }
  0xf3   :  { %v1365_v13 = vsel %vm1108_vm1, %v1333_v8, 0.0  ;;  %v1116_v15 = vsel %vm1108_vm1, %v3246_v12, 0.0  ;;  %v1334_v16 = vmul.f32 %v3246_v12, %v3246_v12  ;;  %v1379_v20 = vsel %vm1108_vm1, %v1335_v27, 0.0 }
  0xf4   :  { %v1111_v18 = vadd.f32 %v1110_v0, %v1109_v7  ;;  %v1366_v19 = vrot.slane %v1365_v13, 4  ;;  %v1117_v21 = vrot.slane %v1116_v15, 4  ;;  %v482_v22 = vpop.f32.mrf.mxu0  ;;  %v1125_v23 = vadd.f32 %v1124_v14, %v1123_v11  ;;  %v523_v28 = vpop.f32.mrf.mxu1 }
  0xf5   :  { %v1380_v24 = vrot.slane %v1379_v20, 4  ;;  %v1372_v25 = vsel %vm1108_vm1, %v1334_v16, 0.0  ;;  %v1130_v26 = vsel %vm1108_vm1, %v3253_v17, 0.0  ;;  %v1336_v37 = vmul.f32 %v3253_v17, %v3253_v17 }
  0xf6   :  { %v1112_v29 = vrot.slane %v1111_v18, 2  ;;  %v1367_v30 = vadd.f32 %v1366_v19, %v1365_v13  ;;  %v1118_v31 = vadd.f32 %v1117_v21, %v1116_v15  ;;  %v1373_v32 = vrot.slane %v1372_v25, 4  ;;  %v483_v33 = vpop.f32.mrf.mxu0  ;;  %v524_v38 = vpop.f32.mrf.mxu1 }
  0xf7   :  { %v1126_v34 = vrot.slane %v1125_v23, 2  ;;  %v1381_v35 = vadd.f32 %v1380_v24, %v1379_v20  ;;  %v1131_v36 = vrot.slane %v1130_v26, 4  ;;  %v1386_v47 = vsel %vm1108_vm1, %v1336_v37, 0.0 }
  0xf8   :  { %v1113_v39 = vadd.f32 %v1112_v29, %v1111_v18  ;;  %v1368_v40 = vrot.slane %v1367_v30, 2  ;;  %v1119_v41 = vrot.slane %v1118_v31, 2  ;;  %v1374_v42 = vadd.f32 %v1373_v32, %v1372_v25  ;;  %v3261_v43 = vpop.f32.mrf.mxu0  ;;  %v3264_v48 = vpop.f32.mrf.mxu1 }
  0xf9   :  { %v1127_v44 = vadd.f32 %v1126_v34, %v1125_v23  ;;  %v1382_v45 = vrot.slane %v1381_v35, 2  ;;  %v1132_v46 = vadd.f32 %v1131_v36, %v1130_v26  ;;  %v1387_v57 = vrot.slane %v1386_v47, 4 }
  0xfa   :  { %v1114_v49 = vrot.slane %v1113_v39, 1  ;;  %v1369_v50 = vadd.f32 %v1368_v40, %v1367_v30  ;;  %v1120_v51 = vadd.f32 %v1119_v41, %v1118_v31  ;;  %v1375_v52 = vrot.slane %v1374_v42, 2  ;;  %v3266_v53 = vpop.f32.mrf.mxu0  ;;  %v3268_v58 = vpop.f32.mrf.mxu1 }
  0xfb   :  { %v1128_v54 = vrot.slane %v1127_v44, 1  ;;  %v1383_v55 = vadd.f32 %v1382_v45, %v1381_v35  ;;  %v1133_v56 = vrot.slane %v1132_v46, 2  ;;  %v1388_v4 = vadd.f32 %v1387_v57, %v1386_v47 }
  0xfc   :  { %v1115_v59 = vadd.f32 %v1114_v49, %v1113_v39  ;;  %v1370_v60 = vrot.slane %v1369_v50, 1  ;;  %v1121_v61 = vrot.slane %v1120_v51, 1  ;;  %v1376_v62 = vadd.f32 %v1375_v52, %v1374_v42  ;;  %v564_v63 = vpop.f32.mrf.mxu0  ;;  %v605_v5 = vpop.f32.mrf.mxu1 }
  0xfd   :  { %v1129_v1 = vadd.f32 %v1128_v54, %v1127_v44  ;;  %v1384_v2 = vrot.slane %v1383_v55, 1  ;;  %v1134_v3 = vadd.f32 %v1133_v56, %v1132_v46  ;;  %v1389_v16 = vrot.slane %v1388_v4, 2 }
  0xfe   :  { %v1371_v7 = vadd.f32 %v1370_v60, %v1369_v50  ;;  %v3270_v8 = vmul.f32 0.5, %v1115_v59  ;;  %v1122_v0 = vadd.f32 %v1121_v61, %v1120_v51  ;;  %v1377_v11 = vrot.slane %v1376_v62, 1  ;;  %v565_v27 = vpop.f32.mrf.mxu0  ;;  %v606_v18 = vpop.f32.mrf.mxu1 }
  0xff   :  { %v1385_v13 = vadd.f32 %v1384_v2, %v1383_v55  ;;  %v3272_v14 = vmul.f32 0.5, %v1129_v1  ;;  %v1135_v15 = vrot.slane %v1134_v3, 1  ;;  %v1390_v28 = vadd.f32 %v1389_v16, %v1388_v4 }
 0x100   :  { %v1621_v19 = vmul.f32 0.5, %v1371_v7  ;;  %v1653_v20 = vmul.f32 %v3270_v8, %v3270_v8  ;;  %v1378_v21 = vadd.f32 %v1377_v11, %v1376_v62  ;;  %v3276_v22 = vmul.f32 0.5, %v1122_v0  ;;  %v3278_v23 = vpop.f32.mrf.mxu0  ;;  %v3282_v29 = vpop.f32.mrf.mxu1 }
 0x101   :  { %4039 = vst [vmem:[#allocation9_spill] sm:$0xff] %v3278_v23  ;;  %v1623_v24 = vmul.f32 0.5, %v1385_v13  ;;  %v1655_v25 = vmul.f32 %v3272_v14, %v3272_v14  ;;  %v1136_v26 = vadd.f32 %v1135_v15, %v1134_v3  ;;  %4040 = vst [vmem:[#allocation10_spill] sm:$0xff] %v3282_v29  ;;  %v1137_v33 = vsel %vm1108_vm1, %v3261_v43, 0.0 }
 0x102   :  { %v1685_v30 = vsub.f32 %v1621_v19, %v1653_v20  ;;  %v1622_v31 = vmul.f32 0.5, %v1378_v21  ;;  %v1654_v32 = vmul.f32 %v3276_v22, %v3276_v22  ;;  %v3288_v34 = vpop.f32.mrf.mxu0  ;;  %v1391_v36 = vrot.slane %v1390_v28, 1  ;;  %v3292_v39 = vpop.f32.mrf.mxu1 }
 0x103   :  { %4041 = vst [vmem:[#allocation11_spill] sm:$0xff] %v3288_v34  ;;  %v1687_v35 = vsub.f32 %v1623_v24, %v1655_v25  ;;  %v3290_v37 = vmul.f32 0.5, %v1136_v26  ;;  %v1138_v38 = vrot.slane %v1137_v33, 4  ;;  %4042 = vst [vmem:[#allocation12_spill] sm:$0xff] %v3292_v39  ;;  %v1337_v42 = vmul.f32 %v3261_v43, %v3261_v43 }
 0x104   :  { %v1717_v40 = vadd.f32 1e-05, %v1685_v30  ;;  %v1686_v41 = vsub.f32 %v1622_v31, %v1654_v32  ;;  %v1151_v44 = vsel %vm1108_vm1, %v3264_v48, 0.0  ;;  %v646_v45 = vpop.f32.mrf.mxu0  ;;  %v1392_v47 = vadd.f32 %v1391_v36, %v1390_v28  ;;  %v687_v51 = vpop.f32.mrf.mxu1 }
 0x105   :  { %v1719_v46 = vadd.f32 1e-05, %v1687_v35  ;;  %v1656_v49 = vmul.f32 %v3290_v37, %v3290_v37  ;;  %v1139_v50 = vadd.f32 %v1138_v38, %v1137_v33  ;;  %v1393_v52 = vsel %vm1108_vm1, %v1337_v42, 0.0 }
 0x106   :  { %3010 = vrsqrt.f32 %v1717_v40  ;;  %v1152_v54 = vrot.slane %v1151_v44, 4  ;;  %v647_v55 = vpop.f32.mrf.mxu0  ;;  %v1718_v56 = vadd.f32 1e-05, %v1686_v41  ;;  %v1624_v57 = vmul.f32 0.5, %v1392_v47  ;;  %v688_v61 = vpop.f32.mrf.mxu1 }
 0x107   :  { %v1140_v59 = vrot.slane %v1139_v50, 2  ;;  %v1394_v60 = vrot.slane %v1393_v52, 4  ;;  %3012 = vrsqrt.f32 %v1719_v46  ;;  %v1339_v63 = vmul.f32 %v3264_v48, %v3264_v48 }
 0x108   :  { %v1153_v62 = vadd.f32 %v1152_v54, %v1151_v44  ;;  %v1144_v1 = vsel %vm1108_vm1, %v3266_v53, 0.0  ;;  %v3305_v2 = vpop.f32.mrf.mxu0  ;;  %v1688_v3 = vsub.f32 %v1624_v57, %v1656_v49  ;;  %v3307_v0 = vpop.f32.mrf.mxu1  ;;  %v1338_v13 = vmul.f32 %v3266_v53, %v3266_v53 }
 0x109   :  { %4043 = vst [vmem:[#allocation13_spill] sm:$0xff] %v3305_v2  ;;  %v1141_v4 = vadd.f32 %v1140_v59, %v1139_v50  ;;  %v1395_v5 = vadd.f32 %v1394_v60, %v1393_v52  ;;  %v1145_v7 = vrot.slane %v1144_v1, 4  ;;  %v1407_v27 = vsel %vm1108_vm1, %v1339_v63, 0.0 }
 0x10a   :  { %v1154_v11 = vrot.slane %v1153_v62, 2  ;;  %v1158_v15 = vsel %vm1108_vm1, %v3268_v58, 0.0  ;;  %v3314_v16 = vpop.f32.mrf.mxu0  ;;  %3014 = vrsqrt.f32 %v1718_v56  ;;  %v1408_v20 = vrot.slane %v1407_v27, 4  ;;  %v3316_v21 = vpop.f32.mrf.mxu1 }
 0x10b   :  { %v1142_v18 = vrot.slane %v1141_v4, 1  ;;  %v1396_v19 = vrot.slane %v1395_v5, 2  ;;  %v1146_v25 = vadd.f32 %v1145_v7, %v1144_v1  ;;  %v1400_v26 = vsel %vm1108_vm1, %v1338_v13, 0.0 }
 0x10c   :  { %v1155_v24 = vadd.f32 %v1154_v11, %v1153_v62  ;;  %v1159_v28 = vrot.slane %v1158_v15, 4  ;;  %v728_v30 = vpop.f32.mrf.mxu0  ;;  %v1720_v31 = vadd.f32 1e-05, %v1688_v3  ;;  %v1409_v35 = vadd.f32 %v1408_v20, %v1407_v27  ;;  %v769_v36 = vpop.f32.mrf.mxu1 }
 0x10d   :  { %v1143_v32 = vadd.f32 %v1142_v18, %v1141_v4  ;;  %v1397_v33 = vadd.f32 %v1396_v19, %v1395_v5  ;;  %v1147_v40 = vrot.slane %v1146_v25, 2  ;;  %v1401_v41 = vrot.slane %v1400_v26, 4  ;;  %v3345_v30 = vld [vmem:[#allocation4] sm:$0xff] }
 0x10e   :  { %v1156_v38 = vrot.slane %v1155_v24, 1  ;;  %v1160_v42 = vadd.f32 %v1159_v28, %v1158_v15  ;;  %v729_v44 = vpop.f32.mrf.mxu0  ;;  %v1410_v47 = vrot.slane %v1409_v35, 2  ;;  %v1340_v49 = vmul.f32 %v3268_v58, %v3268_v58  ;;  %v770_v50 = vpop.f32.mrf.mxu1 }
 0x10f   :  { %v1398_v45 = vrot.slane %v1397_v33, 1  ;;  %v3319_v46 = vmul.f32 0.5, %v1143_v32  ;;  %v1148_v52 = vadd.f32 %v1147_v40, %v1146_v25  ;;  %v1402_v54 = vadd.f32 %v1401_v41, %v1400_v26 }
 0x110   :  { %v1157_v51 = vadd.f32 %v1156_v38, %v1155_v24  ;;  %v1161_v55 = vrot.slane %v1160_v42, 2  ;;  %v3323_v56 = vpop.f32.mrf.mxu0  ;;  %v3144_v57 = vmov 1966171168   ;;  %3016 = vrsqrt.f32 %v1720_v31  ;;  %v3325_v62 = vpop.f32.mrf.mxu1 }
 0x111   :  { %v2046_v59 = vunpack.c.l.s4 %v3144_v57  ;;  %v1399_v60 = vadd.f32 %v1398_v45, %v1397_v33  ;;  %v1411_v61 = vadd.f32 %v1410_v47, %v1409_v35  ;;  %4044 = vst [vmem:[#allocation14_spill] sm:$0xff] %v3325_v62  ;;  %v3328_v63 = vsub.s32 0, %v3240_v10 }
 0x112   :  { %v1657_v1 = vmul.f32 %v3319_v46, %v3319_v46  ;;  %v1149_v3 = vrot.slane %v1148_v52, 1  ;;  %v1403_v4 = vrot.slane %v1402_v54, 2  ;;  %v3332_v5 = vpop.f32.mrf.mxu0  ;;  %v3334_v13 = vmul.f32 0.5, %v1157_v51  ;;  %v3336_v18 = vpop.f32.mrf.mxu1 }
 0x113   :  { %4045 = vst [vmem:[#allocation15_spill] sm:$0xff] %v3332_v5  ;;  %v3011_v7 = vpop.eup %3010  ;;  %v1625_v11 = vmul.f32 0.5, %v1399_v60  ;;  %v1412_v27 = vrot.slane %v1411_v61, 1  ;;  %v1162_v15 = vadd.f32 %v1161_v55, %v1160_v42  ;;  %4046 = vst [vmem:[#allocation16_spill] sm:$0xff] %v3336_v18  ;;  %v3339_v19 = vsub.s32 2, %v3240_v10 }
 0x114   :  { %v3342_v20 = vsub.s32 1, %v3240_v10  ;;  %v1404_v24 = vadd.f32 %v1403_v4, %v1402_v54  ;;  %v1414_v25 = vsel %vm1108_vm1, %v1340_v49, 0.0  ;;  %v810_v26 = vpop.f32.mrf.mxu0  ;;  %v3013_v28 = vpop.eup %3012  ;;  %v2047_v31 = vunpack.c.0.s8 %v2046_v59 }
 0x115   :  { %v3348_v32 = vsub.s32 3, %v3240_v10  ;;  %v1413_v33 = vadd.f32 %v1412_v27, %v1411_v61  ;;  %v1150_v35 = vadd.f32 %v1149_v3, %v1148_v52  ;;  %v851_v36 = vpop.f32.mrf.mxu1  ;;  %v1689_v38 = vsub.f32 %v1625_v11, %v1657_v1 }
 0x116   :  { %v3351_v40 = vsub.s32 4, %v3240_v10  ;;  %v1405_v41 = vrot.slane %v1404_v24, 1  ;;  %v811_v42 = vpop.f32.mrf.mxu0  ;;  %v1659_v45 = vmul.f32 %v3334_v13, %v3334_v13  ;;  %v1163_v47 = vrot.slane %v1162_v15, 1 }
 0x117   :  { %v1627_v44 = vmul.f32 0.5, %v1413_v33  ;;  %v1415_v49 = vrot.slane %v1414_v25, 4  ;;  %v852_v50 = vpop.f32.mrf.mxu1  ;;  %v3015_v51 = vpop.eup %3014  ;;  %v1788_v54 = vrot.slane %v3345_v30, %v3328_v63  ;;  %v1796_v52 = vrot.slane %v3345_v30, %v3339_v19 }
 0x118   :  { %v1792_v55 = vrot.slane %v3345_v30, %v3342_v20  ;;  %v1406_v57 = vadd.f32 %v1405_v41, %v1404_v24  ;;  %v3361_v59 = vpop.f32.mrf.mxu0  ;;  %v3364_v60 = vsub.s32 %v2047_v31, %v3240_v10  ;;  %v1800_v61 = vrot.slane %v3345_v30, %v3348_v32 }
 0x119   :  { %4047 = vst [vmem:[#allocation17_spill] sm:$0xff] %v3361_v59  ;;  %v3368_v1 = vmul.f32 0.5, %v1150_v35  ;;  %v1165_v3 = vsel %vm1108_vm1, %v3278_v23, 0.0  ;;  %v3372_v4 = vpop.f32.mrf.mxu1  ;;  %v1721_v11 = vadd.f32 1e-05, %v1689_v38  ;;  %v3377_v24 = vsub.s32 6, %v3240_v10 }
 0x11a   :  { %4048 = vst [vmem:[#allocation18_spill] sm:$0xff] %v3372_v4  ;;  %v1626_v26 = vmul.f32 0.5, %v1406_v57  ;;  %v3379_v31 = vpop.f32.mrf.mxu0  ;;  %v1691_v33 = vsub.f32 %v1627_v44, %v1659_v45  ;;  %v1164_v36 = vadd.f32 %v1163_v47, %v1162_v15  ;;  %v1416_v41 = vadd.f32 %v1415_v49, %v1414_v25 }
 0x11b   :  { %4049 = vst [vmem:[#allocation19_spill] sm:$0xff] %v3379_v31  ;;  %v1658_v35 = vmul.f32 %v3368_v1, %v3368_v1  ;;  %v3383_v42 = vpop.f32.mrf.mxu1  ;;  %v3386_v50 = vsub.s32 5, %v3240_v10  ;;  %v3389_v38 = vsub.s32 7, %v3240_v10  ;;  %v1166_v27 = vrot.slane %v1165_v3, 4 }
 0x11c   :  { %4050 = vst [vmem:[#allocation20_spill] sm:$0xff] %v3383_v42  ;;  %v1341_v57 = vmul.f32 %v3278_v23, %v3278_v23  ;;  %v892_v4 = vpop.f32.mrf.mxu0  ;;  %v3393_v31 = vmul.f32 %v3011_v7, %v1788_v54  ;;  %v3395_v44 = vmul.f32 %v3013_v28, %v1796_v52  ;;  %v3397_v45 = vmul.f32 %v3015_v51, %v1792_v55 }
 0x11d   :  { %v1690_v15 = vsub.f32 %v1626_v26, %v1658_v35  ;;  %v933_v25 = vpop.f32.mrf.mxu1  ;;  %v3017_v47 = vpop.eup %3016  ;;  %3018 = vrsqrt.f32 %v1721_v11  ;;  %v1417_v49 = vrot.slane %v1416_v41, 2  ;;  %v1167_v42 = vadd.f32 %v1166_v27, %v1165_v3 }
 0x11e   :  { %v1421_v10 = vsel %vm1108_vm1, %v1341_v57, 0.0  ;;  %v893_v59 = vpop.f32.mrf.mxu0  ;;  %v1723_v18 = vadd.f32 1e-05, %v1691_v33  ;;  %v3400_v62 = vmul.f32 0.5, %v1164_v36  ;;  %v1179_v51 = vsel %vm1108_vm1, %v3282_v29, 0.0 }
 0x11f   :  { %v1722_v5 = vadd.f32 1e-05, %v1690_v15  ;;  %v1422_v4 = vrot.slane %v1421_v10, 4  ;;  %v934_v7 = vpop.f32.mrf.mxu1  ;;  %v1418_v54 = vadd.f32 %v1417_v49, %v1416_v41  ;;  %v1168_v28 = vrot.slane %v1167_v42, 2 }
 0x120   :  { %v1343_v52 = vmul.f32 %v3282_v29, %v3282_v29  ;;  %v3406_v55 = vpop.f32.mrf.mxu0  ;;  %v3408_v3 = vmul.f32 %v3017_v47, %v1800_v61  ;;  %v1180_v11 = vrot.slane %v1179_v51, 4  ;;  %v1172_v35 = vsel %vm1108_vm1, %v3288_v34, 0.0 }
 0x121   :  { %4051 = vst [vmem:[#allocation21_spill] sm:$0xff] %v3406_v55  ;;  %3020 = vrsqrt.f32 %v1722_v5  ;;  %v1423_v59 = vadd.f32 %v1422_v4, %v1421_v10  ;;  %v1419_v27 = vrot.slane %v1418_v54, 1  ;;  %v1169_v26 = vadd.f32 %v1168_v28, %v1167_v42 }
 0x122   :  { %v1435_v33 = vsel %vm1108_vm1, %v1343_v52, 0.0  ;;  %3022 = vrsqrt.f32 %v1723_v18  ;;  %v1181_v41 = vadd.f32 %v1180_v11, %v1179_v51  ;;  %v1660_v25 = vmul.f32 %v3400_v62, %v3400_v62  ;;  %v3417_v47 = vpop.f32.mrf.mxu0 }
 0x123   :  { %v1424_v36 = vrot.slane %v1423_v59, 2  ;;  %v1436_v57 = vrot.slane %v1435_v33, 4  ;;  %v1420_v15 = vadd.f32 %v1419_v27, %v1418_v54  ;;  %v1173_v61 = vrot.slane %v1172_v35, 4  ;;  %4052 = vst [vmem:[#allocation22_spill] sm:$0xff] %v3417_v47 }
 0x124   :  { %v1342_v5 = vmul.f32 %v3288_v34, %v3288_v34  ;;  %v1978_v42 = vmul.f32 %v3397_v45, %v3276_v22  ;;  %v1980_v49 = vmul.f32 %v3408_v3, %v3290_v37  ;;  %v1182_v18 = vrot.slane %v1181_v41, 2  ;;  %v974_v51 = vpop.f32.mrf.mxu0  ;;  %v3428_v22 = vpop.f32.mrf.mxu1  ;;  %v3430_v37 = vld [vmem:[#allocation4 + $0x8] sm:$0xff] }
 0x125   :  { %v1437_v10 = vadd.f32 %v1436_v57, %v1435_v33  ;;  %v1628_v4 = vmul.f32 0.5, %v1420_v15  ;;  %v1170_v7 = vrot.slane %v1169_v26, 1  ;;  %v1174_v54 = vadd.f32 %v1173_v61, %v1172_v35  ;;  %4053 = vst [vmem:[#allocation23_spill] sm:$0xff] %v3428_v22 }
 0x126   :  { %v1428_v28 = vsel %vm1108_vm1, %v1342_v5, 0.0  ;;  %v1977_v52 = vmul.f32 %v3393_v31, %v3270_v8  ;;  %v1979_v11 = vmul.f32 %v3395_v44, %v3272_v14  ;;  %v1425_v27 = vadd.f32 %v1424_v36, %v1423_v59  ;;  %v975_v35 = vpop.f32.mrf.mxu0 }
 0x127   :  { %v1183_v47 = vadd.f32 %v1182_v18, %v1181_v41  ;;  %v1692_v55 = vsub.f32 %v1628_v4, %v1660_v25  ;;  %v1438_v33 = vrot.slane %v1437_v10, 2  ;;  %v1175_v57 = vrot.slane %v1174_v54, 2 }
 0x128   :  { %v1429_v15 = vrot.slane %v1428_v28, 4  ;;  %v2041_v61 = vcombine.low %v1977_v52, %v1978_v42  ;;  %v2042_v5 = vcombine.low %v1979_v11, %v1980_v49  ;;  %v1812_v51 = vrot.slane %v3345_v30, %v3377_v24  ;;  %v3444_v52 = vpop.f32.mrf.mxu1 }
 0x129   :  { %v1808_v8 = vrot.slane %v3345_v30, %v3386_v50  ;;  %v2248_v14 = vrot.slane %v3393_v31, %v3328_v63  ;;  %v1724_v59 = vadd.f32 1e-05, %v1692_v55  ;;  %v1171_v36 = vadd.f32 %v1170_v7, %v1169_v26  ;;  %4054 = vst [vmem:[#allocation24_spill] sm:$0xff] %v3444_v52 }
 0x12a   :  { %v1176_v41 = vadd.f32 %v1175_v57, %v1174_v54  ;;  %v3019_v25 = vpop.eup %3018  ;;  %v2256_v18 = vrot.slane %v3395_v44, %v3328_v63  ;;  %v1426_v49 = vrot.slane %v1425_v27, 1  ;;  %v1184_v11 = vrot.slane %v1183_v47, 1  ;;  %v1015_v54 = vpop.f32.mrf.mxu1 }
 0x12b   :  { %3024 = vrsqrt.f32 %v1724_v59  ;;  %v1439_v35 = vadd.f32 %v1438_v33, %v1437_v10  ;;  %v1430_v31 = vadd.f32 %v1429_v15, %v1428_v28  ;;  %v3447_v55 = vrot.slane %v2041_v61, %v3364_v60 }
 0x12c   :  { %v3450_v26 = vrot.slane %v2042_v5, %v3364_v60  ;;  %v1177_v7 = vrot.slane %v1176_v41, 1  ;;  %v3455_v4 = vmul.f32 %v2248_v14, %v3232_v6  ;;  %v3457_v42 = vmul.f32 0.5, %v1171_v36  ;;  %v1016_v5 = vpop.f32.mrf.mxu1 }
 0x12d   :  { %v1431_v59 = vrot.slane %v1430_v31, 2  ;;  %v1186_v10 = vsel %vm1108_vm1, %v3292_v39, 0.0  ;;  %v3462_v28 = vmul.f32 %v2256_v18, %v3238_v9  ;;  %v2252_v33 = vrot.slane %v3397_v45, %v3328_v63 }
 0x12e   :  { %v3021_v57 = vpop.eup %3020  ;;  %v2260_v15 = vrot.slane %v3408_v3, %v3328_v63  ;;  %v1427_v61 = vadd.f32 %v1426_v49, %v1425_v27  ;;  %v1185_v6 = vadd.f32 %v1184_v11, %v1183_v47  ;;  %v1440_v14 = vrot.slane %v1439_v35, 1 }
 0x12f   :  { %v3023_v54 = vpop.eup %3022  ;;  %v1432_v36 = vadd.f32 %v1431_v59, %v1430_v31  ;;  %v1187_v44 = vrot.slane %v1186_v10, 4  ;;  %v2073_v52 = vcombine.low %v3447_v55, %v3450_v26  ;;  %v4055_v9 = vrot.slane %v3345_v30, %v3351_v40 }
 0x130   :  { %v1178_v22 = vadd.f32 %v1177_v7, %v1176_v41  ;;  %v1344_v45 = vmul.f32 %v3292_v39, %v3292_v39  ;;  %v3477_v3 = vmul.f32 %v3021_v57, %v1808_v8  ;;  %v1661_v47 = vmul.f32 %v3457_v42, %v3457_v42 }
 0x131   :  { %v3473_v18 = vmul.f32 %v3019_v25, %v4055_v9  ;;  %v1433_v27 = vrot.slane %v1432_v36, 1  ;;  %v1188_v49 = vadd.f32 %v1187_v44, %v1186_v10  ;;  %v3481_v11 = vmul.f32 %v3023_v54, %v1812_v51 }
 0x132   :  { %v1629_v31 = vmul.f32 0.5, %v1427_v61  ;;  %v1442_v55 = vsel %vm1108_vm1, %v1344_v45, 0.0  ;;  %v1193_v25 = vsel %vm1108_vm1, %v3305_v2, 0.0  ;;  %v1441_v26 = vadd.f32 %v1440_v14, %v1439_v35 }
 0x133   :  { %v3486_v41 = vmul.f32 0.5, %v1185_v6  ;;  %v1189_v7 = vrot.slane %v1188_v49, 2  ;;  %v1443_v59 = vrot.slane %v1442_v55, 4  ;;  %v3488_v8 = vmul.f32 0.5, %v1178_v22 }
 0x134   :  { %v1194_v57 = vrot.slane %v1193_v25, 4  ;;  %v1345_v5 = vmul.f32 %v3305_v2, %v3305_v2  ;;  %v1207_v51 = vsel %vm1108_vm1, %v3307_v0, 0.0  ;;  %v1982_v44 = vmul.f32 %v3477_v3, %v3368_v1 }
 0x135   :  { %v1434_v10 = vadd.f32 %v1433_v27, %v1432_v36  ;;  %v1190_v61 = vadd.f32 %v1189_v7, %v1188_v49  ;;  %v1444_v54 = vadd.f32 %v1443_v59, %v1442_v55  ;;  %v1208_v14 = vrot.slane %v1207_v51, 4 }
 0x136   :  { %v1195_v35 = vadd.f32 %v1194_v57, %v1193_v25  ;;  %v1449_v6 = vsel %vm1108_vm1, %v1345_v5, 0.0  ;;  %v1347_v22 = vmul.f32 %v3307_v0, %v3307_v0  ;;  %v1981_v9 = vmul.f32 %v3473_v18, %v3319_v46 }
 0x137   :  { %v1191_v45 = vrot.slane %v1190_v61, 1  ;;  %v1445_v2 = vrot.slane %v1444_v54, 2  ;;  %v1450_v39 = vrot.slane %v1449_v6, 4  ;;  %v1693_v29 = vsub.f32 %v1629_v31, %v1661_v47 }
 0x138   :  { %v3025_v34 = vpop.eup %3024  ;;  %v1631_v23 = vmul.f32 0.5, %v1441_v26  ;;  %v1663_v1 = vmul.f32 %v3486_v41, %v3486_v41  ;;  %v1209_v36 = vadd.f32 %v1208_v14, %v1207_v51  ;;  %v2043_v27 = vcombine.low %v1981_v9, %v1982_v44 }
 0x139   :  { %v4056_v49 = vrot.slane %v3345_v30, %v3389_v38  ;;  %v1446_v25 = vadd.f32 %v1445_v2, %v1444_v54  ;;  %v1463_v7 = vsel %vm1108_vm1, %v1347_v22, 0.0  ;;  %v1983_v46 = vmul.f32 %v3481_v11, %v3334_v13 }
 0x13a   :  { %v1630_v59 = vmul.f32 0.5, %v1434_v10  ;;  %v1662_v47 = vmul.f32 %v3488_v8, %v3488_v8  ;;  %v1196_v31 = vrot.slane %v1195_v35, 2  ;;  %v1192_v57 = vadd.f32 %v1191_v45, %v1190_v61 }
 0x13b   :  { %v1952_v55 = vmul.f32 %v3025_v34, %v4056_v49  ;;  %v1447_v5 = vrot.slane %v1446_v25, 1  ;;  %v1451_v51 = vadd.f32 %v1450_v39, %v1449_v6  ;;  %v3513_v44 = vmul.f32 %v2252_v33, %v3246_v12 }
 0x13c   :  { %v3516_v34 = vmul.f32 %v2260_v15, %v3253_v17  ;;  %v1210_v2 = vrot.slane %v1209_v36, 2  ;;  %v1464_v30 = vrot.slane %v1463_v7, 4  ;;  %v2065_v13 = vrot.slane %v2043_v27, %v3364_v60 }
 0x13d   :  { %v1984_v26 = vmul.f32 %v1952_v55, %v3400_v62  ;;  %v1725_v54 = vadd.f32 1e-05, %v1693_v29  ;;  %v1695_v14 = vsub.f32 %v1631_v23, %v1663_v1  ;;  %v2081_v22 = vrot.slane %v2073_v52, %v3364_v60 }
 0x13e   :  { %v1694_v9 = vsub.f32 %v1630_v59, %v1662_v47  ;;  %v1197_v62 = vadd.f32 %v1196_v31, %v1195_v35  ;;  %v1200_v39 = vsel %vm1108_vm1, %v3314_v16, 0.0  ;;  %v1448_v33 = vadd.f32 %v1447_v5, %v1446_v25 }
 0x13f   :  { %v2044_v10 = vcombine.low %v1983_v46, %v1984_v26  ;;  %v3523_v61 = vmul.f32 0.5, %v1192_v57  ;;  %v1452_v17 = vrot.slane %v1451_v51, 2  ;;  %v2264_v15 = vrot.slane %v3473_v18, %v3328_v63  ;;  %v3532_v46 = vpop.f32.mrf.mxu0 }
 0x140   :  { %v2272_v29 = vrot.slane %v3481_v11, %v3328_v63  ;;  %v1211_v23 = vadd.f32 %v1210_v2, %v1209_v36  ;;  %v1465_v6 = vadd.f32 %v1464_v30, %v1463_v7  ;;  %v2268_v52 = vrot.slane %v3477_v3, %v3328_v63  ;;  %v1104_v3 = vld [vmem:[#allocation6] sm:$0xff] }
 0x141   :  { %v2072_v12 = vrot.slane %v2044_v10, %v3364_v60  ;;  %3026 = vrsqrt.f32 %v1725_v54  ;;  %v1727_v45 = vadd.f32 1e-05, %v1695_v14  ;;  %v2276_v1 = vrot.slane %v1952_v55, %v3328_v63 }
 0x142   :  { %v1726_v27 = vadd.f32 1e-05, %v1694_v9  ;;  %v1198_v49 = vrot.slane %v1197_v62, 1  ;;  %v1201_v25 = vrot.slane %v1200_v39, 4  ;;  %v3535_v59 = vmul.f32 0.5, %v1448_v33 }
 0x143   :  { %v2074_v35 = vcombine.low %v2065_v13, %v2072_v12  ;;  %v3539_v11 = vmul.f32 %v3523_v61, %v3523_v61  ;;  %v3541_v36 = vadd.f32 %v1452_v17, %v1451_v51  ;;  %v1212_v7 = vrot.slane %v1211_v23, 1  ;;  %v3549_v13 = vpop.f32.mrf.mxu0 }
 0x144   :  { %v1466_v47 = vrot.slane %v1465_v6, 2  ;;  %v1202_v31 = vadd.f32 %v1201_v25, %v1200_v39  ;;  %v1346_v55 = vmul.f32 %v3314_v16, %v3314_v16  ;;  %v2377_v26 = vmul.f32 %v2264_v15, %v3261_v43  ;;  %4057 = vst [vmem:[#allocation25_spill] sm:$0xff] %v3549_v13 }
 0x145   :  { %v2088_v18 = vrot.slane %v2074_v35, %v3364_v60  ;;  %v2379_v57 = vmul.f32 %v2272_v29, %v3264_v48  ;;  %3028 = vrsqrt.f32 %v1727_v45  ;;  %v2378_v2 = vmul.f32 %v2268_v52, %v3266_v53  ;;  %v1056_v12 = vpop.f32.mrf.mxu0 }
 0x146   :  { %v2380_v30 = vmul.f32 %v2276_v1, %v3268_v58  ;;  %3030 = vrsqrt.f32 %v1726_v27  ;;  %v1203_v51 = vrot.slane %v1202_v31, 2  ;;  %v1696_v54 = vsub.f32 %v3535_v59, %v3539_v11  ;;  %v3567_v59 = vpop.f32.mrf.mxu1 }
 0x147   :  { %v2089_v5 = vcombine.low %v2081_v22, %v2088_v18  ;;  %v1199_v14 = vadd.f32 %v1198_v49, %v1197_v62  ;;  %v1454_v9 = vrot.slane %v3541_v36, 1  ;;  %v1213_v43 = vadd.f32 %v1212_v7, %v1211_v23  ;;  %4058 = vst [vmem:[#allocation26_spill] sm:$0xff] %v3567_v59 }
 0x148   :  { %v1467_v39 = vadd.f32 %v1466_v47, %v1465_v6  ;;  %v1204_v48 = vadd.f32 %v1203_v51, %v1202_v31  ;;  %v1456_v22 = vsel %vm1108_vm1, %v1346_v55, 0.0  ;;  %v1057_v6 = vpop.f32.mrf.mxu0  ;;  %v3571_v12 = vpop.f32.mrf.mxu1 }
 0x149   :  { %v2241_v10 = vsub.f32 %v1104_v3, %v2089_v5  ;;  %4059 = vst [vmem:[#allocation27_spill] sm:$0xff] %v3571_v12 }
 0x14a   :  { %v1097_v6 = vpop.f32.mrf.mxu1 }
 0x14b   :  { %v2412_v53 = vrot.slane %v2241_v10, %v3328_v63  ;;  %v2416_v58 = vrot.slane %v2241_v10, %v3342_v20  ;;  %v2420_v33 = vrot.slane %v2241_v10, %v3339_v19  ;;  %v2424_v17 = vrot.slane %v2241_v10, %v3348_v32 }
 0x14c   :  { %v2428_v15 = vrot.slane %v2241_v10, %v3351_v40  ;;  %v2432_v62 = vrot.slane %v2241_v10, %v3386_v50  ;;  %v2436_v29 = vrot.slane %v2241_v10, %v3377_v24  ;;  %v2440_v23 = vrot.slane %v2241_v10, %v3389_v38 }
 0x14d   :  { %v2569_v52 = vadd.f32 %v2412_v53, %v3455_v4  ;;  %v2570_v35 = vadd.f32 %v2416_v58, %v3513_v44  ;;  %v2571_v45 = vadd.f32 %v2420_v33, %v3462_v28  ;;  %v2572_v1 = vadd.f32 %v2424_v17, %v3516_v34 }
 0x14e   :  { %v2573_v27 = vadd.f32 %v2428_v15, %v2377_v26  ;;  %v2574_v49 = vadd.f32 %v2432_v62, %v2378_v2  ;;  %v2575_v25 = vadd.f32 %v2436_v29, %v2379_v57  ;;  %v2576_v18 = vadd.f32 %v2440_v23, %v2380_v30  ;;  %v3027_v31 = vpop.eup %3026 }
 0x14f   :  { %v2601_v11 = vmax.f32 %v2569_v52, 0.0  ;;  %v2602_v3 = vmax.f32 %v2570_v35, 0.0  ;;  %v2603_v7 = vmax.f32 %v2571_v45, 0.0  ;;  %v2604_v47 = vmax.f32 %v2572_v1, 0.0 }
 0x150   :  { %v2605_v55 = vmax.f32 %v2573_v27, 0.0  ;;  %v2606_v5 = vmax.f32 %v2574_v49, 0.0  ;;  %v2607_v4 = vmax.f32 %v2575_v25, 0.0  ;;  %v2608_v51 = vmax.f32 %v2576_v18, 0.0  ;;  %v1098_v25 = vpop.f32.mrf.mxu1 }
 0x151   :  { %v2987_v44 = vpack.c.bf16 %v2602_v3, %v2601_v11  ;;  %v2988_v10 = vpack.c.bf16 %v2604_v47, %v2603_v7  ;;  %v3569_v28 = vmul.f32 0.5, %v1199_v14  ;;  %v1468_v34 = vrot.slane %v1467_v39, 1 }
 0x152   :  { %v2989_v26 = vpack.c.bf16 %v2606_v5, %v2605_v55  ;;  %v2990_v2 = vpack.c.bf16 %v2608_v51, %v2607_v4  ;;  %v1205_v57 = vrot.slane %v1204_v48, 1  ;;  %v1457_v30 = vrot.slane %v1456_v22, 4  ;;  %v3029_v15 = vpop.eup %3028 }
 0x153   :  { %v2707_v53 = vrot.slane %v2987_v44, %v3364_v60  ;;  %v2714_v58 = vrot.slane %v2988_v10, %v3364_v60  ;;  %v1728_v33 = vadd.f32 1e-05, %v1696_v54  ;;  %v1455_v17 = vadd.f32 %v1454_v9, %v3541_v36  ;;  %v3031_v52 = vpop.eup %3030 }
 0x154   :  { %v2721_v62 = vrot.slane %v2989_v26, %v3364_v60  ;;  %v2728_v14 = vrot.slane %v2990_v2, %v3364_v60  ;;  %v1824_v29 = vrot.slane %v3430_v37, %v3342_v20  ;;  %v3580_v23 = vmul.f32 0.5, %v1213_v43 }
 0x155   :  { %v2729_v35 = vcombine.low %v2707_v53, %v2714_v58  ;;  %v1469_v45 = vadd.f32 %v1468_v34, %v1467_v39  ;;  %v1206_v1 = vadd.f32 %v1205_v57, %v1204_v48  ;;  %v1214_v54 = vsel %vm1108_vm1, %v3316_v21, 0.0 }
 0x156   :  { %v2730_v27 = vcombine.low %v2721_v62, %v2728_v14  ;;  %v1832_v36 = vrot.slane %v3430_v37, %v3348_v32  ;;  %v1458_v49 = vadd.f32 %v1457_v30, %v1456_v22  ;;  %3032 = vrsqrt.f32 %v1728_v33 }
 0x157   :  { %v2737_v43 = vrot.slane %v2729_v35, %v3364_v60  ;;  %v1633_v18 = vmul.f32 0.5, %v1455_v17  ;;  %v1665_v39 = vmul.f32 %v3569_v28, %v3569_v28  ;;  %v1215_v7 = vrot.slane %v1214_v54, 4  ;;  %v4061_v35 = vld [vmem:[#allocation14_spill] sm:$0xff] }
 0x158   :  { %v2744_v48 = vrot.slane %v2730_v27, %v3364_v60  ;;  %v1459_v3 = vrot.slane %v1458_v49, 2  ;;  %v1635_v47 = vmul.f32 0.5, %v1469_v45  ;;  %v1667_v55 = vmul.f32 %v3580_v23, %v3580_v23 }
 0x159   :  { %v3596_v22 = vmul.f32 0.5, %v1206_v1  ;;  %v1348_v5 = vmul.f32 %v3316_v21, %v3316_v21  ;;  %v1216_v44 = vadd.f32 %v1215_v7, %v1214_v54  ;;  %v1221_v10 = vsel %vm1108_vm1, %v3323_v56, 0.0 }
 0x15a   :  { %v2745_v4 = vcombine.low %v2737_v43, %v2744_v48  ;;  %v1460_v51 = vadd.f32 %v1459_v3, %v1458_v49  ;;  %v1697_v34 = vsub.f32 %v1633_v18, %v1665_v39  ;;  %v1222_v2 = vrot.slane %v1221_v10, 4 }
 0x15b   :  { %v1470_v26 = vsel %vm1108_vm1, %v1348_v5, 0.0  ;;  %v1349_v57 = vmul.f32 %v3323_v56, %v3323_v56  ;;  %v3608_v30 = vmul.f32 %v3031_v52, %v1824_v29  ;;  %v1217_v58 = vrot.slane %v1216_v44, 2 }
 0x15c   :  { %2897 = vst [vmem:[%s4012_s4] sm:$0xff] %v2745_v4  ;;  %v1461_v53 = vrot.slane %v1460_v51, 1  ;;  %v1471_v33 = vrot.slane %v1470_v26, 4  ;;  %v4060_v17 = vrot.slane %v3430_v37, %v3328_v63  ;;  %v1699_v14 = vsub.f32 %v1635_v47, %v1667_v55 }
 0x15d   :  { %v1666_v6 = vmul.f32 %v3596_v22, %v3596_v22  ;;  %v1235_v45 = vsel %vm1108_vm1, %v4061_v35, 0.0  ;;  %v1218_v54 = vadd.f32 %v1217_v58, %v1216_v44  ;;  %v1477_v29 = vsel %vm1108_vm1, %v1349_v57, 0.0 }
 0x15e   :  { %v1953_v62 = vmul.f32 %v3027_v31, %v4060_v17  ;;  %v1462_v1 = vadd.f32 %v1461_v53, %v1460_v51  ;;  %v1472_v27 = vadd.f32 %v1471_v33, %v1470_v26  ;;  %v4062_v52 = vrot.slane %v3430_v37, %v3339_v19 }
 0x15f   :  { %v1729_v25 = vadd.f32 1e-05, %v1697_v34  ;;  %v1223_v43 = vadd.f32 %v1222_v2, %v1221_v10  ;;  %v1236_v18 = vrot.slane %v1235_v45, 4  ;;  %v1986_v31 = vmul.f32 %v3608_v30, %v3488_v8 }
 0x160   :  { %v1955_v49 = vmul.f32 %v3029_v15, %v4062_v52  ;;  %v1634_v39 = vmul.f32 0.5, %v1462_v1  ;;  %v1219_v48 = vrot.slane %v1218_v54, 1  ;;  %v1473_v3 = vrot.slane %v1472_v27, 2  ;;  %v4064_v52 = vld [vmem:[#allocation10_spill] sm:$0xff] }
 0x161   :  { %v1985_v7 = vmul.f32 %v1953_v62, %v3457_v42  ;;  %v1731_v47 = vadd.f32 1e-05, %v1699_v14  ;;  %v1478_v55 = vrot.slane %v1477_v29, 4  ;;  %v1237_v5 = vadd.f32 %v1236_v18, %v1235_v45 }
 0x162   :  { %v2280_v4 = vrot.slane %v1953_v62, %v3328_v63  ;;  %v1698_v51 = vsub.f32 %v1634_v39, %v1666_v6  ;;  %v1220_v44 = vadd.f32 %v1219_v48, %v1218_v54  ;;  %v1474_v26 = vadd.f32 %v1473_v3, %v1472_v27  ;;  %v4063_v62 = vld [vmem:[#allocation9_spill] sm:$0xff]  ;;  %v4065_v3 = vld [vmem:[#allocation15_spill] sm:$0xff] }
 0x163   :  { %v2288_v15 = vrot.slane %v1955_v49, %v3328_v63  ;;  %3034 = vrsqrt.f32 %v1729_v25  ;;  %v1224_v10 = vrot.slane %v1223_v43, 2  ;;  %v1351_v8 = vmul.f32 %v4061_v35, %v4061_v35  ;;  %v3033_v34 = vpop.eup %3032 }
 0x164   :  { %v2090_v2 = vcombine.low %v1985_v7, %v1986_v31  ;;  %v1730_v57 = vadd.f32 1e-05, %v1698_v51  ;;  %v1475_v53 = vrot.slane %v1474_v26, 1  ;;  %v3628_v42 = vmul.f32 0.5, %v1220_v44 }
 0x165   :  { %3036 = vrsqrt.f32 %v1731_v47  ;;  %v1479_v58 = vadd.f32 %v1478_v55, %v1477_v29  ;;  %v1238_v33 = vrot.slane %v1237_v5, 2  ;;  %v1491_v17 = vsel %vm1108_vm1, %v1351_v8, 0.0 }
 0x166   :  { %v3632_v14 = vmul.f32 %v2280_v4, %v4063_v62  ;;  %3038 = vrsqrt.f32 %v1730_v57  ;;  %v1840_v6 = vrot.slane %v3430_v37, %v3386_v50  ;;  %v1476_v45 = vadd.f32 %v1475_v53, %v1474_v26  ;;  %v4066_v26 = vld [vmem:[#allocation16_spill] sm:$0xff] }
 0x167   :  { %v1987_v1 = vmul.f32 %v1955_v49, %v3486_v41  ;;  %v3640_v54 = vmul.f32 %v3033_v34, %v1832_v36  ;;  %v1668_v27 = vmul.f32 %v3628_v42, %v3628_v42  ;;  %v1225_v29 = vadd.f32 %v1224_v10, %v1223_v43 }
 0x168   :  { %v3645_v25 = vmul.f32 %v2288_v15, %v4064_v52  ;;  %v1636_v31 = vmul.f32 0.5, %v1476_v45  ;;  %v1492_v39 = vrot.slane %v1491_v17, 4  ;;  %v3650_v48 = vrot.slane %v2090_v2, %v3364_v60 }
 0x169   :  { %v1480_v41 = vrot.slane %v1479_v58, 2  ;;  %v1239_v49 = vadd.f32 %v1238_v33, %v1237_v5  ;;  %v1228_v36 = vsel %vm1108_vm1, %v4065_v3, 0.0  ;;  %v1350_v43 = vmul.f32 %v4065_v3, %v4065_v3 }
 0x16a   :  { %v1700_v7 = vsub.f32 %v1636_v31, %v1668_v27  ;;  %v1493_v47 = vadd.f32 %v1492_v39, %v1491_v17  ;;  %v1229_v55 = vrot.slane %v1228_v36, 4  ;;  %v1988_v4 = vmul.f32 %v3640_v54, %v3523_v61 }
 0x16b   :  { %v1226_v44 = vrot.slane %v1225_v29, 1  ;;  %v1242_v15 = vsel %vm1108_vm1, %v4066_v26, 0.0  ;;  %v1484_v34 = vsel %vm1108_vm1, %v1350_v43, 0.0  ;;  %v1481_v2 = vadd.f32 %v1480_v41, %v1479_v58  ;;  %v4067_v41 = vld [vmem:[#allocation17_spill] sm:$0xff] }
 0x16c   :  { %v1732_v5 = vadd.f32 1e-05, %v1700_v7  ;;  %v1494_v10 = vrot.slane %v1493_v47, 2  ;;  %v1230_v8 = vadd.f32 %v1229_v55, %v1228_v36  ;;  %v1240_v57 = vrot.slane %v1239_v49, 1 }
 0x16d   :  { %v1485_v53 = vrot.slane %v1484_v34, 4  ;;  %v1243_v33 = vrot.slane %v1242_v15, 4  ;;  %v1352_v61 = vmul.f32 %v4066_v26, %v4066_v26  ;;  %v2091_v45 = vcombine.low %v1987_v1, %v1988_v4 }
 0x16e   :  { %3040 = vrsqrt.f32 %v1732_v5  ;;  %v1495_v17 = vadd.f32 %v1494_v10, %v1493_v47  ;;  %v1231_v62 = vrot.slane %v1230_v8, 2  ;;  %v1848_v27 = vrot.slane %v3430_v37, %v3389_v38 }
 0x16f   :  { %v1486_v52 = vadd.f32 %v1485_v53, %v1484_v34  ;;  %v1244_v31 = vadd.f32 %v1243_v33, %v1242_v15  ;;  %v1227_v36 = vadd.f32 %v1226_v44, %v1225_v29  ;;  %v1498_v58 = vsel %vm1108_vm1, %v1352_v61, 0.0 }
 0x170   :  { %v3035_v39 = vpop.eup %3034  ;;  %v1232_v7 = vadd.f32 %v1231_v62, %v1230_v8  ;;  %v1249_v55 = vsel %vm1108_vm1, %v4067_v41, 0.0  ;;  %v1482_v43 = vrot.slane %v1481_v2, 1  ;;  %v1499_v10 = vrot.slane %v1498_v58, 4 }
 0x171   :  { %v1487_v47 = vrot.slane %v1486_v52, 2  ;;  %v1245_v5 = vrot.slane %v1244_v31, 2  ;;  %v1241_v18 = vadd.f32 %v1240_v57, %v1239_v49  ;;  %v1496_v1 = vrot.slane %v1495_v17, 1 }
 0x172   :  { %v3037_v51 = vpop.eup %3036  ;;  %v1233_v4 = vrot.slane %v1232_v7, 1  ;;  %v1250_v11 = vrot.slane %v1249_v55, 4  ;;  %v1500_v53 = vadd.f32 %v1499_v10, %v1498_v58  ;;  %v1353_v29 = vmul.f32 %v4067_v41, %v4067_v41 }
 0x173   :  { %v3039_v9 = vpop.eup %3038  ;;  %v1488_v34 = vadd.f32 %v1487_v47, %v1486_v52  ;;  %v1246_v15 = vadd.f32 %v1245_v5, %v1244_v31  ;;  %v2107_v44 = vrot.slane %v2091_v45, %v3364_v60  ;;  %v4068_v8 = vrot.slane %v3430_v37, %v3351_v40 }
 0x174   :  { %v3676_v62 = vmul.f32 %v3039_v9, %v1840_v6  ;;  %v1234_v61 = vadd.f32 %v1233_v4, %v1232_v7  ;;  %v1501_v12 = vrot.slane %v1500_v53, 2  ;;  %v1251_v13 = vadd.f32 %v1250_v11, %v1249_v55 }
 0x175   :  { %v1957_v33 = vmul.f32 %v3035_v39, %v4068_v8  ;;  %v1489_v49 = vrot.slane %v1488_v34, 1  ;;  %v1247_v57 = vrot.slane %v1246_v15, 1  ;;  %v4069_v52 = vrot.slane %v3430_v37, %v3377_v24 }
 0x176   :  { %v1483_v58 = vadd.f32 %v1482_v43, %v1481_v2  ;;  %v3683_v47 = vmul.f32 0.5, %v1227_v36  ;;  %v3685_v45 = vmul.f32 0.5, %v1241_v18  ;;  %v1990_v39 = vmul.f32 %v3676_v62, %v3596_v22 }
 0x177   :  { %v3681_v31 = vmul.f32 %v3037_v51, %v4069_v52  ;;  %v1497_v9 = vadd.f32 %v1496_v1, %v1495_v17  ;;  %v1502_v6 = vadd.f32 %v1501_v12, %v1500_v53  ;;  %v1505_v7 = vsel %vm1108_vm1, %v1353_v29, 0.0  ;;  %v4070_v17 = vld [vmem:[#allocation18_spill] sm:$0xff] }
 0x178   :  { %v2122_v5 = vcombine.low %v3650_v48, %v2107_v44  ;;  %v1989_v11 = vmul.f32 %v1957_v33, %v3569_v28  ;;  %v2296_v37 = vrot.slane %v1957_v33, %v3328_v63  ;;  %v3693_v51 = vmul.f32 0.5, %v1234_v61 }
 0x179   :  { %v1490_v2 = vadd.f32 %v1489_v49, %v1488_v34  ;;  %v1248_v36 = vadd.f32 %v1247_v57, %v1246_v15  ;;  %v1503_v55 = vrot.slane %v1502_v6, 1  ;;  %v1252_v18 = vrot.slane %v1251_v13, 2 }
 0x17a   :  { %v1991_v43 = vmul.f32 %v3681_v31, %v3580_v23  ;;  %v1669_v12 = vmul.f32 %v3683_v47, %v3683_v47  ;;  %v1506_v22 = vrot.slane %v1505_v7, 4  ;;  %v1263_v48 = vsel %vm1108_vm1, %v4070_v17, 0.0 }
 0x17b   :  { %v3041_v10 = vpop.eup %3040  ;;  %v2092_v28 = vcombine.low %v1989_v11, %v1990_v39  ;;  %v1637_v1 = vmul.f32 0.5, %v1483_v58  ;;  %v1639_v4 = vmul.f32 0.5, %v1497_v9  ;;  %v1671_v34 = vmul.f32 %v3685_v45, %v3685_v45  ;;  %v4071_v39 = vld [vmem:[#allocation11_spill] sm:$0xff]  ;;  %v4073_v11 = vld [vmem:[#allocation12_spill] sm:$0xff] }
 0x17c   :  { %v1960_v15 = vmul.f32 %v3041_v10, %v1848_v27  ;;  %v1670_v53 = vmul.f32 %v3693_v51, %v3693_v51  ;;  %v1507_v29 = vadd.f32 %v1506_v22, %v1505_v7  ;;  %v1264_v23 = vrot.slane %v1263_v48, 4 }
 0x17d   :  { %v1638_v44 = vmul.f32 0.5, %v1490_v2  ;;  %v1504_v8 = vadd.f32 %v1503_v55, %v1502_v6  ;;  %v3705_v33 = vmul.f32 0.5, %v1248_v36  ;;  %v1253_v61 = vadd.f32 %v1252_v18, %v1251_v13  ;;  %v4075_v36 = vld [vmem:[#allocation13_spill] sm:$0xff] }
 0x17e   :  { %v1992_v49 = vmul.f32 %v1960_v15, %v3628_v42  ;;  %v1508_v57 = vrot.slane %v1507_v29, 2  ;;  %v1265_v52 = vadd.f32 %v1264_v23, %v1263_v48  ;;  %v1355_v58 = vmul.f32 %v4070_v17, %v4070_v17 }
 0x17f   :  { %v4072_v27 = vrot.slane %v3608_v30, %v3328_v63  ;;  %v2130_v7 = vrot.slane %v2122_v5, %v3364_v60  ;;  %v4074_v6 = vrot.slane %v3640_v54, %v3328_v63  ;;  %v1701_v13 = vsub.f32 %v1637_v1, %v1669_v12 }
 0x180   :  { %v2385_v42 = vmul.f32 %v2296_v37, %v4075_v36  ;;  %v2114_v55 = vrot.slane %v2092_v28, %v3364_v60  ;;  %v2093_v18 = vcombine.low %v1991_v43, %v1992_v49  ;;  %v1703_v22 = vsub.f32 %v1639_v4, %v1671_v34  ;;  %v4076_v28 = vld [vmem:[#allocation19_spill] sm:$0xff]  ;;  %v1105_v36 = vld [vmem:[#allocation6 + $0x8] sm:$0xff] }
 0x181   :  { %v2382_v9 = vmul.f32 %v4072_v27, %v4071_v39  ;;  %v2384_v2 = vmul.f32 %v4074_v6, %v4073_v11  ;;  %v1702_v48 = vsub.f32 %v1638_v44, %v1670_v53  ;;  %v1640_v10 = vmul.f32 0.5, %v1504_v8 }
 0x182   :  { %v1672_v30 = vmul.f32 %v3705_v33, %v3705_v33  ;;  %v1254_v23 = vrot.slane %v1253_v61, 1  ;;  %v2121_v5 = vrot.slane %v2093_v18, %v3364_v60  ;;  %v1509_v39 = vadd.f32 %v1508_v57, %v1507_v29 }
 0x183   :  { %v1266_v27 = vrot.slane %v1265_v52, 2  ;;  %v1519_v54 = vsel %vm1108_vm1, %v1355_v58, 0.0  ;;  %v2304_v12 = vrot.slane %v3681_v31, %v3328_v63  ;;  %v1733_v37 = vadd.f32 1e-05, %v1701_v13 }
 0x184   :  { %v1520_v1 = vrot.slane %v1519_v54, 4  ;;  %v1256_v43 = vsel %vm1108_vm1, %v4076_v28, 0.0  ;;  %v2300_v4 = vrot.slane %v3676_v62, %v3328_v63  ;;  %v2123_v34 = vcombine.low %v2114_v55, %v2121_v5 }
 0x185   :  { %v1735_v53 = vadd.f32 1e-05, %v1703_v22  ;;  %v1257_v44 = vrot.slane %v1256_v43, 4  ;;  %v2308_v8 = vrot.slane %v1960_v15, %v3328_v63  ;;  %v1734_v29 = vadd.f32 1e-05, %v1702_v48  ;;  %v4077_v22 = vld [vmem:[#allocation20_spill] sm:$0xff] }
 0x186   :  { %v1255_v49 = vadd.f32 %v1254_v23, %v1253_v61  ;;  %v1354_v57 = vmul.f32 %v4076_v28, %v4076_v28  ;;  %v2137_v31 = vrot.slane %v2123_v34, %v3364_v60  ;;  %v1704_v58 = vsub.f32 %v1640_v10, %v1672_v30 }
 0x187   :  { %v1510_v11 = vrot.slane %v1509_v39, 1  ;;  %v1267_v6 = vadd.f32 %v1266_v27, %v1265_v52  ;;  %v2387_v13 = vmul.f32 %v2304_v12, %v3307_v0  ;;  %3042 = vrsqrt.f32 %v1733_v37 }
 0x188   :  { %v1521_v62 = vadd.f32 %v1520_v1, %v1519_v54  ;;  %v1258_v55 = vadd.f32 %v1257_v44, %v1256_v43  ;;  %v2138_v18 = vcombine.low %v2130_v7, %v2137_v31  ;;  %3044 = vrsqrt.f32 %v1735_v53 }
 0x189   :  { %v1512_v15 = vsel %vm1108_vm1, %v1354_v57, 0.0  ;;  %v1270_v61 = vsel %vm1108_vm1, %v4077_v22, 0.0  ;;  %v2386_v48 = vmul.f32 %v2300_v4, %v3314_v16  ;;  %v2388_v23 = vmul.f32 %v2308_v8, %v3316_v21 }
 0x18a   :  { %3046 = vrsqrt.f32 %v1734_v29  ;;  %v3741_v10 = vmul.f32 0.5, %v1255_v49  ;;  %v2242_v52 = vsub.f32 %v1105_v36, %v2138_v18  ;;  %v1736_v0 = vadd.f32 1e-05, %v1704_v58 }
 0x18b   :  { %v1511_v30 = vadd.f32 %v1510_v11, %v1509_v39  ;;  %v1268_v5 = vrot.slane %v1267_v6, 1  ;;  %v1522_v27 = vrot.slane %v1521_v62, 2  ;;  %v1259_v54 = vrot.slane %v1258_v55, 2 }
 0x18c   :  { %v1513_v7 = vrot.slane %v1512_v15, 4  ;;  %v1271_v12 = vrot.slane %v1270_v61, 4  ;;  %v2444_v37 = vrot.slane %v2242_v52, %v3328_v63  ;;  %v2448_v1 = vrot.slane %v2242_v52, %v3342_v20 }
 0x18d   :  { %v2452_v43 = vrot.slane %v2242_v52, %v3339_v19  ;;  %v2456_v16 = vrot.slane %v2242_v52, %v3348_v32  ;;  %v2460_v21 = vrot.slane %v2242_v52, %v3351_v40  ;;  %v2464_v4 = vrot.slane %v2242_v52, %v3386_v50 }
 0x18e   :  { %v2468_v34 = vrot.slane %v2242_v52, %v3377_v24  ;;  %v2472_v39 = vrot.slane %v2242_v52, %v3389_v38  ;;  %v2577_v53 = vadd.f32 %v2444_v37, %v3632_v14  ;;  %v2578_v44 = vadd.f32 %v2448_v1, %v2382_v9 }
 0x18f   :  { %v2579_v8 = vadd.f32 %v2452_v43, %v3645_v25  ;;  %v2580_v29 = vadd.f32 %v2456_v16, %v2384_v2  ;;  %v2581_v49 = vadd.f32 %v2460_v21, %v2385_v42  ;;  %v2582_v57 = vadd.f32 %v2464_v4, %v2386_v48 }
 0x190   :  { %v2583_v31 = vadd.f32 %v2468_v34, %v2387_v13  ;;  %v2584_v58 = vadd.f32 %v2472_v39, %v2388_v23  ;;  %v2609_v11 = vmax.f32 %v2577_v53, 0.0  ;;  %v2610_v36 = vmax.f32 %v2578_v44, 0.0 }
 0x191   :  { %v2611_v18 = vmax.f32 %v2579_v8, 0.0  ;;  %v2612_v28 = vmax.f32 %v2580_v29, 0.0  ;;  %v2613_v17 = vmax.f32 %v2581_v49, 0.0  ;;  %v2614_v59 = vmax.f32 %v2582_v57, 0.0  ;;  %v4078_v8 = vld [vmem:[#allocation21_spill] sm:$0xff] }
 0x192   :  { %v2615_v41 = vmax.f32 %v2583_v31, 0.0  ;;  %v2616_v26 = vmax.f32 %v2584_v58, 0.0  ;;  %v2991_v3 = vpack.c.bf16 %v2610_v36, %v2609_v11  ;;  %v1673_v14 = vmul.f32 %v3741_v10, %v3741_v10  ;;  %v3775_v58 = vld [vmem:[#allocation4 + $0x10] sm:$0xff] }
 0x193   :  { %v2992_v52 = vpack.c.bf16 %v2612_v28, %v2611_v18  ;;  %v1523_v9 = vadd.f32 %v1522_v27, %v1521_v62  ;;  %v2993_v25 = vpack.c.bf16 %v2614_v59, %v2613_v17  ;;  %3048 = vrsqrt.f32 %v1736_v0 }
 0x194   :  { %v2994_v2 = vpack.c.bf16 %v2616_v26, %v2615_v41  ;;  %v1260_v42 = vadd.f32 %v1259_v54, %v1258_v55  ;;  %v3043_v13 = vpop.eup %3042  ;;  %v2756_v48 = vrot.slane %v2991_v3, %v3364_v60  ;;  %v1641_v37 = vmul.f32 0.5, %v1511_v30 }
 0x195   :  { %v2763_v23 = vrot.slane %v2992_v52, %v3364_v60  ;;  %v1514_v1 = vadd.f32 %v1513_v7, %v1512_v15  ;;  %v3045_v43 = vpop.eup %3044  ;;  %v2770_v16 = vrot.slane %v2993_v25, %v3364_v60  ;;  %v1269_v21 = vadd.f32 %v1268_v5, %v1267_v6 }
 0x196   :  { %v2777_v28 = vrot.slane %v2994_v2, %v3364_v60  ;;  %v1272_v4 = vadd.f32 %v1271_v12, %v1270_v61  ;;  %v1524_v59 = vrot.slane %v1523_v9, 1  ;;  %v1356_v26 = vmul.f32 %v4077_v22, %v4077_v22 }
 0x197   :  { %v3047_v34 = vpop.eup %3046  ;;  %v2778_v62 = vcombine.low %v2756_v48, %v2763_v23  ;;  %v1261_v17 = vrot.slane %v1260_v42, 1  ;;  %v1705_v55 = vsub.f32 %v1641_v37, %v1673_v14  ;;  %v1515_v0 = vrot.slane %v1514_v1, 2 }
 0x198   :  { %v2779_v41 = vcombine.low %v2770_v16, %v2777_v28  ;;  %v3763_v30 = vmul.f32 0.5, %v1269_v21  ;;  %v1273_v54 = vrot.slane %v1272_v4, 2  ;;  %v1525_v6 = vadd.f32 %v1524_v59, %v1523_v9 }
 0x199   :  { %v2786_v3 = vrot.slane %v2778_v62, %v3364_v60  ;;  %v1262_v27 = vadd.f32 %v1261_v17, %v1260_v42  ;;  %v1516_v61 = vadd.f32 %v1515_v0, %v1514_v1  ;;  %v1526_v5 = vsel %vm1108_vm1, %v1356_v26, 0.0 }
 0x19a   :  { %v2793_v15 = vrot.slane %v2779_v41, %v3364_v60  ;;  %v1274_v39 = vadd.f32 %v1273_v54, %v1272_v4  ;;  %v1527_v44 = vrot.slane %v1526_v5, 4  ;;  %v1277_v29 = vsel %vm1108_vm1, %v4078_v8, 0.0 }
 0x19b   :  { %v3766_v12 = vmul.f32 0.5, %v1262_v27  ;;  %v1517_v53 = vrot.slane %v1516_v61, 1  ;;  %v1737_v49 = vadd.f32 1e-05, %v1705_v55  ;;  %v1675_v57 = vmul.f32 %v3763_v30, %v3763_v30  ;;  %v4079_v55 = vld [vmem:[#allocation23_spill] sm:$0xff] }
 0x19c   :  { %v2794_v7 = vcombine.low %v2786_v3, %v2793_v15  ;;  %v1275_v31 = vrot.slane %v1274_v39, 1  ;;  %v1643_v11 = vmul.f32 0.5, %v1525_v6  ;;  %v1528_v52 = vadd.f32 %v1527_v44, %v1526_v5 }
 0x19d   :  { %v1518_v36 = vadd.f32 %v1517_v53, %v1516_v61  ;;  %v1674_v18 = vmul.f32 %v3766_v12, %v3766_v12  ;;  %v1856_v14 = vrot.slane %v3775_v58, %v3342_v20  ;;  %v1278_v25 = vrot.slane %v1277_v29, 4 }
 0x19e   :  { %2898 = vst [vmem:[%s4012_s4 + $0x8] sm:$0xff] %v2794_v7  ;;  %v1276_v9 = vadd.f32 %v1275_v31, %v1274_v39  ;;  %v1864_v42 = vrot.slane %v3775_v58, %v3348_v32  ;;  %v1529_v23 = vrot.slane %v1528_v52, 2  ;;  %v1852_v37 = vrot.slane %v3775_v58, %v3328_v63 }
 0x19f   :  { %v1642_v48 = vmul.f32 0.5, %v1518_v36  ;;  %v1860_v1 = vrot.slane %v3775_v58, %v3339_v19  ;;  %3050 = vrsqrt.f32 %v1737_v49  ;;  %v1707_v16 = vsub.f32 %v1643_v11, %v1675_v57  ;;  %v4080_v57 = vld [vmem:[#allocation22_spill] sm:$0xff] }
 0x1a0   :  { %v3049_v2 = vpop.eup %3048  ;;  %v1530_v21 = vadd.f32 %v1529_v23, %v1528_v52  ;;  %v3787_v4 = vmul.f32 0.5, %v1276_v9  ;;  %v3789_v62 = vmul.f32 %v3047_v34, %v1856_v14  ;;  %v1279_v59 = vadd.f32 %v1278_v25, %v1277_v29  ;;  %v4081_v23 = vld [vmem:[#allocation24_spill] sm:$0xff] }
 0x1a1   :  { %v1706_v28 = vsub.f32 %v1642_v48, %v1674_v18  ;;  %v1357_v26 = vmul.f32 %v4078_v8, %v4078_v8  ;;  %v3793_v41 = vmul.f32 %v3049_v2, %v1864_v42  ;;  %v1291_v0 = vsel %vm1108_vm1, %v4079_v55, 0.0 }
 0x1a2   :  { %v1531_v3 = vrot.slane %v1530_v21, 1  ;;  %v1961_v15 = vmul.f32 %v3043_v13, %v1852_v37  ;;  %v1963_v27 = vmul.f32 %v3045_v43, %v1860_v1  ;;  %v1739_v54 = vadd.f32 1e-05, %v1707_v16 }
 0x1a3   :  { %v1738_v17 = vadd.f32 1e-05, %v1706_v28  ;;  %v1676_v34 = vmul.f32 %v3787_v4, %v3787_v4  ;;  %v1994_v61 = vmul.f32 %v3789_v62, %v3693_v51  ;;  %v1280_v5 = vrot.slane %v1279_v59, 2 }
 0x1a4   :  { %v1532_v6 = vadd.f32 %v1531_v3, %v1530_v21  ;;  %v1533_v7 = vsel %vm1108_vm1, %v1357_v26, 0.0  ;;  %v1292_v39 = vrot.slane %v1291_v0, 4  ;;  %v1996_v53 = vmul.f32 %v3793_v41, %v3705_v33 }
 0x1a5   :  { %3052 = vrsqrt.f32 %v1738_v17  ;;  %v1993_v13 = vmul.f32 %v1961_v15, %v3683_v47  ;;  %v1995_v43 = vmul.f32 %v1963_v27, %v3685_v45  ;;  %v1534_v49 = vrot.slane %v1533_v7, 4 }
 0x1a6   :  { %v1644_v44 = vmul.f32 0.5, %v1532_v6  ;;  %3054 = vrsqrt.f32 %v1739_v54  ;;  %v1358_v31 = vmul.f32 %v4080_v57, %v4080_v57  ;;  %v1281_v51 = vadd.f32 %v1280_v5, %v1279_v59 }
 0x1a7   :  { %v2139_v11 = vcombine.low %v1993_v13, %v1994_v61  ;;  %v1293_v36 = vadd.f32 %v1292_v39, %v1291_v0  ;;  %v2140_v18 = vcombine.low %v1995_v43, %v1996_v53  ;;  %v1868_v52 = vrot.slane %v3775_v58, %v3351_v40 }
 0x1a8   :  { %v1708_v29 = vsub.f32 %v1644_v44, %v1676_v34  ;;  %v1359_v33 = vmul.f32 %v4079_v55, %v4079_v55  ;;  %v2312_v47 = vrot.slane %v1961_v15, %v3328_v63  ;;  %v1876_v45 = vrot.slane %v3775_v58, %v3377_v24 }
 0x1a9   :  { %v1872_v9 = vrot.slane %v3775_v58, %v3386_v50  ;;  %v1284_v25 = vsel %vm1108_vm1, %v4080_v57, 0.0  ;;  %v1535_v42 = vadd.f32 %v1534_v49, %v1533_v7  ;;  %v1540_v48 = vsel %vm1108_vm1, %v1358_v31, 0.0  ;;  %v4082_v49 = vld [vmem:[#allocation15_spill] sm:$0xff] }
 0x1aa   :  { %v1740_v14 = vadd.f32 1e-05, %v1708_v29  ;;  %v1298_v37 = vsel %vm1108_vm1, %v4081_v23, 0.0  ;;  %v2320_v1 = vrot.slane %v1963_v27, %v3328_v63  ;;  %v2149_v16 = vrot.slane %v2139_v11, %v3364_v60 }
 0x1ab   :  { %v1282_v28 = vrot.slane %v1281_v51, 1  ;;  %v1294_v21 = vrot.slane %v1293_v36, 2  ;;  %v2156_v59 = vrot.slane %v2140_v18, %v3364_v60  ;;  %v1547_v26 = vsel %vm1108_vm1, %v1359_v33, 0.0 }
 0x1ac   :  { %v3051_v2 = vpop.eup %3050  ;;  %3056 = vrsqrt.f32 %v1740_v14  ;;  %v1285_v17 = vrot.slane %v1284_v25, 4  ;;  %v1360_v3 = vmul.f32 %v4081_v23, %v4081_v23  ;;  %v3829_v0 = vmul.f32 %v2312_v47, %v3323_v56 }
 0x1ad   :  { %v2316_v15 = vrot.slane %v3789_v62, %v3328_v63  ;;  %v1541_v54 = vrot.slane %v1540_v48, 4  ;;  %v1299_v27 = vrot.slane %v1298_v37, 4  ;;  %v2324_v6 = vrot.slane %v3793_v41, %v3328_v63 }
 0x1ae   :  { %v1965_v34 = vmul.f32 %v3051_v2, %v1868_v52  ;;  %v1536_v61 = vrot.slane %v1535_v42, 2  ;;  %v1554_v5 = vsel %vm1108_vm1, %v1360_v3, 0.0  ;;  %v1283_v39 = vadd.f32 %v1282_v28, %v1281_v51  ;;  %v4083_v52 = vld [vmem:[#allocation16_spill] sm:$0xff] }
 0x1af   :  { %v1295_v53 = vadd.f32 %v1294_v21, %v1293_v36  ;;  %v1548_v44 = vrot.slane %v1547_v26, 4  ;;  %v1305_v56 = vsel %vm1108_vm1, %v3532_v46, 0.0  ;;  %v3839_v13 = vmul.f32 %v2320_v1, %v4061_v35 }
 0x1b0   :  { %v2171_v62 = vcombine.low %v2149_v16, %v2156_v59  ;;  %v1286_v29 = vadd.f32 %v1285_v17, %v1284_v25  ;;  %v3844_v41 = vmul.f32 %v2316_v15, %v4082_v49  ;;  %v1542_v31 = vadd.f32 %v1541_v54, %v1540_v48 }
 0x1b1   :  { %v1300_v11 = vadd.f32 %v1299_v27, %v1298_v37  ;;  %v1555_v18 = vrot.slane %v1554_v5, 4  ;;  %v3847_v51 = vmul.f32 %v2324_v6, %v4083_v52  ;;  %v2328_v36 = vrot.slane %v1965_v34, %v3328_v63 }
 0x1b2   :  { %v3053_v7 = vpop.eup %3052  ;;  %v1537_v14 = vadd.f32 %v1536_v61, %v1535_v42  ;;  %v1306_v33 = vrot.slane %v1305_v56, 4  ;;  %v1880_v35 = vrot.slane %v3775_v58, %v3389_v38  ;;  %v1296_v25 = vrot.slane %v1295_v53, 1  ;;  %v4084_v58 = vld [vmem:[#allocation17_spill] sm:$0xff] }
 0x1b3   :  { %v3841_v43 = vmul.f32 %v3053_v7, %v1872_v9  ;;  %v3055_v47 = vpop.eup %3054  ;;  %v3852_v9 = vmul.f32 0.5, %v1283_v39  ;;  %v1549_v2 = vadd.f32 %v1548_v44, %v1547_v26  ;;  %v3855_v1 = vrot.slane %v2171_v62, %v3364_v60  ;;  %v4085_v7 = vld [vmem:[#allocation26_spill] sm:$0xff] }
 0x1b4   :  { %v1997_v48 = vmul.f32 %v1965_v34, %v3741_v10  ;;  %v1287_v16 = vrot.slane %v1286_v29, 2  ;;  %v1543_v28 = vrot.slane %v1542_v31, 2  ;;  %v1301_v42 = vrot.slane %v1300_v11, 2 }
 0x1b5   :  { %v1998_v37 = vmul.f32 %v3841_v43, %v3766_v12  ;;  %v1556_v21 = vadd.f32 %v1555_v18, %v1554_v5  ;;  %v1361_v59 = vmul.f32 %v3532_v46, %v3532_v46  ;;  %v3863_v17 = vmul.f32 %v2328_v36, %v4084_v58 }
 0x1b6   :  { %v1967_v3 = vmul.f32 %v3055_v47, %v1876_v45  ;;  %v1538_v26 = vrot.slane %v1537_v14, 1  ;;  %v1307_v15 = vadd.f32 %v1306_v33, %v1305_v56  ;;  %v3867_v10 = vmul.f32 %v3852_v9, %v3852_v9 }
 0x1b7   :  { %v1297_v27 = vadd.f32 %v1296_v25, %v1295_v53  ;;  %v1550_v12 = vrot.slane %v1549_v2, 2  ;;  %v1561_v6 = vsel %vm1108_vm1, %v1361_v59, 0.0  ;;  %v2141_v34 = vcombine.low %v1997_v48, %v1998_v37 }
 0x1b8   :  { %v1288_v5 = vadd.f32 %v1287_v16, %v1286_v29  ;;  %v1319_v39 = vsel %vm1108_vm1, %v4085_v7, 0.0  ;;  %v1544_v44 = vadd.f32 %v1543_v28, %v1542_v31  ;;  %v1302_v62 = vadd.f32 %v1301_v42, %v1300_v11  ;;  %v4086_v28 = vld [vmem:[#allocation25_spill] sm:$0xff] }
 0x1b9   :  { %v3057_v54 = vpop.eup %3056  ;;  %v1557_v45 = vrot.slane %v1556_v21, 2  ;;  %v1363_v56 = vmul.f32 %v4085_v7, %v4085_v7  ;;  %v1999_v49 = vmul.f32 %v1967_v3, %v3763_v30  ;;  %v1308_v53 = vrot.slane %v1307_v15, 2 }
 0x1ba   :  { %v1968_v61 = vmul.f32 %v3057_v54, %v1880_v35  ;;  %v1562_v52 = vrot.slane %v1561_v6, 4  ;;  %v1539_v36 = vadd.f32 %v1538_v26, %v1537_v14  ;;  %v1551_v33 = vadd.f32 %v1550_v12, %v1549_v2 }
 0x1bb   :  { %v3876_v47 = vmul.f32 0.5, %v1297_v27  ;;  %v1320_v29 = vrot.slane %v1319_v39, 4  ;;  %v2163_v35 = vrot.slane %v2141_v34, %v3364_v60  ;;  %v1289_v31 = vrot.slane %v1288_v5, 1 }
 0x1bc   :  { %v2000_v18 = vmul.f32 %v1968_v61, %v3787_v4  ;;  %v1575_v11 = vsel %vm1108_vm1, %v1363_v56, 0.0  ;;  %v1545_v48 = vrot.slane %v1544_v44, 1  ;;  %v1303_v37 = vrot.slane %v1302_v62, 1 }
 0x1bd   :  { %v1558_v16 = vadd.f32 %v1557_v45, %v1556_v21  ;;  %v1312_v30 = vsel %vm1108_vm1, %v4086_v28, 0.0  ;;  %v2336_v4 = vrot.slane %v1967_v3, %v3328_v63  ;;  %v1309_v2 = vadd.f32 %v1308_v53, %v1307_v15  ;;  %v1106_v53 = vld [vmem:[#allocation6 + $0x10] sm:$0xff] }
 0x1be   :  { %v2142_v25 = vcombine.low %v1999_v49, %v2000_v18  ;;  %v1563_v42 = vadd.f32 %v1562_v52, %v1561_v6  ;;  %v3884_v59 = vmul.f32 0.5, %v1539_v36  ;;  %v1321_v58 = vadd.f32 %v1320_v29, %v1319_v39 }
 0x1bf   :  { %v1576_v26 = vrot.slane %v1575_v11, 4  ;;  %v1313_v54 = vrot.slane %v1312_v30, 4  ;;  %v1552_v12 = vrot.slane %v1551_v33, 1  ;;  %v3888_v34 = vmul.f32 %v3876_v47, %v3876_v47 }
 0x1c0   :  { %v2170_v14 = vrot.slane %v2142_v25, %v3364_v60  ;;  %v1290_v21 = vadd.f32 %v1289_v31, %v1288_v5  ;;  %v2332_v45 = vrot.slane %v3841_v43, %v3328_v63  ;;  %v1546_v3 = vadd.f32 %v1545_v48, %v1544_v44  ;;  %v4087_v5 = vld [vmem:[#allocation18_spill] sm:$0xff]  ;;  %v4088_v31 = vld [vmem:[#allocation19_spill] sm:$0xff] }
 0x1c1   :  { %v1304_v56 = vadd.f32 %v1303_v37, %v1302_v62  ;;  %v1559_v49 = vrot.slane %v1558_v16, 1  ;;  %v2340_v6 = vrot.slane %v1968_v61, %v3328_v63  ;;  %v1310_v39 = vrot.slane %v1309_v2, 1 }
 0x1c2   :  { %v2172_v27 = vcombine.low %v2163_v35, %v2170_v14  ;;  %v1564_v18 = vrot.slane %v1563_v42, 2  ;;  %v1322_v52 = vrot.slane %v1321_v58, 2  ;;  %v1577_v36 = vadd.f32 %v1576_v26, %v1575_v11 }
 0x1c3   :  { %v1314_v29 = vadd.f32 %v1313_v54, %v1312_v30  ;;  %v1362_v35 = vmul.f32 %v4086_v28, %v4086_v28  ;;  %v2395_v25 = vmul.f32 %v2336_v4, %v4087_v5  ;;  %v1553_v44 = vadd.f32 %v1552_v12, %v1551_v33 }
 0x1c4   :  { %v2186_v15 = vrot.slane %v2172_v27, %v3364_v60  ;;  %v3898_v62 = vmul.f32 0.5, %v1290_v21  ;;  %v2394_v48 = vmul.f32 %v2332_v45, %v4088_v31  ;;  %v3901_v37 = vmul.f32 0.5, %v1546_v3 }
 0x1c5   :  { %v1560_v61 = vadd.f32 %v1559_v49, %v1558_v16  ;;  %v3903_v14 = vmul.f32 0.5, %v1304_v56  ;;  %v2396_v11 = vmul.f32 %v2340_v6, %v4077_v22  ;;  %v1311_v30 = vadd.f32 %v1310_v39, %v1309_v2 }
 0x1c6   :  { %v2187_v43 = vcombine.low %v3855_v1, %v2186_v15  ;;  %v1565_v26 = vadd.f32 %v1564_v18, %v1563_v42  ;;  %v1323_v54 = vadd.f32 %v1322_v52, %v1321_v58  ;;  %v1578_v28 = vrot.slane %v1577_v36, 2 }
 0x1c7   :  { %v1315_v4 = vrot.slane %v1314_v29, 2  ;;  %v1568_v1 = vsel %vm1108_vm1, %v1362_v35, 0.0 }
 0x1c8   :  { %v2243_v27 = vsub.f32 %v1106_v53, %v2187_v43 }
 0x1ca   :  { %v2476_v33 = vrot.slane %v2243_v27, %v3328_v63  ;;  %v2480_v12 = vrot.slane %v2243_v27, %v3342_v20  ;;  %v2484_v21 = vrot.slane %v2243_v27, %v3339_v19  ;;  %v2488_v16 = vrot.slane %v2243_v27, %v3348_v32 }
 0x1cb   :  { %v2492_v45 = vrot.slane %v2243_v27, %v3351_v40  ;;  %v2496_v3 = vrot.slane %v2243_v27, %v3386_v50  ;;  %v2500_v22 = vrot.slane %v2243_v27, %v3377_v24  ;;  %v2504_v2 = vrot.slane %v2243_v27, %v3389_v38 }
 0x1cc   :  { %v2585_v42 = vadd.f32 %v2476_v33, %v3829_v0  ;;  %v2586_v58 = vadd.f32 %v2480_v12, %v3844_v41  ;;  %v2587_v56 = vadd.f32 %v2484_v21, %v3839_v13  ;;  %v2588_v49 = vadd.f32 %v2488_v16, %v3847_v51 }
 0x1cd   :  { %v2589_v15 = vadd.f32 %v2492_v45, %v3863_v17  ;;  %v2590_v6 = vadd.f32 %v2496_v3, %v2394_v48  ;;  %v2591_v39 = vadd.f32 %v2500_v22, %v2395_v25  ;;  %v2592_v18 = vadd.f32 %v2504_v2, %v2396_v11 }
 0x1ce   :  { %v2617_v53 = vmax.f32 %v2585_v42, 0.0  ;;  %v2618_v52 = vmax.f32 %v2586_v58, 0.0  ;;  %v2619_v35 = vmax.f32 %v2587_v56, 0.0  ;;  %v2620_v5 = vmax.f32 %v2588_v49, 0.0 }
 0x1cf   :  { %v2621_v43 = vmax.f32 %v2589_v15, 0.0  ;;  %v2622_v31 = vmax.f32 %v2590_v6, 0.0  ;;  %v2623_v27 = vmax.f32 %v2591_v39, 0.0  ;;  %v2624_v7 = vmax.f32 %v2592_v18, 0.0  ;;  %v4089_v39 = vld [vmem:[#allocation27_spill] sm:$0xff] }
 0x1d0   :  { %v2995_v0 = vpack.c.bf16 %v2618_v52, %v2617_v53  ;;  %v2996_v33 = vpack.c.bf16 %v2620_v5, %v2619_v35  ;;  %v1566_v41 = vrot.slane %v1565_v26, 1  ;;  %v1324_v12 = vrot.slane %v1323_v54, 1 }
 0x1d1   :  { %v2997_v13 = vpack.c.bf16 %v2622_v31, %v2621_v43  ;;  %v2998_v21 = vpack.c.bf16 %v2624_v7, %v2623_v27  ;;  %v1579_v51 = vadd.f32 %v1578_v28, %v1577_v36  ;;  %v1316_v16 = vadd.f32 %v1315_v4, %v1314_v29 }
 0x1d2   :  { %v2805_v17 = vrot.slane %v2995_v0, %v3364_v60  ;;  %v2812_v25 = vrot.slane %v2996_v33, %v3364_v60  ;;  %v1678_v48 = vmul.f32 %v3898_v62, %v3898_v62  ;;  %v1569_v11 = vrot.slane %v1568_v1, 4 }
 0x1d3   :  { %v2819_v45 = vrot.slane %v2997_v13, %v3364_v60  ;;  %v2826_v3 = vrot.slane %v2998_v21, %v3364_v60  ;;  %v1648_v22 = vmul.f32 0.5, %v1560_v61  ;;  %v1680_v2 = vmul.f32 %v3903_v14, %v3903_v14 }
 0x1d4   :  { %v2827_v42 = vcombine.low %v2805_v17, %v2812_v25  ;;  %v1647_v7 = vmul.f32 0.5, %v1553_v44  ;;  %v1567_v28 = vadd.f32 %v1566_v41, %v1565_v26  ;;  %v3928_v36 = vmul.f32 0.5, %v1311_v30 }
 0x1d5   :  { %v2828_v29 = vcombine.low %v2819_v45, %v2826_v3  ;;  %v1325_v4 = vadd.f32 %v1324_v12, %v1323_v54  ;;  %v1580_v58 = vrot.slane %v1579_v51, 1  ;;  %v1317_v56 = vrot.slane %v1316_v16, 1 }
 0x1d6   :  { %v2835_v49 = vrot.slane %v2827_v42, %v3364_v60  ;;  %v1710_v15 = vsub.f32 %v3901_v37, %v1678_v48  ;;  %v1570_v6 = vadd.f32 %v1569_v11, %v1568_v1  ;;  %v1326_v61 = vsel %vm1108_vm1, %v4089_v39, 0.0 }
 0x1d7   :  { %v2842_v18 = vrot.slane %v2828_v29, %v3364_v60  ;;  %v1712_v53 = vsub.f32 %v1648_v22, %v1680_v2  ;;  %v1318_v52 = vadd.f32 %v1317_v56, %v1316_v16  ;;  %v1327_v44 = vrot.slane %v1326_v61, 4 }
 0x1d8   :  { %v1649_v26 = vmul.f32 0.5, %v1567_v28  ;;  %v1681_v30 = vmul.f32 %v3928_v36, %v3928_v36  ;;  %v1571_v54 = vrot.slane %v1570_v6, 2  ;;  %v1364_v35 = vmul.f32 %v4089_v39, %v4089_v39 }
 0x1d9   :  { %v2843_v5 = vcombine.low %v2835_v49, %v2842_v18  ;;  %v1581_v43 = vadd.f32 %v1580_v58, %v1579_v51  ;;  %v3939_v37 = vmul.f32 0.5, %v1325_v4  ;;  %v1328_v1 = vadd.f32 %v1327_v44, %v1326_v61 }
 0x1da   :  { %v1709_v31 = vsub.f32 %v3884_v59, %v3867_v10  ;;  %v1572_v27 = vadd.f32 %v1571_v54, %v1570_v6  ;;  %v3943_v0 = vmul.f32 0.5, %v1318_v52  ;;  %v1582_v33 = vsel %vm1108_vm1, %v1364_v35, 0.0 }
 0x1db   :  { %2899 = vst [vmem:[%s4012_s4 + $0x10] sm:$0xff] %v2843_v5  ;;  %v1711_v41 = vsub.f32 %v1647_v7, %v3888_v34  ;;  %v1742_v12 = vadd.f32 1e-05, %v1710_v15  ;;  %v1329_v13 = vrot.slane %v1328_v1, 2  ;;  %v1583_v21 = vrot.slane %v1582_v33, 4 }
 0x1dc   :  { %v1744_v51 = vadd.f32 1e-05, %v1712_v53  ;;  %v1713_v16 = vsub.f32 %v1649_v26, %v1681_v30  ;;  %v1573_v17 = vrot.slane %v1572_v27, 1  ;;  %v1651_v25 = vmul.f32 0.5, %v1581_v43  ;;  %v1103_v30 = vld [vmem:[#allocation4 + $0x18] sm:$0xff] }
 0x1dd   :  { %v1683_v10 = vmul.f32 %v3939_v37, %v3939_v37  ;;  %v1330_v59 = vadd.f32 %v1329_v13, %v1328_v1  ;;  %v1584_v48 = vadd.f32 %v1583_v21, %v1582_v33  ;;  %v1741_v11 = vadd.f32 1e-05, %v1709_v31 }
 0x1de   :  { %v1574_v45 = vadd.f32 %v1573_v17, %v1572_v27  ;;  %v1682_v3 = vmul.f32 %v3943_v0, %v3943_v0  ;;  %v1743_v22 = vadd.f32 1e-05, %v1711_v41  ;;  %3058 = vrsqrt.f32 %v1742_v12 }
 0x1df   :  { %v1331_v34 = vrot.slane %v1330_v59, 1  ;;  %v1585_v2 = vrot.slane %v1584_v48, 2  ;;  %3060 = vrsqrt.f32 %v1744_v51  ;;  %v1745_v7 = vadd.f32 1e-05, %v1713_v16 }
 0x1e0   :  { %v1650_v42 = vmul.f32 0.5, %v1574_v45  ;;  %v1715_v28 = vsub.f32 %v1651_v25, %v1683_v10  ;;  %3062 = vrsqrt.f32 %v1741_v11  ;;  %v1888_v35 = vrot.slane %v1103_v30, %v3342_v20 }
 0x1e1   :  { %v1332_v29 = vadd.f32 %v1331_v34, %v1330_v59  ;;  %v1586_v4 = vadd.f32 %v1585_v2, %v1584_v48  ;;  %3064 = vrsqrt.f32 %v1743_v22  ;;  %v1896_v5 = vrot.slane %v1103_v30, %v3348_v32 }
 0x1e2   :  { %v1714_v58 = vsub.f32 %v1650_v42, %v1682_v3  ;;  %3066 = vrsqrt.f32 %v1745_v7  ;;  %v1747_v6 = vadd.f32 1e-05, %v1715_v28  ;;  %v1884_v1 = vrot.slane %v1103_v30, %v3328_v63 }
 0x1e3   :  { %v1587_v56 = vrot.slane %v1586_v4, 1  ;;  %v1620_v49 = vmul.f32 0.5, %v1332_v29  ;;  %v1892_v31 = vrot.slane %v1103_v30, %v3339_v19  ;;  %v1904_v33 = vrot.slane %v1103_v30, %v3386_v50 }
 0x1e4   :  { %v1746_v15 = vadd.f32 1e-05, %v1714_v58  ;;  %v1900_v13 = vrot.slane %v1103_v30, %v3351_v40  ;;  %v1908_v11 = vrot.slane %v1103_v30, %v3377_v24  ;;  %v1912_v2 = vrot.slane %v1103_v30, %v3389_v38 }
 0x1e5   :  { %v1588_v61 = vadd.f32 %v1587_v56, %v1586_v4  ;;  %v1684_v18 = vmul.f32 %v1620_v49, %v1620_v49 }
 0x1e6   :  { %3068 = vrsqrt.f32 %v1746_v15 }
 0x1e7   :  { %v1652_v53 = vmul.f32 0.5, %v1588_v61  ;;  %3070 = vrsqrt.f32 %v1747_v6 }
 0x1e9   :  { %v1716_v52 = vsub.f32 %v1652_v53, %v1684_v18 }
 0x1eb   :  { %v1748_v44 = vadd.f32 1e-05, %v1716_v52  ;;  %v3059_v26 = vpop.eup %3058 }
 0x1ec   :  { %v3061_v54 = vpop.eup %3060  ;;  %v1970_v41 = vmul.f32 %v3059_v26, %v1888_v35  ;;  %v1107_v35 = vld [vmem:[#allocation6 + $0x18] sm:$0xff] }
 0x1ed   :  { %3072 = vrsqrt.f32 %v1748_v44  ;;  %v3063_v43 = vpop.eup %3062  ;;  %v1972_v12 = vmul.f32 %v3061_v54, %v1896_v5 }
 0x1ee   :  { %v3065_v27 = vpop.eup %3064  ;;  %v1969_v16 = vmul.f32 %v3063_v43, %v1884_v1  ;;  %v2002_v10 = vmul.f32 %v1970_v41, %v3898_v62  ;;  %v2348_v52 = vrot.slane %v1970_v41, %v3328_v63 }
 0x1ef   :  { %v3067_v21 = vpop.eup %3066  ;;  %v1971_v17 = vmul.f32 %v3065_v27, %v1892_v31  ;;  %v2004_v59 = vmul.f32 %v1972_v12, %v3903_v14  ;;  %v2356_v26 = vrot.slane %v1972_v12, %v3328_v63 }
 0x1f0   :  { %v1973_v48 = vmul.f32 %v3067_v21, %v1900_v13  ;;  %v2001_v3 = vmul.f32 %v1969_v16, %v3852_v9  ;;  %v2398_v27 = vmul.f32 %v2348_v52, %v4080_v57  ;;  %v4090_v13 = vld [vmem:[#allocation26_spill] sm:$0xff] }
 0x1f1   :  { %v2003_v22 = vmul.f32 %v1971_v17, %v3876_v47  ;;  %v2352_v53 = vrot.slane %v1971_v17, %v3328_v63 }
 0x1f2   :  { %v2188_v42 = vcombine.low %v2001_v3, %v2002_v10  ;;  %v2005_v28 = vmul.f32 %v1973_v48, %v3928_v36  ;;  %v2344_v36 = vrot.slane %v1969_v16, %v3328_v63 }
 0x1f3   :  { %v3069_v51 = vpop.eup %3068  ;;  %v2189_v7 = vcombine.low %v2003_v22, %v2004_v59  ;;  %v2399_v31 = vmul.f32 %v2352_v53, %v4079_v55 }
 0x1f4   :  { %v1974_v25 = vmul.f32 %v3069_v51, %v1904_v33  ;;  %v3071_v45 = vpop.eup %3070  ;;  %v2198_v58 = vrot.slane %v2188_v42, %v3364_v60  ;;  %v2397_v1 = vmul.f32 %v2344_v36, %v4078_v8  ;;  %v2400_v33 = vmul.f32 %v2356_v26, %v4081_v23  ;;  %v4091_v51 = vld [vmem:[#allocation25_spill] sm:$0xff] }
 0x1f5   :  { %v1975_v29 = vmul.f32 %v3071_v45, %v1908_v11  ;;  %v2205_v56 = vrot.slane %v2189_v7, %v3364_v60 }
 0x1f6   :  { %v2006_v34 = vmul.f32 %v1974_v25, %v3943_v0  ;;  %v2364_v54 = vrot.slane %v1974_v25, %v3328_v63 }
 0x1f7   :  { %v2007_v9 = vmul.f32 %v1975_v29, %v3939_v37  ;;  %v2220_v6 = vcombine.low %v2198_v58, %v2205_v56  ;;  %v2368_v30 = vrot.slane %v1975_v29, %v3328_v63 }
 0x1f8   :  { %v2190_v4 = vcombine.low %v2005_v28, %v2006_v34  ;;  %v2402_v16 = vmul.f32 %v2364_v54, %v4091_v51 }
 0x1f9   :  { %v2228_v44 = vrot.slane %v2220_v6, %v3364_v60  ;;  %v2403_v21 = vmul.f32 %v2368_v30, %v4090_v13 }
 0x1fa   :  { %v3073_v62 = vpop.eup %3072  ;;  %v2212_v47 = vrot.slane %v2190_v4, %v3364_v60 }
 0x1fb   :  { %v1976_v14 = vmul.f32 %v3073_v62, %v1912_v2 }
 0x1fd   :  { %v2008_v15 = vmul.f32 %v1976_v14, %v1620_v49  ;;  %v2360_v49 = vrot.slane %v1973_v48, %v3328_v63  ;;  %v2372_v5 = vrot.slane %v1976_v14, %v3328_v63 }
 0x1ff   :  { %v2191_v0 = vcombine.low %v2007_v9, %v2008_v15  ;;  %v2401_v12 = vmul.f32 %v2360_v49, %v3532_v46  ;;  %v2404_v17 = vmul.f32 %v2372_v5, %v4089_v39 }
 0x201   :  { %v2219_v61 = vrot.slane %v2191_v0, %v3364_v60 }
 0x203   :  { %v2221_v18 = vcombine.low %v2212_v47, %v2219_v61 }
 0x205   :  { %v2235_v37 = vrot.slane %v2221_v18, %v3364_v60 }
 0x207   :  { %v2236_v43 = vcombine.low %v2228_v44, %v2235_v37 }
 0x209   :  { %v2244_v41 = vsub.f32 %v1107_v35, %v2236_v43 }
 0x20b   :  { %v2508_v25 = vrot.slane %v2244_v41, %v3328_v63  ;;  %v2512_v10 = vrot.slane %v2244_v41, %v3342_v20  ;;  %v2516_v8 = vrot.slane %v2244_v41, %v3339_v19  ;;  %v2520_v55 = vrot.slane %v2244_v41, %v3348_v32 }
 0x20c   :  { %v2524_v57 = vrot.slane %v2244_v41, %v3351_v40  ;;  %v2528_v23 = vrot.slane %v2244_v41, %v3386_v50  ;;  %v2532_v46 = vrot.slane %v2244_v41, %v3377_v24  ;;  %v2536_v59 = vrot.slane %v2244_v41, %v3389_v38 }
 0x20d   :  { %v2593_v48 = vadd.f32 %v2508_v25, %v2397_v1  ;;  %v2594_v11 = vadd.f32 %v2512_v10, %v2398_v27  ;;  %v2595_v45 = vadd.f32 %v2516_v8, %v2399_v31  ;;  %v2596_v39 = vadd.f32 %v2520_v55, %v2400_v33 }
 0x20e   :  { %v2597_v3 = vadd.f32 %v2524_v57, %v2401_v12  ;;  %v2598_v63 = vadd.f32 %v2528_v23, %v2402_v16  ;;  %v2599_v22 = vadd.f32 %v2532_v46, %v2403_v21  ;;  %v2600_v20 = vadd.f32 %v2536_v59, %v2404_v17 }
 0x20f   :  { %v2625_v34 = vmax.f32 %v2593_v48, 0.0  ;;  %v2626_v19 = vmax.f32 %v2594_v11, 0.0  ;;  %v2627_v2 = vmax.f32 %v2595_v45, 0.0  ;;  %v2628_v32 = vmax.f32 %v2596_v39, 0.0 }
 0x210   :  { %v2629_v42 = vmax.f32 %v2597_v3, 0.0  ;;  %v2630_v40 = vmax.f32 %v2598_v63, 0.0  ;;  %v2631_v7 = vmax.f32 %v2599_v22, 0.0  ;;  %v2632_v50 = vmax.f32 %v2600_v20, 0.0 }
 0x211   :  { %v2999_v28 = vpack.c.bf16 %v2626_v19, %v2625_v34  ;;  %v3000_v24 = vpack.c.bf16 %v2628_v32, %v2627_v2 }
 0x212   :  { %v3001_v29 = vpack.c.bf16 %v2630_v40, %v2629_v42  ;;  %v3002_v38 = vpack.c.bf16 %v2632_v50, %v2631_v7 }
 0x213   :  { %v2854_v62 = vrot.slane %v2999_v28, %v3364_v60  ;;  %v2861_v4 = vrot.slane %v3000_v24, %v3364_v60 }
 0x214   :  { %v2868_v14 = vrot.slane %v3001_v29, %v3364_v60  ;;  %v2875_v58 = vrot.slane %v3002_v38, %v3364_v60 }
 0x215   :  { %v2876_v56 = vcombine.low %v2854_v62, %v2861_v4 }
 0x216   :  { %v2877_v9 = vcombine.low %v2868_v14, %v2875_v58 }
 0x217   :  { %v2884_v15 = vrot.slane %v2876_v56, %v3364_v60 }
 0x218   :  { %v2891_v47 = vrot.slane %v2877_v9, %v3364_v60 }
 0x21a   :  { %v2892_v0 = vcombine.low %v2884_v15, %v2891_v47 }
 0x21c   :  { %2900 = vst [vmem:[%s4012_s4 + $0x18] sm:$0xff] %v2892_v0 }
 0x21d   :  { %2905 = vsyncpa [#allocation3], 1 }
 0x21e   :  { %2906 = vsyncpa [#allocation5], 1 }

// kernel: decoder_forward.4
= control target key start
LH: loop header
LB: loop body
LE: loop exit
PB: predicated region body
PF: predicated region fallthrough
CT: control target
= control target key end

     0   :  { %9 = vsyncpa [#allocation3], 0  ;;  %s6148_s0 = inlined_call_operand.vmem [shape: bf16[4,32,1024], index: 0, kind: input, shape index: {}]   ;;  %s6149_s1 = inlined_call_operand.vmem [shape: bf16[4,1024,128], index: 1, kind: input, shape index: {}]   ;;  %s6150_s2 = inlined_call_operand.hbm [shape: f32[1,128], index: 2, kind: input, shape index: {}]   ;;  %s6151_s3 = inlined_call_operand.hbm [shape: f32[1,128], index: 3, kind: input, shape index: {}]   ;;  %s6152_s4 = inlined_call_operand.vmem [shape: bf16[32,512], index: 4, kind: output, shape index: {}]  }
   0x1   :  { %10 = vsyncpa [#allocation5], 0  ;;  %s5009_s15 = smov [#allocation2]   ;;  %s5010_s17 = smov [#allocation4]  }
   0x2   :  { %s21_s16 = sshll.u32 %s5009_s15, 4  ;;  %s31_s18 = sshll.u32 %s5010_s17, 4  ;;  %s22_s16 = int_to_ptr.vmem [resolvable:$true] %s21_s16  ;;  %s32_s18 = int_to_ptr.vmem [resolvable:$true] %s31_s18 }
   0x3   :  { %s4973_s19 = scalar_lea.vmem %s22_s16, 16  ;;  %s4977_s20 = scalar_lea.vmem %s22_s16, 32 }
   0x4   :  { %p4974_p0 = scmp.ne.s32.totalorder %s22_s16, %s4973_s19  ;;  %p4978_p1 = scmp.lt.s32.totalorder %s22_s16, %s22_s16 }
   0x5   :  { %p4979_p2 = scmp.lt.s32.totalorder %s4977_s20, %s4973_s19 }
   0x7   :  { %p4980_p3 = por %p4979_p2, %p4978_p1 }
   0x9   :  { %p4981_p4 = pnand %p4980_p3, %p4974_p0 }
   0xb   :  { %4984 = shalt.err (!%p4981_p4)
}
   0xc   :  { %24 = dma.hbm_to_vmem [thread:$0]  %s6150_s2, 16, %s22_s16, [#allocation3]  }
   0xd   :  { %s4993_s23 = scalar_lea.vmem %s32_s18, 16  ;;  %s4997_s24 = scalar_lea.vmem %s32_s18, 32 }
   0xe   :  { %p4994_p5 = scmp.ne.s32.totalorder %s32_s18, %s4993_s23  ;;  %p4998_p6 = scmp.lt.s32.totalorder %s32_s18, %s32_s18 }
   0xf   :  { %p4999_p7 = scmp.lt.s32.totalorder %s4997_s24, %s4993_s23 }
  0x11   :  { %p5000_p8 = por %p4999_p7, %p4998_p6 }
  0x13   :  { %p5001_p9 = pnand %p5000_p8, %p4994_p5 }
  0x15   :  { %5004 = shalt.err (!%p5001_p9)
}
  0x16   :  { %34 = dma.hbm_to_vmem [thread:$0]  %s6151_s3, 16, %s32_s18, [#allocation5]  }
  0x17   :  { %5005 = dma.done.wait [#allocation3], 16  }
  0x18   :  { %5006 = vsyncadd [#allocation3], 4294967280 }
  0x19   :  { %5007 = dma.done.wait [#allocation5], 16  }
  0x1a   :  { %5008 = vsyncadd [#allocation5], 4294967280  ;;  %v4707_v0 = vld [vmem:[%s6149_s1 + $0x78] sm:$0xff]   ;;  %v4711_v4 = vld [vmem:[%s6149_s1 + $0x70] sm:$0xff]  }
  0x1b   :  { %v4708_v1 = vld [vmem:[%s6149_s1 + $0xf8] sm:$0xff]   ;;  %4257 = vmatprep.subr.bf16.mxu0 %v4707_v0  ;;  %v4712_v5 = vld [vmem:[%s6149_s1 + $0xf0] sm:$0xff]   ;;  %v4715_v8 = vld [vmem:[%s6149_s1 + $0x68] sm:$0xff]  }
  0x1c   :  { %v4709_v2 = vld [vmem:[%s6149_s1 + $0x38] sm:$0xff]   ;;  %4285 = vmatprep.subr.bf16.mxu1 %v4708_v1  ;;  %v4713_v6 = vld [vmem:[%s6149_s1 + $0x30] sm:$0xff]   ;;  %v4716_v9 = vld [vmem:[%s6149_s1 + $0xe8] sm:$0xff]  }
  0x1d   :  { %v4710_v3 = vld [vmem:[%s6149_s1 + $0xb8] sm:$0xff]   ;;  %4258 = vmatpush3.bf16.msra.mxu0 %v4709_v2  ;;  %v4714_v7 = vld [vmem:[%s6149_s1 + $0xb0] sm:$0xff]   ;;  %v4717_v10 = vld [vmem:[%s6149_s1 + $0x28] sm:$0xff]  }
  0x1e   :  { %4286 = vmatpush3.bf16.msra.mxu1 %v4710_v3  ;;  %4259 = vmatprep.subr.bf16.mxu0 %v4711_v4  ;;  %v4718_v11 = vld [vmem:[%s6149_s1 + $0xa8] sm:$0xff]   ;;  %v4719_v12 = vld [vmem:[%s6149_s1 + $0x60] sm:$0xff]   ;;  %v4723_v16 = vld [vmem:[%s6149_s1 + $0x58] sm:$0xff]  }
  0x1f   :  { %4287 = vmatprep.subr.bf16.mxu1 %v4712_v5  ;;  %v4720_v13 = vld [vmem:[%s6149_s1 + $0xe0] sm:$0xff]   ;;  %v4724_v17 = vld [vmem:[%s6149_s1 + $0xd8] sm:$0xff]   ;;  %v4727_v20 = vld [vmem:[%s6149_s1 + $0x50] sm:$0xff]  }
  0x20   :  { %v4721_v14 = vld [vmem:[%s6149_s1 + $0x20] sm:$0xff]   ;;  %v4725_v18 = vld [vmem:[%s6149_s1 + $0x18] sm:$0xff]   ;;  %v4728_v21 = vld [vmem:[%s6149_s1 + $0xd0] sm:$0xff]  }
  0x21   :  { %4260 = vmatpush3.bf16.msra.mxu0 %v4713_v6  ;;  %v4722_v15 = vld [vmem:[%s6149_s1 + $0xa0] sm:$0xff]   ;;  %v4726_v19 = vld [vmem:[%s6149_s1 + $0x98] sm:$0xff]   ;;  %v4729_v22 = vld [vmem:[%s6149_s1 + $0x10] sm:$0xff]  }
  0x22   :  { %4288 = vmatpush3.bf16.msra.mxu1 %v4714_v7  ;;  %4261 = vmatprep.subr.bf16.mxu0 %v4715_v8  ;;  %v4730_v23 = vld [vmem:[%s6149_s1 + $0x90] sm:$0xff]   ;;  %v4731_v24 = vld [vmem:[%s6149_s1 + $0x48] sm:$0xff]   ;;  %v4735_v28 = vld [vmem:[%s6149_s1 + $0x40] sm:$0xff]  }
  0x23   :  { %4289 = vmatprep.subr.bf16.mxu1 %v4716_v9  ;;  %v4732_v25 = vld [vmem:[%s6149_s1 + $0xc8] sm:$0xff]   ;;  %v4736_v29 = vld [vmem:[%s6149_s1 + $0xc0] sm:$0xff]   ;;  %v4739_v40 = vld [vmem:[%s6149_s1 + $0x178] sm:$0xff]  }
  0x24   :  { %v4733_v26 = vld [vmem:[%s6149_s1 + $0x8] sm:$0xff]   ;;  %v4737_v30 = vld [vmem:[%s6149_s1] sm:$0xff]   ;;  %v4740_v41 = vld [vmem:[%s6149_s1 + $0x1f8] sm:$0xff]  }
  0x25   :  { %4262 = vmatpush3.bf16.msra.mxu0 %v4717_v10  ;;  %v4734_v27 = vld [vmem:[%s6149_s1 + $0x88] sm:$0xff]   ;;  %v4738_v31 = vld [vmem:[%s6149_s1 + $0x80] sm:$0xff]   ;;  %v4741_v42 = vld [vmem:[%s6149_s1 + $0x138] sm:$0xff]  }
  0x26   :  { %4290 = vmatpush3.bf16.msra.mxu1 %v4718_v11  ;;  %4263 = vmatprep.subr.bf16.mxu0 %v4719_v12  ;;  %v42_v32 = vld [vmem:[%s6148_s0] sm:$0xff]  ;;  %v43_v34 = vld [vmem:[%s6148_s0 + $0x8] sm:$0xff]  ;;  %v4742_v43 = vld [vmem:[%s6149_s1 + $0x1b8] sm:$0xff]  }
  0x27   :  { %4291 = vmatprep.subr.bf16.mxu1 %v4720_v13  ;;  %v46_v33 = vld [vmem:[%s6148_s0 + $0x20] sm:$0xff]  ;;  %v47_v37 = vld [vmem:[%s6148_s0 + $0x28] sm:$0xff]  ;;  %v4743_v44 = vld [vmem:[%s6149_s1 + $0x170] sm:$0xff]  }
  0x28   :  { %v3489_v35 = vcombine.low %v42_v32, %v46_v33  ;;  %v3490_v36 = vcombine.high %v42_v32, %v46_v33  ;;  %v3491_v38 = vcombine.low %v43_v34, %v47_v37  ;;  %v3492_v39 = vcombine.high %v43_v34, %v47_v37  ;;  %v4744_v45 = vld [vmem:[%s6149_s1 + $0x1f0] sm:$0xff]   ;;  %v4747_v48 = vld [vmem:[%s6149_s1 + $0x168] sm:$0xff]   ;;  %v4751_v52 = vld [vmem:[%s6149_s1 + $0x160] sm:$0xff]  }
  0x29   :  { %4264 = vmatpush3.bf16.msra.mxu0 %v4721_v14  ;;  %v4745_v46 = vld [vmem:[%s6149_s1 + $0x130] sm:$0xff]   ;;  %v4748_v49 = vld [vmem:[%s6149_s1 + $0x1e8] sm:$0xff]   ;;  %v4752_v53 = vld [vmem:[%s6149_s1 + $0x1e0] sm:$0xff]  }
  0x2a   :  { %4292 = vmatpush3.bf16.msra.mxu1 %v4722_v15  ;;  %4265 = vmatprep.subr.bf16.mxu0 %v4723_v16  ;;  %v4746_v47 = vld [vmem:[%s6149_s1 + $0x1b0] sm:$0xff]   ;;  %v4749_v50 = vld [vmem:[%s6149_s1 + $0x128] sm:$0xff]   ;;  %v4753_v54 = vld [vmem:[%s6149_s1 + $0x120] sm:$0xff]  }
  0x2b   :  { %4293 = vmatprep.subr.bf16.mxu1 %v4724_v17  ;;  %682 = vmatprep.mubr.bf16.mxu0 %v3490_v36  ;;  %v4750_v51 = vld [vmem:[%s6149_s1 + $0x1a8] sm:$0xff]   ;;  %v4754_v55 = vld [vmem:[%s6149_s1 + $0x1a0] sm:$0xff]   ;;  %v4755_v56 = vld [vmem:[%s6149_s1 + $0x158] sm:$0xff]  }
  0x2c   :  { %731 = vmatprep.mubr.bf16.mxu1 %v3492_v39  ;;  %v4756_v57 = vld [vmem:[%s6149_s1 + $0x1d8] sm:$0xff]   ;;  %v50_v60 = vld [vmem:[%s6148_s0 + $0x40] sm:$0xff]  ;;  %v51_v63 = vld [vmem:[%s6148_s0 + $0x48] sm:$0xff] }
  0x2d   :  { %4266 = vmatpush3.bf16.msra.mxu0 %v4725_v18  ;;  %v4757_v58 = vld [vmem:[%s6149_s1 + $0x118] sm:$0xff]   ;;  %v54_v61 = vld [vmem:[%s6148_s0 + $0x60] sm:$0xff]  ;;  %v55_v0 = vld [vmem:[%s6148_s0 + $0x68] sm:$0xff] }
  0x2e   :  { %4294 = vmatpush3.bf16.msra.mxu1 %v4726_v19  ;;  %4267 = vmatprep.subr.bf16.mxu0 %v4727_v20  ;;  %v4758_v59 = vld [vmem:[%s6149_s1 + $0x198] sm:$0xff]   ;;  %v3498_v62 = vcombine.high %v50_v60, %v54_v61  ;;  %v3497_v1 = vcombine.low %v50_v60, %v54_v61  ;;  %v3500_v2 = vcombine.high %v51_v63, %v55_v0  ;;  %v4759_v4 = vld [vmem:[%s6149_s1 + $0x150] sm:$0xff]   ;;  %v4763_v8 = vld [vmem:[%s6149_s1 + $0x148] sm:$0xff]  }
  0x2f   :  { %4295 = vmatprep.subr.bf16.mxu1 %v4728_v21  ;;  %v3499_v3 = vcombine.low %v51_v63, %v55_v0  ;;  %v4760_v5 = vld [vmem:[%s6149_s1 + $0x1d0] sm:$0xff]   ;;  %v4764_v9 = vld [vmem:[%s6149_s1 + $0x1c8] sm:$0xff]   ;;  %v4767_v12 = vld [vmem:[%s6149_s1 + $0x140] sm:$0xff]  }
  0x30   :  { %v4761_v6 = vld [vmem:[%s6149_s1 + $0x110] sm:$0xff]   ;;  %v4765_v10 = vld [vmem:[%s6149_s1 + $0x108] sm:$0xff]   ;;  %v4768_v13 = vld [vmem:[%s6149_s1 + $0x1c0] sm:$0xff]  }
  0x31   :  { %4268 = vmatpush3.bf16.msra.mxu0 %v4729_v22  ;;  %v4762_v7 = vld [vmem:[%s6149_s1 + $0x190] sm:$0xff]   ;;  %v4766_v11 = vld [vmem:[%s6149_s1 + $0x188] sm:$0xff]   ;;  %v4769_v14 = vld [vmem:[%s6149_s1 + $0x100] sm:$0xff]  }
  0x32   :  { %4296 = vmatpush3.bf16.msra.mxu1 %v4730_v23  ;;  %4269 = vmatprep.subr.bf16.mxu0 %v4731_v24  ;;  %v4770_v15 = vld [vmem:[%s6149_s1 + $0x180] sm:$0xff]   ;;  %v44_v16 = vld [vmem:[%s6148_s0 + $0x10] sm:$0xff]  ;;  %v45_v18 = vld [vmem:[%s6148_s0 + $0x18] sm:$0xff] }
  0x33   :  { %4297 = vmatprep.subr.bf16.mxu1 %v4732_v25  ;;  %v48_v17 = vld [vmem:[%s6148_s0 + $0x30] sm:$0xff]  ;;  %v49_v19 = vld [vmem:[%s6148_s0 + $0x38] sm:$0xff]  ;;  %v4779_v36 = vld [vmem:[%s6149_s1 + $0x268] sm:$0xff]  }
  0x34   :  { %v3493_v20 = vcombine.low %v44_v16, %v48_v17  ;;  %v3494_v21 = vcombine.high %v44_v16, %v48_v17  ;;  %v3495_v22 = vcombine.low %v45_v18, %v49_v19  ;;  %v3496_v23 = vcombine.high %v45_v18, %v49_v19  ;;  %v4771_v24 = vld [vmem:[%s6149_s1 + $0x278] sm:$0xff]   ;;  %v52_v32 = vld [vmem:[%s6148_s0 + $0x50] sm:$0xff]  ;;  %v4780_v37 = vld [vmem:[%s6149_s1 + $0x2e8] sm:$0xff]  }
  0x35   :  { %4270 = vmatpush3.bf16.msra.mxu0 %v4733_v26  ;;  %v4772_v25 = vld [vmem:[%s6149_s1 + $0x2f8] sm:$0xff]   ;;  %v56_v33 = vld [vmem:[%s6148_s0 + $0x70] sm:$0xff]  ;;  %v4799_v60 = vld [vmem:[%s6149_s1 + $0x240] sm:$0xff]  }
  0x36   :  { %4298 = vmatpush3.bf16.msra.mxu1 %v4734_v27  ;;  %4271 = vmatprep.subr.bf16.mxu0 %v4735_v28  ;;  %v4773_v26 = vld [vmem:[%s6149_s1 + $0x238] sm:$0xff]   ;;  %v4775_v28 = vld [vmem:[%s6149_s1 + $0x270] sm:$0xff]   ;;  %v3502_v34 = vcombine.high %v52_v32, %v56_v33  ;;  %v4800_v61 = vld [vmem:[%s6149_s1 + $0x2c0] sm:$0xff]  }
  0x37   :  { %4299 = vmatprep.subr.bf16.mxu1 %v4736_v29  ;;  %v4774_v27 = vld [vmem:[%s6149_s1 + $0x2b8] sm:$0xff]   ;;  %v4776_v29 = vld [vmem:[%s6149_s1 + $0x2f0] sm:$0xff]   ;;  %v4802_v63 = vld [vmem:[%s6149_s1 + $0x280] sm:$0xff]  }
  0x38   :  { %v57_v39 = vld [vmem:[%s6148_s0 + $0x78] sm:$0xff]  ;;  %v3569_v0 = vld [vmem:[%s6148_s0 + $0x80] sm:$0xff]  ;;  %v4811_v16 = vld [vmem:[%s6149_s1 + $0x368] sm:$0xff]  }
  0x39   :  { %4272 = vmatpush3.bf16.msra.mxu0 %v4737_v30  ;;  %v4777_v30 = vld [vmem:[%s6149_s1 + $0x230] sm:$0xff]   ;;  %v4812_v17 = vld [vmem:[%s6149_s1 + $0x3e8] sm:$0xff]  }
  0x3a   :  { %4300 = vmatpush3.bf16.msra.mxu1 %v4738_v31  ;;  %4313 = vmatprep.subr.bf16.mxu0 %v4739_v40  ;;  %v4778_v31 = vld [vmem:[%s6149_s1 + $0x2b0] sm:$0xff]   ;;  %v4813_v18 = vld [vmem:[%s6149_s1 + $0x328] sm:$0xff]  }
  0x3b   :  { %4341 = vmatprep.subr.bf16.mxu1 %v4740_v41  ;;  %v4781_v41 = vld [vmem:[%s6149_s1 + $0x228] sm:$0xff]  }
  0x3c   :  { %683 = vmatmul.mubr.bf16.vlgmr.msra.gmra.mxu0 %v3489_v35  ;;  %v3501_v35 = vcombine.low %v52_v32, %v56_v33  ;;  %v4814_v19 = vld [vmem:[%s6149_s1 + $0x3a8] sm:$0xff]  }
  0x3d   :  { %732 = vmatmul.mubr.bf16.vlgmr.msra.gmra.mxu1 %v3491_v38  ;;  %4314 = vmatpush3.bf16.msra.mxu0 %v4741_v42  ;;  %v53_v38 = vld [vmem:[%s6148_s0 + $0x58] sm:$0xff] }
  0x3e   :  { %4342 = vmatpush3.bf16.msra.mxu1 %v4742_v43  ;;  %4315 = vmatprep.subr.bf16.mxu0 %v4743_v44  ;;  %v3504_v40 = vcombine.high %v53_v38, %v57_v39  ;;  %v3503_v42 = vcombine.low %v53_v38, %v57_v39  ;;  %v4782_v43 = vld [vmem:[%s6149_s1 + $0x2a8] sm:$0xff]   ;;  %v4783_v44 = vld [vmem:[%s6149_s1 + $0x260] sm:$0xff]   ;;  %v4825_v38 = vld [vmem:[%s6149_s1 + $0x310] sm:$0xff]  }
  0x3f   :  { %4343 = vmatprep.subr.bf16.mxu1 %v4744_v45  ;;  %690 = vmatprep.mubr.bf16.mxu0 %v3498_v62  ;;  %v4784_v45 = vld [vmem:[%s6149_s1 + $0x2e0] sm:$0xff]   ;;  %v4826_v39 = vld [vmem:[%s6149_s1 + $0x390] sm:$0xff]  }
  0x40   :  { %739 = vmatprep.mubr.bf16.mxu1 %v3500_v2  ;;  %v4801_v62 = vld [vmem:[%s6149_s1 + $0x200] sm:$0xff]  }
  0x41   :  { %4316 = vmatpush3.bf16.msra.mxu0 %v4745_v46  ;;  %v4785_v46 = vld [vmem:[%s6149_s1 + $0x220] sm:$0xff]  }
  0x42   :  { %4344 = vmatpush3.bf16.msra.mxu1 %v4746_v47  ;;  %4317 = vmatprep.subr.bf16.mxu0 %v4747_v48  ;;  %v4786_v47 = vld [vmem:[%s6149_s1 + $0x2a0] sm:$0xff]   ;;  %v4787_v48 = vld [vmem:[%s6149_s1 + $0x258] sm:$0xff]  }
  0x43   :  { %4345 = vmatprep.subr.bf16.mxu1 %v4748_v49  ;;  %v4788_v49 = vld [vmem:[%s6149_s1 + $0x2d8] sm:$0xff]  }
  0x44   :  { %691 = vmatmul.mubr.bf16.gmra.mxu0 %v3497_v1  ;;  %v3573_v1 = vld [vmem:[%s6148_s0 + $0xa0] sm:$0xff] }
  0x45   :  { %4318 = vmatpush3.bf16.msra.mxu0 %v4749_v50  ;;  %740 = vmatmul.mubr.bf16.gmra.mxu1 %v3499_v3  ;;  %v4789_v50 = vld [vmem:[%s6149_s1 + $0x218] sm:$0xff]   ;;  %v3713_v2 = vcombine.low %v3569_v0, %v3573_v1  ;;  %v3714_v3 = vcombine.high %v3569_v0, %v3573_v1  ;;  %v3579_v0 = vld [vmem:[%s6148_s0 + $0xd0] sm:$0xff] }
  0x46   :  { %4346 = vmatpush3.bf16.msra.mxu1 %v4750_v51  ;;  %4319 = vmatprep.subr.bf16.mxu0 %v4751_v52  ;;  %v4790_v51 = vld [vmem:[%s6149_s1 + $0x298] sm:$0xff]   ;;  %v4791_v52 = vld [vmem:[%s6149_s1 + $0x250] sm:$0xff]  }
  0x47   :  { %4347 = vmatprep.subr.bf16.mxu1 %v4752_v53  ;;  %780 = vmatprep.mubr.bf16.mxu0 %v3494_v21  ;;  %v4792_v53 = vld [vmem:[%s6149_s1 + $0x2d0] sm:$0xff]   ;;  %v4816_v21 = vld [vmem:[%s6149_s1 + $0x3e0] sm:$0xff]  }
  0x48   :  { %829 = vmatprep.mubr.bf16.mxu1 %v3496_v23  ;;  %v4818_v23 = vld [vmem:[%s6149_s1 + $0x3a0] sm:$0xff]   ;;  %v3583_v1 = vld [vmem:[%s6148_s0 + $0xf0] sm:$0xff] }
  0x49   :  { %4320 = vmatpush3.bf16.msra.mxu0 %v4753_v54  ;;  %v4793_v54 = vld [vmem:[%s6149_s1 + $0x210] sm:$0xff]  }
  0x4a   :  { %4348 = vmatpush3.bf16.msra.mxu1 %v4754_v55  ;;  %4321 = vmatprep.subr.bf16.mxu0 %v4755_v56  ;;  %v4794_v55 = vld [vmem:[%s6149_s1 + $0x290] sm:$0xff]   ;;  %v4795_v56 = vld [vmem:[%s6149_s1 + $0x248] sm:$0xff]  }
  0x4b   :  { %4349 = vmatprep.subr.bf16.mxu1 %v4756_v57  ;;  %v4796_v57 = vld [vmem:[%s6149_s1 + $0x2c8] sm:$0xff]  }
  0x4d   :  { %4322 = vmatpush3.bf16.msra.mxu0 %v4757_v58  ;;  %v4797_v58 = vld [vmem:[%s6149_s1 + $0x208] sm:$0xff]  }
  0x4e   :  { %4350 = vmatpush3.bf16.msra.mxu1 %v4758_v59  ;;  %4323 = vmatprep.subr.bf16.mxu0 %v4759_v4  ;;  %v4798_v59 = vld [vmem:[%s6149_s1 + $0x288] sm:$0xff]  }
  0x4f   :  { %4351 = vmatprep.subr.bf16.mxu1 %v4760_v5  ;;  %v3570_v4 = vld [vmem:[%s6148_s0 + $0x88] sm:$0xff] }
  0x50   :  { %v3574_v5 = vld [vmem:[%s6148_s0 + $0xa8] sm:$0xff] }
  0x51   :  { %4324 = vmatpush3.bf16.msra.mxu0 %v4761_v6  ;;  %v3715_v6 = vcombine.low %v3570_v4, %v3574_v5 }
  0x52   :  { %4352 = vmatpush3.bf16.msra.mxu1 %v4762_v7  ;;  %4325 = vmatprep.subr.bf16.mxu0 %v4763_v8  ;;  %v3716_v7 = vcombine.high %v3570_v4, %v3574_v5  ;;  %v4803_v8 = vld [vmem:[%s6149_s1 + $0x378] sm:$0xff]   ;;  %v4843_v4 = vld [vmem:[%s6149_s1 + $0x468] sm:$0xff]  }
  0x53   :  { %4353 = vmatprep.subr.bf16.mxu1 %v4764_v9  ;;  %v4804_v9 = vld [vmem:[%s6149_s1 + $0x3f8] sm:$0xff]   ;;  %v4844_v5 = vld [vmem:[%s6149_s1 + $0x4e8] sm:$0xff]  }
  0x55   :  { %4326 = vmatpush3.bf16.msra.mxu0 %v4765_v10  ;;  %v4805_v10 = vld [vmem:[%s6149_s1 + $0x338] sm:$0xff]  }
  0x56   :  { %4354 = vmatpush3.bf16.msra.mxu1 %v4766_v11  ;;  %4327 = vmatprep.subr.bf16.mxu0 %v4767_v12  ;;  %v4806_v11 = vld [vmem:[%s6149_s1 + $0x3b8] sm:$0xff]   ;;  %v4807_v12 = vld [vmem:[%s6149_s1 + $0x370] sm:$0xff]  }
  0x57   :  { %4355 = vmatprep.subr.bf16.mxu1 %v4768_v13  ;;  %v4808_v13 = vld [vmem:[%s6149_s1 + $0x3f0] sm:$0xff]  }
  0x59   :  { %4328 = vmatpush3.bf16.msra.mxu0 %v4769_v14  ;;  %v4809_v14 = vld [vmem:[%s6149_s1 + $0x330] sm:$0xff]  }
  0x5a   :  { %4356 = vmatpush3.bf16.msra.mxu1 %v4770_v15  ;;  %4369 = vmatprep.subr.bf16.mxu0 %v4771_v24  ;;  %v4810_v15 = vld [vmem:[%s6149_s1 + $0x3b0] sm:$0xff]   ;;  %v4819_v24 = vld [vmem:[%s6149_s1 + $0x358] sm:$0xff]  }
  0x5b   :  { %4397 = vmatprep.subr.bf16.mxu1 %v4772_v25  ;;  %v4820_v25 = vld [vmem:[%s6149_s1 + $0x3d8] sm:$0xff]  }
  0x5c   :  { %781 = vmatmul.mubr.bf16.vlgmr.msra.gmra.mxu0 %v3493_v20  ;;  %v4815_v20 = vld [vmem:[%s6149_s1 + $0x360] sm:$0xff]  }
  0x5d   :  { %830 = vmatmul.mubr.bf16.vlgmr.msra.gmra.mxu1 %v3495_v22  ;;  %4370 = vmatpush3.bf16.msra.mxu0 %v4773_v26  ;;  %v4817_v22 = vld [vmem:[%s6149_s1 + $0x320] sm:$0xff]   ;;  %v4821_v26 = vld [vmem:[%s6149_s1 + $0x318] sm:$0xff]  }
  0x5e   :  { %4398 = vmatpush3.bf16.msra.mxu1 %v4774_v27  ;;  %4371 = vmatprep.subr.bf16.mxu0 %v4775_v28  ;;  %v4822_v27 = vld [vmem:[%s6149_s1 + $0x398] sm:$0xff]   ;;  %v3577_v28 = vld [vmem:[%s6148_s0 + $0xc0] sm:$0xff] }
  0x5f   :  { %4399 = vmatprep.subr.bf16.mxu1 %v4776_v29  ;;  %788 = vmatprep.mubr.bf16.mxu0 %v3502_v34  ;;  %v3581_v29 = vld [vmem:[%s6148_s0 + $0xe0] sm:$0xff] }
  0x60   :  { %837 = vmatprep.mubr.bf16.mxu1 %v3504_v40  ;;  %v3722_v32 = vcombine.high %v3577_v28, %v3581_v29  ;;  %v3721_v34 = vcombine.low %v3577_v28, %v3581_v29  ;;  %v4827_v40 = vld [vmem:[%s6149_s1 + $0x348] sm:$0xff]   ;;  %v4863_v28 = vld [vmem:[%s6149_s1 + $0x440] sm:$0xff]  }
  0x61   :  { %4372 = vmatpush3.bf16.msra.mxu0 %v4777_v30  ;;  %v3578_v30 = vld [vmem:[%s6148_s0 + $0xc8] sm:$0xff]  ;;  %v4864_v29 = vld [vmem:[%s6149_s1 + $0x4c0] sm:$0xff]  }
  0x62   :  { %4400 = vmatpush3.bf16.msra.mxu1 %v4778_v31  ;;  %4373 = vmatprep.subr.bf16.mxu0 %v4779_v36  ;;  %v3582_v31 = vld [vmem:[%s6148_s0 + $0xe8] sm:$0xff]  ;;  %v4823_v36 = vld [vmem:[%s6149_s1 + $0x350] sm:$0xff]  }
  0x63   :  { %4401 = vmatprep.subr.bf16.mxu1 %v4780_v37  ;;  %v3724_v33 = vcombine.high %v3578_v30, %v3582_v31  ;;  %v4824_v37 = vld [vmem:[%s6149_s1 + $0x3d0] sm:$0xff]  }
  0x64   :  { %789 = vmatmul.mubr.bf16.gmra.mxu0 %v3501_v35  ;;  %v3723_v35 = vcombine.low %v3578_v30, %v3582_v31  ;;  %v4865_v30 = vld [vmem:[%s6149_s1 + $0x400] sm:$0xff]  }
  0x65   :  { %4374 = vmatpush3.bf16.msra.mxu0 %v4781_v41  ;;  %838 = vmatmul.mubr.bf16.gmra.mxu1 %v3503_v42  ;;  %v4828_v41 = vld [vmem:[%s6149_s1 + $0x3c8] sm:$0xff]   ;;  %v4866_v31 = vld [vmem:[%s6149_s1 + $0x480] sm:$0xff]  }
  0x66   :  { %4402 = vmatpush3.bf16.msra.mxu1 %v4782_v43  ;;  %4375 = vmatprep.subr.bf16.mxu0 %v4783_v44  ;;  %v4829_v42 = vld [vmem:[%s6149_s1 + $0x308] sm:$0xff]   ;;  %v4831_v44 = vld [vmem:[%s6149_s1 + $0x340] sm:$0xff]  }
  0x67   :  { %4403 = vmatprep.subr.bf16.mxu1 %v4784_v45  ;;  %1488 = vmatprep.mubr.bf16.mxu0 %v3714_v3  ;;  %v4830_v43 = vld [vmem:[%s6149_s1 + $0x388] sm:$0xff]   ;;  %v4832_v45 = vld [vmem:[%s6149_s1 + $0x3c0] sm:$0xff]   ;;  %v3725_v3 = vcombine.low %v3579_v0, %v3583_v1 }
  0x68   :  { %1537 = vmatprep.mubr.bf16.mxu1 %v3716_v7  ;;  %v3584_v7 = vld [vmem:[%s6148_s0 + $0xf8] sm:$0xff] }
  0x69   :  { %4376 = vmatpush3.bf16.msra.mxu0 %v4785_v46  ;;  %v4833_v46 = vld [vmem:[%s6149_s1 + $0x300] sm:$0xff]  }
  0x6a   :  { %4404 = vmatpush3.bf16.msra.mxu1 %v4786_v47  ;;  %4377 = vmatprep.subr.bf16.mxu0 %v4787_v48  ;;  %v4834_v47 = vld [vmem:[%s6149_s1 + $0x380] sm:$0xff]   ;;  %v3571_v48 = vld [vmem:[%s6148_s0 + $0x90] sm:$0xff] }
  0x6b   :  { %4405 = vmatprep.subr.bf16.mxu1 %v4788_v49  ;;  %v3575_v49 = vld [vmem:[%s6148_s0 + $0xb0] sm:$0xff] }
  0x6d   :  { %4378 = vmatpush3.bf16.msra.mxu0 %v4789_v50  ;;  %v3572_v50 = vld [vmem:[%s6148_s0 + $0x98] sm:$0xff] }
  0x6e   :  { %4406 = vmatpush3.bf16.msra.mxu1 %v4790_v51  ;;  %4379 = vmatprep.subr.bf16.mxu0 %v4791_v52  ;;  %v3717_v51 = vcombine.low %v3571_v48, %v3575_v49  ;;  %v3718_v52 = vcombine.high %v3571_v48, %v3575_v49  ;;  %v4875_v48 = vld [vmem:[%s6149_s1 + $0x568] sm:$0xff]  }
  0x6f   :  { %4407 = vmatprep.subr.bf16.mxu1 %v4792_v53  ;;  %v3576_v53 = vld [vmem:[%s6148_s0 + $0xb8] sm:$0xff]  ;;  %v4876_v49 = vld [vmem:[%s6149_s1 + $0x5e8] sm:$0xff]  }
  0x71   :  { %4380 = vmatpush3.bf16.msra.mxu0 %v4793_v54  ;;  %v3719_v54 = vcombine.low %v3572_v50, %v3576_v53 }
  0x72   :  { %4408 = vmatpush3.bf16.msra.mxu1 %v4794_v55  ;;  %4381 = vmatprep.subr.bf16.mxu0 %v4795_v56  ;;  %v3720_v55 = vcombine.high %v3572_v50, %v3576_v53  ;;  %v4835_v56 = vld [vmem:[%s6149_s1 + $0x478] sm:$0xff]   ;;  %v4877_v50 = vld [vmem:[%s6149_s1 + $0x528] sm:$0xff]   ;;  %v4880_v53 = vld [vmem:[%s6149_s1 + $0x5e0] sm:$0xff]  }
  0x73   :  { %4409 = vmatprep.subr.bf16.mxu1 %v4796_v57  ;;  %v4836_v57 = vld [vmem:[%s6149_s1 + $0x4f8] sm:$0xff]  }
  0x75   :  { %4382 = vmatpush3.bf16.msra.mxu0 %v4797_v58  ;;  %v4837_v58 = vld [vmem:[%s6149_s1 + $0x438] sm:$0xff]  }
  0x76   :  { %4410 = vmatpush3.bf16.msra.mxu1 %v4798_v59  ;;  %4383 = vmatprep.subr.bf16.mxu0 %v4799_v60  ;;  %v4838_v59 = vld [vmem:[%s6149_s1 + $0x4b8] sm:$0xff]   ;;  %v4839_v60 = vld [vmem:[%s6149_s1 + $0x470] sm:$0xff]  }
  0x77   :  { %4411 = vmatprep.subr.bf16.mxu1 %v4800_v61  ;;  %v4840_v61 = vld [vmem:[%s6149_s1 + $0x4f0] sm:$0xff]  }
  0x79   :  { %4384 = vmatpush3.bf16.msra.mxu0 %v4801_v62  ;;  %v4841_v62 = vld [vmem:[%s6149_s1 + $0x430] sm:$0xff]  }
  0x7a   :  { %4412 = vmatpush3.bf16.msra.mxu1 %v4802_v63  ;;  %4425 = vmatprep.subr.bf16.mxu0 %v4803_v8  ;;  %v4842_v63 = vld [vmem:[%s6149_s1 + $0x4b0] sm:$0xff]  }
  0x7b   :  { %4453 = vmatprep.subr.bf16.mxu1 %v4804_v9  ;;  %v4845_v9 = vld [vmem:[%s6149_s1 + $0x428] sm:$0xff]  }
  0x7c   :  { %1489 = vmatmul.mubr.bf16.vlgmr.msra.gmra.mxu0 %v3713_v2  ;;  %v3726_v2 = vcombine.high %v3579_v0, %v3583_v1  ;;  %v3806_v0 = vld [vmem:[%s6148_s0 + $0x168] sm:$0xff] }
  0x7d   :  { %1538 = vmatmul.mubr.bf16.vlgmr.msra.gmra.mxu1 %v3715_v6  ;;  %4426 = vmatpush3.bf16.msra.mxu0 %v4805_v10  ;;  %v3580_v6 = vld [vmem:[%s6148_s0 + $0xd8] sm:$0xff] }
  0x7e   :  { %4454 = vmatpush3.bf16.msra.mxu1 %v4806_v11  ;;  %4427 = vmatprep.subr.bf16.mxu0 %v4807_v12  ;;  %v3728_v8 = vcombine.high %v3580_v6, %v3584_v7  ;;  %v3727_v10 = vcombine.low %v3580_v6, %v3584_v7  ;;  %v4846_v11 = vld [vmem:[%s6149_s1 + $0x4a8] sm:$0xff]   ;;  %v4847_v12 = vld [vmem:[%s6149_s1 + $0x460] sm:$0xff]   ;;  %v4889_v6 = vld [vmem:[%s6149_s1 + $0x510] sm:$0xff]  }
  0x7f   :  { %4455 = vmatprep.subr.bf16.mxu1 %v4808_v13  ;;  %1496 = vmatprep.mubr.bf16.mxu0 %v3722_v32  ;;  %v4848_v13 = vld [vmem:[%s6149_s1 + $0x4e0] sm:$0xff]   ;;  %v4890_v7 = vld [vmem:[%s6149_s1 + $0x590] sm:$0xff]  }
  0x80   :  { %1545 = vmatprep.mubr.bf16.mxu1 %v3724_v33  ;;  %v3793_v32 = vld [vmem:[%s6148_s0 + $0x100] sm:$0xff] }
  0x81   :  { %4428 = vmatpush3.bf16.msra.mxu0 %v4809_v14  ;;  %v4849_v14 = vld [vmem:[%s6149_s1 + $0x420] sm:$0xff]  }
  0x82   :  { %4456 = vmatpush3.bf16.msra.mxu1 %v4810_v15  ;;  %4429 = vmatprep.subr.bf16.mxu0 %v4811_v16  ;;  %v4850_v15 = vld [vmem:[%s6149_s1 + $0x4a0] sm:$0xff]   ;;  %v4851_v16 = vld [vmem:[%s6149_s1 + $0x458] sm:$0xff]  }
  0x83   :  { %4457 = vmatprep.subr.bf16.mxu1 %v4812_v17  ;;  %v4852_v17 = vld [vmem:[%s6149_s1 + $0x4d8] sm:$0xff]   ;;  %v3797_v33 = vld [vmem:[%s6148_s0 + $0x120] sm:$0xff] }
  0x84   :  { %1497 = vmatmul.mubr.bf16.gmra.mxu0 %v3721_v34  ;;  %v3794_v34 = vld [vmem:[%s6148_s0 + $0x108] sm:$0xff] }
  0x85   :  { %4430 = vmatpush3.bf16.msra.mxu0 %v4813_v18  ;;  %1546 = vmatmul.mubr.bf16.gmra.mxu1 %v3723_v35  ;;  %v4853_v18 = vld [vmem:[%s6149_s1 + $0x418] sm:$0xff]   ;;  %v3798_v35 = vld [vmem:[%s6148_s0 + $0x128] sm:$0xff] }
  0x86   :  { %4458 = vmatpush3.bf16.msra.mxu1 %v4814_v19  ;;  %4431 = vmatprep.subr.bf16.mxu0 %v4815_v20  ;;  %v4854_v19 = vld [vmem:[%s6149_s1 + $0x498] sm:$0xff]   ;;  %v4855_v20 = vld [vmem:[%s6149_s1 + $0x450] sm:$0xff]  }
  0x87   :  { %4459 = vmatprep.subr.bf16.mxu1 %v4816_v21  ;;  %1586 = vmatprep.mubr.bf16.mxu0 %v3718_v52  ;;  %v4856_v21 = vld [vmem:[%s6149_s1 + $0x4d0] sm:$0xff]   ;;  %v4879_v52 = vld [vmem:[%s6149_s1 + $0x560] sm:$0xff]  }
  0x88   :  { %1635 = vmatprep.mubr.bf16.mxu1 %v3720_v55  ;;  %v4882_v55 = vld [vmem:[%s6149_s1 + $0x5a0] sm:$0xff]  }
  0x89   :  { %4432 = vmatpush3.bf16.msra.mxu0 %v4817_v22  ;;  %v4857_v22 = vld [vmem:[%s6149_s1 + $0x410] sm:$0xff]  }
  0x8a   :  { %4460 = vmatpush3.bf16.msra.mxu1 %v4818_v23  ;;  %4433 = vmatprep.subr.bf16.mxu0 %v4819_v24  ;;  %v4858_v23 = vld [vmem:[%s6149_s1 + $0x490] sm:$0xff]   ;;  %v4859_v24 = vld [vmem:[%s6149_s1 + $0x448] sm:$0xff]  }
  0x8b   :  { %4461 = vmatprep.subr.bf16.mxu1 %v4820_v25  ;;  %v4860_v25 = vld [vmem:[%s6149_s1 + $0x4c8] sm:$0xff]  }
  0x8d   :  { %4434 = vmatpush3.bf16.msra.mxu0 %v4821_v26  ;;  %v4861_v26 = vld [vmem:[%s6149_s1 + $0x408] sm:$0xff]  }
  0x8e   :  { %4462 = vmatpush3.bf16.msra.mxu1 %v4822_v27  ;;  %4435 = vmatprep.subr.bf16.mxu0 %v4823_v36  ;;  %v4862_v27 = vld [vmem:[%s6149_s1 + $0x488] sm:$0xff]   ;;  %v3937_v36 = vcombine.low %v3793_v32, %v3797_v33 }
  0x8f   :  { %4463 = vmatprep.subr.bf16.mxu1 %v4824_v37  ;;  %v3938_v37 = vcombine.high %v3793_v32, %v3797_v33  ;;  %v3803_v32 = vld [vmem:[%s6148_s0 + $0x150] sm:$0xff] }
  0x90   :  { %v3807_v33 = vld [vmem:[%s6148_s0 + $0x170] sm:$0xff] }
  0x91   :  { %4436 = vmatpush3.bf16.msra.mxu0 %v4825_v38  ;;  %v3939_v38 = vcombine.low %v3794_v34, %v3798_v35 }
  0x92   :  { %4464 = vmatpush3.bf16.msra.mxu1 %v4826_v39  ;;  %4437 = vmatprep.subr.bf16.mxu0 %v4827_v40  ;;  %v3940_v39 = vcombine.high %v3794_v34, %v3798_v35  ;;  %v4867_v40 = vld [vmem:[%s6149_s1 + $0x578] sm:$0xff]   ;;  %v3950_v34 = vcombine.high %v3803_v32, %v3807_v33  ;;  %v3949_v35 = vcombine.low %v3803_v32, %v3807_v33  ;;  %v4940_v33 = vld [vmem:[%s6149_s1 + $0x7e8] sm:$0xff]  }
  0x93   :  { %4465 = vmatprep.subr.bf16.mxu1 %v4828_v41  ;;  %v4868_v41 = vld [vmem:[%s6149_s1 + $0x5f8] sm:$0xff]  }
  0x95   :  { %4438 = vmatpush3.bf16.msra.mxu0 %v4829_v42  ;;  %v4869_v42 = vld [vmem:[%s6149_s1 + $0x538] sm:$0xff]  }
  0x96   :  { %4466 = vmatpush3.bf16.msra.mxu1 %v4830_v43  ;;  %4439 = vmatprep.subr.bf16.mxu0 %v4831_v44  ;;  %v4870_v43 = vld [vmem:[%s6149_s1 + $0x5b8] sm:$0xff]   ;;  %v4871_v44 = vld [vmem:[%s6149_s1 + $0x570] sm:$0xff]  }
  0x97   :  { %4467 = vmatprep.subr.bf16.mxu1 %v4832_v45  ;;  %v4872_v45 = vld [vmem:[%s6149_s1 + $0x5f0] sm:$0xff]  }
  0x99   :  { %4440 = vmatpush3.bf16.msra.mxu0 %v4833_v46  ;;  %v4873_v46 = vld [vmem:[%s6149_s1 + $0x530] sm:$0xff]  }
  0x9a   :  { %4468 = vmatpush3.bf16.msra.mxu1 %v4834_v47  ;;  %4481 = vmatprep.subr.bf16.mxu0 %v4835_v56  ;;  %v4874_v47 = vld [vmem:[%s6149_s1 + $0x5b0] sm:$0xff]   ;;  %v4883_v56 = vld [vmem:[%s6149_s1 + $0x558] sm:$0xff]  }
  0x9b   :  { %4509 = vmatprep.subr.bf16.mxu1 %v4836_v57  ;;  %v4884_v57 = vld [vmem:[%s6149_s1 + $0x5d8] sm:$0xff]  }
  0x9c   :  { %1587 = vmatmul.mubr.bf16.vlgmr.msra.gmra.mxu0 %v3717_v51  ;;  %v4878_v51 = vld [vmem:[%s6149_s1 + $0x5a8] sm:$0xff]  }
  0x9d   :  { %1636 = vmatmul.mubr.bf16.vlgmr.msra.gmra.mxu1 %v3719_v54  ;;  %4482 = vmatpush3.bf16.msra.mxu0 %v4837_v58  ;;  %v4881_v54 = vld [vmem:[%s6149_s1 + $0x520] sm:$0xff]   ;;  %v4885_v58 = vld [vmem:[%s6149_s1 + $0x518] sm:$0xff]  }
  0x9e   :  { %4510 = vmatpush3.bf16.msra.mxu1 %v4838_v59  ;;  %4483 = vmatprep.subr.bf16.mxu0 %v4839_v60  ;;  %v4886_v59 = vld [vmem:[%s6149_s1 + $0x598] sm:$0xff]   ;;  %v3801_v60 = vld [vmem:[%s6148_s0 + $0x140] sm:$0xff] }
  0x9f   :  { %4511 = vmatprep.subr.bf16.mxu1 %v4840_v61  ;;  %1594 = vmatprep.mubr.bf16.mxu0 %v3726_v2  ;;  %v3805_v61 = vld [vmem:[%s6148_s0 + $0x160] sm:$0xff] }
  0xa0   :  { %1643 = vmatprep.mubr.bf16.mxu1 %v3728_v8  ;;  %v3945_v1 = vcombine.low %v3801_v60, %v3805_v61  ;;  %v4891_v8 = vld [vmem:[%s6149_s1 + $0x548] sm:$0xff]  }
  0xa1   :  { %4484 = vmatpush3.bf16.msra.mxu0 %v4841_v62  ;;  %v3802_v62 = vld [vmem:[%s6148_s0 + $0x148] sm:$0xff] }
  0xa2   :  { %4512 = vmatpush3.bf16.msra.mxu1 %v4842_v63  ;;  %4485 = vmatprep.subr.bf16.mxu0 %v4843_v4  ;;  %v3946_v63 = vcombine.high %v3801_v60, %v3805_v61  ;;  %v3948_v2 = vcombine.high %v3802_v62, %v3806_v0  ;;  %v4887_v4 = vld [vmem:[%s6149_s1 + $0x550] sm:$0xff]   ;;  %v4923_v61 = vld [vmem:[%s6149_s1 + $0x648] sm:$0xff]  }
  0xa3   :  { %4513 = vmatprep.subr.bf16.mxu1 %v4844_v5  ;;  %v4888_v5 = vld [vmem:[%s6149_s1 + $0x5d0] sm:$0xff]  }
  0xa4   :  { %1595 = vmatmul.mubr.bf16.gmra.mxu0 %v3725_v3  ;;  %v3947_v3 = vcombine.low %v3802_v62, %v3806_v0  ;;  %v4924_v0 = vld [vmem:[%s6149_s1 + $0x6c8] sm:$0xff]  }
  0xa5   :  { %4486 = vmatpush3.bf16.msra.mxu0 %v4845_v9  ;;  %1644 = vmatmul.mubr.bf16.gmra.mxu1 %v3727_v10  ;;  %v4892_v9 = vld [vmem:[%s6149_s1 + $0x5c8] sm:$0xff]  }
  0xa6   :  { %4514 = vmatpush3.bf16.msra.mxu1 %v4846_v11  ;;  %4487 = vmatprep.subr.bf16.mxu0 %v4847_v12  ;;  %v4893_v10 = vld [vmem:[%s6149_s1 + $0x508] sm:$0xff]   ;;  %v4895_v12 = vld [vmem:[%s6149_s1 + $0x540] sm:$0xff]  }
  0xa7   :  { %4515 = vmatprep.subr.bf16.mxu1 %v4848_v13  ;;  %2294 = vmatprep.mubr.bf16.mxu0 %v3938_v37  ;;  %v4894_v11 = vld [vmem:[%s6149_s1 + $0x588] sm:$0xff]   ;;  %v4896_v13 = vld [vmem:[%s6149_s1 + $0x5c0] sm:$0xff]  }
  0xa8   :  { %2343 = vmatprep.mubr.bf16.mxu1 %v3940_v39  ;;  %v4908_v37 = vld [vmem:[%s6149_s1 + $0x6e8] sm:$0xff]   ;;  %v3808_v39 = vld [vmem:[%s6148_s0 + $0x178] sm:$0xff] }
  0xa9   :  { %4488 = vmatpush3.bf16.msra.mxu0 %v4849_v14  ;;  %v4897_v14 = vld [vmem:[%s6149_s1 + $0x500] sm:$0xff]  }
  0xaa   :  { %4516 = vmatpush3.bf16.msra.mxu1 %v4850_v15  ;;  %4489 = vmatprep.subr.bf16.mxu0 %v4851_v16  ;;  %v4898_v15 = vld [vmem:[%s6149_s1 + $0x580] sm:$0xff]   ;;  %v3795_v16 = vld [vmem:[%s6148_s0 + $0x110] sm:$0xff] }
  0xab   :  { %4517 = vmatprep.subr.bf16.mxu1 %v4852_v17  ;;  %v3799_v17 = vld [vmem:[%s6148_s0 + $0x130] sm:$0xff] }
  0xad   :  { %4490 = vmatpush3.bf16.msra.mxu0 %v4853_v18  ;;  %v3941_v18 = vcombine.low %v3795_v16, %v3799_v17 }
  0xae   :  { %4518 = vmatpush3.bf16.msra.mxu1 %v4854_v19  ;;  %4491 = vmatprep.subr.bf16.mxu0 %v4855_v20  ;;  %v3942_v19 = vcombine.high %v3795_v16, %v3799_v17  ;;  %v3796_v20 = vld [vmem:[%s6148_s0 + $0x118] sm:$0xff]  ;;  %v4018_v16 = vld [vmem:[%s6148_s0 + $0x188] sm:$0xff] }
  0xaf   :  { %4519 = vmatprep.subr.bf16.mxu1 %v4856_v21  ;;  %v3800_v21 = vld [vmem:[%s6148_s0 + $0x138] sm:$0xff] }
  0xb1   :  { %4492 = vmatpush3.bf16.msra.mxu0 %v4857_v22  ;;  %v3943_v22 = vcombine.low %v3796_v20, %v3800_v21 }
  0xb2   :  { %4520 = vmatpush3.bf16.msra.mxu1 %v4858_v23  ;;  %4493 = vmatprep.subr.bf16.mxu0 %v4859_v24  ;;  %v3944_v23 = vcombine.high %v3796_v20, %v3800_v21  ;;  %v4899_v24 = vld [vmem:[%s6149_s1 + $0x678] sm:$0xff]  }
  0xb3   :  { %4521 = vmatprep.subr.bf16.mxu1 %v4860_v25  ;;  %v4900_v25 = vld [vmem:[%s6149_s1 + $0x6f8] sm:$0xff]  }
  0xb5   :  { %4494 = vmatpush3.bf16.msra.mxu0 %v4861_v26  ;;  %v4901_v26 = vld [vmem:[%s6149_s1 + $0x638] sm:$0xff]  }
  0xb6   :  { %4522 = vmatpush3.bf16.msra.mxu1 %v4862_v27  ;;  %4495 = vmatprep.subr.bf16.mxu0 %v4863_v28  ;;  %v4902_v27 = vld [vmem:[%s6149_s1 + $0x6b8] sm:$0xff]   ;;  %v4903_v28 = vld [vmem:[%s6149_s1 + $0x670] sm:$0xff]  }
  0xb7   :  { %4523 = vmatprep.subr.bf16.mxu1 %v4864_v29  ;;  %v4904_v29 = vld [vmem:[%s6149_s1 + $0x6f0] sm:$0xff]  }
  0xb9   :  { %4496 = vmatpush3.bf16.msra.mxu0 %v4865_v30  ;;  %v4905_v30 = vld [vmem:[%s6149_s1 + $0x630] sm:$0xff]  }
  0xba   :  { %4524 = vmatpush3.bf16.msra.mxu1 %v4866_v31  ;;  %4537 = vmatprep.subr.bf16.mxu0 %v4867_v40  ;;  %v4906_v31 = vld [vmem:[%s6149_s1 + $0x6b0] sm:$0xff]  }
  0xbb   :  { %4565 = vmatprep.subr.bf16.mxu1 %v4868_v41  ;;  %v4909_v41 = vld [vmem:[%s6149_s1 + $0x628] sm:$0xff]  }
  0xbc   :  { %2295 = vmatmul.mubr.bf16.vlgmr.msra.gmra.mxu0 %v3937_v36  ;;  %v4907_v36 = vld [vmem:[%s6149_s1 + $0x668] sm:$0xff]  }
  0xbd   :  { %2344 = vmatmul.mubr.bf16.vlgmr.msra.gmra.mxu1 %v3939_v38  ;;  %4538 = vmatpush3.bf16.msra.mxu0 %v4869_v42  ;;  %v3804_v38 = vld [vmem:[%s6148_s0 + $0x158] sm:$0xff] }
  0xbe   :  { %4566 = vmatpush3.bf16.msra.mxu1 %v4870_v43  ;;  %4539 = vmatprep.subr.bf16.mxu0 %v4871_v44  ;;  %v3952_v40 = vcombine.high %v3804_v38, %v3808_v39  ;;  %v3951_v42 = vcombine.low %v3804_v38, %v3808_v39  ;;  %v4910_v43 = vld [vmem:[%s6149_s1 + $0x6a8] sm:$0xff]   ;;  %v4911_v44 = vld [vmem:[%s6149_s1 + $0x660] sm:$0xff]  }
  0xbf   :  { %4567 = vmatprep.subr.bf16.mxu1 %v4872_v45  ;;  %2302 = vmatprep.mubr.bf16.mxu0 %v3946_v63  ;;  %v4912_v45 = vld [vmem:[%s6149_s1 + $0x6e0] sm:$0xff]   ;;  %v4942_v38 = vld [vmem:[%s6149_s1 + $0x7a8] sm:$0xff]  }
  0xc0   :  { %2351 = vmatprep.mubr.bf16.mxu1 %v3948_v2  ;;  %v4925_v2 = vld [vmem:[%s6149_s1 + $0x608] sm:$0xff]  }
  0xc1   :  { %4540 = vmatpush3.bf16.msra.mxu0 %v4873_v46  ;;  %v4913_v46 = vld [vmem:[%s6149_s1 + $0x620] sm:$0xff]  }
  0xc2   :  { %4568 = vmatpush3.bf16.msra.mxu1 %v4874_v47  ;;  %4541 = vmatprep.subr.bf16.mxu0 %v4875_v48  ;;  %v4914_v47 = vld [vmem:[%s6149_s1 + $0x6a0] sm:$0xff]   ;;  %v4915_v48 = vld [vmem:[%s6149_s1 + $0x658] sm:$0xff]  }
  0xc3   :  { %4569 = vmatprep.subr.bf16.mxu1 %v4876_v49  ;;  %v4916_v49 = vld [vmem:[%s6149_s1 + $0x6d8] sm:$0xff]  }
  0xc4   :  { %2303 = vmatmul.mubr.bf16.gmra.mxu0 %v3945_v1 }
  0xc5   :  { %4542 = vmatpush3.bf16.msra.mxu0 %v4877_v50  ;;  %2352 = vmatmul.mubr.bf16.gmra.mxu1 %v3947_v3  ;;  %v4917_v50 = vld [vmem:[%s6149_s1 + $0x618] sm:$0xff]  }
  0xc6   :  { %4570 = vmatpush3.bf16.msra.mxu1 %v4878_v51  ;;  %4543 = vmatprep.subr.bf16.mxu0 %v4879_v52  ;;  %v4918_v51 = vld [vmem:[%s6149_s1 + $0x698] sm:$0xff]   ;;  %v4919_v52 = vld [vmem:[%s6149_s1 + $0x650] sm:$0xff]  }
  0xc7   :  { %4571 = vmatprep.subr.bf16.mxu1 %v4880_v53  ;;  %2392 = vmatprep.mubr.bf16.mxu0 %v3942_v19  ;;  %v4022_v19 = vld [vmem:[%s6148_s0 + $0x1a8] sm:$0xff] }
  0xc8   :  { %2441 = vmatprep.mubr.bf16.mxu1 %v3944_v23  ;;  %v4163_v20 = vcombine.low %v4018_v16, %v4022_v19  ;;  %v4164_v21 = vcombine.high %v4018_v16, %v4022_v19  ;;  %v4932_v23 = vld [vmem:[%s6149_s1 + $0x7f8] sm:$0xff]  }
  0xc9   :  { %4544 = vmatpush3.bf16.msra.mxu0 %v4881_v54  ;;  %v4920_v54 = vld [vmem:[%s6149_s1 + $0x6d0] sm:$0xff]  }
  0xca   :  { %4572 = vmatpush3.bf16.msra.mxu1 %v4882_v55  ;;  %4545 = vmatprep.subr.bf16.mxu0 %v4883_v56  ;;  %v4921_v56 = vld [vmem:[%s6149_s1 + $0x610] sm:$0xff]  }
  0xcb   :  { %4573 = vmatprep.subr.bf16.mxu1 %v4884_v57 }
  0xcd   :  { %4546 = vmatpush3.bf16.msra.mxu0 %v4885_v58  ;;  %v4922_v58 = vld [vmem:[%s6149_s1 + $0x690] sm:$0xff]  }
  0xce   :  { %4574 = vmatpush3.bf16.msra.mxu1 %v4886_v59  ;;  %4547 = vmatprep.subr.bf16.mxu0 %v4887_v4 }
  0xcf   :  { %4575 = vmatprep.subr.bf16.mxu1 %v4888_v5  ;;  %v4926_v5 = vld [vmem:[%s6149_s1 + $0x688] sm:$0xff]  }
  0xd1   :  { %4548 = vmatpush3.bf16.msra.mxu0 %v4889_v6 }
  0xd2   :  { %4576 = vmatpush3.bf16.msra.mxu1 %v4890_v7  ;;  %4549 = vmatprep.subr.bf16.mxu0 %v4891_v8  ;;  %v4927_v8 = vld [vmem:[%s6149_s1 + $0x640] sm:$0xff]  }
  0xd3   :  { %4577 = vmatprep.subr.bf16.mxu1 %v4892_v9 }
  0xd5   :  { %4550 = vmatpush3.bf16.msra.mxu0 %v4893_v10  ;;  %v4928_v10 = vld [vmem:[%s6149_s1 + $0x6c0] sm:$0xff]  }
  0xd6   :  { %4578 = vmatpush3.bf16.msra.mxu1 %v4894_v11  ;;  %4551 = vmatprep.subr.bf16.mxu0 %v4895_v12  ;;  %v4929_v11 = vld [vmem:[%s6149_s1 + $0x600] sm:$0xff]  }
  0xd7   :  { %4579 = vmatprep.subr.bf16.mxu1 %v4896_v13  ;;  %v4930_v13 = vld [vmem:[%s6149_s1 + $0x680] sm:$0xff]  }
  0xd9   :  { %4552 = vmatpush3.bf16.msra.mxu0 %v4897_v14  ;;  %v4017_v14 = vld [vmem:[%s6148_s0 + $0x180] sm:$0xff] }
  0xda   :  { %4580 = vmatpush3.bf16.msra.mxu1 %v4898_v15  ;;  %4593 = vmatprep.subr.bf16.mxu0 %v4899_v24  ;;  %v4021_v15 = vld [vmem:[%s6148_s0 + $0x1a0] sm:$0xff]  ;;  %v4933_v24 = vld [vmem:[%s6149_s1 + $0x738] sm:$0xff]  }
  0xdb   :  { %4621 = vmatprep.subr.bf16.mxu1 %v4900_v25  ;;  %v4161_v17 = vcombine.low %v4017_v14, %v4021_v15  ;;  %v4934_v25 = vld [vmem:[%s6149_s1 + $0x7b8] sm:$0xff]  }
  0xdc   :  { %2393 = vmatmul.mubr.bf16.vlgmr.msra.gmra.mxu0 %v3941_v18  ;;  %v4162_v18 = vcombine.high %v4017_v14, %v4021_v15  ;;  %v4956_v15 = vld [vmem:[%s6149_s1 + $0x7c8] sm:$0xff]  }
  0xdd   :  { %2442 = vmatmul.mubr.bf16.vlgmr.msra.gmra.mxu1 %v3943_v22  ;;  %4594 = vmatpush3.bf16.msra.mxu0 %v4901_v26  ;;  %v4931_v22 = vld [vmem:[%s6149_s1 + $0x778] sm:$0xff]   ;;  %v4935_v26 = vld [vmem:[%s6149_s1 + $0x770] sm:$0xff]  }
  0xde   :  { %4622 = vmatpush3.bf16.msra.mxu1 %v4902_v27  ;;  %4595 = vmatprep.subr.bf16.mxu0 %v4903_v28  ;;  %v4936_v27 = vld [vmem:[%s6149_s1 + $0x7f0] sm:$0xff]  }
  0xdf   :  { %4623 = vmatprep.subr.bf16.mxu1 %v4904_v29  ;;  %2400 = vmatprep.mubr.bf16.mxu0 %v3950_v34  ;;  %v4937_v28 = vld [vmem:[%s6149_s1 + $0x730] sm:$0xff]  }
  0xe0   :  { %2449 = vmatprep.mubr.bf16.mxu1 %v3952_v40  ;;  %v4938_v29 = vld [vmem:[%s6149_s1 + $0x7b0] sm:$0xff]  }
  0xe1   :  { %4596 = vmatpush3.bf16.msra.mxu0 %v4905_v30 }
  0xe2   :  { %4624 = vmatpush3.bf16.msra.mxu1 %v4906_v31  ;;  %4597 = vmatprep.subr.bf16.mxu0 %v4907_v36  ;;  %v4939_v31 = vld [vmem:[%s6149_s1 + $0x768] sm:$0xff]  }
  0xe3   :  { %4625 = vmatprep.subr.bf16.mxu1 %v4908_v37 }
  0xe4   :  { %2401 = vmatmul.mubr.bf16.gmra.mxu0 %v3949_v35  ;;  %v4941_v35 = vld [vmem:[%s6149_s1 + $0x728] sm:$0xff]  }
  0xe5   :  { %4598 = vmatpush3.bf16.msra.mxu0 %v4909_v41  ;;  %2450 = vmatmul.mubr.bf16.gmra.mxu1 %v3951_v42  ;;  %v4943_v41 = vld [vmem:[%s6149_s1 + $0x760] sm:$0xff]  }
  0xe6   :  { %4626 = vmatpush3.bf16.msra.mxu1 %v4910_v43  ;;  %4599 = vmatprep.subr.bf16.mxu0 %v4911_v44  ;;  %v4944_v43 = vld [vmem:[%s6149_s1 + $0x7e0] sm:$0xff]  }
  0xe7   :  { %4627 = vmatprep.subr.bf16.mxu1 %v4912_v45  ;;  %3100 = vmatprep.mubr.bf16.mxu0 %v4162_v18 }
  0xe8   :  { %3149 = vmatprep.mubr.bf16.mxu1 %v4164_v21 }
  0xe9   :  { %4600 = vmatpush3.bf16.msra.mxu0 %v4913_v46  ;;  %v4945_v46 = vld [vmem:[%s6149_s1 + $0x720] sm:$0xff]  }
  0xea   :  { %4628 = vmatpush3.bf16.msra.mxu1 %v4914_v47  ;;  %4601 = vmatprep.subr.bf16.mxu0 %v4915_v48 }
  0xeb   :  { %4629 = vmatprep.subr.bf16.mxu1 %v4916_v49  ;;  %v4946_v49 = vld [vmem:[%s6149_s1 + $0x7a0] sm:$0xff]  }
  0xed   :  { %4602 = vmatpush3.bf16.msra.mxu0 %v4917_v50 }
  0xee   :  { %4630 = vmatpush3.bf16.msra.mxu1 %v4918_v51  ;;  %4603 = vmatprep.subr.bf16.mxu0 %v4919_v52  ;;  %v4947_v51 = vld [vmem:[%s6149_s1 + $0x758] sm:$0xff]  }
  0xef   :  { %4631 = vmatprep.subr.bf16.mxu1 %v4920_v54  ;;  %v4948_v52 = vld [vmem:[%s6149_s1 + $0x7d8] sm:$0xff]   ;;  %v4029_v54 = vld [vmem:[%s6148_s0 + $0x1e0] sm:$0xff] }
  0xf1   :  { %4604 = vmatpush3.bf16.msra.mxu0 %v4921_v56 }
  0xf2   :  { %4632 = vmatpush3.bf16.msra.mxu1 %v4922_v58  ;;  %4605 = vmatprep.subr.bf16.mxu0 %v4923_v61  ;;  %v4030_v58 = vld [vmem:[%s6148_s0 + $0x1e8] sm:$0xff]  ;;  %v4949_v61 = vld [vmem:[%s6149_s1 + $0x718] sm:$0xff]  }
  0xf3   :  { %4633 = vmatprep.subr.bf16.mxu1 %v4924_v0  ;;  %v4951_v0 = vld [vmem:[%s6149_s1 + $0x750] sm:$0xff]  }
  0xf5   :  { %4606 = vmatpush3.bf16.msra.mxu0 %v4925_v2 }
  0xf6   :  { %4634 = vmatpush3.bf16.msra.mxu1 %v4926_v5  ;;  %4607 = vmatprep.subr.bf16.mxu0 %v4927_v8  ;;  %v4953_v5 = vld [vmem:[%s6149_s1 + $0x710] sm:$0xff]  }
  0xf7   :  { %4635 = vmatprep.subr.bf16.mxu1 %v4928_v10  ;;  %v4954_v8 = vld [vmem:[%s6149_s1 + $0x790] sm:$0xff]  }
  0xf9   :  { %4608 = vmatpush3.bf16.msra.mxu0 %v4929_v11  ;;  %v4955_v11 = vld [vmem:[%s6149_s1 + $0x748] sm:$0xff]  }
  0xfa   :  { %4636 = vmatpush3.bf16.msra.mxu1 %v4930_v13  ;;  %4649 = vmatprep.subr.bf16.mxu0 %v4931_v22 }
  0xfb   :  { %4677 = vmatprep.subr.bf16.mxu1 %v4932_v23 }
  0xfc   :  { %v4273_v53 = vpop.f32.mrf.mxu0  ;;  %3101 = vmatmul.mubr.bf16.vlgmr.msra.gmra.mxu0 %v4161_v17  ;;  %v4957_v17 = vld [vmem:[%s6149_s1 + $0x708] sm:$0xff]  }
  0xfd   :  { %v4301_v55 = vpop.f32.mrf.mxu1  ;;  %3150 = vmatmul.mubr.bf16.vlgmr.msra.gmra.mxu1 %v4163_v20  ;;  %4650 = vmatpush3.bf16.msra.mxu0 %v4933_v24  ;;  %v4958_v20 = vld [vmem:[%s6149_s1 + $0x788] sm:$0xff]   ;;  %v4960_v24 = vld [vmem:[%s6149_s1 + $0x7c0] sm:$0xff]  }
  0xfe   :  { %v4274_v57 = vpop.f32.mrf.mxu0  ;;  %4678 = vmatpush3.bf16.msra.mxu1 %v4934_v25  ;;  %4651 = vmatprep.subr.bf16.mxu0 %v4935_v26 }
  0xff   :  { %v4275_v59 = vadd.f32 %v4274_v57, %v4273_v53  ;;  %v4302_v60 = vpop.f32.mrf.mxu1  ;;  %4679 = vmatprep.subr.bf16.mxu1 %v4936_v27  ;;  %v4025_v53 = vld [vmem:[%s6148_s0 + $0x1c0] sm:$0xff]  ;;  %v4026_v57 = vld [vmem:[%s6148_s0 + $0x1c8] sm:$0xff] }
 0x100   :  { %v4303_v62 = vadd.f32 %v4302_v60, %v4301_v55  ;;  %v4276_v63 = vpop.f32.mrf.mxu0  ;;  %v4170_v56 = vcombine.high %v4025_v53, %v4029_v54  ;;  %v4172_v60 = vcombine.high %v4026_v57, %v4030_v58  ;;  %v4961_v27 = vld [vmem:[%s6149_s1 + $0x700] sm:$0xff]  }
 0x101   :  { %v4304_v1 = vpop.f32.mrf.mxu1  ;;  %4652 = vmatpush3.bf16.msra.mxu0 %v4937_v28  ;;  %v4962_v28 = vld [vmem:[%s6149_s1 + $0x780] sm:$0xff]  }
 0x102   :  { %v5843_v3 = vadd.f32 %v4303_v62, %v4275_v59  ;;  %v4277_v4 = vpop.f32.mrf.mxu0  ;;  %4680 = vmatpush3.bf16.msra.mxu1 %v4938_v29  ;;  %4653 = vmatprep.subr.bf16.mxu0 %v4939_v31  ;;  %v4169_v59 = vcombine.low %v4025_v53, %v4029_v54  ;;  %v4171_v62 = vcombine.low %v4026_v57, %v4030_v58  ;;  %v4019_v29 = vld [vmem:[%s6148_s0 + $0x190] sm:$0xff] }
 0x103   :  { %v4278_v6 = vadd.f32 %v4277_v4, %v4276_v63  ;;  %v4305_v7 = vpop.f32.mrf.mxu1  ;;  %4681 = vmatprep.subr.bf16.mxu1 %v4940_v33  ;;  %3108 = vmatprep.mubr.bf16.mxu0 %v4170_v56  ;;  %v4950_v63 = vld [vmem:[%s6149_s1 + $0x798] sm:$0xff]   ;;  %v4952_v4 = vld [vmem:[%s6149_s1 + $0x7d0] sm:$0xff]  }
 0x104   :  { %v4306_v9 = vadd.f32 %v4305_v7, %v4304_v1  ;;  %v4279_v30 = vpop.f32.mrf.mxu0  ;;  %3157 = vmatprep.mubr.bf16.mxu1 %v4172_v60  ;;  %3109 = vmatmul.mubr.bf16.gmra.mxu0 %v4169_v59  ;;  %v4024_v33 = vld [vmem:[%s6148_s0 + $0x1b8] sm:$0xff] }
 0x105   :  { %v4307_v32 = vpop.f32.mrf.mxu1  ;;  %4654 = vmatpush3.bf16.msra.mxu0 %v4941_v35  ;;  %3158 = vmatmul.mubr.bf16.gmra.mxu1 %v4171_v62 }
 0x106   :  { %v5857_v12 = vadd.f32 %v4306_v9, %v4278_v6  ;;  %v4280_v34 = vpop.f32.mrf.mxu0  ;;  %4682 = vmatpush3.bf16.msra.mxu1 %v4942_v38  ;;  %4655 = vmatprep.subr.bf16.mxu0 %v4943_v41  ;;  %v4028_v41 = vld [vmem:[%s6148_s0 + $0x1d8] sm:$0xff] }
 0x107   :  { %v4281_v36 = vadd.f32 %v4280_v34, %v4279_v30  ;;  %v4308_v37 = vpop.f32.mrf.mxu1  ;;  %4683 = vmatprep.subr.bf16.mxu1 %v4944_v43 }
 0x108   :  { %v4309_v39 = vadd.f32 %v4308_v37, %v4307_v32  ;;  %v4282_v40 = vpop.f32.mrf.mxu0  ;;  %v4020_v32 = vld [vmem:[%s6148_s0 + $0x198] sm:$0xff] }
 0x109   :  { %v4310_v42 = vpop.f32.mrf.mxu1  ;;  %4656 = vmatpush3.bf16.msra.mxu0 %v4945_v46  ;;  %v4167_v37 = vcombine.low %v4020_v32, %v4024_v33  ;;  %v4168_v38 = vcombine.high %v4020_v32, %v4024_v33 }
 0x10a   :  { %v5916_v44 = vadd.f32 %v4309_v39, %v4281_v36  ;;  %v4283_v45 = vpop.f32.mrf.mxu0  ;;  %4684 = vmatpush3.bf16.msra.mxu1 %v4946_v49  ;;  %4657 = vmatprep.subr.bf16.mxu0 %v4947_v51  ;;  %v4027_v39 = vld [vmem:[%s6148_s0 + $0x1d0] sm:$0xff]  ;;  %v4032_v49 = vld [vmem:[%s6148_s0 + $0x1f8] sm:$0xff] }
 0x10b   :  { %v4284_v47 = vadd.f32 %v4283_v45, %v4282_v40  ;;  %v4311_v48 = vpop.f32.mrf.mxu1  ;;  %4685 = vmatprep.subr.bf16.mxu1 %v4948_v52  ;;  %v4031_v40 = vld [vmem:[%s6148_s0 + $0x1f0] sm:$0xff]  ;;  %3247 = vmatprep.mubr.bf16.mxu1 %v4168_v38 }
 0x10c   :  { %v4312_v50 = vadd.f32 %v4311_v48, %v4310_v42  ;;  %v4174_v48 = vcombine.high %v4027_v39, %v4031_v40 }
 0x10d   :  { %4658 = vmatpush3.bf16.msra.mxu0 %v4949_v61  ;;  %v4173_v61 = vcombine.low %v4027_v39, %v4031_v40 }
 0x10e   :  { %v5936_v55 = vadd.f32 %v4312_v50, %v4284_v47  ;;  %4686 = vmatpush3.bf16.msra.mxu1 %v4950_v63  ;;  %4659 = vmatprep.subr.bf16.mxu0 %v4951_v0  ;;  %v4176_v50 = vcombine.high %v4028_v41, %v4032_v49  ;;  %v4175_v63 = vcombine.low %v4028_v41, %v4032_v49 }
 0x10f   :  { %4687 = vmatprep.subr.bf16.mxu1 %v4952_v4 }
 0x111   :  { %4660 = vmatpush3.bf16.msra.mxu0 %v4953_v5 }
 0x112   :  { %4688 = vmatpush3.bf16.msra.mxu1 %v4954_v8  ;;  %4661 = vmatprep.subr.bf16.mxu0 %v4955_v11 }
 0x113   :  { %4689 = vmatprep.subr.bf16.mxu1 %v4956_v15 }
 0x115   :  { %4662 = vmatpush3.bf16.msra.mxu0 %v4957_v17 }
 0x116   :  { %4690 = vmatpush3.bf16.msra.mxu1 %v4958_v20 }
 0x117   :  { %4691 = vmatprep.subr.bf16.mxu1 %v4960_v24 }
 0x11a   :  { %4692 = vmatpush3.bf16.msra.mxu1 %v4962_v28 }
 0x11c   :  { %v4329_v1 = vpop.f32.mrf.mxu0 }
 0x11d   :  { %v4357_v2 = vpop.f32.mrf.mxu1  ;;  %3248 = vmatmul.mubr.bf16.vlgmr.msra.gmra.mxu1 %v4167_v37 }
 0x11e   :  { %v4330_v6 = vpop.f32.mrf.mxu0  ;;  %3255 = vmatprep.mubr.bf16.mxu1 %v4176_v50 }
 0x11f   :  { %v4358_v7 = vpop.f32.mrf.mxu1  ;;  %v4331_v9 = vadd.f32 %v4330_v6, %v4329_v1 }
 0x120   :  { %v4359_v10 = vadd.f32 %v4358_v7, %v4357_v2  ;;  %v4332_v13 = vpop.f32.mrf.mxu0 }
 0x121   :  { %v4360_v14 = vpop.f32.mrf.mxu1  ;;  %v783_v16 = vadd.f32 %v4331_v9, %v5843_v3  ;;  %v4959_v3 = vld [vmem:[%s6149_s1 + $0x740] sm:$0xff]  }
 0x122   :  { %v4333_v18 = vpop.f32.mrf.mxu0  ;;  %4663 = vmatprep.subr.bf16.mxu0 %v4959_v3 }
 0x123   :  { %v4361_v19 = vpop.f32.mrf.mxu1  ;;  %v5975_v21 = vadd.f32 %v4359_v10, %v783_v16  ;;  %v4334_v22 = vadd.f32 %v4333_v18, %v4332_v13  ;;  %4664 = vmatpush3.bf16.msra.mxu0 %v4961_v27 }
 0x124   :  { %v4362_v23 = vadd.f32 %v4361_v19, %v4360_v14  ;;  %v4335_v26 = vpop.f32.mrf.mxu0 }
 0x125   :  { %v786_v25 = vadd.f32 %v4334_v22, %v5857_v12  ;;  %v4023_v12 = vld [vmem:[%s6148_s0 + $0x1b0] sm:$0xff]  ;;  %v4363_v42 = vpop.f32.mrf.mxu1  ;;  %v3275_v45 = vmul.f32 %v5975_v21, %v5975_v21  ;;  %3256 = vmatmul.mubr.bf16.gmra.mxu1 %v4175_v63 }
 0x126   :  { %v4336_v31 = vpop.f32.mrf.mxu0  ;;  %v4165_v35 = vcombine.low %v4019_v29, %v4023_v12  ;;  %v4166_v36 = vcombine.high %v4019_v29, %v4023_v12 }
 0x127   :  { %v5993_v30 = vadd.f32 %v4362_v23, %v786_v25  ;;  %v4337_v34 = vadd.f32 %v4336_v31, %v4335_v26  ;;  %v4364_v52 = vpop.f32.mrf.mxu1 }
 0x128   :  { %v4338_v43 = vpop.f32.mrf.mxu0  ;;  %3198 = vmatprep.mubr.bf16.mxu0 %v4166_v36  ;;  %v4365_v56 = vadd.f32 %v4364_v52, %v4363_v42 }
 0x129   :  { %v3266_v46 = vadd.f32 %v5993_v30, %v5975_v21  ;;  %v3276_v47 = vmul.f32 %v5993_v30, %v5993_v30  ;;  %v791_v51 = vadd.f32 %v4337_v34, %v5916_v44  ;;  %3199 = vmatmul.mubr.bf16.vlgmr.msra.gmra.mxu0 %v4165_v35  ;;  %v4366_v58 = vpop.f32.mrf.mxu1 }
 0x12a   :  { %v4339_v53 = vpop.f32.mrf.mxu0  ;;  %3206 = vmatprep.mubr.bf16.mxu0 %v4174_v48 }
 0x12b   :  { %v3279_v54 = vadd.f32 %v3276_v47, %v3275_v45  ;;  %v4340_v57 = vadd.f32 %v4339_v53, %v4338_v43  ;;  %v6023_v59 = vadd.f32 %v4365_v56, %v791_v51  ;;  %v4367_v62 = vpop.f32.mrf.mxu1 }
 0x12c   :  { %v4368_v1 = vadd.f32 %v4367_v62, %v4366_v58 }
 0x12d   :  { %v794_v60 = vadd.f32 %v4340_v57, %v5936_v55  ;;  %v3267_v0 = vadd.f32 %v3266_v46, %v6023_v59  ;;  %v3277_v44 = vmul.f32 %v6023_v59, %v6023_v59 }
 0x12f   :  { %v3280_v2 = vadd.f32 %v3279_v54, %v3277_v44  ;;  %v6029_v4 = vadd.f32 %v4368_v1, %v794_v60 }
 0x131   :  { %3207 = vmatmul.mubr.bf16.gmra.mxu0 %v4173_v61  ;;  %v6032_v5 = vadd.f32 %v3267_v0, %v6029_v4  ;;  %v3278_v55 = vmul.f32 %v6029_v4, %v6029_v4 }
 0x133   :  { %v6036_v6 = vadd.f32 %v3280_v2, %v3278_v55  ;;  %v3269_v2 = vrot.slane %v6032_v5, 4 }
 0x13c   :  { %v4385_v7 = vpop.f32.mrf.mxu0 }
 0x13d   :  { %v4413_v8 = vpop.f32.mrf.mxu1 }
 0x13e   :  { %v4386_v9 = vpop.f32.mrf.mxu0 }
 0x13f   :  { %v4387_v10 = vadd.f32 %v4386_v9, %v4385_v7  ;;  %v4414_v11 = vpop.f32.mrf.mxu1  ;;  %v3282_v9 = vrot.slane %v6036_v6, 4 }
 0x140   :  { %v4415_v13 = vadd.f32 %v4414_v11, %v4413_v8  ;;  %v4388_v14 = vpop.f32.mrf.mxu0 }
 0x141   :  { %v4416_v15 = vpop.f32.mrf.mxu1 }
 0x142   :  { %v1540_v16 = vadd.f32 %v4415_v13, %v4387_v10  ;;  %v4389_v17 = vpop.f32.mrf.mxu0 }
 0x143   :  { %v4390_v18 = vadd.f32 %v4389_v17, %v4388_v14  ;;  %v4417_v19 = vpop.f32.mrf.mxu1  ;;  %v3270_v14 = vadd.f32 %v3269_v2, %v6032_v5 }
 0x144   :  { %v4418_v20 = vadd.f32 %v4417_v19, %v4416_v15  ;;  %v4391_v23 = vpop.f32.mrf.mxu0 }
 0x145   :  { %v4419_v3 = vpop.f32.mrf.mxu1 }
 0x146   :  { %v1543_v22 = vadd.f32 %v4418_v20, %v4390_v18  ;;  %v4392_v24 = vpop.f32.mrf.mxu0  ;;  %v3283_v18 = vadd.f32 %v3282_v9, %v6036_v6 }
 0x147   :  { %v4420_v25 = vpop.f32.mrf.mxu1  ;;  %v4393_v26 = vadd.f32 %v4392_v24, %v4391_v23 }
 0x148   :  { %v4421_v27 = vadd.f32 %v4420_v25, %v4419_v3  ;;  %v4394_v28 = vpop.f32.mrf.mxu0  ;;  %v3284_v24 = vrot.slane %v3283_v18, 2 }
 0x149   :  { %v4422_v29 = vpop.f32.mrf.mxu1 }
 0x14a   :  { %v1548_v31 = vadd.f32 %v4421_v27, %v4393_v26  ;;  %v4395_v12 = vpop.f32.mrf.mxu0 }
 0x14b   :  { %v4423_v32 = vpop.f32.mrf.mxu1  ;;  %v4396_v33 = vadd.f32 %v4395_v12, %v4394_v28 }
 0x14c   :  { %v4424_v34 = vadd.f32 %v4423_v32, %v4422_v29  ;;  %v3285_v29 = vadd.f32 %v3284_v24, %v3283_v18 }
 0x14e   :  { %v1551_v35 = vadd.f32 %v4424_v34, %v4396_v33  ;;  %v3286_v34 = vrot.slane %v3285_v29, 1 }
 0x15c   :  { %v4441_v36 = vpop.f32.mrf.mxu0 }
 0x15d   :  { %v4469_v37 = vpop.f32.mrf.mxu1 }
 0x15e   :  { %v4442_v38 = vpop.f32.mrf.mxu0 }
 0x15f   :  { %v4443_v39 = vadd.f32 %v4442_v38, %v4441_v36  ;;  %v4470_v40 = vpop.f32.mrf.mxu1 }
 0x160   :  { %v4471_v41 = vadd.f32 %v4470_v40, %v4469_v37  ;;  %v4444_v42 = vpop.f32.mrf.mxu0  ;;  %v3287_v40 = vadd.f32 %v3286_v34, %v3285_v29 }
 0x161   :  { %v1589_v43 = vadd.f32 %v4443_v39, %v1540_v16  ;;  %v4472_v45 = vpop.f32.mrf.mxu1 }
 0x162   :  { %v4445_v46 = vpop.f32.mrf.mxu0 }
 0x163   :  { %v6038_v47 = vadd.f32 %v4471_v41, %v1589_v43  ;;  %v4446_v48 = vadd.f32 %v4445_v46, %v4444_v42  ;;  %v4473_v49 = vpop.f32.mrf.mxu1 }
 0x164   :  { %v4474_v50 = vadd.f32 %v4473_v49, %v4472_v45  ;;  %v4447_v52 = vpop.f32.mrf.mxu0 }
 0x165   :  { %6157 = vst [vmem:[#allocation8_spill] sm:$0xff] %v6038_v47  ;;  %v1592_v51 = vadd.f32 %v4446_v48, %v1543_v22  ;;  %v3298_v57 = vmul.f32 %v6038_v47, %v6038_v47  ;;  %v4475_v61 = vpop.f32.mrf.mxu1  ;;  %v3271_v22 = vrot.slane %v3270_v14, 2 }
 0x166   :  { %v4448_v54 = vpop.f32.mrf.mxu0 }
 0x167   :  { %v6040_v53 = vadd.f32 %v4474_v50, %v1592_v51  ;;  %v4449_v56 = vadd.f32 %v4448_v54, %v4447_v52  ;;  %v4476_v44 = vpop.f32.mrf.mxu1  ;;  %v3272_v26 = vadd.f32 %v3271_v22, %v3270_v14 }
 0x168   :  { %v4450_v62 = vpop.f32.mrf.mxu0  ;;  %v4477_v55 = vadd.f32 %v4476_v44, %v4475_v61 }
 0x169   :  { %6158 = vst [vmem:[#allocation9_spill] sm:$0xff] %v6040_v53  ;;  %v3288_v58 = vadd.f32 %v6040_v53, %v6038_v47  ;;  %v3299_v60 = vmul.f32 %v6040_v53, %v6040_v53  ;;  %v1597_v63 = vadd.f32 %v4449_v56, %v1548_v31  ;;  %v4478_v8 = vpop.f32.mrf.mxu1  ;;  %v3273_v32 = vrot.slane %v3272_v26, 1 }
 0x16a   :  { %v4451_v1 = vpop.f32.mrf.mxu0 }
 0x16b   :  { %v3302_v0 = vadd.f32 %v3299_v60, %v3298_v57  ;;  %v4452_v7 = vadd.f32 %v4451_v1, %v4450_v62  ;;  %v6050_v10 = vadd.f32 %v4477_v55, %v1597_v63  ;;  %v4479_v13 = vpop.f32.mrf.mxu1  ;;  %v3274_v37 = vadd.f32 %v3273_v32, %v3272_v26 }
 0x16c   :  { %v4480_v17 = vadd.f32 %v4479_v13, %v4478_v8 }
 0x16d   :  { %6159 = vst [vmem:[#allocation10_spill] sm:$0xff] %v6050_v10  ;;  %v1600_v11 = vadd.f32 %v4452_v7, %v1551_v35  ;;  %v3289_v15 = vadd.f32 %v3288_v58, %v6050_v10  ;;  %v3300_v16 = vmul.f32 %v6050_v10, %v6050_v10 }
 0x16f   :  { %v3303_v19 = vadd.f32 %v3302_v0, %v3300_v16  ;;  %v6057_v20 = vadd.f32 %v4480_v17, %v1600_v11 }
 0x171   :  { %6160 = vst [vmem:[#allocation11_spill] sm:$0xff] %v6057_v20  ;;  %v3290_v23 = vadd.f32 %v3289_v15, %v6057_v20  ;;  %v3301_v3 = vmul.f32 %v6057_v20, %v6057_v20 }
 0x173   :  { %v3291_v25 = vrot.slane %v3290_v23, 4  ;;  %v3304_v5 = vadd.f32 %v3303_v19, %v3301_v3 }
 0x175   :  { %v3292_v27 = vadd.f32 %v3291_v25, %v3290_v23  ;;  %v3305_v28 = vrot.slane %v3304_v5, 4 }
 0x177   :  { %v3293_v31 = vrot.slane %v3292_v27, 2  ;;  %v3306_v12 = vadd.f32 %v3305_v28, %v3304_v5 }
 0x179   :  { %v3294_v6 = vadd.f32 %v3293_v31, %v3292_v27  ;;  %v3307_v33 = vrot.slane %v3306_v12, 2 }
 0x17b   :  { %v3295_v35 = vrot.slane %v3294_v6, 1  ;;  %v3308_v36 = vadd.f32 %v3307_v33, %v3306_v12 }
 0x17c   :  { %v4497_v45 = vpop.f32.mrf.mxu0 }
 0x17d   :  { %v3296_v38 = vadd.f32 %v3295_v35, %v3294_v6  ;;  %v3309_v39 = vrot.slane %v3308_v36, 1  ;;  %v4525_v46 = vpop.f32.mrf.mxu1 }
 0x17e   :  { %v4498_v48 = vpop.f32.mrf.mxu0 }
 0x17f   :  { %v6062_v41 = vadd.f32 %v3296_v38, %v3274_v37  ;;  %v3310_v42 = vadd.f32 %v3309_v39, %v3308_v36  ;;  %v4526_v49 = vpop.f32.mrf.mxu1  ;;  %v4499_v12 = vadd.f32 %v4498_v48, %v4497_v45 }
 0x180   :  { %v4500_v50 = vpop.f32.mrf.mxu0  ;;  %v4527_v32 = vadd.f32 %v4526_v49, %v4525_v46 }
 0x181   :  { %v6064_v43 = vadd.f32 %v3310_v42, %v3287_v40  ;;  %v4528_v51 = vpop.f32.mrf.mxu1 }
 0x182   :  { %v4501_v52 = vpop.f32.mrf.mxu0  ;;  %v2346_v20 = vadd.f32 %v4527_v32, %v4499_v12 }
 0x183   :  { %v4529_v54 = vpop.f32.mrf.mxu1  ;;  %v4502_v27 = vadd.f32 %v4501_v52, %v4500_v50 }
 0x184   :  { %v4503_v56 = vpop.f32.mrf.mxu0  ;;  %v4530_v28 = vadd.f32 %v4529_v54, %v4528_v51 }
 0x185   :  { %v4531_v57 = vpop.f32.mrf.mxu1 }
 0x186   :  { %v4504_v58 = vpop.f32.mrf.mxu0  ;;  %v2349_v37 = vadd.f32 %v4530_v28, %v4502_v27 }
 0x187   :  { %v4532_v60 = vpop.f32.mrf.mxu1  ;;  %v4505_v33 = vadd.f32 %v4504_v58, %v4503_v56 }
 0x188   :  { %v4506_v61 = vpop.f32.mrf.mxu0  ;;  %v4533_v34 = vadd.f32 %v4532_v60, %v4531_v57 }
 0x189   :  { %v4534_v62 = vpop.f32.mrf.mxu1 }
 0x18a   :  { %v4507_v63 = vpop.f32.mrf.mxu0  ;;  %v2354_v53 = vadd.f32 %v4533_v34, %v4505_v33 }
 0x18b   :  { %v4535_v0 = vpop.f32.mrf.mxu1  ;;  %v4508_v39 = vadd.f32 %v4507_v63, %v4506_v61 }
 0x18c   :  { %v4536_v40 = vadd.f32 %v4535_v0, %v4534_v62 }
 0x18e   :  { %v2357_v46 = vadd.f32 %v4536_v40, %v4508_v39 }
 0x19c   :  { %v4553_v44 = vpop.f32.mrf.mxu0 }
 0x19d   :  { %v4581_v1 = vpop.f32.mrf.mxu1 }
 0x19e   :  { %v4554_v2 = vpop.f32.mrf.mxu0 }
 0x19f   :  { %v4582_v55 = vpop.f32.mrf.mxu1  ;;  %v4555_v38 = vadd.f32 %v4554_v2, %v4553_v44 }
 0x1a0   :  { %v4556_v7 = vpop.f32.mrf.mxu0  ;;  %v4583_v54 = vadd.f32 %v4582_v55, %v4581_v1 }
 0x1a1   :  { %v4584_v8 = vpop.f32.mrf.mxu1  ;;  %v2395_v52 = vadd.f32 %v4555_v38, %v2346_v20 }
 0x1a2   :  { %v4557_v9 = vpop.f32.mrf.mxu0 }
 0x1a3   :  { %v4585_v11 = vpop.f32.mrf.mxu1  ;;  %v4558_v6 = vadd.f32 %v4557_v9, %v4556_v7  ;;  %v6068_v62 = vadd.f32 %v4583_v54, %v2395_v52 }
 0x1a4   :  { %v4559_v13 = vpop.f32.mrf.mxu0  ;;  %v4586_v45 = vadd.f32 %v4585_v11, %v4584_v8 }
 0x1a5   :  { %v4587_v14 = vpop.f32.mrf.mxu1  ;;  %v2398_v10 = vadd.f32 %v4558_v6, %v2349_v37 }
 0x1a6   :  { %v4560_v15 = vpop.f32.mrf.mxu0 }
 0x1a7   :  { %v4588_v16 = vpop.f32.mrf.mxu1  ;;  %v4561_v42 = vadd.f32 %v4560_v15, %v4559_v13  ;;  %v6066_v56 = vadd.f32 %v4586_v45, %v2398_v10 }
 0x1a8   :  { %v4562_v17 = vpop.f32.mrf.mxu0  ;;  %v4589_v49 = vadd.f32 %v4588_v16, %v4587_v14 }
 0x1a9   :  { %v4590_v18 = vpop.f32.mrf.mxu1  ;;  %v2403_v48 = vadd.f32 %v4561_v42, %v2354_v53  ;;  %v3323_v0 = vmul.f32 %v6066_v56, %v6066_v56  ;;  %v3322_v53 = vmul.f32 %v6068_v62, %v6068_v62 }
 0x1aa   :  { %v4563_v19 = vpop.f32.mrf.mxu0 }
 0x1ab   :  { %v4591_v22 = vpop.f32.mrf.mxu1  ;;  %v4564_v47 = vadd.f32 %v4563_v19, %v4562_v17  ;;  %v6070_v63 = vadd.f32 %v4589_v49, %v2403_v48  ;;  %v3326_v7 = vadd.f32 %v3323_v0, %v3322_v53 }
 0x1ac   :  { %v4592_v58 = vadd.f32 %v4591_v22, %v4590_v18 }
 0x1ad   :  { %v2406_v57 = vadd.f32 %v4564_v47, %v2357_v46  ;;  %v3312_v47 = vadd.f32 %v6066_v56, %v6068_v62  ;;  %v3324_v10 = vmul.f32 %v6070_v63, %v6070_v63 }
 0x1af   :  { %v6074_v44 = vadd.f32 %v4592_v58, %v2406_v57  ;;  %v3313_v8 = vadd.f32 %v3312_v47, %v6070_v63  ;;  %v3327_v18 = vadd.f32 %v3326_v7, %v3324_v10 }
 0x1b1   :  { %v3325_v9 = vmul.f32 %v6074_v44, %v6074_v44  ;;  %v3314_v19 = vadd.f32 %v3313_v8, %v6074_v44 }
 0x1b3   :  { %v3328_v12 = vadd.f32 %v3327_v18, %v3325_v9 }
 0x1bc   :  { %v4609_v23 = vpop.f32.mrf.mxu0 }
 0x1bd   :  { %v4637_v3 = vpop.f32.mrf.mxu1 }
 0x1be   :  { %v4610_v24 = vpop.f32.mrf.mxu0 }
 0x1bf   :  { %v4638_v25 = vpop.f32.mrf.mxu1  ;;  %v4611_v11 = vadd.f32 %v4610_v24, %v4609_v23  ;;  %v3315_v23 = vrot.slane %v3314_v19, 4 }
 0x1c0   :  { %v4612_v5 = vpop.f32.mrf.mxu0  ;;  %v4639_v13 = vadd.f32 %v4638_v25, %v4637_v3 }
 0x1c1   :  { %v4640_v26 = vpop.f32.mrf.mxu1 }
 0x1c2   :  { %v4613_v29 = vpop.f32.mrf.mxu0  ;;  %v3152_v32 = vadd.f32 %v4639_v13, %v4611_v11 }
 0x1c3   :  { %v4641_v31 = vpop.f32.mrf.mxu1  ;;  %v4614_v16 = vadd.f32 %v4613_v29, %v4612_v5  ;;  %v3329_v29 = vrot.slane %v3328_v12, 4 }
 0x1c4   :  { %v4615_v35 = vpop.f32.mrf.mxu0  ;;  %v4642_v17 = vadd.f32 %v4641_v31, %v4640_v26 }
 0x1c5   :  { %v4643_v36 = vpop.f32.mrf.mxu1  ;;  %v3330_v58 = vadd.f32 %v3329_v29, %v3328_v12 }
 0x1c6   :  { %v4616_v50 = vpop.f32.mrf.mxu0  ;;  %v3155_v38 = vadd.f32 %v4642_v17, %v4614_v16 }
 0x1c7   :  { %v4644_v51 = vpop.f32.mrf.mxu1  ;;  %v4617_v6 = vadd.f32 %v4616_v50, %v4615_v35  ;;  %v3331_v9 = vrot.slane %v3330_v58, 2 }
 0x1c8   :  { %v4618_v60 = vpop.f32.mrf.mxu0  ;;  %v4645_v33 = vadd.f32 %v4644_v51, %v4643_v36  ;;  %v3316_v36 = vadd.f32 %v3315_v23, %v3314_v19 }
 0x1c9   :  { %v4646_v61 = vpop.f32.mrf.mxu1  ;;  %v3332_v19 = vadd.f32 %v3331_v9, %v3330_v58  ;;  %v6163_v9 = vld [vmem:[#allocation10_spill] sm:$0xff] }
 0x1ca   :  { %v4619_v20 = vpop.f32.mrf.mxu0  ;;  %v3160_v31 = vadd.f32 %v4645_v33, %v4617_v6 }
 0x1cb   :  { %v4647_v1 = vpop.f32.mrf.mxu1  ;;  %v4620_v54 = vadd.f32 %v4619_v20, %v4618_v60  ;;  %v3333_v6 = vrot.slane %v3332_v19, 1 }
 0x1cc   :  { %v4648_v45 = vadd.f32 %v4647_v1, %v4646_v61  ;;  %v3317_v61 = vrot.slane %v3316_v36, 2 }
 0x1cd   :  { %v3334_v23 = vadd.f32 %v3333_v6, %v3332_v19 }
 0x1ce   :  { %v3163_v47 = vadd.f32 %v4648_v45, %v4620_v54 }
 0x1cf   :  { %v3335_v29 = vadd.f32 %v3334_v23, %v6064_v43 }
 0x1dd   :  { %v4693_v55 = vpop.f32.mrf.mxu1 }
 0x1df   :  { %v4694_v15 = vpop.f32.mrf.mxu1 }
 0x1e0   :  { %v4695_v40 = vadd.f32 %v4694_v15, %v4693_v55  ;;  %v3318_v15 = vadd.f32 %v3317_v61, %v3316_v36 }
 0x1e1   :  { %v4696_v28 = vpop.f32.mrf.mxu1 }
 0x1e3   :  { %v4697_v37 = vpop.f32.mrf.mxu1 }
 0x1e4   :  { %v4698_v26 = vadd.f32 %v4697_v37, %v4696_v28  ;;  %v3319_v28 = vrot.slane %v3318_v15, 1 }
 0x1e5   :  { %v4699_v25 = vpop.f32.mrf.mxu1 }
 0x1e6   :  { %v3320_v37 = vadd.f32 %v3319_v28, %v3318_v15  ;;  %v6164_v15 = vld [vmem:[#allocation11_spill] sm:$0xff] }
 0x1e7   :  { %v4700_v52 = vpop.f32.mrf.mxu1 }
 0x1e8   :  { %v4701_v57 = vadd.f32 %v4700_v52, %v4699_v25  ;;  %v3321_v25 = vadd.f32 %v3320_v37, %v6062_v41  ;;  %v3265_v41 = vld [vmem:[#allocation4] sm:$0x1] }
 0x1e9   :  { %v4665_v2 = vpop.f32.mrf.mxu0  ;;  %v4702_v48 = vpop.f32.mrf.mxu1 }
 0x1eb   :  { %v4666_v14 = vpop.f32.mrf.mxu0  ;;  %v4703_v53 = vpop.f32.mrf.mxu1 }
 0x1ec   :  { %v4667_v22 = vadd.f32 %v4666_v14, %v4665_v2  ;;  %v4704_v8 = vadd.f32 %v4703_v53, %v4702_v48 }
 0x1ed   :  { %v4668_v27 = vpop.f32.mrf.mxu0 }
 0x1ee   :  { %v3201_v3 = vadd.f32 %v4667_v22, %v3152_v32 }
 0x1ef   :  { %v4669_v34 = vpop.f32.mrf.mxu0 }
 0x1f0   :  { %v4670_v39 = vadd.f32 %v4669_v34, %v4668_v27  ;;  %v6088_v50 = vadd.f32 %v4695_v40, %v3201_v3 }
 0x1f1   :  { %v4671_v24 = vpop.f32.mrf.mxu0 }
 0x1f2   :  { %v3204_v5 = vadd.f32 %v4670_v39, %v3155_v38  ;;  %v3346_v20 = vmul.f32 %v6088_v50, %v6088_v50 }
 0x1f3   :  { %v4672_v42 = vpop.f32.mrf.mxu0 }
 0x1f4   :  { %v6086_v46 = vadd.f32 %v4698_v26, %v3204_v5  ;;  %v4673_v35 = vadd.f32 %v4672_v42, %v4671_v24 }
 0x1f5   :  { %v4674_v51 = vpop.f32.mrf.mxu0 }
 0x1f6   :  { %v3209_v49 = vadd.f32 %v4673_v35, %v3160_v31  ;;  %v3347_v10 = vmul.f32 %v6086_v46, %v6086_v46  ;;  %v3336_v1 = vadd.f32 %v6086_v46, %v6088_v50 }
 0x1f7   :  { %v4675_v0 = vpop.f32.mrf.mxu0 }
 0x1f8   :  { %v6092_v2 = vadd.f32 %v4701_v57, %v3209_v49  ;;  %v4676_v60 = vadd.f32 %v4675_v0, %v4674_v51  ;;  %v3350_v11 = vadd.f32 %v3347_v10, %v3346_v20  ;;  %v3369_v51 = vlaneseq  ;;  %v3264_v49 = vld [vmem:[#allocation2] sm:$0x1] }
 0x1fa   :  { %v3348_v55 = vmul.f32 %v6092_v2, %v6092_v2  ;;  %v3212_v7 = vadd.f32 %v4676_v60, %v3163_v47  ;;  %v3337_v13 = vadd.f32 %v3336_v1, %v6092_v2  ;;  %v3370_v48 = vshrl.u32 %v3369_v51, 7  ;;  %v6161_v1 = vld [vmem:[#allocation8_spill] sm:$0xff] }
 0x1fc   :  { %v6101_v14 = vadd.f32 %v4704_v8, %v3212_v7  ;;  %v3351_v16 = vadd.f32 %v3350_v11, %v3348_v55  ;;  %v3371_v57 = vsub.s32 0, %v3370_v48  ;;  %v6162_v7 = vld [vmem:[#allocation9_spill] sm:$0xff] }
 0x1fe   :  { %v3338_v17 = vadd.f32 %v3337_v13, %v6101_v14  ;;  %v3349_v18 = vmul.f32 %v6101_v14, %v6101_v14 }
 0x200   :  { %v3339_v22 = vrot.slane %v3338_v17, 4  ;;  %v3352_v27 = vadd.f32 %v3351_v16, %v3349_v18 }
 0x202   :  { %v3340_v12 = vadd.f32 %v3339_v22, %v3338_v17  ;;  %v3353_v32 = vrot.slane %v3352_v27, 4 }
 0x204   :  { %v3341_v33 = vrot.slane %v3340_v12, 2  ;;  %v3354_v34 = vadd.f32 %v3353_v32, %v3352_v27 }
 0x206   :  { %v3342_v38 = vadd.f32 %v3341_v33, %v3340_v12  ;;  %v3355_v39 = vrot.slane %v3354_v34, 2 }
 0x208   :  { %v3343_v3 = vrot.slane %v3342_v38, 1  ;;  %v3356_v24 = vadd.f32 %v3355_v39, %v3354_v34 }
 0x20a   :  { %v3344_v5 = vadd.f32 %v3343_v3, %v3342_v38  ;;  %v3357_v26 = vrot.slane %v3356_v24, 1 }
 0x20c   :  { %v3345_v31 = vadd.f32 %v3344_v5, %v3321_v25  ;;  %v3358_v40 = vadd.f32 %v3357_v26, %v3356_v24 }
 0x20e   :  { %v3359_v42 = vadd.f32 %v3358_v40, %v3335_v29  ;;  %v3360_v52 = vmul.f32 0.0078125, %v3345_v31 }
 0x210   :  { %v3361_v54 = vmul.f32 0.0078125, %v3359_v42  ;;  %v3362_v45 = vmul.f32 %v3360_v52, %v3360_v52 }
 0x212   :  { %v3363_v35 = vsub.f32 %v3361_v54, %v3362_v45 }
 0x214   :  { %v3364_v36 = vadd.f32 1e-05, %v3363_v35 }
 0x216   :  { %4963 = vrsqrt.f32 %v3364_v36 }
 0x223   :  { %v4964_v58 = vpop.eup %4963 }
 0x224   :  { %v3366_v0 = vmul.f32 %v4964_v58, %v3264_v49 }
 0x226   :  { %v3367_v53 = vmul.f32 %v3366_v0, %v3360_v52  ;;  %v3372_v47 = vrot.slane %v3366_v0, %v3371_v57 }
 0x228   :  { %v3368_v10 = vsub.f32 %v3265_v41, %v3367_v53  ;;  %v3373_v43 = vmul.f32 %v3372_v47, %v5975_v21  ;;  %v3374_v60 = vmul.f32 %v3372_v47, %v5993_v30  ;;  %v3375_v61 = vmul.f32 %v3372_v47, %v6023_v59 }
 0x229   :  { %v3376_v20 = vmul.f32 %v3372_v47, %v6029_v4  ;;  %v3391_v55 = vmul.f32 %v3372_v47, %v6161_v1  ;;  %v3392_v8 = vmul.f32 %v3372_v47, %v6162_v7  ;;  %v3393_v11 = vmul.f32 %v3372_v47, %v6163_v9 }
 0x22a   :  { %v3381_v13 = vrot.slane %v3368_v10, %v3371_v57  ;;  %v3394_v16 = vmul.f32 %v3372_v47, %v6164_v15  ;;  %v3403_v17 = vmul.f32 %v3372_v47, %v6068_v62  ;;  %v3404_v18 = vmul.f32 %v3372_v47, %v6066_v56 }
 0x22b   :  { %v3405_v21 = vmul.f32 %v3372_v47, %v6070_v63  ;;  %v3406_v30 = vmul.f32 %v3372_v47, %v6074_v44  ;;  %v3415_v59 = vmul.f32 %v3372_v47, %v6088_v50  ;;  %v3416_v4 = vmul.f32 %v3372_v47, %v6086_v46 }
 0x22c   :  { %v3383_v19 = vadd.f32 %v3381_v13, %v3373_v43  ;;  %v3384_v22 = vadd.f32 %v3381_v13, %v3374_v60  ;;  %v3385_v27 = vadd.f32 %v3381_v13, %v3375_v61  ;;  %v3386_v28 = vadd.f32 %v3381_v13, %v3376_v20 }
 0x22d   :  { %v3395_v12 = vadd.f32 %v3391_v55, %v3381_v13  ;;  %v3396_v32 = vadd.f32 %v3392_v8, %v3381_v13  ;;  %v3397_v6 = vadd.f32 %v3393_v11, %v3381_v13  ;;  %v3398_v33 = vadd.f32 %v3394_v16, %v3381_v13 }
 0x22e   :  { %v3387_v34 = vmax.f32 %v3383_v19, 0.0  ;;  %v3388_v62 = vmax.f32 %v3384_v22, 0.0  ;;  %v3389_v37 = vmax.f32 %v3385_v27, 0.0  ;;  %v3390_v56 = vmax.f32 %v3386_v28, 0.0 }
 0x22f   :  { %v3399_v38 = vmax.f32 %v3395_v12, 0.0  ;;  %v3400_v63 = vmax.f32 %v3396_v32, 0.0  ;;  %v3401_v39 = vmax.f32 %v3397_v6, 0.0  ;;  %v3402_v44 = vmax.f32 %v3398_v33, 0.0 }
 0x230   :  { %v3407_v23 = vadd.f32 %v3403_v17, %v3381_v13  ;;  %v3408_v50 = vadd.f32 %v3404_v18, %v3381_v13  ;;  %v3409_v3 = vadd.f32 %v3405_v21, %v3381_v13  ;;  %v3410_v46 = vadd.f32 %v3406_v30, %v3381_v13 }
 0x231   :  { %v3417_v24 = vmul.f32 %v3372_v47, %v6092_v2  ;;  %v3418_v25 = vmul.f32 %v3372_v47, %v6101_v14  ;;  %v3419_v5 = vadd.f32 %v3415_v59, %v3381_v13  ;;  %v3420_v26 = vadd.f32 %v3416_v4, %v3381_v13 }
 0x232   :  { %v3411_v29 = vmax.f32 %v3407_v23, 0.0  ;;  %v3412_v31 = vmax.f32 %v3408_v50, 0.0  ;;  %v3413_v40 = vmax.f32 %v3409_v3, 0.0  ;;  %v3414_v42 = vmax.f32 %v3410_v46, 0.0 }
 0x233   :  { %v3421_v52 = vadd.f32 %v3417_v24, %v3381_v13  ;;  %v3422_v54 = vadd.f32 %v3418_v25, %v3381_v13  ;;  %v3423_v45 = vmax.f32 %v3419_v5, 0.0  ;;  %v3424_v35 = vmax.f32 %v3420_v26, 0.0 }
 0x234   :  { %v4249_v36 = vpack.c.bf16 %v3399_v38, %v3387_v34  ;;  %v4251_v51 = vpack.c.bf16 %v3400_v63, %v3388_v62  ;;  %v4253_v48 = vpack.c.bf16 %v3401_v39, %v3389_v37  ;;  %v4255_v49 = vpack.c.bf16 %v3402_v44, %v3390_v56 }
 0x235   :  { %v3425_v57 = vmax.f32 %v3421_v52, 0.0  ;;  %v3426_v58 = vmax.f32 %v3422_v54, 0.0  ;;  %v4250_v0 = vpack.c.bf16 %v3423_v45, %v3411_v29  ;;  %v4252_v2 = vpack.c.bf16 %v3424_v35, %v3412_v31 }
 0x236   :  { %3475 = vst [vmem:[%s6152_s4] sm:$0xff] %v4249_v36  ;;  %3477 = vst [vmem:[%s6152_s4 + $0x10] sm:$0xff] %v4251_v51 }
 0x237   :  { %3479 = vst [vmem:[%s6152_s4 + $0x20] sm:$0xff] %v4253_v48  ;;  %3481 = vst [vmem:[%s6152_s4 + $0x30] sm:$0xff] %v4255_v49  ;;  %v4254_v14 = vpack.c.bf16 %v3425_v57, %v3413_v40  ;;  %v4256_v41 = vpack.c.bf16 %v3426_v58, %v3414_v42 }
 0x238   :  { %3476 = vst [vmem:[%s6152_s4 + $0x8] sm:$0xff] %v4250_v0  ;;  %3478 = vst [vmem:[%s6152_s4 + $0x18] sm:$0xff] %v4252_v2 }
 0x239   :  { %3480 = vst [vmem:[%s6152_s4 + $0x28] sm:$0xff] %v4254_v14  ;;  %3482 = vst [vmem:[%s6152_s4 + $0x38] sm:$0xff] %v4256_v41 }
 0x23a   :  { %3487 = vsyncpa [#allocation3], 1 }
 0x23b   :  { %3488 = vsyncpa [#allocation5], 1 }

// kernel: decoder_forward.5
= control target key start
LH: loop header
LB: loop body
LE: loop exit
PB: predicated region body
PF: predicated region fallthrough
CT: control target
= control target key end

     0   :  { %vm2597_vm0 = vcmask 523264   ;;  %s7300_s1 = inlined_call_operand.vmem [shape: bf16[4,512,64], index: 1, kind: input, shape index: {}]   ;;  %s7301_s0 = inlined_call_operand.vmem [shape: bf16[4,128,512], index: 0, kind: input, shape index: {}]   ;;  %s7302_s4 = inlined_call_operand.vmem [shape: bf16[64,64], index: 4, kind: input, shape index: {}]   ;;  %s7303_s2 = inlined_call_operand.vmem [shape: f32[1,64], index: 2, kind: input, shape index: {}]   ;;  %s7304_s3 = inlined_call_operand.vmem [shape: f32[1,64], index: 3, kind: input, shape index: {}]   ;;  %s7305_s5 = inlined_call_operand.vmem [shape: f32[128,256], index: 5, kind: output, shape index: {}]  }
   0x1   :  { %v5156_v0 = vld [vmem:[%s7300_s1 + $0x78] sm:$0xff]   ;;  %v5160_v4 = vld [vmem:[%s7300_s1 + $0x70] sm:$0xff]   ;;  %v5164_v8 = vld [vmem:[%s7300_s1 + $0x68] sm:$0xff]  }
   0x2   :  { %v5157_v1 = vld [vmem:[%s7300_s1 + $0xf8] sm:$0xff]   ;;  %4499 = vmatprep.subr.bf16.mxu0 %v5156_v0  ;;  %v5161_v5 = vld [vmem:[%s7300_s1 + $0xf0] sm:$0xff]   ;;  %v5165_v9 = vld [vmem:[%s7300_s1 + $0xe8] sm:$0xff]  }
   0x3   :  { %v5158_v2 = vld [vmem:[%s7300_s1 + $0x38] sm:$0xff]   ;;  %4563 = vmatprep.subr.bf16.mxu1 %v5157_v1  ;;  %v5162_v6 = vld [vmem:[%s7300_s1 + $0x30] sm:$0xff]   ;;  %v5166_v10 = vld [vmem:[%s7300_s1 + $0x28] sm:$0xff]  }
   0x4   :  { %v5159_v3 = vld [vmem:[%s7300_s1 + $0xb8] sm:$0xff]   ;;  %4500 = vmatpush3.bf16.msra.mxu0 %v5158_v2  ;;  %v5163_v7 = vld [vmem:[%s7300_s1 + $0xb0] sm:$0xff]   ;;  %v5167_v11 = vld [vmem:[%s7300_s1 + $0xa8] sm:$0xff]  }
   0x5   :  { %4564 = vmatpush3.bf16.msra.mxu1 %v5159_v3  ;;  %4501 = vmatprep.subr.bf16.mxu0 %v5160_v4  ;;  %v5168_v12 = vld [vmem:[%s7300_s1 + $0x60] sm:$0xff]   ;;  %v5172_v16 = vld [vmem:[%s7300_s1 + $0x58] sm:$0xff]   ;;  %v5176_v20 = vld [vmem:[%s7300_s1 + $0x50] sm:$0xff]  }
   0x6   :  { %4565 = vmatprep.subr.bf16.mxu1 %v5161_v5  ;;  %v5169_v13 = vld [vmem:[%s7300_s1 + $0xe0] sm:$0xff]   ;;  %v5173_v17 = vld [vmem:[%s7300_s1 + $0xd8] sm:$0xff]   ;;  %v5177_v21 = vld [vmem:[%s7300_s1 + $0xd0] sm:$0xff]  }
   0x7   :  { %v5170_v14 = vld [vmem:[%s7300_s1 + $0x20] sm:$0xff]   ;;  %v5174_v18 = vld [vmem:[%s7300_s1 + $0x18] sm:$0xff]   ;;  %v5178_v22 = vld [vmem:[%s7300_s1 + $0x10] sm:$0xff]  }
   0x8   :  { %4502 = vmatpush3.bf16.msra.mxu0 %v5162_v6  ;;  %v5171_v15 = vld [vmem:[%s7300_s1 + $0xa0] sm:$0xff]   ;;  %v5175_v19 = vld [vmem:[%s7300_s1 + $0x98] sm:$0xff]   ;;  %v5179_v23 = vld [vmem:[%s7300_s1 + $0x90] sm:$0xff]  }
   0x9   :  { %4566 = vmatpush3.bf16.msra.mxu1 %v5163_v7  ;;  %4503 = vmatprep.subr.bf16.mxu0 %v5164_v8  ;;  %v5180_v24 = vld [vmem:[%s7300_s1 + $0x48] sm:$0xff]   ;;  %v5184_v28 = vld [vmem:[%s7300_s1 + $0x40] sm:$0xff]   ;;  %v5194_v36 = vld [vmem:[%s7300_s1 + $0x178] sm:$0xff]  }
   0xa   :  { %4567 = vmatprep.subr.bf16.mxu1 %v5165_v9  ;;  %v5181_v25 = vld [vmem:[%s7300_s1 + $0xc8] sm:$0xff]   ;;  %v5185_v29 = vld [vmem:[%s7300_s1 + $0xc0] sm:$0xff]   ;;  %v5195_v37 = vld [vmem:[%s7300_s1 + $0x1f8] sm:$0xff]  }
   0xb   :  { %v5182_v26 = vld [vmem:[%s7300_s1 + $0x8] sm:$0xff]   ;;  %v5186_v30 = vld [vmem:[%s7300_s1] sm:$0xff]   ;;  %v5196_v38 = vld [vmem:[%s7300_s1 + $0x138] sm:$0xff]  }
   0xc   :  { %4504 = vmatpush3.bf16.msra.mxu0 %v5166_v10  ;;  %v5183_v27 = vld [vmem:[%s7300_s1 + $0x88] sm:$0xff]   ;;  %v5187_v31 = vld [vmem:[%s7300_s1 + $0x80] sm:$0xff]   ;;  %v5197_v39 = vld [vmem:[%s7300_s1 + $0x1b8] sm:$0xff]  }
   0xd   :  { %4568 = vmatpush3.bf16.msra.mxu1 %v5167_v11  ;;  %4505 = vmatprep.subr.bf16.mxu0 %v5168_v12  ;;  %v5188_v32 = vld [vmem:[%s7301_s0] ss:$16 sps:$4 sm:$0xff]   ;;  %v5190_v33 = vld [vmem:[%s7301_s0 + $0x4] ss:$16 sps:$4 sm:$0xff]   ;;  %v5191_v34 = vld [vmem:[%s7301_s0 + $0x8] ss:$16 sps:$4 sm:$0xff]  }
   0xe   :  { %4569 = vmatprep.subr.bf16.mxu1 %v5169_v13  ;;  %v5193_v35 = vld [vmem:[%s7301_s0 + $0xc] ss:$16 sps:$4 sm:$0xff]   ;;  %501 = vmatprep.mubr.bf16.mxu0 %v5190_v33  ;;  %v5198_v40 = vld [vmem:[%s7301_s0 + $0x24] ss:$16 sps:$4 sm:$0xff]   ;;  %v5202_v42 = vld [vmem:[%s7301_s0 + $0x20] ss:$16 sps:$4 sm:$0xff]  }
   0xf   :  { %598 = vmatprep.mubr.bf16.mxu1 %v5193_v35  ;;  %v5200_v41 = vld [vmem:[%s7301_s0 + $0x2c] ss:$16 sps:$4 sm:$0xff]   ;;  %v5203_v43 = vld [vmem:[%s7301_s0 + $0x28] ss:$16 sps:$4 sm:$0xff]   ;;  %v5204_v44 = vld [vmem:[%s7300_s1 + $0x170] sm:$0xff]  }
  0x10   :  { %4506 = vmatpush3.bf16.msra.mxu0 %v5170_v14  ;;  %v5205_v45 = vld [vmem:[%s7300_s1 + $0x1f0] sm:$0xff]   ;;  %v5210_v49 = vld [vmem:[%s7301_s0 + $0x4c] ss:$16 sps:$4 sm:$0xff]   ;;  %v5213_v51 = vld [vmem:[%s7301_s0 + $0x48] ss:$16 sps:$4 sm:$0xff]  }
  0x11   :  { %4570 = vmatpush3.bf16.msra.mxu1 %v5171_v15  ;;  %4507 = vmatprep.subr.bf16.mxu0 %v5172_v16  ;;  %v5206_v46 = vld [vmem:[%s7300_s1 + $0x130] sm:$0xff]   ;;  %v5214_v52 = vld [vmem:[%s7300_s1 + $0x168] sm:$0xff]   ;;  %v5224_v60 = vld [vmem:[%s7300_s1 + $0x160] sm:$0xff]  }
  0x12   :  { %4571 = vmatprep.subr.bf16.mxu1 %v5173_v17  ;;  %v5207_v47 = vld [vmem:[%s7300_s1 + $0x1b0] sm:$0xff]   ;;  %v5215_v53 = vld [vmem:[%s7300_s1 + $0x1e8] sm:$0xff]   ;;  %v5225_v61 = vld [vmem:[%s7300_s1 + $0x1e0] sm:$0xff]  }
  0x13   :  { %v5208_v48 = vld [vmem:[%s7301_s0 + $0x44] ss:$16 sps:$4 sm:$0xff]   ;;  %v5212_v50 = vld [vmem:[%s7301_s0 + $0x40] ss:$16 sps:$4 sm:$0xff]   ;;  %v5216_v54 = vld [vmem:[%s7300_s1 + $0x128] sm:$0xff]  }
  0x14   :  { %4508 = vmatpush3.bf16.msra.mxu0 %v5174_v18  ;;  %v5217_v55 = vld [vmem:[%s7300_s1 + $0x1a8] sm:$0xff]   ;;  %v5218_v56 = vld [vmem:[%s7301_s0 + $0x64] ss:$16 sps:$4 sm:$0xff]   ;;  %v5222_v58 = vld [vmem:[%s7301_s0 + $0x60] ss:$16 sps:$4 sm:$0xff]  }
  0x15   :  { %4572 = vmatpush3.bf16.msra.mxu1 %v5175_v19  ;;  %4509 = vmatprep.subr.bf16.mxu0 %v5176_v20  ;;  %v5220_v57 = vld [vmem:[%s7301_s0 + $0x6c] ss:$16 sps:$4 sm:$0xff]   ;;  %v5223_v59 = vld [vmem:[%s7301_s0 + $0x68] ss:$16 sps:$4 sm:$0xff]   ;;  %v5226_v62 = vld [vmem:[%s7300_s1 + $0x120] sm:$0xff]  }
  0x16   :  { %4573 = vmatprep.subr.bf16.mxu1 %v5177_v21  ;;  %v5227_v63 = vld [vmem:[%s7300_s1 + $0x1a0] sm:$0xff]   ;;  %v5230_v1 = vld [vmem:[%s7301_s0 + $0x8c] ss:$16 sps:$4 sm:$0xff]   ;;  %v5233_v4 = vld [vmem:[%s7301_s0 + $0x88] ss:$16 sps:$4 sm:$0xff]  }
  0x17   :  { %v5228_v0 = vld [vmem:[%s7301_s0 + $0x84] ss:$16 sps:$4 sm:$0xff]   ;;  %v5232_v2 = vld [vmem:[%s7301_s0 + $0x80] ss:$16 sps:$4 sm:$0xff]   ;;  %v5234_v3 = vld [vmem:[%s7300_s1 + $0x158] sm:$0xff]  }
  0x18   :  { %4510 = vmatpush3.bf16.msra.mxu0 %v5178_v22  ;;  %v5235_v5 = vld [vmem:[%s7300_s1 + $0x1d8] sm:$0xff]   ;;  %v5238_v8 = vld [vmem:[%s7301_s0 + $0xa4] ss:$16 sps:$4 sm:$0xff]   ;;  %v5242_v12 = vld [vmem:[%s7301_s0 + $0xa0] ss:$16 sps:$4 sm:$0xff]  }
  0x19   :  { %4574 = vmatpush3.bf16.msra.mxu1 %v5179_v23  ;;  %4511 = vmatprep.subr.bf16.mxu0 %v5180_v24  ;;  %v5236_v6 = vld [vmem:[%s7300_s1 + $0x118] sm:$0xff]   ;;  %v5244_v10 = vld [vmem:[%s7300_s1 + $0x150] sm:$0xff]   ;;  %v5254_v18 = vld [vmem:[%s7300_s1 + $0x148] sm:$0xff]  }
  0x1a   :  { %4575 = vmatprep.subr.bf16.mxu1 %v5181_v25  ;;  %v5237_v7 = vld [vmem:[%s7300_s1 + $0x198] sm:$0xff]   ;;  %v5245_v11 = vld [vmem:[%s7300_s1 + $0x1d0] sm:$0xff]   ;;  %v5255_v19 = vld [vmem:[%s7300_s1 + $0x1c8] sm:$0xff]  }
  0x1b   :  { %v5240_v9 = vld [vmem:[%s7301_s0 + $0xac] ss:$16 sps:$4 sm:$0xff]   ;;  %v5246_v13 = vld [vmem:[%s7300_s1 + $0x110] sm:$0xff]   ;;  %v5243_v15 = vld [vmem:[%s7301_s0 + $0xa8] ss:$16 sps:$4 sm:$0xff]  }
  0x1c   :  { %4512 = vmatpush3.bf16.msra.mxu0 %v5182_v26  ;;  %v5247_v14 = vld [vmem:[%s7300_s1 + $0x190] sm:$0xff]   ;;  %v5250_v17 = vld [vmem:[%s7301_s0 + $0xcc] ss:$16 sps:$4 sm:$0xff]   ;;  %v5253_v23 = vld [vmem:[%s7301_s0 + $0xc8] ss:$16 sps:$4 sm:$0xff]  }
  0x1d   :  { %4576 = vmatpush3.bf16.msra.mxu1 %v5183_v27  ;;  %4513 = vmatprep.subr.bf16.mxu0 %v5184_v28  ;;  %v5248_v16 = vld [vmem:[%s7301_s0 + $0xc4] ss:$16 sps:$4 sm:$0xff]   ;;  %v5256_v20 = vld [vmem:[%s7300_s1 + $0x108] sm:$0xff]   ;;  %v5252_v22 = vld [vmem:[%s7301_s0 + $0xc0] ss:$16 sps:$4 sm:$0xff]  }
  0x1e   :  { %4577 = vmatprep.subr.bf16.mxu1 %v5185_v29  ;;  %v5257_v21 = vld [vmem:[%s7300_s1 + $0x188] sm:$0xff]   ;;  %v5258_v24 = vld [vmem:[%s7301_s0 + $0xe4] ss:$16 sps:$4 sm:$0xff]   ;;  %v5274_v33 = vld [vmem:[%s7300_s1 + $0x278] sm:$0xff]  }
  0x1f   :  { %v5260_v25 = vld [vmem:[%s7301_s0 + $0xec] ss:$16 sps:$4 sm:$0xff]   ;;  %v5264_v26 = vld [vmem:[%s7300_s1 + $0x140] sm:$0xff]  }
  0x20   :  { %4514 = vmatpush3.bf16.msra.mxu0 %v5186_v30  ;;  %v5265_v27 = vld [vmem:[%s7300_s1 + $0x1c0] sm:$0xff]   ;;  %v5273_v35 = vld [vmem:[%s7301_s0 + $0x10c] ss:$16 sps:$4 sm:$0xff]  }
  0x21   :  { %4578 = vmatpush3.bf16.msra.mxu1 %v5187_v31  ;;  %4627 = vmatprep.subr.bf16.mxu0 %v5194_v36  ;;  %v5266_v28 = vld [vmem:[%s7300_s1 + $0x100] sm:$0xff]   ;;  %v5263_v31 = vld [vmem:[%s7301_s0 + $0xe8] ss:$16 sps:$4 sm:$0xff]  }
  0x22   :  { %4691 = vmatprep.subr.bf16.mxu1 %v5195_v37  ;;  %v5267_v29 = vld [vmem:[%s7300_s1 + $0x180] sm:$0xff]   ;;  %v5271_v37 = vld [vmem:[%s7301_s0 + $0x108] ss:$16 sps:$4 sm:$0xff]  }
  0x23   :  { %502 = vmatmul.mubr.bf16.vlgmr.msra.gmra.mxu0 %v5188_v32  ;;  %v5262_v30 = vld [vmem:[%s7301_s0 + $0xe0] ss:$16 sps:$4 sm:$0xff]   ;;  %v5270_v32 = vld [vmem:[%s7301_s0 + $0x104] ss:$16 sps:$4 sm:$0xff]  }
  0x24   :  { %599 = vmatmul.mubr.bf16.vlgmr.msra.gmra.mxu1 %v5191_v34  ;;  %4628 = vmatpush3.bf16.msra.mxu0 %v5196_v38  ;;  %v5275_v34 = vld [vmem:[%s7300_s1 + $0x2f8] sm:$0xff]   ;;  %v5268_v36 = vld [vmem:[%s7301_s0 + $0x100] ss:$16 sps:$4 sm:$0xff]  }
  0x25   :  { %4692 = vmatpush3.bf16.msra.mxu1 %v5197_v39  ;;  %509 = vmatprep.mubr.bf16.mxu0 %v5198_v40  ;;  %v5276_v38 = vld [vmem:[%s7300_s1 + $0x238] sm:$0xff]   ;;  %v5278_v40 = vld [vmem:[%s7301_s0 + $0x124] ss:$16 sps:$4 sm:$0xff]  }
  0x26   :  { %606 = vmatprep.mubr.bf16.mxu1 %v5200_v41  ;;  %4629 = vmatprep.subr.bf16.mxu0 %v5204_v44  ;;  %v5277_v39 = vld [vmem:[%s7300_s1 + $0x2b8] sm:$0xff]   ;;  %v5286_v44 = vld [vmem:[%s7300_s1 + $0x230] sm:$0xff]  }
  0x27   :  { %4693 = vmatprep.subr.bf16.mxu1 %v5205_v45  ;;  %v5280_v41 = vld [vmem:[%s7301_s0 + $0x12c] ss:$16 sps:$4 sm:$0xff]   ;;  %v5287_v45 = vld [vmem:[%s7300_s1 + $0x2b0] sm:$0xff]  }
  0x28   :  { %4630 = vmatpush3.bf16.msra.mxu0 %v5206_v46  ;;  %v5282_v46 = vld [vmem:[%s7301_s0 + $0x120] ss:$16 sps:$4 sm:$0xff]  }
  0x29   :  { %4694 = vmatpush3.bf16.msra.mxu1 %v5207_v47  ;;  %4631 = vmatprep.subr.bf16.mxu0 %v5214_v52  ;;  %v5294_v47 = vld [vmem:[%s7300_s1 + $0x268] sm:$0xff]  }
  0x2a   :  { %4695 = vmatprep.subr.bf16.mxu1 %v5215_v53  ;;  %v5296_v52 = vld [vmem:[%s7300_s1 + $0x228] sm:$0xff]  }
  0x2b   :  { %510 = vmatmul.mubr.bf16.gmra.mxu0 %v5202_v42  ;;  %v5284_v42 = vld [vmem:[%s7300_s1 + $0x270] sm:$0xff]   ;;  %v5297_v53 = vld [vmem:[%s7300_s1 + $0x2a8] sm:$0xff]  }
  0x2c   :  { %607 = vmatmul.mubr.bf16.gmra.mxu1 %v5203_v43  ;;  %517 = vmatprep.mubr.bf16.mxu0 %v5208_v48  ;;  %v5285_v43 = vld [vmem:[%s7300_s1 + $0x2f0] sm:$0xff]   ;;  %v5283_v48 = vld [vmem:[%s7301_s0 + $0x128] ss:$16 sps:$4 sm:$0xff]  }
  0x2d   :  { %614 = vmatprep.mubr.bf16.mxu1 %v5210_v49  ;;  %4632 = vmatpush3.bf16.msra.mxu0 %v5216_v54  ;;  %v5295_v49 = vld [vmem:[%s7300_s1 + $0x2e8] sm:$0xff]   ;;  %v5304_v54 = vld [vmem:[%s7300_s1 + $0x260] sm:$0xff]  }
  0x2e   :  { %4696 = vmatpush3.bf16.msra.mxu1 %v5217_v55  ;;  %4633 = vmatprep.subr.bf16.mxu0 %v5224_v60  ;;  %v5305_v55 = vld [vmem:[%s7300_s1 + $0x2e0] sm:$0xff]  }
  0x2f   :  { %4697 = vmatprep.subr.bf16.mxu1 %v5225_v61  ;;  %v5298_v60 = vld [vmem:[%s7301_s0 + $0x164] ss:$16 sps:$4 sm:$0xff]   ;;  %v5300_v61 = vld [vmem:[%s7301_s0 + $0x16c] ss:$16 sps:$4 sm:$0xff]  }
  0x31   :  { %4634 = vmatpush3.bf16.msra.mxu0 %v5226_v62  ;;  %v5314_v62 = vld [vmem:[%s7300_s1 + $0x258] sm:$0xff]  }
  0x32   :  { %4698 = vmatpush3.bf16.msra.mxu1 %v5227_v63  ;;  %4635 = vmatprep.subr.bf16.mxu0 %v5234_v3  ;;  %v5315_v63 = vld [vmem:[%s7300_s1 + $0x2d8] sm:$0xff]  }
  0x33   :  { %518 = vmatmul.mubr.bf16.gmra.mxu0 %v5212_v50  ;;  %4699 = vmatprep.subr.bf16.mxu1 %v5235_v5  ;;  %v5288_v50 = vld [vmem:[%s7301_s0 + $0x144] ss:$16 sps:$4 sm:$0xff]   ;;  %v5303_v3 = vld [vmem:[%s7301_s0 + $0x168] ss:$16 sps:$4 sm:$0xff]   ;;  %v5310_v5 = vld [vmem:[%s7301_s0 + $0x18c] ss:$16 sps:$4 sm:$0xff]  }
  0x34   :  { %615 = vmatmul.mubr.bf16.gmra.mxu1 %v5213_v51  ;;  %525 = vmatprep.mubr.bf16.mxu0 %v5218_v56  ;;  %v5290_v51 = vld [vmem:[%s7301_s0 + $0x14c] ss:$16 sps:$4 sm:$0xff]   ;;  %v5292_v56 = vld [vmem:[%s7301_s0 + $0x140] ss:$16 sps:$4 sm:$0xff]  }
  0x35   :  { %622 = vmatprep.mubr.bf16.mxu1 %v5220_v57  ;;  %4636 = vmatpush3.bf16.msra.mxu0 %v5236_v6  ;;  %v5306_v57 = vld [vmem:[%s7300_s1 + $0x220] sm:$0xff]   ;;  %v5324_v6 = vld [vmem:[%s7300_s1 + $0x250] sm:$0xff]  }
  0x36   :  { %4700 = vmatpush3.bf16.msra.mxu1 %v5237_v7  ;;  %4637 = vmatprep.subr.bf16.mxu0 %v5244_v10  ;;  %v5325_v7 = vld [vmem:[%s7300_s1 + $0x2d0] sm:$0xff]  }
  0x37   :  { %4701 = vmatprep.subr.bf16.mxu1 %v5245_v11  ;;  %v5312_v10 = vld [vmem:[%s7301_s0 + $0x180] ss:$16 sps:$4 sm:$0xff]   ;;  %v5313_v11 = vld [vmem:[%s7301_s0 + $0x188] ss:$16 sps:$4 sm:$0xff]  }
  0x39   :  { %4638 = vmatpush3.bf16.msra.mxu0 %v5246_v13  ;;  %v5320_v13 = vld [vmem:[%s7301_s0 + $0x1ac] ss:$16 sps:$4 sm:$0xff]  }
  0x3a   :  { %4702 = vmatpush3.bf16.msra.mxu1 %v5247_v14  ;;  %4639 = vmatprep.subr.bf16.mxu0 %v5254_v18  ;;  %v5334_v14 = vld [vmem:[%s7300_s1 + $0x248] sm:$0xff]   ;;  %v5322_v18 = vld [vmem:[%s7301_s0 + $0x1a0] ss:$16 sps:$4 sm:$0xff]  }
  0x3b   :  { %526 = vmatmul.mubr.bf16.gmra.mxu0 %v5222_v58  ;;  %4703 = vmatprep.subr.bf16.mxu1 %v5255_v19  ;;  %v5307_v58 = vld [vmem:[%s7300_s1 + $0x2a0] sm:$0xff]   ;;  %v5323_v19 = vld [vmem:[%s7301_s0 + $0x1a8] ss:$16 sps:$4 sm:$0xff]  }
  0x3c   :  { %623 = vmatmul.mubr.bf16.gmra.mxu1 %v5223_v59  ;;  %533 = vmatprep.mubr.bf16.mxu0 %v5228_v0  ;;  %v5293_v59 = vld [vmem:[%s7301_s0 + $0x148] ss:$16 sps:$4 sm:$0xff]  }
  0x3d   :  { %630 = vmatprep.mubr.bf16.mxu1 %v5230_v1  ;;  %4640 = vmatpush3.bf16.msra.mxu0 %v5256_v20  ;;  %v5316_v0 = vld [vmem:[%s7300_s1 + $0x218] sm:$0xff]   ;;  %v5328_v20 = vld [vmem:[%s7301_s0 + $0x1c4] ss:$16 sps:$4 sm:$0xff]  }
  0x3e   :  { %4704 = vmatpush3.bf16.msra.mxu1 %v5257_v21  ;;  %4641 = vmatprep.subr.bf16.mxu0 %v5264_v26  ;;  %v5317_v1 = vld [vmem:[%s7300_s1 + $0x298] sm:$0xff]   ;;  %v5344_v21 = vld [vmem:[%s7300_s1 + $0x240] sm:$0xff]  }
  0x3f   :  { %4705 = vmatprep.subr.bf16.mxu1 %v5265_v27  ;;  %v5332_v26 = vld [vmem:[%s7301_s0 + $0x1c0] ss:$16 sps:$4 sm:$0xff]   ;;  %v5354_v27 = vld [vmem:[%s7300_s1 + $0x378] sm:$0xff]  }
  0x41   :  { %4642 = vmatpush3.bf16.msra.mxu0 %v5266_v28  ;;  %v5355_v28 = vld [vmem:[%s7300_s1 + $0x3f8] sm:$0xff]  }
  0x42   :  { %4706 = vmatpush3.bf16.msra.mxu1 %v5267_v29  ;;  %4755 = vmatprep.subr.bf16.mxu0 %v5274_v33  ;;  %v5333_v29 = vld [vmem:[%s7301_s0 + $0x1c8] ss:$16 sps:$4 sm:$0xff]  }
  0x43   :  { %534 = vmatmul.mubr.bf16.gmra.mxu0 %v5232_v2  ;;  %4819 = vmatprep.subr.bf16.mxu1 %v5275_v34  ;;  %v5302_v2 = vld [vmem:[%s7301_s0 + $0x160] ss:$16 sps:$4 sm:$0xff]   ;;  %v5343_v33 = vld [vmem:[%s7301_s0 + $0x1e8] ss:$16 sps:$4 sm:$0xff]   ;;  %v5350_v34 = vld [vmem:[%s7301_s0 + $0x204] ss:$16 sps:$4 sm:$0xff]  }
  0x44   :  { %631 = vmatmul.mubr.bf16.gmra.mxu1 %v5233_v4  ;;  %541 = vmatprep.mubr.bf16.mxu0 %v5238_v8  ;;  %v5308_v4 = vld [vmem:[%s7301_s0 + $0x184] ss:$16 sps:$4 sm:$0xff]  }
  0x45   :  { %638 = vmatprep.mubr.bf16.mxu1 %v5240_v9  ;;  %v5326_v8 = vld [vmem:[%s7300_s1 + $0x210] sm:$0xff]  }
  0x46   :  { %v5327_v9 = vld [vmem:[%s7300_s1 + $0x290] sm:$0xff]  }
  0x4b   :  { %542 = vmatmul.mubr.bf16.gmra.mxu0 %v5242_v12  ;;  %v5318_v12 = vld [vmem:[%s7301_s0 + $0x1a4] ss:$16 sps:$4 sm:$0xff]  }
  0x4c   :  { %639 = vmatmul.mubr.bf16.gmra.mxu1 %v5243_v15  ;;  %549 = vmatprep.mubr.bf16.mxu0 %v5248_v16  ;;  %v5335_v15 = vld [vmem:[%s7300_s1 + $0x2c8] sm:$0xff]  }
  0x4d   :  { %646 = vmatprep.mubr.bf16.mxu1 %v5250_v17  ;;  %v5336_v16 = vld [vmem:[%s7300_s1 + $0x208] sm:$0xff]  }
  0x4e   :  { %v5337_v17 = vld [vmem:[%s7300_s1 + $0x288] sm:$0xff]  }
  0x53   :  { %550 = vmatmul.mubr.bf16.gmra.mxu0 %v5252_v22  ;;  %v5330_v22 = vld [vmem:[%s7301_s0 + $0x1cc] ss:$16 sps:$4 sm:$0xff]  }
  0x54   :  { %647 = vmatmul.mubr.bf16.gmra.mxu1 %v5253_v23  ;;  %557 = vmatprep.mubr.bf16.mxu0 %v5258_v24  ;;  %v5345_v23 = vld [vmem:[%s7300_s1 + $0x2c0] sm:$0xff]  }
  0x55   :  { %654 = vmatprep.mubr.bf16.mxu1 %v5260_v25  ;;  %v5346_v24 = vld [vmem:[%s7300_s1 + $0x200] sm:$0xff]  }
  0x56   :  { %v5347_v25 = vld [vmem:[%s7300_s1 + $0x280] sm:$0xff]  }
  0x5b   :  { %558 = vmatmul.mubr.bf16.gmra.mxu0 %v5262_v30  ;;  %v5338_v30 = vld [vmem:[%s7301_s0 + $0x1e4] ss:$16 sps:$4 sm:$0xff]  }
  0x5c   :  { %655 = vmatmul.mubr.bf16.gmra.mxu1 %v5263_v31  ;;  %1145 = vmatprep.mubr.bf16.mxu0 %v5270_v32  ;;  %v5340_v31 = vld [vmem:[%s7301_s0 + $0x1ec] ss:$16 sps:$4 sm:$0xff]   ;;  %v5342_v32 = vld [vmem:[%s7301_s0 + $0x1e0] ss:$16 sps:$4 sm:$0xff]  }
  0x5d   :  { %1242 = vmatprep.mubr.bf16.mxu1 %v5273_v35  ;;  %v5353_v35 = vld [vmem:[%s7301_s0 + $0x20c] ss:$16 sps:$4 sm:$0xff]  }
  0x63   :  { %1146 = vmatmul.mubr.bf16.vlgmr.msra.gmra.mxu0 %v5268_v36  ;;  %v5348_v36 = vld [vmem:[%s7301_s0 + $0x200] ss:$16 sps:$4 sm:$0xff]  }
  0x64   :  { %1243 = vmatmul.mubr.bf16.vlgmr.msra.gmra.mxu1 %v5271_v37  ;;  %4756 = vmatpush3.bf16.msra.mxu0 %v5276_v38  ;;  %v5351_v37 = vld [vmem:[%s7301_s0 + $0x208] ss:$16 sps:$4 sm:$0xff]  }
  0x65   :  { %4820 = vmatpush3.bf16.msra.mxu1 %v5277_v39  ;;  %1153 = vmatprep.mubr.bf16.mxu0 %v5278_v40  ;;  %v5356_v38 = vld [vmem:[%s7300_s1 + $0x338] sm:$0xff]   ;;  %v5358_v40 = vld [vmem:[%s7301_s0 + $0x224] ss:$16 sps:$4 sm:$0xff]  }
  0x66   :  { %1250 = vmatprep.mubr.bf16.mxu1 %v5280_v41  ;;  %4757 = vmatprep.subr.bf16.mxu0 %v5284_v42  ;;  %v5357_v39 = vld [vmem:[%s7300_s1 + $0x3b8] sm:$0xff]   ;;  %v5364_v42 = vld [vmem:[%s7300_s1 + $0x370] sm:$0xff]  }
  0x67   :  { %4821 = vmatprep.subr.bf16.mxu1 %v5285_v43  ;;  %v5360_v41 = vld [vmem:[%s7301_s0 + $0x22c] ss:$16 sps:$4 sm:$0xff]   ;;  %v5365_v43 = vld [vmem:[%s7300_s1 + $0x3f0] sm:$0xff]  }
  0x68   :  { %4758 = vmatpush3.bf16.msra.mxu0 %v5286_v44  ;;  %v5366_v44 = vld [vmem:[%s7300_s1 + $0x330] sm:$0xff]  }
  0x69   :  { %4822 = vmatpush3.bf16.msra.mxu1 %v5287_v45  ;;  %4759 = vmatprep.subr.bf16.mxu0 %v5294_v47  ;;  %v5367_v45 = vld [vmem:[%s7300_s1 + $0x3b0] sm:$0xff]   ;;  %v5374_v47 = vld [vmem:[%s7300_s1 + $0x368] sm:$0xff]  }
  0x6a   :  { %4823 = vmatprep.subr.bf16.mxu1 %v5295_v49  ;;  %v5368_v49 = vld [vmem:[%s7301_s0 + $0x244] ss:$16 sps:$4 sm:$0xff]  }
  0x6b   :  { %1154 = vmatmul.mubr.bf16.gmra.mxu0 %v5282_v46  ;;  %v5362_v46 = vld [vmem:[%s7301_s0 + $0x220] ss:$16 sps:$4 sm:$0xff]  }
  0x6c   :  { %1251 = vmatmul.mubr.bf16.gmra.mxu1 %v5283_v48  ;;  %1161 = vmatprep.mubr.bf16.mxu0 %v5288_v50  ;;  %v5363_v48 = vld [vmem:[%s7301_s0 + $0x228] ss:$16 sps:$4 sm:$0xff]  }
  0x6d   :  { %1258 = vmatprep.mubr.bf16.mxu1 %v5290_v51  ;;  %4760 = vmatpush3.bf16.msra.mxu0 %v5296_v52  ;;  %v5375_v50 = vld [vmem:[%s7300_s1 + $0x3e8] sm:$0xff]  }
  0x6e   :  { %4824 = vmatpush3.bf16.msra.mxu1 %v5297_v53  ;;  %4761 = vmatprep.subr.bf16.mxu0 %v5304_v54  ;;  %v5370_v51 = vld [vmem:[%s7301_s0 + $0x24c] ss:$16 sps:$4 sm:$0xff]   ;;  %v5384_v54 = vld [vmem:[%s7300_s1 + $0x360] sm:$0xff]  }
  0x6f   :  { %4825 = vmatprep.subr.bf16.mxu1 %v5305_v55  ;;  %v5376_v52 = vld [vmem:[%s7300_s1 + $0x328] sm:$0xff]   ;;  %v5385_v55 = vld [vmem:[%s7300_s1 + $0x3e0] sm:$0xff]  }
  0x70   :  { %v5377_v53 = vld [vmem:[%s7300_s1 + $0x3a8] sm:$0xff]  }
  0x71   :  { %4762 = vmatpush3.bf16.msra.mxu0 %v5306_v57  ;;  %v5386_v57 = vld [vmem:[%s7300_s1 + $0x320] sm:$0xff]  }
  0x72   :  { %4826 = vmatpush3.bf16.msra.mxu1 %v5307_v58  ;;  %4763 = vmatprep.subr.bf16.mxu0 %v5314_v62  ;;  %v5387_v58 = vld [vmem:[%s7300_s1 + $0x3a0] sm:$0xff]   ;;  %v5380_v62 = vld [vmem:[%s7301_s0 + $0x26c] ss:$16 sps:$4 sm:$0xff]  }
  0x73   :  { %1162 = vmatmul.mubr.bf16.gmra.mxu0 %v5292_v56  ;;  %4827 = vmatprep.subr.bf16.mxu1 %v5315_v63  ;;  %v5372_v56 = vld [vmem:[%s7301_s0 + $0x240] ss:$16 sps:$4 sm:$0xff]   ;;  %v5395_v63 = vld [vmem:[%s7300_s1 + $0x3d8] sm:$0xff]  }
  0x74   :  { %1259 = vmatmul.mubr.bf16.gmra.mxu1 %v5293_v59  ;;  %1169 = vmatprep.mubr.bf16.mxu0 %v5298_v60  ;;  %v5373_v59 = vld [vmem:[%s7301_s0 + $0x248] ss:$16 sps:$4 sm:$0xff]   ;;  %v5378_v60 = vld [vmem:[%s7301_s0 + $0x264] ss:$16 sps:$4 sm:$0xff]  }
  0x75   :  { %1266 = vmatprep.mubr.bf16.mxu1 %v5300_v61  ;;  %4764 = vmatpush3.bf16.msra.mxu0 %v5316_v0  ;;  %v5394_v61 = vld [vmem:[%s7300_s1 + $0x358] sm:$0xff]  }
  0x76   :  { %4828 = vmatpush3.bf16.msra.mxu1 %v5317_v1  ;;  %4765 = vmatprep.subr.bf16.mxu0 %v5324_v6  ;;  %v5396_v0 = vld [vmem:[%s7300_s1 + $0x318] sm:$0xff]   ;;  %v5407_v6 = vld [vmem:[%s7300_s1 + $0x390] sm:$0xff]  }
  0x77   :  { %4829 = vmatprep.subr.bf16.mxu1 %v5325_v7  ;;  %v5397_v1 = vld [vmem:[%s7300_s1 + $0x398] sm:$0xff]  }
  0x78   :  { %v5383_v7 = vld [vmem:[%s7301_s0 + $0x268] ss:$16 sps:$4 sm:$0xff]  }
  0x79   :  { %4766 = vmatpush3.bf16.msra.mxu0 %v5326_v8  ;;  %v5388_v8 = vld [vmem:[%s7301_s0 + $0x284] ss:$16 sps:$4 sm:$0xff]  }
  0x7a   :  { %4830 = vmatpush3.bf16.msra.mxu1 %v5327_v9  ;;  %4767 = vmatprep.subr.bf16.mxu0 %v5334_v14  ;;  %v5414_v9 = vld [vmem:[%s7300_s1 + $0x348] sm:$0xff]   ;;  %v5424_v14 = vld [vmem:[%s7300_s1 + $0x340] sm:$0xff]  }
  0x7b   :  { %1170 = vmatmul.mubr.bf16.gmra.mxu0 %v5302_v2  ;;  %4831 = vmatprep.subr.bf16.mxu1 %v5335_v15  ;;  %v5404_v2 = vld [vmem:[%s7300_s1 + $0x350] sm:$0xff]   ;;  %v5425_v15 = vld [vmem:[%s7300_s1 + $0x3c0] sm:$0xff]  }
  0x7c   :  { %1267 = vmatmul.mubr.bf16.gmra.mxu1 %v5303_v3  ;;  %1177 = vmatprep.mubr.bf16.mxu0 %v5308_v4  ;;  %v5405_v3 = vld [vmem:[%s7300_s1 + $0x3d0] sm:$0xff]  }
  0x7d   :  { %1274 = vmatprep.mubr.bf16.mxu1 %v5310_v5  ;;  %4768 = vmatpush3.bf16.msra.mxu0 %v5336_v16  ;;  %v5406_v4 = vld [vmem:[%s7300_s1 + $0x310] sm:$0xff]  }
  0x7e   :  { %4832 = vmatpush3.bf16.msra.mxu1 %v5337_v17  ;;  %4769 = vmatprep.subr.bf16.mxu0 %v5344_v21  ;;  %v5382_v5 = vld [vmem:[%s7301_s0 + $0x260] ss:$16 sps:$4 sm:$0xff]   ;;  %v5400_v21 = vld [vmem:[%s7301_s0 + $0x2ac] ss:$16 sps:$4 sm:$0xff]  }
  0x7f   :  { %4833 = vmatprep.subr.bf16.mxu1 %v5345_v23  ;;  %v5392_v16 = vld [vmem:[%s7301_s0 + $0x280] ss:$16 sps:$4 sm:$0xff]   ;;  %v5403_v23 = vld [vmem:[%s7301_s0 + $0x2a8] ss:$16 sps:$4 sm:$0xff]  }
  0x80   :  { %v5426_v17 = vld [vmem:[%s7300_s1 + $0x300] sm:$0xff]  }
  0x81   :  { %4770 = vmatpush3.bf16.msra.mxu0 %v5346_v24  ;;  %v5408_v24 = vld [vmem:[%s7301_s0 + $0x2c4] ss:$16 sps:$4 sm:$0xff]  }
  0x82   :  { %4834 = vmatpush3.bf16.msra.mxu1 %v5347_v25  ;;  %4883 = vmatprep.subr.bf16.mxu0 %v5354_v27  ;;  %v5410_v25 = vld [vmem:[%s7301_s0 + $0x2cc] ss:$16 sps:$4 sm:$0xff]   ;;  %v5413_v27 = vld [vmem:[%s7301_s0 + $0x2c8] ss:$16 sps:$4 sm:$0xff]  }
  0x83   :  { %1178 = vmatmul.mubr.bf16.gmra.mxu0 %v5312_v10  ;;  %4947 = vmatprep.subr.bf16.mxu1 %v5355_v28  ;;  %v5415_v10 = vld [vmem:[%s7300_s1 + $0x3c8] sm:$0xff]   ;;  %v5418_v28 = vld [vmem:[%s7301_s0 + $0x2e4] ss:$16 sps:$4 sm:$0xff]  }
  0x84   :  { %1275 = vmatmul.mubr.bf16.gmra.mxu1 %v5313_v11  ;;  %1185 = vmatprep.mubr.bf16.mxu0 %v5318_v12  ;;  %v5390_v11 = vld [vmem:[%s7301_s0 + $0x28c] ss:$16 sps:$4 sm:$0xff]  }
  0x85   :  { %1282 = vmatprep.mubr.bf16.mxu1 %v5320_v13  ;;  %v5416_v12 = vld [vmem:[%s7300_s1 + $0x308] sm:$0xff]  }
  0x86   :  { %v5417_v13 = vld [vmem:[%s7300_s1 + $0x388] sm:$0xff]  }
  0x8b   :  { %1186 = vmatmul.mubr.bf16.gmra.mxu0 %v5322_v18  ;;  %v5427_v18 = vld [vmem:[%s7300_s1 + $0x380] sm:$0xff]  }
  0x8c   :  { %1283 = vmatmul.mubr.bf16.gmra.mxu1 %v5323_v19  ;;  %1193 = vmatprep.mubr.bf16.mxu0 %v5328_v20  ;;  %v5393_v19 = vld [vmem:[%s7301_s0 + $0x288] ss:$16 sps:$4 sm:$0xff]   ;;  %v5398_v20 = vld [vmem:[%s7301_s0 + $0x2a4] ss:$16 sps:$4 sm:$0xff]  }
  0x8d   :  { %1290 = vmatprep.mubr.bf16.mxu1 %v5330_v22  ;;  %v5402_v22 = vld [vmem:[%s7301_s0 + $0x2a0] ss:$16 sps:$4 sm:$0xff]  }
  0x93   :  { %1194 = vmatmul.mubr.bf16.gmra.mxu0 %v5332_v26  ;;  %v5412_v26 = vld [vmem:[%s7301_s0 + $0x2c0] ss:$16 sps:$4 sm:$0xff]  }
  0x94   :  { %1291 = vmatmul.mubr.bf16.gmra.mxu1 %v5333_v29  ;;  %1201 = vmatprep.mubr.bf16.mxu0 %v5338_v30  ;;  %v5420_v29 = vld [vmem:[%s7301_s0 + $0x2ec] ss:$16 sps:$4 sm:$0xff]   ;;  %v5422_v30 = vld [vmem:[%s7301_s0 + $0x2e0] ss:$16 sps:$4 sm:$0xff]  }
  0x95   :  { %1298 = vmatprep.mubr.bf16.mxu1 %v5340_v31  ;;  %v5423_v31 = vld [vmem:[%s7301_s0 + $0x2e8] ss:$16 sps:$4 sm:$0xff]  }
  0x9b   :  { %1202 = vmatmul.mubr.bf16.gmra.mxu0 %v5342_v32  ;;  %v5430_v32 = vld [vmem:[%s7301_s0 + $0x304] ss:$16 sps:$4 sm:$0xff]  }
  0x9c   :  { %1299 = vmatmul.mubr.bf16.gmra.mxu1 %v5343_v33  ;;  %1789 = vmatprep.mubr.bf16.mxu0 %v5350_v34  ;;  %v5433_v33 = vld [vmem:[%s7301_s0 + $0x30c] ss:$16 sps:$4 sm:$0xff]   ;;  %v5428_v34 = vld [vmem:[%s7301_s0 + $0x300] ss:$16 sps:$4 sm:$0xff]  }
  0x9d   :  { %1886 = vmatprep.mubr.bf16.mxu1 %v5353_v35  ;;  %v5431_v35 = vld [vmem:[%s7301_s0 + $0x308] ss:$16 sps:$4 sm:$0xff]  }
  0xa3   :  { %1790 = vmatmul.mubr.bf16.vlgmr.msra.gmra.mxu0 %v5348_v36  ;;  %v5434_v36 = vld [vmem:[%s7301_s0 + $0x324] ss:$16 sps:$4 sm:$0xff]  }
  0xa4   :  { %1887 = vmatmul.mubr.bf16.vlgmr.msra.gmra.mxu1 %v5351_v37  ;;  %4884 = vmatpush3.bf16.msra.mxu0 %v5356_v38  ;;  %v5436_v37 = vld [vmem:[%s7301_s0 + $0x32c] ss:$16 sps:$4 sm:$0xff]  }
  0xa5   :  { %4948 = vmatpush3.bf16.msra.mxu1 %v5357_v39  ;;  %1797 = vmatprep.mubr.bf16.mxu0 %v5358_v40 }
  0xa6   :  { %1894 = vmatprep.mubr.bf16.mxu1 %v5360_v41  ;;  %4885 = vmatprep.subr.bf16.mxu0 %v5364_v42 }
  0xa7   :  { %4949 = vmatprep.subr.bf16.mxu1 %v5365_v43 }
  0xa8   :  { %4886 = vmatpush3.bf16.msra.mxu0 %v5366_v44 }
  0xa9   :  { %4950 = vmatpush3.bf16.msra.mxu1 %v5367_v45  ;;  %4887 = vmatprep.subr.bf16.mxu0 %v5374_v47  ;;  %v5438_v45 = vld [vmem:[%s7301_s0 + $0x320] ss:$16 sps:$4 sm:$0xff]   ;;  %v5439_v47 = vld [vmem:[%s7301_s0 + $0x328] ss:$16 sps:$4 sm:$0xff]  }
  0xaa   :  { %4951 = vmatprep.subr.bf16.mxu1 %v5375_v50 }
  0xab   :  { %1798 = vmatmul.mubr.bf16.gmra.mxu0 %v5362_v46 }
  0xac   :  { %1895 = vmatmul.mubr.bf16.gmra.mxu1 %v5363_v48  ;;  %1805 = vmatprep.mubr.bf16.mxu0 %v5368_v49  ;;  %v5440_v48 = vld [vmem:[%s7301_s0 + $0x344] ss:$16 sps:$4 sm:$0xff]  }
  0xad   :  { %1902 = vmatprep.mubr.bf16.mxu1 %v5370_v51  ;;  %4888 = vmatpush3.bf16.msra.mxu0 %v5376_v52  ;;  %v5442_v51 = vld [vmem:[%s7301_s0 + $0x34c] ss:$16 sps:$4 sm:$0xff]  }
  0xae   :  { %4952 = vmatpush3.bf16.msra.mxu1 %v5377_v53  ;;  %4889 = vmatprep.subr.bf16.mxu0 %v5384_v54 }
  0xaf   :  { %4953 = vmatprep.subr.bf16.mxu1 %v5385_v55 }
  0xb1   :  { %4890 = vmatpush3.bf16.msra.mxu0 %v5386_v57 }
  0xb2   :  { %4954 = vmatpush3.bf16.msra.mxu1 %v5387_v58  ;;  %4891 = vmatprep.subr.bf16.mxu0 %v5394_v61 }
  0xb3   :  { %1806 = vmatmul.mubr.bf16.gmra.mxu0 %v5372_v56  ;;  %4955 = vmatprep.subr.bf16.mxu1 %v5395_v63  ;;  %v5444_v63 = vld [vmem:[%s7301_s0 + $0x340] ss:$16 sps:$4 sm:$0xff]  }
  0xb4   :  { %1903 = vmatmul.mubr.bf16.gmra.mxu1 %v5373_v59  ;;  %1813 = vmatprep.mubr.bf16.mxu0 %v5378_v60 }
  0xb5   :  { %1910 = vmatprep.mubr.bf16.mxu1 %v5380_v62  ;;  %4892 = vmatpush3.bf16.msra.mxu0 %v5396_v0 }
  0xb6   :  { %4956 = vmatpush3.bf16.msra.mxu1 %v5397_v1  ;;  %4893 = vmatprep.subr.bf16.mxu0 %v5404_v2  ;;  %v5445_v1 = vld [vmem:[%s7301_s0 + $0x348] ss:$16 sps:$4 sm:$0xff]   ;;  %v5446_v2 = vld [vmem:[%s7301_s0 + $0x364] ss:$16 sps:$4 sm:$0xff]  }
  0xb7   :  { %4957 = vmatprep.subr.bf16.mxu1 %v5405_v3 }
  0xb9   :  { %4894 = vmatpush3.bf16.msra.mxu0 %v5406_v4 }
  0xba   :  { %4958 = vmatpush3.bf16.msra.mxu1 %v5407_v6  ;;  %4895 = vmatprep.subr.bf16.mxu0 %v5414_v9 }
  0xbb   :  { %1814 = vmatmul.mubr.bf16.gmra.mxu0 %v5382_v5  ;;  %4959 = vmatprep.subr.bf16.mxu1 %v5415_v10  ;;  %v5448_v5 = vld [vmem:[%s7301_s0 + $0x36c] ss:$16 sps:$4 sm:$0xff]  }
  0xbc   :  { %1911 = vmatmul.mubr.bf16.gmra.mxu1 %v5383_v7  ;;  %1821 = vmatprep.mubr.bf16.mxu0 %v5388_v8 }
  0xbd   :  { %1918 = vmatprep.mubr.bf16.mxu1 %v5390_v11  ;;  %4896 = vmatpush3.bf16.msra.mxu0 %v5416_v12 }
  0xbe   :  { %4960 = vmatpush3.bf16.msra.mxu1 %v5417_v13  ;;  %4897 = vmatprep.subr.bf16.mxu0 %v5424_v14 }
  0xbf   :  { %4961 = vmatprep.subr.bf16.mxu1 %v5425_v15 }
  0xc1   :  { %4898 = vmatpush3.bf16.msra.mxu0 %v5426_v17  ;;  %v5450_v17 = vld [vmem:[%s7301_s0 + $0x360] ss:$16 sps:$4 sm:$0xff]  }
  0xc2   :  { %4962 = vmatpush3.bf16.msra.mxu1 %v5427_v18 }
  0xc3   :  { %1822 = vmatmul.mubr.bf16.gmra.mxu0 %v5392_v16 }
  0xc4   :  { %1919 = vmatmul.mubr.bf16.gmra.mxu1 %v5393_v19  ;;  %1829 = vmatprep.mubr.bf16.mxu0 %v5398_v20  ;;  %v5451_v19 = vld [vmem:[%s7301_s0 + $0x368] ss:$16 sps:$4 sm:$0xff]   ;;  %v5454_v20 = vld [vmem:[%s7301_s0 + $0x384] ss:$16 sps:$4 sm:$0xff]  }
  0xc5   :  { %1926 = vmatprep.mubr.bf16.mxu1 %v5400_v21 }
  0xcb   :  { %1830 = vmatmul.mubr.bf16.gmra.mxu0 %v5402_v22 }
  0xcc   :  { %1927 = vmatmul.mubr.bf16.gmra.mxu1 %v5403_v23  ;;  %1837 = vmatprep.mubr.bf16.mxu0 %v5408_v24  ;;  %v5457_v23 = vld [vmem:[%s7301_s0 + $0x38c] ss:$16 sps:$4 sm:$0xff]  }
  0xcd   :  { %1934 = vmatprep.mubr.bf16.mxu1 %v5410_v25 }
  0xd3   :  { %1838 = vmatmul.mubr.bf16.gmra.mxu0 %v5412_v26 }
  0xd4   :  { %1935 = vmatmul.mubr.bf16.gmra.mxu1 %v5413_v27  ;;  %1845 = vmatprep.mubr.bf16.mxu0 %v5418_v28 }
  0xd5   :  { %1942 = vmatprep.mubr.bf16.mxu1 %v5420_v29 }
  0xdb   :  { %1846 = vmatmul.mubr.bf16.gmra.mxu0 %v5422_v30 }
  0xdc   :  { %1943 = vmatmul.mubr.bf16.gmra.mxu1 %v5423_v31  ;;  %2433 = vmatprep.mubr.bf16.mxu0 %v5430_v32 }
  0xdd   :  { %2530 = vmatprep.mubr.bf16.mxu1 %v5433_v33 }
  0xe3   :  { %v4515_v38 = vpop.f32.mrf.mxu0  ;;  %2434 = vmatmul.mubr.bf16.vlgmr.msra.gmra.mxu0 %v5428_v34 }
  0xe4   :  { %v4579_v39 = vpop.f32.mrf.mxu1  ;;  %2531 = vmatmul.mubr.bf16.vlgmr.msra.gmra.mxu1 %v5431_v35  ;;  %2441 = vmatprep.mubr.bf16.mxu0 %v5434_v36  ;;  %v5452_v35 = vld [vmem:[%s7301_s0 + $0x380] ss:$16 sps:$4 sm:$0xff]  }
  0xe5   :  { %v4516_v40 = vpop.f32.mrf.mxu0  ;;  %2538 = vmatprep.mubr.bf16.mxu1 %v5436_v37  ;;  %v5455_v37 = vld [vmem:[%s7301_s0 + $0x388] ss:$16 sps:$4 sm:$0xff]  }
  0xe6   :  { %v4517_v41 = vadd.f32 %v4516_v40, %v4515_v38  ;;  %v4580_v42 = vpop.f32.mrf.mxu1  ;;  %v5460_v38 = vld [vmem:[%s7301_s0 + $0x3a4] ss:$16 sps:$4 sm:$0xff]  }
  0xe7   :  { %v4581_v43 = vadd.f32 %v4580_v42, %v4579_v39  ;;  %v4518_v44 = vpop.f32.mrf.mxu0 }
  0xe8   :  { %v4582_v46 = vpop.f32.mrf.mxu1 }
  0xe9   :  { %v6214_v49 = vadd.f32 %v4581_v43, %v4517_v41  ;;  %v4519_v50 = vpop.f32.mrf.mxu0  ;;  %v5463_v41 = vld [vmem:[%s7301_s0 + $0x3ac] ss:$16 sps:$4 sm:$0xff]  }
  0xea   :  { %v4520_v52 = vadd.f32 %v4519_v50, %v4518_v44  ;;  %v4583_v53 = vpop.f32.mrf.mxu1 }
  0xeb   :  { %v4584_v54 = vadd.f32 %v4583_v53, %v4582_v46  ;;  %v4521_v55 = vpop.f32.mrf.mxu0  ;;  %2442 = vmatmul.mubr.bf16.gmra.mxu0 %v5438_v45 }
  0xec   :  { %v4585_v56 = vpop.f32.mrf.mxu1  ;;  %2539 = vmatmul.mubr.bf16.gmra.mxu1 %v5439_v47  ;;  %2449 = vmatprep.mubr.bf16.mxu0 %v5440_v48 }
  0xed   :  { %v6219_v57 = vadd.f32 %v4584_v54, %v4520_v52  ;;  %v4522_v58 = vpop.f32.mrf.mxu0  ;;  %2546 = vmatprep.mubr.bf16.mxu1 %v5442_v51  ;;  %v5458_v54 = vld [vmem:[%s7301_s0 + $0x3a0] ss:$16 sps:$4 sm:$0xff]  }
  0xee   :  { %v4523_v59 = vadd.f32 %v4522_v58, %v4521_v55  ;;  %v4586_v60 = vpop.f32.mrf.mxu1  ;;  %v5466_v58 = vld [vmem:[%s7301_s0 + $0x3c4] ss:$16 sps:$4 sm:$0xff]  }
  0xef   :  { %v4587_v61 = vadd.f32 %v4586_v60, %v4585_v56  ;;  %v4524_v62 = vpop.f32.mrf.mxu0  ;;  %v5461_v56 = vld [vmem:[%s7301_s0 + $0x3a8] ss:$16 sps:$4 sm:$0xff]  }
  0xf0   :  { %v4588_v0 = vpop.f32.mrf.mxu1 }
  0xf1   :  { %v6230_v3 = vadd.f32 %v4587_v61, %v4523_v59  ;;  %v4525_v4 = vpop.f32.mrf.mxu0  ;;  %v5469_v61 = vld [vmem:[%s7301_s0 + $0x3cc] ss:$16 sps:$4 sm:$0xff]  }
  0xf2   :  { %v4526_v6 = vadd.f32 %v4525_v4, %v4524_v62  ;;  %v4589_v7 = vpop.f32.mrf.mxu1 }
  0xf3   :  { %v4590_v8 = vadd.f32 %v4589_v7, %v4588_v0  ;;  %v4527_v9 = vpop.f32.mrf.mxu0  ;;  %2450 = vmatmul.mubr.bf16.gmra.mxu0 %v5444_v63 }
  0xf4   :  { %v4591_v10 = vpop.f32.mrf.mxu1  ;;  %2547 = vmatmul.mubr.bf16.gmra.mxu1 %v5445_v1  ;;  %2457 = vmatprep.mubr.bf16.mxu0 %v5446_v2 }
  0xf5   :  { %v6235_v11 = vadd.f32 %v4590_v8, %v4526_v6  ;;  %v4528_v12 = vpop.f32.mrf.mxu0  ;;  %2554 = vmatprep.mubr.bf16.mxu1 %v5448_v5 }
  0xf6   :  { %v4529_v13 = vadd.f32 %v4528_v12, %v4527_v9  ;;  %v4592_v14 = vpop.f32.mrf.mxu1 }
  0xf7   :  { %v4593_v15 = vadd.f32 %v4592_v14, %v4591_v10  ;;  %v4530_v16 = vpop.f32.mrf.mxu0  ;;  %v5464_v10 = vld [vmem:[%s7301_s0 + $0x3c0] ss:$16 sps:$4 sm:$0xff]   ;;  %v5472_v14 = vld [vmem:[%s7301_s0 + $0x3e4] ss:$16 sps:$4 sm:$0xff]  }
  0xf8   :  { %v4594_v18 = vpop.f32.mrf.mxu1 }
  0xf9   :  { %v6246_v21 = vadd.f32 %v4593_v15, %v4529_v13  ;;  %v4531_v22 = vpop.f32.mrf.mxu0  ;;  %v5467_v13 = vld [vmem:[%s7301_s0 + $0x3c8] ss:$16 sps:$4 sm:$0xff]  }
  0xfa   :  { %v4532_v24 = vadd.f32 %v4531_v22, %v4530_v16  ;;  %v4595_v25 = vpop.f32.mrf.mxu1 }
  0xfb   :  { %7347 = vst [vmem:[#allocation2_spill] sm:$0xff] %v6246_v21  ;;  %v4596_v26 = vadd.f32 %v4595_v25, %v4594_v18  ;;  %v4533_v27 = vpop.f32.mrf.mxu0  ;;  %2458 = vmatmul.mubr.bf16.gmra.mxu0 %v5450_v17  ;;  %v5475_v17 = vld [vmem:[%s7301_s0 + $0x3ec] ss:$16 sps:$4 sm:$0xff]  }
  0xfc   :  { %v4597_v28 = vpop.f32.mrf.mxu1  ;;  %2555 = vmatmul.mubr.bf16.gmra.mxu1 %v5451_v19  ;;  %2465 = vmatprep.mubr.bf16.mxu0 %v5454_v20 }
  0xfd   :  { %v6251_v29 = vadd.f32 %v4596_v26, %v4532_v24  ;;  %v4534_v30 = vpop.f32.mrf.mxu0  ;;  %2562 = vmatprep.mubr.bf16.mxu1 %v5457_v23 }
  0xfe   :  { %v4535_v31 = vadd.f32 %v4534_v30, %v4533_v27  ;;  %v4598_v32 = vpop.f32.mrf.mxu1 }
  0xff   :  { %v4599_v33 = vadd.f32 %v4598_v32, %v4597_v28  ;;  %v4536_v34 = vpop.f32.mrf.mxu0 }
 0x100   :  { %v4600_v36 = vpop.f32.mrf.mxu1 }
 0x101   :  { %v6262_v39 = vadd.f32 %v4599_v33, %v4535_v31  ;;  %v4537_v40 = vpop.f32.mrf.mxu0  ;;  %v5470_v31 = vld [vmem:[%s7301_s0 + $0x3e0] ss:$16 sps:$4 sm:$0xff]   ;;  %v5473_v33 = vld [vmem:[%s7301_s0 + $0x3e8] ss:$16 sps:$4 sm:$0xff]  }
 0x102   :  { %v4538_v42 = vadd.f32 %v4537_v40, %v4536_v34  ;;  %v4601_v43 = vpop.f32.mrf.mxu1 }
 0x103   :  { %7348 = vst [vmem:[#allocation3_spill] sm:$0xff] %v6262_v39  ;;  %v4602_v44 = vadd.f32 %v4601_v43, %v4600_v36  ;;  %v4539_v45 = vpop.f32.mrf.mxu0  ;;  %2466 = vmatmul.mubr.bf16.gmra.mxu0 %v5452_v35 }
 0x104   :  { %v4603_v46 = vpop.f32.mrf.mxu1  ;;  %2563 = vmatmul.mubr.bf16.gmra.mxu1 %v5455_v37  ;;  %2473 = vmatprep.mubr.bf16.mxu0 %v5460_v38 }
 0x105   :  { %v6267_v47 = vadd.f32 %v4602_v44, %v4538_v42  ;;  %v4540_v48 = vpop.f32.mrf.mxu0  ;;  %2570 = vmatprep.mubr.bf16.mxu1 %v5463_v41 }
 0x106   :  { %v4541_v50 = vadd.f32 %v4540_v48, %v4539_v45  ;;  %v4604_v51 = vpop.f32.mrf.mxu1 }
 0x107   :  { %7349 = vst [vmem:[#allocation4_spill] sm:$0xff] %v6267_v47  ;;  %v4605_v52 = vadd.f32 %v4604_v51, %v4603_v46  ;;  %v4542_v53 = vpop.f32.mrf.mxu0 }
 0x108   :  { %v4606_v55 = vpop.f32.mrf.mxu1 }
 0x109   :  { %v6278_v59 = vadd.f32 %v4605_v52, %v4541_v50  ;;  %v4543_v60 = vpop.f32.mrf.mxu0 }
 0x10a   :  { %v4544_v62 = vadd.f32 %v4543_v60, %v4542_v53  ;;  %v4607_v63 = vpop.f32.mrf.mxu1 }
 0x10b   :  { %7350 = vst [vmem:[#allocation5_spill] sm:$0xff] %v6278_v59  ;;  %v4608_v0 = vadd.f32 %v4607_v63, %v4606_v55  ;;  %v4545_v1 = vpop.f32.mrf.mxu0  ;;  %2474 = vmatmul.mubr.bf16.gmra.mxu0 %v5458_v54 }
 0x10c   :  { %v4609_v2 = vpop.f32.mrf.mxu1  ;;  %2571 = vmatmul.mubr.bf16.gmra.mxu1 %v5461_v56  ;;  %2481 = vmatprep.mubr.bf16.mxu0 %v5466_v58 }
 0x10d   :  { %v6283_v4 = vadd.f32 %v4608_v0, %v4544_v62  ;;  %v4546_v5 = vpop.f32.mrf.mxu0  ;;  %2578 = vmatprep.mubr.bf16.mxu1 %v5469_v61 }
 0x10e   :  { %v4547_v6 = vadd.f32 %v4546_v5, %v4545_v1  ;;  %v4610_v7 = vpop.f32.mrf.mxu1 }
 0x10f   :  { %7351 = vst [vmem:[#allocation6_spill] sm:$0xff] %v6283_v4  ;;  %v4611_v8 = vadd.f32 %v4610_v7, %v4609_v2  ;;  %v4548_v9 = vpop.f32.mrf.mxu0 }
 0x110   :  { %v4612_v12 = vpop.f32.mrf.mxu1 }
 0x111   :  { %v6294_v15 = vadd.f32 %v4611_v8, %v4547_v6  ;;  %v4549_v16 = vpop.f32.mrf.mxu0 }
 0x112   :  { %v4550_v18 = vadd.f32 %v4549_v16, %v4548_v9  ;;  %v4613_v19 = vpop.f32.mrf.mxu1 }
 0x113   :  { %7352 = vst [vmem:[#allocation7_spill] sm:$0xff] %v6294_v15  ;;  %v4614_v20 = vadd.f32 %v4613_v19, %v4612_v12  ;;  %v4551_v22 = vpop.f32.mrf.mxu0  ;;  %2482 = vmatmul.mubr.bf16.gmra.mxu0 %v5464_v10 }
 0x114   :  { %v4615_v23 = vpop.f32.mrf.mxu1  ;;  %2579 = vmatmul.mubr.bf16.gmra.mxu1 %v5467_v13  ;;  %2489 = vmatprep.mubr.bf16.mxu0 %v5472_v14 }
 0x115   :  { %v6299_v24 = vadd.f32 %v4614_v20, %v4550_v18  ;;  %v4552_v25 = vpop.f32.mrf.mxu0  ;;  %2586 = vmatprep.mubr.bf16.mxu1 %v5475_v17 }
 0x116   :  { %v4553_v26 = vadd.f32 %v4552_v25, %v4551_v22  ;;  %v4616_v27 = vpop.f32.mrf.mxu1 }
 0x117   :  { %7353 = vst [vmem:[#allocation8_spill] sm:$0xff] %v6299_v24  ;;  %v4617_v28 = vadd.f32 %v4616_v27, %v4615_v23  ;;  %v4554_v30 = vpop.f32.mrf.mxu0 }
 0x118   :  { %v4618_v32 = vpop.f32.mrf.mxu1 }
 0x119   :  { %v6307_v34 = vadd.f32 %v4617_v28, %v4553_v26  ;;  %v4555_v35 = vpop.f32.mrf.mxu0 }
 0x11a   :  { %v4556_v36 = vadd.f32 %v4555_v35, %v4554_v30  ;;  %v4619_v37 = vpop.f32.mrf.mxu1 }
 0x11b   :  { %7354 = vst [vmem:[#allocation9_spill] sm:$0xff] %v6307_v34  ;;  %v4620_v38 = vadd.f32 %v4619_v37, %v4618_v32  ;;  %v4557_v40 = vpop.f32.mrf.mxu0  ;;  %2490 = vmatmul.mubr.bf16.gmra.mxu0 %v5470_v31 }
 0x11c   :  { %v4621_v41 = vpop.f32.mrf.mxu1  ;;  %2587 = vmatmul.mubr.bf16.gmra.mxu1 %v5473_v33 }
 0x11d   :  { %v6309_v42 = vadd.f32 %v4620_v38, %v4556_v36  ;;  %v4558_v43 = vpop.f32.mrf.mxu0 }
 0x11e   :  { %v4559_v44 = vadd.f32 %v4558_v43, %v4557_v40  ;;  %v4622_v45 = vpop.f32.mrf.mxu1 }
 0x11f   :  { %7355 = vst [vmem:[#allocation10_spill] sm:$0xff] %v6309_v42  ;;  %v4623_v46 = vadd.f32 %v4622_v45, %v4621_v41  ;;  %v4560_v48 = vpop.f32.mrf.mxu0 }
 0x120   :  { %v4624_v50 = vpop.f32.mrf.mxu1 }
 0x121   :  { %v6311_v51 = vadd.f32 %v4623_v46, %v4559_v44  ;;  %v4561_v52 = vpop.f32.mrf.mxu0 }
 0x122   :  { %v4562_v53 = vadd.f32 %v4561_v52, %v4560_v48  ;;  %v4625_v54 = vpop.f32.mrf.mxu1 }
 0x123   :  { %7356 = vst [vmem:[#allocation11_spill] sm:$0xff] %v6311_v51  ;;  %v4626_v55 = vadd.f32 %v4625_v54, %v4624_v50  ;;  %v4643_v56 = vpop.f32.mrf.mxu0 }
 0x124   :  { %v4707_v58 = vpop.f32.mrf.mxu1 }
 0x125   :  { %v6313_v60 = vadd.f32 %v4626_v55, %v4562_v53  ;;  %v4644_v61 = vpop.f32.mrf.mxu0 }
 0x126   :  { %v4645_v62 = vadd.f32 %v4644_v61, %v4643_v56  ;;  %v4708_v63 = vpop.f32.mrf.mxu1 }
 0x127   :  { %7357 = vst [vmem:[#allocation12_spill] sm:$0xff] %v6313_v60  ;;  %v4709_v0 = vadd.f32 %v4708_v63, %v4707_v58  ;;  %v4646_v1 = vpop.f32.mrf.mxu0 }
 0x128   :  { %v4710_v2 = vpop.f32.mrf.mxu1 }
 0x129   :  { %v6315_v5 = vadd.f32 %v4709_v0, %v4645_v62  ;;  %v4647_v6 = vpop.f32.mrf.mxu0 }
 0x12a   :  { %v4648_v7 = vadd.f32 %v4647_v6, %v4646_v1  ;;  %v4711_v8 = vpop.f32.mrf.mxu1 }
 0x12b   :  { %7358 = vst [vmem:[#allocation13_spill] sm:$0xff] %v6315_v5  ;;  %v4712_v9 = vadd.f32 %v4711_v8, %v4710_v2  ;;  %v4649_v10 = vpop.f32.mrf.mxu0 }
 0x12c   :  { %v4713_v12 = vpop.f32.mrf.mxu1 }
 0x12d   :  { %v6317_v13 = vadd.f32 %v4712_v9, %v4648_v7  ;;  %v4650_v14 = vpop.f32.mrf.mxu0 }
 0x12e   :  { %v4651_v16 = vadd.f32 %v4650_v14, %v4649_v10  ;;  %v4714_v17 = vpop.f32.mrf.mxu1 }
 0x12f   :  { %7359 = vst [vmem:[#allocation14_spill] sm:$0xff] %v6317_v13  ;;  %v4715_v18 = vadd.f32 %v4714_v17, %v4713_v12  ;;  %v4652_v19 = vpop.f32.mrf.mxu0 }
 0x130   :  { %v4716_v20 = vpop.f32.mrf.mxu1 }
 0x131   :  { %v6319_v22 = vadd.f32 %v4715_v18, %v4651_v16  ;;  %v4653_v23 = vpop.f32.mrf.mxu0 }
 0x132   :  { %v4654_v25 = vadd.f32 %v4653_v23, %v4652_v19  ;;  %v4717_v26 = vpop.f32.mrf.mxu1 }
 0x133   :  { %v4718_v27 = vadd.f32 %v4717_v26, %v4716_v20  ;;  %v4655_v28 = vpop.f32.mrf.mxu0 }
 0x134   :  { %v4719_v30 = vpop.f32.mrf.mxu1 }
 0x135   :  { %v6321_v31 = vadd.f32 %v4718_v27, %v4654_v25  ;;  %v4656_v32 = vpop.f32.mrf.mxu0 }
 0x136   :  { %v4657_v33 = vadd.f32 %v4656_v32, %v4655_v28  ;;  %v4720_v35 = vpop.f32.mrf.mxu1 }
 0x137   :  { %v4721_v36 = vadd.f32 %v4720_v35, %v4719_v30  ;;  %v4658_v37 = vpop.f32.mrf.mxu0 }
 0x138   :  { %v4722_v38 = vpop.f32.mrf.mxu1 }
 0x139   :  { %v6323_v40 = vadd.f32 %v4721_v36, %v4657_v33  ;;  %v4659_v41 = vpop.f32.mrf.mxu0 }
 0x13a   :  { %v4660_v43 = vadd.f32 %v4659_v41, %v4658_v37  ;;  %v4723_v44 = vpop.f32.mrf.mxu1 }
 0x13b   :  { %7360 = vst [vmem:[#allocation15_spill] sm:$0xff] %v6323_v40  ;;  %v4724_v45 = vadd.f32 %v4723_v44, %v4722_v38  ;;  %v4661_v46 = vpop.f32.mrf.mxu0 }
 0x13c   :  { %v4725_v48 = vpop.f32.mrf.mxu1 }
 0x13d   :  { %v6325_v50 = vadd.f32 %v4724_v45, %v4660_v43  ;;  %v4662_v52 = vpop.f32.mrf.mxu0 }
 0x13e   :  { %v4663_v53 = vadd.f32 %v4662_v52, %v4661_v46  ;;  %v4726_v54 = vpop.f32.mrf.mxu1 }
 0x13f   :  { %7361 = vst [vmem:[#allocation16_spill] sm:$0xff] %v6325_v50  ;;  %v4727_v55 = vadd.f32 %v4726_v54, %v4725_v48  ;;  %v4664_v56 = vpop.f32.mrf.mxu0 }
 0x140   :  { %v4728_v58 = vpop.f32.mrf.mxu1 }
 0x141   :  { %v6327_v61 = vadd.f32 %v4727_v55, %v4663_v53  ;;  %v4665_v62 = vpop.f32.mrf.mxu0 }
 0x142   :  { %v4666_v63 = vadd.f32 %v4665_v62, %v4664_v56  ;;  %v4729_v0 = vpop.f32.mrf.mxu1 }
 0x143   :  { %7362 = vst [vmem:[#allocation17_spill] sm:$0xff] %v6327_v61  ;;  %v4730_v1 = vadd.f32 %v4729_v0, %v4728_v58  ;;  %v4667_v2 = vpop.f32.mrf.mxu0 }
 0x144   :  { %v4731_v6 = vpop.f32.mrf.mxu1 }
 0x145   :  { %v6329_v7 = vadd.f32 %v4730_v1, %v4666_v63  ;;  %v4668_v8 = vpop.f32.mrf.mxu0 }
 0x146   :  { %v4669_v9 = vadd.f32 %v4668_v8, %v4667_v2  ;;  %v4732_v10 = vpop.f32.mrf.mxu1 }
 0x147   :  { %7363 = vst [vmem:[#allocation18_spill] sm:$0xff] %v6329_v7  ;;  %v4733_v12 = vadd.f32 %v4732_v10, %v4731_v6  ;;  %v4670_v14 = vpop.f32.mrf.mxu0 }
 0x148   :  { %v4734_v16 = vpop.f32.mrf.mxu1 }
 0x149   :  { %v6331_v17 = vadd.f32 %v4733_v12, %v4669_v9  ;;  %v4671_v18 = vpop.f32.mrf.mxu0 }
 0x14a   :  { %v4672_v19 = vadd.f32 %v4671_v18, %v4670_v14  ;;  %v4735_v20 = vpop.f32.mrf.mxu1 }
 0x14b   :  { %7364 = vst [vmem:[#allocation19_spill] sm:$0xff] %v6331_v17  ;;  %v4736_v23 = vadd.f32 %v4735_v20, %v4734_v16  ;;  %v4673_v25 = vpop.f32.mrf.mxu0 }
 0x14c   :  { %v4737_v26 = vpop.f32.mrf.mxu1 }
 0x14d   :  { %v6333_v27 = vadd.f32 %v4736_v23, %v4672_v19  ;;  %v4674_v28 = vpop.f32.mrf.mxu0 }
 0x14e   :  { %v4675_v30 = vadd.f32 %v4674_v28, %v4673_v25  ;;  %v4738_v32 = vpop.f32.mrf.mxu1 }
 0x14f   :  { %7365 = vst [vmem:[#allocation20_spill] sm:$0xff] %v6333_v27  ;;  %v4739_v33 = vadd.f32 %v4738_v32, %v4737_v26  ;;  %v4676_v35 = vpop.f32.mrf.mxu0  ;;  %v6348_v32 = vld [vmem:[%s7302_s4 + $0x18] sm:$0xff]  }
 0x150   :  { %v4740_v36 = vpop.f32.mrf.mxu1  ;;  %5083 = vmatprep.subr.bf16.mxu1 %v6348_v32  ;;  %5059 = vmatprep.subr.bf16.mxu0 %v6348_v32 }
 0x151   :  { %v6335_v37 = vadd.f32 %v4739_v33, %v4675_v30  ;;  %v4677_v38 = vpop.f32.mrf.mxu0  ;;  %5084 = vmatpush3.bf16.msra.mxu1 %v6348_v32  ;;  %5060 = vmatpush3.bf16.msra.mxu0 %v6348_v32 }
 0x152   :  { %v4678_v41 = vadd.f32 %v4677_v38, %v4676_v35  ;;  %v4741_v43 = vpop.f32.mrf.mxu1 }
 0x153   :  { %7366 = vst [vmem:[#allocation21_spill] sm:$0xff] %v6335_v37  ;;  %v4742_v44 = vadd.f32 %v4741_v43, %v4740_v36  ;;  %v4679_v45 = vpop.f32.mrf.mxu0 }
 0x154   :  { %v4743_v46 = vpop.f32.mrf.mxu1 }
 0x155   :  { %v6337_v48 = vadd.f32 %v4742_v44, %v4678_v41  ;;  %v4680_v52 = vpop.f32.mrf.mxu0 }
 0x156   :  { %v4681_v53 = vadd.f32 %v4680_v52, %v4679_v45  ;;  %v4744_v54 = vpop.f32.mrf.mxu1 }
 0x157   :  { %7367 = vst [vmem:[#allocation22_spill] sm:$0xff] %v6337_v48  ;;  %v4745_v55 = vadd.f32 %v4744_v54, %v4743_v46  ;;  %v4682_v56 = vpop.f32.mrf.mxu0 }
 0x158   :  { %v4746_v58 = vpop.f32.mrf.mxu1 }
 0x159   :  { %v6339_v62 = vadd.f32 %v4745_v55, %v4681_v53  ;;  %v4683_v63 = vpop.f32.mrf.mxu0 }
 0x15a   :  { %v4684_v0 = vadd.f32 %v4683_v63, %v4682_v56  ;;  %v4747_v1 = vpop.f32.mrf.mxu1 }
 0x15b   :  { %7368 = vst [vmem:[#allocation23_spill] sm:$0xff] %v6339_v62  ;;  %v4748_v2 = vadd.f32 %v4747_v1, %v4746_v58  ;;  %v4685_v6 = vpop.f32.mrf.mxu0 }
 0x15c   :  { %v4749_v8 = vpop.f32.mrf.mxu1 }
 0x15d   :  { %v6341_v9 = vadd.f32 %v4748_v2, %v4684_v0  ;;  %v4686_v10 = vpop.f32.mrf.mxu0 }
 0x15e   :  { %v4687_v12 = vadd.f32 %v4686_v10, %v4685_v6  ;;  %v4750_v14 = vpop.f32.mrf.mxu1 }
 0x15f   :  { %7369 = vst [vmem:[#allocation24_spill] sm:$0xff] %v6341_v9  ;;  %v4751_v16 = vadd.f32 %v4750_v14, %v4749_v8  ;;  %v4688_v18 = vpop.f32.mrf.mxu0 }
 0x160   :  { %v4752_v19 = vpop.f32.mrf.mxu1 }
 0x161   :  { %v6343_v20 = vadd.f32 %v4751_v16, %v4687_v12  ;;  %v4689_v23 = vpop.f32.mrf.mxu0 }
 0x162   :  { %v4690_v25 = vadd.f32 %v4689_v23, %v4688_v18  ;;  %v4753_v26 = vpop.f32.mrf.mxu1 }
 0x163   :  { %7370 = vst [vmem:[#allocation25_spill] sm:$0xff] %v6343_v20  ;;  %v4754_v28 = vadd.f32 %v4753_v26, %v4752_v19  ;;  %v4771_v30 = vpop.f32.mrf.mxu0 }
 0x164   :  { %v4835_v33 = vpop.f32.mrf.mxu1 }
 0x165   :  { %v6350_v35 = vadd.f32 %v4754_v28, %v4690_v25  ;;  %v4772_v36 = vpop.f32.mrf.mxu0 }
 0x166   :  { %v4773_v38 = vadd.f32 %v4772_v36, %v4771_v30  ;;  %v4836_v41 = vpop.f32.mrf.mxu1 }
 0x167   :  { %v4837_v43 = vadd.f32 %v4836_v41, %v4835_v33  ;;  %v4774_v44 = vpop.f32.mrf.mxu0 }
 0x168   :  { %v4838_v45 = vpop.f32.mrf.mxu1 }
 0x169   :  { %v6356_v46 = vadd.f32 %v4837_v43, %v4773_v38  ;;  %v4775_v52 = vpop.f32.mrf.mxu0  ;;  %v2636_v43 = vmul.f32 %v6219_v57, %v6219_v57 }
 0x16a   :  { %v4776_v53 = vadd.f32 %v4775_v52, %v4774_v44  ;;  %v4839_v54 = vpop.f32.mrf.mxu1  ;;  %v2635_v52 = vmul.f32 %v6214_v49, %v6214_v49 }
 0x16b   :  { %7371 = vst [vmem:[#allocation26_spill] sm:$0xff] %v6356_v46  ;;  %v4840_v55 = vadd.f32 %v4839_v54, %v4838_v45  ;;  %v4777_v56 = vpop.f32.mrf.mxu0 }
 0x16c   :  { %v4841_v58 = vpop.f32.mrf.mxu1 }
 0x16d   :  { %v6358_v63 = vadd.f32 %v4840_v55, %v4776_v53  ;;  %v4778_v0 = vpop.f32.mrf.mxu0  ;;  %v2599_v55 = vsel %vm2597_vm0, %v6219_v57, 0.0 }
 0x16e   :  { %v4779_v1 = vadd.f32 %v4778_v0, %v4777_v56  ;;  %v4842_v2 = vpop.f32.mrf.mxu1  ;;  %v2637_v56 = vmul.f32 %v6230_v3, %v6230_v3 }
 0x16f   :  { %7372 = vst [vmem:[#allocation27_spill] sm:$0xff] %v6358_v63  ;;  %v4843_v6 = vadd.f32 %v4842_v2, %v4841_v58  ;;  %v4780_v8 = vpop.f32.mrf.mxu0 }
 0x170   :  { %v4844_v10 = vpop.f32.mrf.mxu1 }
 0x171   :  { %v6360_v12 = vadd.f32 %v4843_v6, %v4779_v1  ;;  %v4781_v14 = vpop.f32.mrf.mxu0  ;;  %v2598_v1 = vsel %vm2597_vm0, %v6214_v49, 0.0  ;;  %v2652_v6 = vsel %vm2597_vm0, %v2636_v43, 0.0 }
 0x172   :  { %v4782_v16 = vadd.f32 %v4781_v14, %v4780_v8  ;;  %v4845_v18 = vpop.f32.mrf.mxu1  ;;  %v2601_v8 = vsel %vm2597_vm0, %v6230_v3, 0.0 }
 0x173   :  { %7373 = vst [vmem:[#allocation28_spill] sm:$0xff] %v6360_v12  ;;  %v4846_v19 = vadd.f32 %v4845_v18, %v4844_v10  ;;  %v4783_v23 = vpop.f32.mrf.mxu0  ;;  %v2638_v10 = vmul.f32 %v6235_v11, %v6235_v11  ;;  %v2651_v18 = vsel %vm2597_vm0, %v2635_v52, 0.0  ;;  %v2605_v52 = vsel %vm2597_vm0, %v6246_v21, 0.0 }
 0x174   :  { %v4847_v25 = vpop.f32.mrf.mxu1 }
 0x175   :  { %v6362_v26 = vadd.f32 %v4846_v19, %v4782_v16  ;;  %v4784_v28 = vpop.f32.mrf.mxu0  ;;  %v2600_v19 = vadd.f32 %v2599_v55, %v2598_v1 }
 0x176   :  { %v4785_v30 = vadd.f32 %v4784_v28, %v4783_v23  ;;  %v4848_v33 = vpop.f32.mrf.mxu1  ;;  %v2654_v28 = vsel %vm2597_vm0, %v2637_v56, 0.0 }
 0x177   :  { %7374 = vst [vmem:[#allocation29_spill] sm:$0xff] %v6362_v26  ;;  %v4849_v36 = vadd.f32 %v4848_v33, %v4847_v25  ;;  %v4786_v38 = vpop.f32.mrf.mxu0  ;;  %v2639_v33 = vmul.f32 %v6246_v21, %v6246_v21  ;;  %v2602_v43 = vadd.f32 %v2601_v8, %v2600_v19  ;;  %v2641_v8 = vmul.f32 %v6262_v39, %v6262_v39 }
 0x178   :  { %v4850_v41 = vpop.f32.mrf.mxu1 }
 0x179   :  { %v6366_v44 = vadd.f32 %v4849_v36, %v4785_v30  ;;  %v4787_v45 = vpop.f32.mrf.mxu0  ;;  %v2603_v30 = vsel %vm2597_vm0, %v6235_v11, 0.0 }
 0x17a   :  { %v4788_v53 = vadd.f32 %v4787_v45, %v4786_v38  ;;  %v4851_v54 = vpop.f32.mrf.mxu1 }
 0x17b   :  { %7375 = vst [vmem:[#allocation30_spill] sm:$0xff] %v6366_v44  ;;  %v4852_v58 = vadd.f32 %v4851_v54, %v4850_v41  ;;  %v4789_v0 = vpop.f32.mrf.mxu0  ;;  %v2653_v41 = vadd.f32 %v2652_v6, %v2651_v18  ;;  %v2640_v54 = vmul.f32 %v6251_v29, %v6251_v29  ;;  %v2607_v6 = vsel %vm2597_vm0, %v6251_v29, 0.0 }
 0x17c   :  { %v4853_v2 = vpop.f32.mrf.mxu1 }
 0x17d   :  { %v6381_v14 = vadd.f32 %v4852_v58, %v4788_v53  ;;  %v4790_v16 = vpop.f32.mrf.mxu0  ;;  %v2656_v53 = vsel %vm2597_vm0, %v2638_v10, 0.0  ;;  %v2655_v58 = vadd.f32 %v2654_v28, %v2653_v41  ;;  %v2609_v28 = vsel %vm2597_vm0, %v6262_v39, 0.0 }
 0x17e   :  { %v4791_v23 = vadd.f32 %v4790_v16, %v4789_v0  ;;  %v4854_v25 = vpop.f32.mrf.mxu1  ;;  %v2604_v0 = vadd.f32 %v2603_v30, %v2602_v43  ;;  %v2642_v30 = vmul.f32 %v6267_v47, %v6267_v47 }
 0x17f   :  { %7376 = vst [vmem:[#allocation31_spill] sm:$0xff] %v6381_v14  ;;  %v4855_v36 = vadd.f32 %v4854_v25, %v4853_v2  ;;  %v4792_v38 = vpop.f32.mrf.mxu0  ;;  %v2658_v2 = vsel %vm2597_vm0, %v2639_v33, 0.0  ;;  %v2657_v19 = vadd.f32 %v2656_v53, %v2655_v58  ;;  %v2611_v53 = vsel %vm2597_vm0, %v6267_v47, 0.0 }
 0x180   :  { %v4856_v45 = vpop.f32.mrf.mxu1  ;;  %v2606_v25 = vadd.f32 %v2605_v52, %v2604_v0  ;;  %v2643_v52 = vmul.f32 %v6278_v59, %v6278_v59 }
 0x181   :  { %v6394_v55 = vadd.f32 %v4855_v36, %v4791_v23  ;;  %v4793_v56 = vpop.f32.mrf.mxu0  ;;  %v2660_v23 = vsel %vm2597_vm0, %v2640_v54, 0.0 }
 0x182   :  { %v4794_v1 = vadd.f32 %v4793_v56, %v4792_v38  ;;  %v4857_v16 = vpop.f32.mrf.mxu1  ;;  %v2659_v38 = vadd.f32 %v2658_v2, %v2657_v19  ;;  %v2608_v41 = vadd.f32 %v2607_v6, %v2606_v25  ;;  %v2613_v2 = vsel %vm2597_vm0, %v6278_v59, 0.0 }
 0x183   :  { %7377 = vst [vmem:[#allocation32_spill] sm:$0xff] %v6394_v55  ;;  %v4858_v10 = vadd.f32 %v4857_v16, %v4856_v45  ;;  %v4795_v18 = vpop.f32.mrf.mxu0  ;;  %v2662_v45 = vsel %vm2597_vm0, %v2641_v8, 0.0  ;;  %v2644_v6 = vmul.f32 %v6283_v4, %v6283_v4 }
 0x184   :  { %v4859_v21 = vpop.f32.mrf.mxu1  ;;  %v2661_v0 = vadd.f32 %v2660_v23, %v2659_v38  ;;  %v2610_v16 = vadd.f32 %v2609_v28, %v2608_v41  ;;  %v2615_v23 = vsel %vm2597_vm0, %v6283_v4, 0.0  ;;  %v2645_v28 = vmul.f32 %v6294_v15, %v6294_v15 }
 0x185   :  { %v6406_v33 = vadd.f32 %v4858_v10, %v4794_v1  ;;  %v4796_v36 = vpop.f32.mrf.mxu0  ;;  %v2664_v1 = vsel %vm2597_vm0, %v2642_v30, 0.0 }
 0x186   :  { %v4797_v43 = vadd.f32 %v4796_v36, %v4795_v18  ;;  %v4860_v56 = vpop.f32.mrf.mxu1  ;;  %v2663_v18 = vadd.f32 %v2662_v45, %v2661_v0  ;;  %v2612_v19 = vadd.f32 %v2611_v53, %v2610_v16  ;;  %v2617_v45 = vsel %vm2597_vm0, %v6294_v15, 0.0 }
 0x187   :  { %7378 = vst [vmem:[#allocation33_spill] sm:$0xff] %v6406_v33  ;;  %v4861_v54 = vadd.f32 %v4860_v56, %v4859_v21  ;;  %v4798_v58 = vpop.f32.mrf.mxu0  ;;  %v2666_v21 = vsel %vm2597_vm0, %v2643_v52, 0.0  ;;  %v2646_v53 = vmul.f32 %v6299_v24, %v6299_v24 }
 0x188   :  { %v4862_v39 = vpop.f32.mrf.mxu1  ;;  %v2665_v41 = vadd.f32 %v2664_v1, %v2663_v18  ;;  %v2614_v56 = vadd.f32 %v2613_v2, %v2612_v19  ;;  %v2619_v1 = vsel %vm2597_vm0, %v6299_v24, 0.0  ;;  %v2647_v2 = vmul.f32 %v6307_v34, %v6307_v34 }
 0x189   :  { %v6418_v8 = vadd.f32 %v4861_v54, %v4797_v43  ;;  %v4799_v10 = vpop.f32.mrf.mxu0  ;;  %v2668_v43 = vsel %vm2597_vm0, %v2644_v6, 0.0 }
 0x18a   :  { %v4800_v25 = vadd.f32 %v4799_v10, %v4798_v58  ;;  %v4863_v36 = vpop.f32.mrf.mxu1  ;;  %v2667_v58 = vadd.f32 %v2666_v21, %v2665_v41  ;;  %v2616_v0 = vadd.f32 %v2615_v23, %v2614_v56  ;;  %v2621_v21 = vsel %vm2597_vm0, %v6307_v34, 0.0 }
 0x18b   :  { %7379 = vst [vmem:[#allocation34_spill] sm:$0xff] %v6418_v8  ;;  %v4864_v30 = vadd.f32 %v4863_v36, %v4862_v39  ;;  %v4801_v38 = vpop.f32.mrf.mxu0  ;;  %v2670_v39 = vsel %vm2597_vm0, %v2645_v28, 0.0  ;;  %v2648_v23 = vmul.f32 %v6309_v42, %v6309_v42 }
 0x18c   :  { %v4865_v59 = vpop.f32.mrf.mxu1  ;;  %v2669_v19 = vadd.f32 %v2668_v43, %v2667_v58  ;;  %v2618_v36 = vadd.f32 %v2617_v45, %v2616_v0 }
 0x18d   :  { %v6430_v52 = vadd.f32 %v4864_v30, %v4800_v25  ;;  %v4802_v54 = vpop.f32.mrf.mxu0  ;;  %v2672_v25 = vsel %vm2597_vm0, %v2646_v53, 0.0  ;;  %v2676_v34 = vsel %vm2597_vm0, %v2648_v23, 0.0 }
 0x18e   :  { %v4803_v16 = vadd.f32 %v4802_v54, %v4801_v38  ;;  %v4866_v10 = vpop.f32.mrf.mxu1  ;;  %v2671_v38 = vadd.f32 %v2670_v39, %v2669_v19  ;;  %v2620_v41 = vadd.f32 %v2619_v1, %v2618_v36  ;;  %v2728_v36 = vmul.f32 %v6319_v22, %v6319_v22 }
 0x18f   :  { %7380 = vst [vmem:[#allocation35_spill] sm:$0xff] %v6430_v52  ;;  %v4867_v6 = vadd.f32 %v4866_v10, %v4865_v59  ;;  %v4804_v18 = vpop.f32.mrf.mxu0  ;;  %v2674_v59 = vsel %vm2597_vm0, %v2647_v2, 0.0  ;;  %v2623_v10 = vsel %vm2597_vm0, %v6309_v42, 0.0  ;;  %v2649_v2 = vmul.f32 %v6311_v51, %v6311_v51 }
 0x190   :  { %v4868_v15 = vpop.f32.mrf.mxu1  ;;  %v2673_v58 = vadd.f32 %v2672_v25, %v2671_v38  ;;  %v2622_v0 = vadd.f32 %v2621_v21, %v2620_v41  ;;  %v2625_v38 = vsel %vm2597_vm0, %v6311_v51, 0.0 }
 0x191   :  { %v6442_v28 = vadd.f32 %v4867_v6, %v4803_v16  ;;  %v4805_v30 = vpop.f32.mrf.mxu0  ;;  %v2727_v16 = vmul.f32 %v6317_v13, %v6317_v13 }
 0x192   :  { %v4806_v56 = vadd.f32 %v4805_v30, %v4804_v18  ;;  %v4869_v54 = vpop.f32.mrf.mxu1  ;;  %v2675_v1 = vadd.f32 %v2674_v59, %v2673_v58  ;;  %v2624_v23 = vadd.f32 %v2623_v10, %v2622_v0  ;;  %v2729_v59 = vmul.f32 %v6321_v31, %v6321_v31 }
 0x193   :  { %7381 = vst [vmem:[#allocation36_spill] sm:$0xff] %v6442_v28  ;;  %v4870_v43 = vadd.f32 %v4869_v54, %v4868_v15  ;;  %v4807_v45 = vpop.f32.mrf.mxu0  ;;  %v2726_v15 = vmul.f32 %v6315_v5, %v6315_v5  ;;  %v2743_v54 = vsel %vm2597_vm0, %v2727_v16, 0.0  ;;  %v2678_v58 = vsel %vm2597_vm0, %v2649_v2, 0.0 }
 0x194   :  { %v4871_v53 = vpop.f32.mrf.mxu1  ;;  %v2677_v30 = vadd.f32 %v2676_v34, %v2675_v1  ;;  %v2688_v34 = vsel %vm2597_vm0, %v6315_v5, 0.0  ;;  %v2745_v16 = vsel %vm2597_vm0, %v2728_v36, 0.0  ;;  %v2730_v1 = vmul.f32 %v6323_v40, %v6323_v40 }
 0x195   :  { %v6450_v6 = vadd.f32 %v4870_v43, %v4806_v56  ;;  %v4808_v39 = vpop.f32.mrf.mxu0  ;;  %v2689_v56 = vsel %vm2597_vm0, %v6317_v13, 0.0  ;;  %v2742_v0 = vsel %vm2597_vm0, %v2726_v15, 0.0  ;;  %v2627_v2 = vsel %vm2597_vm0, %v6313_v60, 0.0 }
 0x196   :  { %v4809_v18 = vadd.f32 %v4808_v39, %v4807_v45  ;;  %v4872_v19 = vpop.f32.mrf.mxu1  ;;  %v2691_v39 = vsel %vm2597_vm0, %v6319_v22, 0.0  ;;  %v2690_v51 = vadd.f32 %v2689_v56, %v2688_v34  ;;  %v2744_v42 = vadd.f32 %v2743_v54, %v2742_v0 }
 0x197   :  { %7382 = vst [vmem:[#allocation37_spill] sm:$0xff] %v6450_v6  ;;  %v4873_v25 = vadd.f32 %v4872_v19, %v4871_v53  ;;  %v4810_v21 = vpop.f32.mrf.mxu0  ;;  %v2693_v15 = vsel %vm2597_vm0, %v6321_v31, 0.0  ;;  %v2731_v36 = vmul.f32 %v6325_v50, %v6325_v50  ;;  %v2695_v56 = vsel %vm2597_vm0, %v6323_v40, 0.0 }
 0x198   :  { %v4874_v41 = vpop.f32.mrf.mxu1  ;;  %v2749_v54 = vsel %vm2597_vm0, %v2730_v1, 0.0  ;;  %v2828_v40 = vmul.f32 %v6442_v28, %v6442_v28 }
 0x199   :  { %v6465_v43 = vadd.f32 %v4873_v25, %v4809_v18  ;;  %v4811_v45 = vpop.f32.mrf.mxu0  ;;  %v2626_v25 = vadd.f32 %v2625_v38, %v2624_v23  ;;  %v2692_v23 = vadd.f32 %v2691_v39, %v2690_v51  ;;  %v2746_v38 = vadd.f32 %v2745_v16, %v2744_v42 }
 0x19a   :  { %v4812_v53 = vadd.f32 %v4811_v45, %v4810_v21  ;;  %v4875_v10 = vpop.f32.mrf.mxu1  ;;  %v2747_v21 = vsel %vm2597_vm0, %v2729_v59, 0.0  ;;  %v2732_v59 = vmul.f32 %v6327_v61, %v6327_v61  ;;  %v2751_v39 = vsel %vm2597_vm0, %v2731_v36, 0.0 }
 0x19b   :  { %7383 = vst [vmem:[#allocation38_spill] sm:$0xff] %v6465_v43  ;;  %v4876_v18 = vadd.f32 %v4875_v10, %v4874_v41  ;;  %v4813_v19 = vpop.f32.mrf.mxu0  ;;  %v6485_v41 = vadd.f32 %v2678_v58, %v2677_v30  ;;  %v6492_v5 = vadd.f32 %v2627_v2, %v2626_v25  ;;  %v2650_v30 = vmul.f32 %v6313_v60, %v6313_v60 }
 0x19c   :  { %v4877_v24 = vpop.f32.mrf.mxu1  ;;  %v2694_v58 = vadd.f32 %v2693_v15, %v2692_v23  ;;  %v2748_v51 = vadd.f32 %v2747_v21, %v2746_v38  ;;  %v2699_v2 = vsel %vm2597_vm0, %v6327_v61, 0.0  ;;  %v2753_v15 = vsel %vm2597_vm0, %v2732_v59, 0.0 }
 0x19d   :  { %v6483_v45 = vadd.f32 %v4876_v18, %v4812_v53  ;;  %v4814_v13 = vpop.f32.mrf.mxu0  ;;  %v2697_v53 = vsel %vm2597_vm0, %v6325_v50, 0.0  ;;  %v2734_v21 = vmul.f32 %v6331_v17, %v6331_v17  ;;  %v2701_v59 = vsel %vm2597_vm0, %v6329_v7, 0.0 }
 0x19e   :  { %v4815_v10 = vadd.f32 %v4814_v13, %v4813_v19  ;;  %v4878_v4 = vpop.f32.mrf.mxu1  ;;  %v6499_v13 = vld [vmem:[%s7302_s4 + $0x10] sm:$0xff]   ;;  %v2696_v1 = vadd.f32 %v2695_v56, %v2694_v58  ;;  %v2750_v18 = vadd.f32 %v2749_v54, %v2748_v51  ;;  %v2819_v58 = vmul.f32 %v6358_v63, %v6358_v63 }
 0x19f   :  { %v4879_v34 = vadd.f32 %v4878_v4, %v4877_v24  ;;  %v4816_v0 = vpop.f32.mrf.mxu0  ;;  %7384 = vst [vmem:[#allocation39_spill] sm:$0xff] %v6499_v13  ;;  %v2733_v4 = vmul.f32 %v6329_v7, %v6329_v7  ;;  %5085 = vmatprep.subr.bf16.mxu1 %v6499_v13  ;;  %5061 = vmatprep.subr.bf16.mxu0 %v6499_v13  ;;  %v2780_v38 = vsel %vm2597_vm0, %v6356_v46, 0.0  ;;  %v2783_v60 = vsel %vm2597_vm0, %v6360_v12, 0.0 }
 0x1a0   :  { %v4880_v42 = vpop.f32.mrf.mxu1  ;;  %5086 = vmatpush3.bf16.msra.mxu1 %v6499_v13  ;;  %5062 = vmatpush3.bf16.msra.mxu0 %v6499_v13  ;;  %v2698_v56 = vadd.f32 %v2697_v53, %v2696_v1  ;;  %v2752_v54 = vadd.f32 %v2751_v39, %v2750_v18  ;;  %v2735_v53 = vmul.f32 %v6333_v27, %v6333_v27  ;;  %v2757_v1 = vsel %vm2597_vm0, %v2734_v21, 0.0 }
 0x1a1   :  { %v6506_v24 = vadd.f32 %v4879_v34, %v4815_v10  ;;  %v4817_v16 = vpop.f32.mrf.mxu0  ;;  %v2680_v10 = vsel %vm2597_vm0, %v2650_v30, 0.0  ;;  %v2703_v30 = vsel %vm2597_vm0, %v6331_v17, 0.0  ;;  %v2781_v18 = vsel %vm2597_vm0, %v6358_v63, 0.0 }
 0x1a2   :  { %v4818_v19 = vadd.f32 %v4817_v16, %v4816_v0  ;;  %v4881_v25 = vpop.f32.mrf.mxu1  ;;  %v2755_v0 = vsel %vm2597_vm0, %v2733_v4, 0.0  ;;  %v2700_v16 = vadd.f32 %v2699_v2, %v2698_v56  ;;  %v2818_v4 = vmul.f32 %v6356_v46, %v6356_v46 }
 0x1a3   :  { %v4882_v36 = vadd.f32 %v4881_v25, %v4880_v42  ;;  %v6515_v23 = vpop.f32.mrf.mxu0  ;;  %v2754_v25 = vadd.f32 %v2753_v15, %v2752_v54  ;;  %v2705_v56 = vsel %vm2597_vm0, %v6333_v27, 0.0  ;;  %v2736_v54 = vmul.f32 %v6335_v37, %v6335_v37 }
 0x1a4   :  { %v6521_v34 = vpop.f32.mrf.mxu1  ;;  %v2702_v15 = vadd.f32 %v2701_v59, %v2700_v16  ;;  %v2835_v63 = vsel %vm2597_vm0, %v2819_v58, 0.0  ;;  %v2821_v59 = vmul.f32 %v6362_v26, %v6362_v26  ;;  %v2759_v13 = vsel %vm2597_vm0, %v2735_v53, 0.0 }
 0x1a5   :  { %v6528_v51 = vadd.f32 %v4882_v36, %v4818_v19  ;;  %v6530_v42 = vpop.f32.mrf.mxu0  ;;  %v2820_v19 = vmul.f32 %v6360_v12, %v6360_v12  ;;  %v2756_v36 = vadd.f32 %v2755_v0, %v2754_v25  ;;  %v2782_v27 = vadd.f32 %v2781_v18, %v2780_v38 }
 0x1a6   :  { %v6536_v39 = vpop.f32.mrf.mxu1  ;;  %v2704_v16 = vadd.f32 %v2703_v30, %v2702_v15  ;;  %v2834_v7 = vsel %vm2597_vm0, %v2818_v4, 0.0  ;;  %v2785_v58 = vsel %vm2597_vm0, %v6362_v26, 0.0  ;;  %v2822_v12 = vmul.f32 %v6366_v44, %v6366_v44 }
 0x1a7   :  { %v6545_v2 = vpop.f32.mrf.mxu0  ;;  %v2758_v25 = vadd.f32 %v2757_v1, %v2756_v36  ;;  %v2837_v46 = vsel %vm2597_vm0, %v2820_v19, 0.0  ;;  %v2707_v30 = vsel %vm2597_vm0, %v6335_v37, 0.0  ;;  %v2836_v53 = vadd.f32 %v2835_v63, %v2834_v7 }
 0x1a8   :  { %v6551_v21 = vpop.f32.mrf.mxu1  ;;  %v2706_v50 = vadd.f32 %v2705_v56, %v2704_v16  ;;  %v2784_v38 = vadd.f32 %v2783_v60, %v2782_v27  ;;  %v2761_v4 = vsel %vm2597_vm0, %v2736_v54, 0.0  ;;  %v2839_v18 = vsel %vm2597_vm0, %v2821_v59, 0.0 }
 0x1a9   :  { %v6560_v0 = vpop.f32.mrf.mxu0  ;;  %v2787_v19 = vsel %vm2597_vm0, %v6366_v44, 0.0  ;;  %v2823_v15 = vmul.f32 %v6381_v14, %v6381_v14  ;;  %v2760_v56 = vadd.f32 %v2759_v13, %v2758_v25  ;;  %v2737_v16 = vmul.f32 %v6337_v48, %v6337_v48 }
 0x1aa   :  { %v6563_v17 = vpop.f32.mrf.mxu1  ;;  %v2838_v7 = vadd.f32 %v2837_v46, %v2836_v53  ;;  %v2786_v60 = vadd.f32 %v2785_v58, %v2784_v38  ;;  %v6590_v63 = vadd.f32 %v2680_v10, %v6485_v41  ;;  %v2841_v54 = vsel %vm2597_vm0, %v2822_v12, 0.0 }
 0x1ab   :  { %v6571_v61 = vpop.f32.mrf.mxu0  ;;  %v2789_v59 = vsel %vm2597_vm0, %v6381_v14, 0.0  ;;  %v2824_v44 = vmul.f32 %v6394_v55, %v6394_v55  ;;  %v2708_v13 = vadd.f32 %v2707_v30, %v2706_v50  ;;  %v2762_v25 = vadd.f32 %v2761_v4, %v2760_v56 }
 0x1ac   :  { %v6575_v1 = vpop.f32.mrf.mxu1  ;;  %v2840_v37 = vadd.f32 %v2839_v18, %v2838_v7  ;;  %v2788_v46 = vadd.f32 %v2787_v19, %v2786_v60  ;;  %v2709_v41 = vsel %vm2597_vm0, %v6337_v48, 0.0  ;;  %v2843_v10 = vsel %vm2597_vm0, %v2823_v15, 0.0 }
 0x1ad   :  { %v6583_v36 = vpop.f32.mrf.mxu0  ;;  %v2791_v12 = vsel %vm2597_vm0, %v6394_v55, 0.0  ;;  %v2825_v53 = vmul.f32 %v6406_v33, %v6406_v33  ;;  %v2763_v50 = vsel %vm2597_vm0, %v2737_v16, 0.0  ;;  %v2711_v30 = vsel %vm2597_vm0, %v6339_v62, 0.0 }
 0x1ae   :  { %v6587_v27 = vpop.f32.mrf.mxu1  ;;  %v2842_v4 = vadd.f32 %v2841_v54, %v2840_v37  ;;  %v2790_v18 = vadd.f32 %v2789_v59, %v2788_v46  ;;  %v2738_v15 = vmul.f32 %v6339_v62, %v6339_v62  ;;  %v2845_v56 = vsel %vm2597_vm0, %v2824_v44, 0.0  ;;  %v6631_v44 = vld [vmem:[%s7302_s4 + $0x8] sm:$0xff]  }
 0x1af   :  { %v6597_v26 = vpop.f32.mrf.mxu0  ;;  %v2793_v7 = vsel %vm2597_vm0, %v6406_v33, 0.0  ;;  %v2826_v60 = vmul.f32 %v6418_v8, %v6418_v8  ;;  %v2710_v16 = vadd.f32 %v2709_v41, %v2708_v13  ;;  %v2713_v37 = vsel %vm2597_vm0, %v6341_v9, 0.0  ;;  %7385 = vst [vmem:[#allocation40_spill] sm:$0xff] %v6631_v44  ;;  %5087 = vmatprep.subr.bf16.mxu1 %v6631_v44  ;;  %5063 = vmatprep.subr.bf16.mxu0 %v6631_v44 }
 0x1b0   :  { %v6599_v58 = vpop.f32.mrf.mxu1  ;;  %v2844_v54 = vadd.f32 %v2843_v10, %v2842_v4  ;;  %v2792_v59 = vadd.f32 %v2791_v12, %v2790_v18  ;;  %v2739_v33 = vmul.f32 %v6341_v9, %v6341_v9  ;;  %v2847_v14 = vsel %vm2597_vm0, %v2825_v53, 0.0  ;;  %5088 = vmatpush3.bf16.msra.mxu1 %v6631_v44  ;;  %5064 = vmatpush3.bf16.msra.mxu0 %v6631_v44 }
 0x1b1   :  { %v6608_v38 = vpop.f32.mrf.mxu0  ;;  %v2795_v13 = vsel %vm2597_vm0, %v6418_v8, 0.0  ;;  %v2827_v41 = vmul.f32 %v6430_v52, %v6430_v52  ;;  %v2764_v12 = vadd.f32 %v2763_v50, %v2762_v25  ;;  %v2712_v4 = vadd.f32 %v2711_v30, %v2710_v16 }
 0x1b2   :  { %v6613_v19 = vpop.f32.mrf.mxu1  ;;  %v2846_v18 = vadd.f32 %v2845_v56, %v2844_v54  ;;  %v2794_v62 = vadd.f32 %v2793_v7, %v2792_v59  ;;  %v2765_v9 = vsel %vm2597_vm0, %v2738_v15, 0.0  ;;  %v2849_v53 = vsel %vm2597_vm0, %v2826_v60, 0.0  ;;  %v6662_v7 = vld [vmem:[%s7302_s4] sm:$0xff]  }
 0x1b3   :  { %v6622_v55 = vpop.f32.mrf.mxu0  ;;  %v2797_v8 = vsel %vm2597_vm0, %v6430_v52, 0.0  ;;  %v2714_v25 = vadd.f32 %v2713_v37, %v2712_v4  ;;  %v2715_v50 = vsel %vm2597_vm0, %v6343_v20, 0.0  ;;  %v2767_v60 = vsel %vm2597_vm0, %v2739_v33, 0.0  ;;  %5089 = vmatprep.subr.bf16.mxu1 %v6662_v7  ;;  %5065 = vmatprep.subr.bf16.mxu0 %v6662_v7 }
 0x1b4   :  { %v6626_v46 = vpop.f32.mrf.mxu1  ;;  %v2848_v30 = vadd.f32 %v2847_v14, %v2846_v18  ;;  %v2796_v15 = vadd.f32 %v2795_v13, %v2794_v62  ;;  %v2740_v16 = vmul.f32 %v6343_v20, %v6343_v20  ;;  %v2851_v37 = vsel %vm2597_vm0, %v2827_v41, 0.0  ;;  %5090 = vmatpush3.bf16.msra.mxu1 %v6662_v7  ;;  %5066 = vmatpush3.bf16.msra.mxu0 %v6662_v7 }
 0x1b5   :  { %v6640_v10 = vpop.f32.mrf.mxu0  ;;  %v2799_v14 = vsel %vm2597_vm0, %v6442_v28, 0.0  ;;  %v2717_v54 = vsel %vm2597_vm0, %v6350_v35, 0.0  ;;  %v2829_v4 = vmul.f32 %v6450_v6, %v6450_v6  ;;  %v2766_v33 = vadd.f32 %v2765_v9, %v2764_v12  ;;  %5131 = vmatprep.subr.bf16.mxu1 %v6348_v32  ;;  %5107 = vmatprep.subr.bf16.mxu0 %v6348_v32 }
 0x1b6   :  { %v6642_v48 = vpop.f32.mrf.mxu1  ;;  %v2850_v59 = vadd.f32 %v2849_v53, %v2848_v30  ;;  %v2798_v13 = vadd.f32 %v2797_v8, %v2796_v15  ;;  %v2716_v41 = vadd.f32 %v2715_v50, %v2714_v25  ;;  %v2853_v28 = vsel %vm2597_vm0, %v2828_v40, 0.0 }
 0x1b7   :  { %v6651_v47 = vpop.f32.mrf.mxu0  ;;  %v2801_v52 = vsel %vm2597_vm0, %v6450_v6, 0.0  ;;  %v7386_v8 = vrot.slane %v6492_v5, 4  ;;  %v2682_v30 = vrot.slane %v6590_v63, 4  ;;  %v2768_v40 = vadd.f32 %v2767_v60, %v2766_v33 }
 0x1b8   :  { %v6657_v56 = vpop.f32.mrf.mxu1  ;;  %v2852_v15 = vadd.f32 %v2851_v37, %v2850_v59  ;;  %v2800_v44 = vadd.f32 %v2799_v14, %v2798_v13  ;;  %v2769_v12 = vsel %vm2597_vm0, %v2740_v16, 0.0  ;;  %v2718_v25 = vadd.f32 %v2717_v54, %v2716_v41 }
 0x1b9   :  { %v6671_v62 = vpop.f32.mrf.mxu0  ;;  %v6690_v53 = vadd.f32 %v7386_v8, %v6492_v5  ;;  %v2741_v50 = vmul.f32 %v6350_v35, %v6350_v35  ;;  %v2855_v37 = vsel %vm2597_vm0, %v2829_v4, 0.0  ;;  %v2830_v14 = vmul.f32 %v6465_v43, %v6465_v43 }
 0x1ba   :  { %v6677_v18 = vpop.f32.mrf.mxu1  ;;  %v2854_v5 = vadd.f32 %v2853_v28, %v2852_v15  ;;  %v2802_v8 = vadd.f32 %v2801_v52, %v2800_v44  ;;  %v2803_v60 = vsel %vm2597_vm0, %v6465_v43, 0.0  ;;  %v2831_v16 = vmul.f32 %v6483_v45, %v6483_v45 }
 0x1bb   :  { %v6684_v20 = vpop.f32.mrf.mxu0  ;;  %v4904_v54 = vadd.f32 %v6560_v0, %v6545_v2  ;;  %v4968_v32 = vadd.f32 %v6563_v17, %v6551_v21  ;;  %v4901_v52 = vadd.f32 %v6530_v42, %v6515_v23  ;;  %v4965_v44 = vadd.f32 %v6536_v39, %v6521_v34 }
 0x1bc   :  { %v6693_v9 = vpop.f32.mrf.mxu1  ;;  %v4907_v13 = vadd.f32 %v6583_v36, %v6571_v61  ;;  %v4971_v4 = vadd.f32 %v6587_v27, %v6575_v1  ;;  %v2631_v41 = vrot.slane %v6690_v53, 2  ;;  %v2770_v2 = vadd.f32 %v2769_v12, %v2768_v40 }
 0x1bd   :  { %v4918_v6 = vpop.f32.mrf.mxu0  ;;  %v2719_v0 = vrot.slane %v2718_v25, 4  ;;  %v2771_v17 = vsel %vm2597_vm0, %v2741_v50, 0.0  ;;  %v2856_v15 = vadd.f32 %v2855_v37, %v2854_v5  ;;  %v2804_v43 = vadd.f32 %v2803_v60, %v2802_v8 }
 0x1be   :  { %v4982_v59 = vpop.f32.mrf.mxu1  ;;  %v2857_v23 = vsel %vm2597_vm0, %v2830_v14, 0.0  ;;  %v2805_v34 = vsel %vm2597_vm0, %v6483_v45, 0.0  ;;  %v2859_v61 = vsel %vm2597_vm0, %v2831_v16, 0.0  ;;  %v6726_v39 = vadd.f32 %v4968_v32, %v4904_v54 }
 0x1bf   :  { %v4920_v28 = vpop.f32.mrf.mxu0  ;;  %v4910_v1 = vadd.f32 %v6608_v38, %v6597_v26  ;;  %v4974_v36 = vadd.f32 %v6613_v19, %v6599_v58  ;;  %v6732_v40 = vadd.f32 %v4965_v44, %v4901_v52  ;;  %v6734_v12 = vadd.f32 %v4971_v4, %v4907_v13 }
 0x1c0   :  { %v4984_v33 = vpop.f32.mrf.mxu1  ;;  %v4913_v50 = vadd.f32 %v6640_v10, %v6622_v55  ;;  %v4977_v5 = vadd.f32 %v6642_v48, %v6626_v46  ;;  %v6741_v37 = vadd.f32 %v2682_v30, %v6590_v63  ;;  %v2858_v14 = vadd.f32 %v2857_v23, %v2856_v15 }
 0x1c1   :  { %v4921_v21 = vpop.f32.mrf.mxu0  ;;  %v2807_v26 = vsel %vm2597_vm0, %v6506_v24, 0.0  ;;  %v2832_v58 = vmul.f32 %v6506_v24, %v6506_v24  ;;  %v6747_v19 = vadd.f32 %v2771_v17, %v2770_v2  ;;  %v2806_v60 = vadd.f32 %v2805_v34, %v2804_v43 }
 0x1c2   :  { %v4985_v42 = vpop.f32.mrf.mxu1  ;;  %v4916_v55 = vadd.f32 %v6671_v62, %v6651_v47  ;;  %v4980_v48 = vadd.f32 %v6677_v18, %v6657_v56  ;;  %v6753_v63 = vadd.f32 %v2719_v0, %v2718_v25  ;;  %v6755_v10 = vadd.f32 %v2859_v61, %v2858_v14 }
 0x1c3   :  { %v4923_v27 = vpop.f32.mrf.mxu0  ;;  %v2911_v30 = vmul.f32 %v6726_v39, %v6726_v39  ;;  %v6759_v16 = vadd.f32 %v4974_v36, %v4910_v1  ;;  %v6761_v32 = vadd.f32 %v2807_v26, %v2806_v60  ;;  %v2910_v43 = vmul.f32 %v6732_v40, %v6732_v40 }
 0x1c4   :  { %v4987_v8 = vpop.f32.mrf.mxu1  ;;  %v2912_v47 = vmul.f32 %v6734_v12, %v6734_v12  ;;  %v6767_v56 = vadd.f32 %v4977_v5, %v4913_v50  ;;  %v6770_v18 = vsel %vm2597_vm0, %v2832_v58, 0.0  ;;  %v2873_v25 = vsel %vm2597_vm0, %v6726_v39, 0.0 }
 0x1c5   :  { %v4924_v38 = vpop.f32.mrf.mxu0  ;;  %v4919_v52 = vadd.f32 %v4918_v6, %v6684_v20  ;;  %v4983_v44 = vadd.f32 %v4982_v59, %v6693_v9  ;;  %v2833_v4 = vmul.f32 %v6528_v51, %v6528_v51  ;;  %v6778_v2 = vadd.f32 %v4980_v48, %v4916_v55 }
 0x1c6   :  { %v4988_v46 = vpop.f32.mrf.mxu1  ;;  %v4922_v0 = vadd.f32 %v4921_v21, %v4920_v28  ;;  %v4986_v17 = vadd.f32 %v4985_v42, %v4984_v33  ;;  %v2872_v23 = vsel %vm2597_vm0, %v6732_v40, 0.0  ;;  %v2927_v34 = vsel %vm2597_vm0, %v2911_v30, 0.0 }
 0x1c7   :  { %v4926_v54 = vpop.f32.mrf.mxu0  ;;  %v2875_v61 = vsel %vm2597_vm0, %v6734_v12, 0.0  ;;  %v2913_v20 = vmul.f32 %v6759_v16, %v6759_v16  ;;  %v2926_v9 = vsel %vm2597_vm0, %v2910_v43, 0.0  ;;  %v2874_v59 = vadd.f32 %v2873_v25, %v2872_v23 }
 0x1c8   :  { %v4990_v62 = vpop.f32.mrf.mxu1  ;;  %v2929_v1 = vsel %vm2597_vm0, %v2912_v47, 0.0  ;;  %v2914_v28 = vmul.f32 %v6767_v56, %v6767_v56  ;;  %v2877_v21 = vsel %vm2597_vm0, %v6759_v16, 0.0  ;;  %v6793_v42 = vadd.f32 %v4983_v44, %v4919_v52 }
 0x1c9   :  { %v4927_v13 = vpop.f32.mrf.mxu0  ;;  %v4925_v36 = vadd.f32 %v4924_v38, %v4923_v27  ;;  %v4989_v50 = vadd.f32 %v4988_v46, %v4987_v8  ;;  %v2928_v14 = vadd.f32 %v2927_v34, %v2926_v9  ;;  %v2876_v26 = vadd.f32 %v2875_v61, %v2874_v59 }
 0x1ca   :  { %v4991_v15 = vpop.f32.mrf.mxu1  ;;  %v2915_v58 = vmul.f32 %v6778_v2, %v6778_v2  ;;  %v6797_v60 = vadd.f32 %v4986_v17, %v4922_v0  ;;  %v2931_v48 = vsel %vm2597_vm0, %v2913_v20, 0.0  ;;  %v2879_v30 = vsel %vm2597_vm0, %v6767_v56, 0.0 }
 0x1cb   :  { %v4929_v6 = vpop.f32.mrf.mxu0  ;;  %v4928_v43 = vadd.f32 %v4927_v13, %v4926_v54  ;;  %v4992_v47 = vadd.f32 %v4991_v15, %v4990_v62  ;;  %v2930_v52 = vadd.f32 %v2929_v1, %v2928_v14  ;;  %v2878_v27 = vadd.f32 %v2877_v21, %v2876_v26 }
 0x1cc   :  { %v4993_v33 = vpop.f32.mrf.mxu1  ;;  %v2933_v8 = vsel %vm2597_vm0, %v2914_v28, 0.0  ;;  %v2881_v38 = vsel %vm2597_vm0, %v6778_v2, 0.0  ;;  %v2916_v44 = vmul.f32 %v6793_v42, %v6793_v42  ;;  %v6807_v0 = vadd.f32 %v4989_v50, %v4925_v36 }
 0x1cd   :  { %v4930_v5 = vpop.f32.mrf.mxu0  ;;  %v2932_v61 = vadd.f32 %v2931_v48, %v2930_v52  ;;  %v2880_v54 = vadd.f32 %v2879_v30, %v2878_v27  ;;  %v2935_v62 = vsel %vm2597_vm0, %v2915_v58, 0.0  ;;  %v2917_v13 = vmul.f32 %v6797_v60, %v6797_v60 }
 0x1ce   :  { %v4994_v55 = vpop.f32.mrf.mxu1  ;;  %v4931_v17 = vadd.f32 %v4930_v5, %v4929_v6  ;;  %v2883_v20 = vsel %vm2597_vm0, %v6793_v42, 0.0  ;;  %v6814_v9 = vadd.f32 %v4992_v47, %v4928_v43  ;;  %v2809_v6 = vsel %vm2597_vm0, %v6528_v51, 0.0 }
 0x1cf   :  { %v4932_v25 = vpop.f32.mrf.mxu0  ;;  %v4995_v23 = vadd.f32 %v4994_v55, %v4993_v33  ;;  %v2863_v33 = vsel %vm2597_vm0, %v2833_v4, 0.0  ;;  %v2934_v21 = vadd.f32 %v2933_v8, %v2932_v61  ;;  %v2882_v36 = vadd.f32 %v2881_v38, %v2880_v54 }
 0x1d0   :  { %v4996_v46 = vpop.f32.mrf.mxu1  ;;  %v2937_v5 = vsel %vm2597_vm0, %v2916_v44, 0.0  ;;  %v2885_v14 = vsel %vm2597_vm0, %v6797_v60, 0.0  ;;  %v2918_v26 = vmul.f32 %v6807_v0, %v6807_v0  ;;  %v2939_v43 = vsel %vm2597_vm0, %v2917_v13, 0.0 }
 0x1d1   :  { %v4933_v34 = vpop.f32.mrf.mxu0  ;;  %v6824_v58 = vadd.f32 %v4995_v23, %v4931_v17  ;;  %v2936_v48 = vadd.f32 %v2935_v62, %v2934_v21  ;;  %v2884_v30 = vadd.f32 %v2883_v20, %v2882_v36  ;;  %v2919_v52 = vmul.f32 %v6814_v9, %v6814_v9 }
 0x1d2   :  { %v4997_v15 = vpop.f32.mrf.mxu1  ;;  %v4934_v59 = vadd.f32 %v4933_v34, %v4932_v25  ;;  %v2887_v25 = vsel %vm2597_vm0, %v6807_v0, 0.0  ;;  %v2810_v44 = vadd.f32 %v2809_v6, %v6761_v32  ;;  %v2941_v61 = vsel %vm2597_vm0, %v2918_v26, 0.0 }
 0x1d3   :  { %v4998_v1 = vadd.f32 %v4997_v15, %v4996_v46  ;;  %v4935_v28 = vpop.f32.mrf.mxu0  ;;  %v2862_v46 = vadd.f32 %v6770_v18, %v6755_v10  ;;  %v2938_v17 = vadd.f32 %v2937_v5, %v2936_v48  ;;  %v2886_v23 = vadd.f32 %v2885_v14, %v2884_v30 }
 0x1d4   :  { %v4999_v50 = vpop.f32.mrf.mxu1  ;;  %v2889_v54 = vsel %vm2597_vm0, %v6814_v9, 0.0  ;;  %v2920_v62 = vmul.f32 %v6824_v58, %v6824_v58  ;;  %v2943_v32 = vsel %vm2597_vm0, %v2919_v52, 0.0  ;;  %v2811_v5 = vrot.slane %v2810_v44, 4 }
 0x1d5   :  { %v4936_v55 = vpop.f32.mrf.mxu0  ;;  %v6831_v27 = vadd.f32 %v4998_v1, %v4934_v59  ;;  %v2864_v20 = vadd.f32 %v2863_v33, %v2862_v46  ;;  %v2940_v59 = vadd.f32 %v2939_v43, %v2938_v17  ;;  %v2888_v1 = vadd.f32 %v2887_v25, %v2886_v23 }
 0x1d6   :  { %v4937_v47 = vadd.f32 %v4936_v55, %v4935_v28  ;;  %v5000_v4 = vpop.f32.mrf.mxu1  ;;  %v2891_v28 = vsel %vm2597_vm0, %v6824_v58, 0.0  ;;  %v2945_v55 = vsel %vm2597_vm0, %v2920_v62, 0.0  ;;  %v2812_v62 = vadd.f32 %v2811_v5, %v2810_v44 }
 0x1d7   :  { %v5001_v8 = vadd.f32 %v5000_v4, %v4999_v50  ;;  %v4938_v38 = vpop.f32.mrf.mxu0  ;;  %v2921_v6 = vmul.f32 %v6831_v27, %v6831_v27  ;;  %v2773_v50 = vrot.slane %v6747_v19, 4  ;;  %v2942_v14 = vadd.f32 %v2941_v61, %v2940_v59 }
 0x1d8   :  { %v5002_v34 = vpop.f32.mrf.mxu1  ;;  %v2890_v26 = vadd.f32 %v2889_v54, %v2888_v1  ;;  %v2893_v48 = vsel %vm2597_vm0, %v6831_v27, 0.0  ;;  %v2865_v4 = vrot.slane %v2864_v20, 4 }
 0x1d9   :  { %v6841_v13 = vadd.f32 %v5001_v8, %v4937_v47  ;;  %v4939_v15 = vpop.f32.mrf.mxu0  ;;  %v2944_v25 = vadd.f32 %v2943_v32, %v2942_v14  ;;  %v2947_v46 = vsel %vm2597_vm0, %v2921_v6, 0.0  ;;  %v2774_v54 = vadd.f32 %v2773_v50, %v6747_v19 }
 0x1da   :  { %v4940_v10 = vadd.f32 %v4939_v15, %v4938_v38  ;;  %v5003_v18 = vpop.f32.mrf.mxu1  ;;  %v2892_v52 = vadd.f32 %v2891_v28, %v2890_v26 }
 0x1db   :  { %v5004_v21 = vadd.f32 %v5003_v18, %v5002_v34  ;;  %v4941_v36 = vpop.f32.mrf.mxu0  ;;  %v2922_v30 = vmul.f32 %v6841_v13, %v6841_v13  ;;  %v2895_v17 = vsel %vm2597_vm0, %v6841_v13, 0.0  ;;  %v2946_v15 = vadd.f32 %v2945_v55, %v2944_v25 }
 0x1dc   :  { %v5005_v33 = vpop.f32.mrf.mxu1  ;;  %v2894_v59 = vadd.f32 %v2893_v48, %v2892_v52  ;;  %v2775_v55 = vrot.slane %v2774_v54, 2  ;;  %v2813_v48 = vrot.slane %v2812_v62, 2  ;;  %v2684_v25 = vrot.slane %v6741_v37, 2 }
 0x1dd   :  { %v6854_v43 = vadd.f32 %v5004_v21, %v4940_v10  ;;  %v4942_v47 = vpop.f32.mrf.mxu0  ;;  %v2721_v10 = vrot.slane %v6753_v63, 2  ;;  %v2949_v18 = vsel %vm2597_vm0, %v2922_v30, 0.0  ;;  %v2866_v21 = vadd.f32 %v2865_v4, %v2864_v20 }
 0x1de   :  { %v4943_v8 = vadd.f32 %v4942_v47, %v4941_v36  ;;  %v5006_v38 = vpop.f32.mrf.mxu1  ;;  %v2948_v36 = vadd.f32 %v2947_v46, %v2946_v15  ;;  %v2896_v14 = vadd.f32 %v2895_v17, %v2894_v59  ;;  %v2632_v17 = vadd.f32 %v2631_v41, %v6690_v53 }
 0x1df   :  { %v2923_v23 = vmul.f32 %v6854_v43, %v6854_v43  ;;  %v5007_v34 = vadd.f32 %v5006_v38, %v5005_v33  ;;  %v4944_v61 = vpop.f32.mrf.mxu0  ;;  %v2897_v32 = vsel %vm2597_vm0, %v6854_v43, 0.0  ;;  %v2722_v52 = vadd.f32 %v2721_v10, %v6753_v63 }
 0x1e0   :  { %v5008_v1 = vpop.f32.mrf.mxu1  ;;  %v2950_v30 = vadd.f32 %v2949_v18, %v2948_v36  ;;  %v2898_v47 = vadd.f32 %v2897_v32, %v2896_v14  ;;  %v2814_v15 = vadd.f32 %v2813_v48, %v2812_v62  ;;  %v2685_v18 = vadd.f32 %v2684_v25, %v6741_v37 }
 0x1e1   :  { %v6866_v28 = vadd.f32 %v5007_v34, %v4943_v8  ;;  %v4945_v6 = vpop.f32.mrf.mxu0  ;;  %v2951_v19 = vsel %vm2597_vm0, %v2923_v23, 0.0  ;;  %v2867_v8 = vrot.slane %v2866_v21, 2  ;;  %v2723_v10 = vrot.slane %v2722_v52, 1 }
 0x1e2   :  { %v4946_v26 = vadd.f32 %v4945_v6, %v4944_v61  ;;  %v5009_v33 = vpop.f32.mrf.mxu1  ;;  %v2952_v38 = vadd.f32 %v2951_v19, %v2950_v30  ;;  %v2776_v61 = vadd.f32 %v2775_v55, %v2774_v54  ;;  %v2633_v14 = vrot.slane %v2632_v17, 1 }
 0x1e3   :  { %v2899_v44 = vsel %vm2597_vm0, %v6866_v28, 0.0  ;;  %v2924_v50 = vmul.f32 %v6866_v28, %v6866_v28  ;;  %v5010_v5 = vadd.f32 %v5009_v33, %v5008_v1  ;;  %v2868_v32 = vadd.f32 %v2867_v8, %v2866_v21 }
 0x1e4   :  { %v2900_v46 = vadd.f32 %v2899_v44, %v2898_v47  ;;  %v2777_v53 = vrot.slane %v2776_v61, 1  ;;  %v2815_v41 = vrot.slane %v2814_v15, 1  ;;  %v2686_v19 = vrot.slane %v2685_v18, 1 }
 0x1e5   :  { %v2953_v20 = vsel %vm2597_vm0, %v2924_v50, 0.0  ;;  %v6875_v4 = vadd.f32 %v5010_v5, %v4946_v26  ;;  %v2724_v44 = vadd.f32 %v2723_v10, %v2722_v52  ;;  %v2869_v50 = vrot.slane %v2868_v32, 1 }
 0x1e6   :  { %v2954_v59 = vadd.f32 %v2953_v20, %v2952_v38  ;;  %v2634_v5 = vadd.f32 %v2633_v14, %v2632_v17  ;;  %v2778_v55 = vadd.f32 %v2777_v53, %v2776_v61  ;;  %v2816_v48 = vadd.f32 %v2815_v41, %v2814_v15 }
 0x1e7   :  { %v2901_v23 = vsel %vm2597_vm0, %v6875_v4, 0.0  ;;  %v2925_v34 = vmul.f32 %v6875_v4, %v6875_v4  ;;  %v2687_v47 = vadd.f32 %v2686_v19, %v2685_v18  ;;  %v2870_v21 = vadd.f32 %v2869_v50, %v2868_v32  ;;  %v2595_v32 = vld [vmem:[%s7303_s2] sm:$0x1] }
 0x1e8   :  { %v2902_v1 = vadd.f32 %v2901_v23, %v2900_v46  ;;  %v2725_v25 = vadd.f32 %v2724_v44, %v2634_v5 }
 0x1e9   :  { %v2955_v63 = vsel %vm2597_vm0, %v2925_v34, 0.0  ;;  %v2779_v38 = vadd.f32 %v2778_v55, %v2687_v47 }
 0x1ea   :  { %v2903_v6 = vrot.slane %v2902_v1, 4  ;;  %v2956_v36 = vadd.f32 %v2955_v63, %v2954_v59  ;;  %v2817_v46 = vadd.f32 %v2816_v48, %v2725_v25 }
 0x1eb   :  { %v2871_v59 = vadd.f32 %v2870_v21, %v2779_v38  ;;  %v7387_v21 = vld [vmem:[#allocation2_spill] sm:$0xff] }
 0x1ec   :  { %v2904_v26 = vadd.f32 %v2903_v6, %v2902_v1  ;;  %v2957_v33 = vrot.slane %v2956_v36, 4 }
 0x1ee   :  { %v2905_v54 = vrot.slane %v2904_v26, 2  ;;  %v2958_v62 = vadd.f32 %v2957_v33, %v2956_v36  ;;  %v2973_v36 = vlaneseq }
 0x1f0   :  { %v2906_v37 = vadd.f32 %v2905_v54, %v2904_v26  ;;  %v2959_v30 = vrot.slane %v2958_v62, 2  ;;  %v2974_v18 = vshrl.u32 %v2973_v36, 7  ;;  %v2596_v26 = vld [vmem:[%s7304_s3] sm:$0x1] }
 0x1f1   :  { %v7394_v36 = vld [vmem:[#allocation14_spill] sm:$0xff] }
 0x1f2   :  { %v2907_v20 = vrot.slane %v2906_v37, 1  ;;  %v2960_v8 = vadd.f32 %v2959_v30, %v2958_v62  ;;  %v2975_v14 = vsub.s32 0, %v2974_v18 }
 0x1f4   :  { %v2908_v23 = vadd.f32 %v2907_v20, %v2906_v37  ;;  %v2961_v34 = vrot.slane %v2960_v8, 1 }
 0x1f6   :  { %v2909_v1 = vadd.f32 %v2908_v23, %v2817_v46  ;;  %v2962_v52 = vadd.f32 %v2961_v34, %v2960_v8  ;;  %v7388_v46 = vld [vmem:[#allocation3_spill] sm:$0xff]  ;;  %v7389_v23 = vld [vmem:[#allocation4_spill] sm:$0xff]  ;;  %v7390_v34 = vld [vmem:[#allocation13_spill] sm:$0xff] }
 0x1f8   :  { %v2963_v63 = vadd.f32 %v2962_v52, %v2871_v59  ;;  %v2964_v10 = vmul.f32 0.001953125, %v2909_v1  ;;  %v7391_v52 = vld [vmem:[#allocation5_spill] sm:$0xff] }
 0x1fa   :  { %v2965_v6 = vmul.f32 0.001953125, %v2963_v63  ;;  %v2966_v17 = vmul.f32 %v2964_v10, %v2964_v10  ;;  %v7392_v63 = vld [vmem:[#allocation15_spill] sm:$0xff] }
 0x1fc   :  { %v2967_v61 = vsub.f32 %v2965_v6, %v2966_v17 }
 0x1fe   :  { %v2968_v15 = vadd.f32 1e-05, %v2967_v61  ;;  %v7393_v61 = vld [vmem:[#allocation6_spill] sm:$0xff] }
 0x200   :  { %5480 = vrsqrt.f32 %v2968_v15 }
 0x20d   :  { %v5481_v53 = vpop.eup %5480 }
 0x20e   :  { %v2970_v41 = vmul.f32 %v5481_v53, %v2595_v32  ;;  %v7395_v32 = vld [vmem:[#allocation16_spill] sm:$0xff]  ;;  %v7396_v53 = vld [vmem:[#allocation17_spill] sm:$0xff] }
 0x210   :  { %v2971_v33 = vmul.f32 %v2970_v41, %v2964_v10  ;;  %v6893_v19 = vrot.slane %v2970_v41, %v2975_v14 }
 0x212   :  { %v2972_v44 = vsub.f32 %v2596_v26, %v2971_v33  ;;  %v3560_v54 = vmul.f32 %v6893_v19, %v6866_v28  ;;  %v3561_v62 = vmul.f32 %v6893_v19, %v6875_v4  ;;  %v2977_v47 = vmul.f32 %v6893_v19, %v6214_v49  ;;  %v7397_v26 = vld [vmem:[#allocation18_spill] sm:$0xff] }
 0x213   :  { %v2978_v25 = vmul.f32 %v6893_v19, %v6219_v57  ;;  %v2979_v28 = vmul.f32 %v6893_v19, %v6230_v3  ;;  %v2980_v4 = vmul.f32 %v6893_v19, %v6235_v11  ;;  %v2981_v20 = vmul.f32 %v6893_v19, %v7387_v21 }
 0x214   :  { %v6895_v50 = vrot.slane %v2972_v44, %v2975_v14  ;;  %v3194_v8 = vmul.f32 %v6893_v19, %v6319_v22  ;;  %v3195_v38 = vmul.f32 %v6893_v19, %v6321_v31  ;;  %v2982_v49 = vmul.f32 %v6893_v19, %v6251_v29  ;;  %v7398_v44 = vld [vmem:[#allocation19_spill] sm:$0xff] }
 0x215   :  { %v2983_v57 = vmul.f32 %v6893_v19, %v7388_v46  ;;  %v2984_v3 = vmul.f32 %v6893_v19, %v7389_v23  ;;  %v3192_v11 = vmul.f32 %v6893_v19, %v7390_v34  ;;  %v2985_v29 = vmul.f32 %v6893_v19, %v7391_v52 }
 0x216   :  { %v3576_v5 = vadd.f32 %v3560_v54, %v6895_v50  ;;  %v3577_v55 = vadd.f32 %v3561_v62, %v6895_v50  ;;  %v3210_v59 = vadd.f32 %v3194_v8, %v6895_v50  ;;  %v3211_v1 = vadd.f32 %v3195_v38, %v6895_v50  ;;  %v7399_v38 = vld [vmem:[#allocation20_spill] sm:$0xff] }
 0x217   :  { %v3001_v22 = vadd.f32 %v6895_v50, %v2979_v28  ;;  %v3002_v31 = vadd.f32 %v6895_v50, %v2980_v4  ;;  %v3196_v10 = vmul.f32 %v6893_v19, %v7392_v63  ;;  %v3208_v6 = vadd.f32 %v3192_v11, %v6895_v50 }
 0x218   :  { %v3592_v48 = vmax.f32 %v3576_v5, 0.0  ;;  %v3593_v37 = vmax.f32 %v3577_v55, 0.0  ;;  %v2999_v17 = vadd.f32 %v6895_v50, %v2977_v47  ;;  %v2986_v15 = vmul.f32 %v6893_v19, %v7393_v61 }
 0x219   :  { %v3193_v18 = vmul.f32 %v6893_v19, %v7394_v36  ;;  %v3197_v14 = vmul.f32 %v6893_v19, %v7395_v32  ;;  %v3198_v41 = vmul.f32 %v6893_v19, %v7396_v53  ;;  %v3199_v33 = vmul.f32 %v6893_v19, %v7397_v26  ;;  %v7400_v26 = vld [vmem:[#allocation7_spill] sm:$0xff] }
 0x21a   :  { %v6903_v30 = vpack.c.bf16 %v3593_v37, %v3592_v48  ;;  %v3200_v54 = vmul.f32 %v6893_v19, %v7398_v44  ;;  %v3212_v62 = vadd.f32 %v3196_v10, %v6895_v50  ;;  %v3003_v5 = vadd.f32 %v6895_v50, %v2981_v20  ;;  %v7401_v44 = vld [vmem:[#allocation8_spill] sm:$0xff] }
 0x21b   :  { %v3226_v55 = vmax.f32 %v3210_v59, 0.0  ;;  %v3227_v48 = vmax.f32 %v3211_v1, 0.0  ;;  %v3017_v37 = vmax.f32 %v3001_v22, 0.0  ;;  %v3018_v47 = vmax.f32 %v3002_v31, 0.0 }
 0x21c   :  { %v3000_v28 = vadd.f32 %v6895_v50, %v2978_v25  ;;  %v3015_v4 = vmax.f32 %v2999_v17, 0.0  ;;  %v3209_v21 = vadd.f32 %v3193_v18, %v6895_v50  ;;  %v3224_v8 = vmax.f32 %v3208_v6, 0.0 }
 0x21d   :  { %v3201_v46 = vmul.f32 %v6893_v19, %v7399_v38  ;;  %v3214_v23 = vadd.f32 %v3198_v41, %v6895_v50  ;;  %v3004_v34 = vadd.f32 %v6895_v50, %v2982_v49  ;;  %v3213_v11 = vadd.f32 %v3197_v14, %v6895_v50 }
 0x21e   :  { %v3016_v20 = vmax.f32 %v3000_v28, 0.0  ;;  %v3225_v59 = vmax.f32 %v3209_v21, 0.0  ;;  %v3019_v1 = vmax.f32 %v3003_v5, 0.0  ;;  %v3228_v22 = vmax.f32 %v3212_v62, 0.0  ;;  %v7402_v62 = vld [vmem:[#allocation21_spill] sm:$0xff]  ;;  %v7404_v5 = vld [vmem:[#allocation23_spill] sm:$0xff] }
 0x21f   :  { %v3241_v31 = vpack.c.bf16 %v3227_v48, %v3226_v55  ;;  %v3032_v52 = vpack.c.bf16 %v3018_v47, %v3017_v37  ;;  %v3020_v25 = vmax.f32 %v3004_v34, 0.0  ;;  %v3229_v63 = vmax.f32 %v3213_v11, 0.0  ;;  %v5482_v21 = vld [vmem:[%s7302_s4 + $0x18] sm:$0xff]  }
 0x220   :  { %v3215_v10 = vadd.f32 %v3199_v33, %v6895_v50  ;;  %v3216_v6 = vadd.f32 %v3200_v54, %v6895_v50  ;;  %v3031_v17 = vpack.c.bf16 %v3016_v20, %v3015_v4  ;;  %v3240_v61 = vpack.c.bf16 %v3225_v59, %v3224_v8  ;;  %v7406_v8 = vld [vmem:[#allocation39_spill] sm:$0xff]  ;;  %v7407_v20 = vld [vmem:[#allocation9_spill] sm:$0xff]  ;;  %v7408_v59 = vld [vmem:[#allocation10_spill] sm:$0xff] }
 0x221   :  { %v3217_v36 = vadd.f32 %v3201_v46, %v6895_v50  ;;  %v3005_v49 = vadd.f32 %v6895_v50, %v2983_v57  ;;  %v3006_v18 = vadd.f32 %v6895_v50, %v2984_v3  ;;  %v3007_v32 = vadd.f32 %v6895_v50, %v2985_v29  ;;  %v7403_v3 = vld [vmem:[#allocation22_spill] sm:$0xff] }
 0x222   :  { %5067 = vmatprep.mubr.msk.bf16.mxu0 %vm2597_vm0, %v3031_v17  ;;  %5091 = vmatprep.mubr.msk.bf16.mxu1 %vm2597_vm0, %v3240_v61  ;;  %v3033_v14 = vpack.c.bf16 %v3020_v25, %v3019_v1  ;;  %v3242_v53 = vpack.c.bf16 %v3229_v63, %v3228_v22  ;;  %v3008_v41 = vadd.f32 %v6895_v50, %v2986_v15  ;;  %v7405_v15 = vld [vmem:[#allocation24_spill] sm:$0xff]  ;;  %v3230_v37 = vmax.f32 %v3214_v23, 0.0 }
 0x223   :  { %v2987_v33 = vmul.f32 %v6893_v19, %v7400_v26  ;;  %v2988_v54 = vmul.f32 %v6893_v19, %v7401_v44  ;;  %v3202_v57 = vmul.f32 %v6893_v19, %v7402_v62  ;;  %5068 = vmatmul.mubr.msk.bf16.vlgmr.msra.gmra.mxu0 %vm2597_vm0, %v3032_v52  ;;  %5092 = vmatmul.mubr.msk.bf16.vlgmr.msra.gmra.mxu1 %vm2597_vm0, %v3241_v31  ;;  %v3231_v47 = vmax.f32 %v3215_v10, 0.0  ;;  %v7411_v26 = vld [vmem:[#allocation12_spill] sm:$0xff]  ;;  %v7412_v44 = vld [vmem:[#allocation25_spill] sm:$0xff] }
 0x224   :  { %v3203_v29 = vmul.f32 %v6893_v19, %v7403_v3  ;;  %v3204_v55 = vmul.f32 %v6893_v19, %v7404_v5  ;;  %v3205_v48 = vmul.f32 %v6893_v19, %v7405_v15  ;;  %5071 = vmatprep.mubr.msk.bf16.mxu0 %vm2597_vm0, %v3033_v14  ;;  %5095 = vmatprep.mubr.msk.bf16.mxu1 %vm2597_vm0, %v3242_v53  ;;  %v3021_v28 = vmax.f32 %v3005_v49, 0.0  ;;  %v7410_v53 = vld [vmem:[#allocation11_spill] sm:$0xff] }
 0x225   :  { %v3022_v4 = vmax.f32 %v3006_v18, 0.0  ;;  %5132 = vmatpush3.bf16.msra.mxu1 %v5482_v21  ;;  %5108 = vmatpush3.bf16.msra.mxu0 %v5482_v21  ;;  %v3023_v38 = vmax.f32 %v3007_v32, 0.0  ;;  %v3024_v46 = vmax.f32 %v3008_v41, 0.0  ;;  %v3232_v34 = vmax.f32 %v3216_v6, 0.0  ;;  %v7409_v32 = vld [vmem:[#allocation40_spill] sm:$0xff] }
 0x226   :  { %5133 = vmatprep.subr.bf16.mxu1 %v7406_v8  ;;  %v3233_v11 = vmax.f32 %v3217_v36, 0.0  ;;  %5109 = vmatprep.subr.bf16.mxu0 %v7406_v8  ;;  %v2989_v23 = vmul.f32 %v6893_v19, %v7407_v20  ;;  %v2990_v1 = vmul.f32 %v6893_v19, %v7408_v59  ;;  %v3218_v22 = vadd.f32 %v3202_v57, %v6895_v50  ;;  %v5483_v36 = vld [vmem:[%s7302_s4 + $0x10] sm:$0xff]   ;;  %s5484_s4 = smov 64  }
 0x227   :  { %v3219_v31 = vadd.f32 %v3203_v29, %v6895_v50  ;;  %v3220_v52 = vadd.f32 %v3204_v55, %v6895_v50  ;;  %v3221_v25 = vadd.f32 %v3205_v48, %v6895_v50  ;;  %v3009_v63 = vadd.f32 %v6895_v50, %v2987_v33  ;;  %v7413_v29 = vld [vmem:[#allocation26_spill] sm:$0xff] }
 0x228   :  { %v3010_v10 = vadd.f32 %v6895_v50, %v2988_v54  ;;  %v3011_v6 = vadd.f32 %v6895_v50, %v2989_v23  ;;  %v3034_v17 = vpack.c.bf16 %v3022_v4, %v3021_v28  ;;  %v3243_v61 = vpack.c.bf16 %v3231_v47, %v3230_v37  ;;  %v7414_v4 = vld [vmem:[#allocation27_spill] sm:$0xff] }
 0x229   :  { %5134 = vmatpush3.bf16.msra.mxu1 %v5483_v36  ;;  %5110 = vmatpush3.bf16.msra.mxu0 %v5483_v36  ;;  %v3035_v49 = vpack.c.bf16 %v3024_v46, %v3023_v38  ;;  %v3244_v18 = vpack.c.bf16 %v3233_v11, %v3232_v34  ;;  %v3012_v14 = vadd.f32 %v6895_v50, %v2990_v1  ;;  %v3234_v62 = vmax.f32 %v3218_v22, 0.0  ;;  %v7418_v36 = vld [vmem:[#allocation31_spill] sm:$0xff] }
 0x22a   :  { %5135 = vmatprep.subr.bf16.mxu1 %v7409_v32  ;;  %5111 = vmatprep.subr.bf16.mxu0 %v7409_v32  ;;  %v2991_v41 = vmul.f32 %v6893_v19, %v7410_v53  ;;  %v2992_v33 = vmul.f32 %v6893_v19, %v7411_v26  ;;  %v3206_v54 = vmul.f32 %v6893_v19, %v7412_v44  ;;  %v3235_v57 = vmax.f32 %v3219_v31, 0.0 }
 0x22b   :  { %5072 = vmatmul.mubr.msk.bf16.gmra.mxu0 %vm2597_vm0, %v3034_v17  ;;  %5096 = vmatmul.mubr.msk.bf16.gmra.mxu1 %vm2597_vm0, %v3243_v61  ;;  %v3207_v3 = vmul.f32 %v6893_v19, %v6350_v35  ;;  %v3369_v5 = vmul.f32 %v6893_v19, %v7413_v29  ;;  %v3025_v55 = vmax.f32 %v3009_v63, 0.0  ;;  %v3026_v15 = vmax.f32 %v3010_v10, 0.0  ;;  %v7416_v63 = vld [vmem:[#allocation29_spill] sm:$0xff] }
 0x22c   :  { %5075 = vmatprep.mubr.msk.bf16.mxu0 %vm2597_vm0, %v3035_v49  ;;  %5099 = vmatprep.mubr.msk.bf16.mxu1 %vm2597_vm0, %v3244_v18  ;;  %v3027_v48 = vmax.f32 %v3011_v6, 0.0  ;;  %v3028_v37 = vmax.f32 %v3012_v14, 0.0  ;;  %v3236_v47 = vmax.f32 %v3220_v52, 0.0  ;;  %v3237_v28 = vmax.f32 %v3221_v25, 0.0  ;;  %v7415_v52 = vld [vmem:[#allocation28_spill] sm:$0xff] }
 0x22d   :  { %5136 = vmatpush3.bf16.msra.mxu1 %v7409_v32  ;;  %5112 = vmatpush3.bf16.msra.mxu0 %v7409_v32  ;;  %v3370_v35 = vmul.f32 %v6893_v19, %v7414_v4  ;;  %v3546_v21 = vmul.f32 %v6893_v19, %v6732_v40  ;;  %v3547_v8 = vmul.f32 %v6893_v19, %v6726_v39  ;;  %v7420_v4 = vld [vmem:[#allocation33_spill] sm:$0xff] }
 0x22e   :  { %5137 = vmatprep.subr.bf16.mxu1 %v6662_v7  ;;  %5113 = vmatprep.subr.bf16.mxu0 %v6662_v7  ;;  %v3222_v38 = vadd.f32 %v3206_v54, %v6895_v50  ;;  %v3223_v46 = vadd.f32 %v3207_v3, %v6895_v50  ;;  %v3245_v34 = vpack.c.bf16 %v3235_v57, %v3234_v62 }
 0x22f   :  { %v3013_v11 = vadd.f32 %v6895_v50, %v2991_v41  ;;  %v3014_v20 = vadd.f32 %v6895_v50, %v2992_v33  ;;  %v3385_v23 = vadd.f32 %v3369_v5, %v6895_v50  ;;  %v3386_v59 = vadd.f32 %v3370_v35, %v6895_v50 }
 0x230   :  { %v3036_v1 = vpack.c.bf16 %v3026_v15, %v3025_v55  ;;  %v3562_v39 = vadd.f32 %v3546_v21, %v6895_v50  ;;  %v3563_v40 = vadd.f32 %v3547_v8, %v6895_v50  ;;  %v3037_v22 = vpack.c.bf16 %v3028_v37, %v3027_v48  ;;  %v7421_v21 = vld [vmem:[#allocation34_spill] sm:$0xff] }
 0x231   :  { %5138 = vmatpush3.bf16.msra.mxu1 %v6662_v7  ;;  %5114 = vmatpush3.bf16.msra.mxu0 %v6662_v7  ;;  %v3246_v31 = vpack.c.bf16 %v3237_v28, %v3236_v47  ;;  %v3371_v25 = vmul.f32 %v6893_v19, %v7415_v52  ;;  %v3372_v10 = vmul.f32 %v6893_v19, %v7416_v63  ;;  %v3238_v6 = vmax.f32 %v3222_v38, 0.0  ;;  %v7417_v7 = vld [vmem:[#allocation30_spill] sm:$0xff]  ;;  %v7419_v47 = vld [vmem:[#allocation32_spill] sm:$0xff]  ;;  %v7422_v38 = vld [vmem:[#allocation35_spill] sm:$0xff] }
 0x232   :  { %v3239_v17 = vmax.f32 %v3223_v46, 0.0  ;;  %v3373_v61 = vmul.f32 %v6893_v19, %v7417_v7  ;;  %v3374_v49 = vmul.f32 %v6893_v19, %v7418_v36  ;;  %v3029_v18 = vmax.f32 %v3013_v11, 0.0 }
 0x233   :  { %5076 = vmatmul.mubr.msk.bf16.gmra.mxu0 %vm2597_vm0, %v3036_v1  ;;  %5100 = vmatmul.mubr.msk.bf16.gmra.mxu1 %vm2597_vm0, %v3245_v34  ;;  %v3030_v32 = vmax.f32 %v3014_v20, 0.0  ;;  %v3401_v14 = vmax.f32 %v3385_v23, 0.0  ;;  %v3402_v53 = vmax.f32 %v3386_v59, 0.0  ;;  %v3578_v41 = vmax.f32 %v3562_v39, 0.0 }
 0x234   :  { %5079 = vmatprep.mubr.msk.bf16.mxu0 %vm2597_vm0, %v3037_v22  ;;  %5103 = vmatprep.mubr.msk.bf16.mxu1 %vm2597_vm0, %v3246_v31  ;;  %v3579_v26 = vmax.f32 %v3563_v40, 0.0  ;;  %v3548_v33 = vmul.f32 %v6893_v19, %v6734_v12  ;;  %v3549_v44 = vmul.f32 %v6893_v19, %v6759_v16  ;;  %v3550_v54 = vmul.f32 %v6893_v19, %v6767_v56 }
 0x235   :  { %v3551_v62 = vmul.f32 %v6893_v19, %v6778_v2  ;;  %v3247_v57 = vpack.c.bf16 %v3239_v17, %v3238_v6  ;;  %v3387_v3 = vadd.f32 %v3371_v25, %v6895_v50  ;;  %v3388_v29 = vadd.f32 %v3372_v10, %v6895_v50 }
 0x236   :  { %v3389_v5 = vadd.f32 %v3373_v61, %v6895_v50  ;;  %v3390_v55 = vadd.f32 %v3374_v49, %v6895_v50  ;;  %v3564_v12 = vadd.f32 %v3548_v33, %v6895_v50  ;;  %v3565_v15 = vadd.f32 %v3549_v44, %v6895_v50 }
 0x237   :  { %v3038_v16 = vpack.c.bf16 %v3030_v32, %v3029_v18  ;;  %v3566_v48 = vadd.f32 %v3550_v54, %v6895_v50  ;;  %v3567_v56 = vadd.f32 %v3551_v62, %v6895_v50  ;;  %v3417_v37 = vpack.c.bf16 %v3402_v53, %v3401_v14  ;;  %v7423_v18 = vld [vmem:[#allocation36_spill] sm:$0xff]  ;;  %v7424_v14 = vld [vmem:[#allocation37_spill] sm:$0xff] }
 0x238   :  { %v3594_v2 = vpack.c.bf16 %v3579_v26, %v3578_v41  ;;  %v3375_v28 = vmul.f32 %v6893_v19, %v7419_v47  ;;  %v3376_v35 = vmul.f32 %v6893_v19, %v7420_v4  ;;  %v3377_v8 = vmul.f32 %v6893_v19, %v7421_v21  ;;  %v7425_v41 = vld [vmem:[#allocation38_spill] sm:$0xff] }
 0x239   :  { %v3378_v46 = vmul.f32 %v6893_v19, %v7422_v38  ;;  %v3403_v34 = vmax.f32 %v3387_v3, 0.0  ;;  %v3404_v11 = vmax.f32 %v3388_v29, 0.0  ;;  %v3580_v20 = vmax.f32 %v3564_v12, 0.0 }
 0x23a   :  { %v3581_v23 = vmax.f32 %v3565_v15, 0.0  ;;  %v3405_v59 = vmax.f32 %v3389_v5, 0.0  ;;  %v3406_v1 = vmax.f32 %v3390_v55, 0.0  ;;  %v3582_v39 = vmax.f32 %v3566_v48, 0.0 }
 0x23b   :  { %5080 = vmatmul.mubr.msk.bf16.gmra.mxu0 %vm2597_vm0, %v3038_v16  ;;  %5104 = vmatmul.mubr.msk.bf16.gmra.mxu1 %vm2597_vm0, %v3247_v57  ;;  %v3583_v40 = vmax.f32 %v3567_v56, 0.0  ;;  %v3552_v22 = vmul.f32 %v6893_v19, %v6793_v42  ;;  %v3553_v31 = vmul.f32 %v6893_v19, %v6797_v60  ;;  %v3554_v52 = vmul.f32 %v6893_v19, %v6807_v0 }
 0x23c   :  { %5115 = vmatprep.mubr.msk.bf16.mxu0 %vm2597_vm0, %v3417_v37  ;;  %5139 = vmatprep.mubr.msk.bf16.mxu1 %vm2597_vm0, %v3594_v2  ;;  %v3555_v25 = vmul.f32 %v6893_v19, %v6814_v9  ;;  %v3391_v63 = vadd.f32 %v3375_v28, %v6895_v50  ;;  %v3392_v10 = vadd.f32 %v3376_v35, %v6895_v50 }
 0x23d   :  { %v3393_v6 = vadd.f32 %v3377_v8, %v6895_v50  ;;  %v3394_v17 = vadd.f32 %v3378_v46, %v6895_v50  ;;  %v3568_v7 = vadd.f32 %v3552_v22, %v6895_v50  ;;  %v3569_v42 = vadd.f32 %v3553_v31, %v6895_v50 }
 0x23e   :  { %v3418_v61 = vpack.c.bf16 %v3404_v11, %v3403_v34  ;;  %v3595_v60 = vpack.c.bf16 %v3581_v23, %v3580_v20  ;;  %v3570_v36 = vadd.f32 %v3554_v52, %v6895_v50  ;;  %v3571_v0 = vadd.f32 %v3555_v25, %v6895_v50 }
 0x23f   :  { %v3419_v49 = vpack.c.bf16 %v3406_v1, %v3405_v59  ;;  %v3596_v9 = vpack.c.bf16 %v3583_v40, %v3582_v39  ;;  %v3379_v32 = vmul.f32 %v6893_v19, %v7423_v18  ;;  %v3380_v53 = vmul.f32 %v6893_v19, %v7424_v14 }
 0x240   :  { %v3381_v26 = vmul.f32 %v6893_v19, %v7425_v41  ;;  %v3382_v33 = vmul.f32 %v6893_v19, %v6483_v45  ;;  %v3407_v44 = vmax.f32 %v3391_v63, 0.0  ;;  %v3408_v54 = vmax.f32 %v3392_v10, 0.0 }
 0x241   :  { %v3584_v62 = vmax.f32 %v3568_v7, 0.0  ;;  %v3585_v57 = vmax.f32 %v3569_v42, 0.0  ;;  %v3409_v3 = vmax.f32 %v3393_v6, 0.0  ;;  %v3410_v29 = vmax.f32 %v3394_v17, 0.0 }
 0x242   :  { %v3586_v5 = vmax.f32 %v3570_v36, 0.0  ;;  %v3587_v55 = vmax.f32 %v3571_v0, 0.0  ;;  %v3556_v12 = vmul.f32 %v6893_v19, %v6824_v58  ;;  %v3557_v15 = vmul.f32 %v6893_v19, %v6831_v27 }
 0x243   :  { %5116 = vmatmul.mubr.msk.bf16.vlgmr.msra.gmra.mxu0 %vm2597_vm0, %v3418_v61  ;;  %5140 = vmatmul.mubr.msk.bf16.vlgmr.msra.gmra.mxu1 %vm2597_vm0, %v3595_v60  ;;  %v3558_v45 = vmul.f32 %v6893_v19, %v6841_v13  ;;  %v3559_v16 = vmul.f32 %v6893_v19, %v6854_v43  ;;  %v3395_v48 = vadd.f32 %v3379_v32, %v6895_v50 }
 0x244   :  { %5119 = vmatprep.mubr.msk.bf16.mxu0 %vm2597_vm0, %v3419_v49  ;;  %5143 = vmatprep.mubr.msk.bf16.mxu1 %vm2597_vm0, %v3596_v9  ;;  %v3396_v56 = vadd.f32 %v3380_v53, %v6895_v50  ;;  %v3397_v37 = vadd.f32 %v3381_v26, %v6895_v50  ;;  %v3398_v2 = vadd.f32 %v3382_v33, %v6895_v50 }
 0x245   :  { %v3572_v47 = vadd.f32 %v3556_v12, %v6895_v50  ;;  %v3573_v58 = vadd.f32 %v3557_v15, %v6895_v50  ;;  %v3420_v28 = vpack.c.bf16 %v3408_v54, %v3407_v44  ;;  %v3597_v27 = vpack.c.bf16 %v3585_v57, %v3584_v62 }
 0x246   :  { %v3574_v4 = vadd.f32 %v3558_v45, %v6895_v50  ;;  %v3575_v13 = vadd.f32 %v3559_v16, %v6895_v50  ;;  %v3421_v35 = vpack.c.bf16 %v3410_v29, %v3409_v3  ;;  %v3598_v43 = vpack.c.bf16 %v3587_v55, %v3586_v5 }
 0x247   :  { %v3411_v21 = vmax.f32 %v3395_v48, 0.0  ;;  %v3412_v8 = vmax.f32 %v3396_v56, 0.0  ;;  %v3588_v38 = vmax.f32 %v3572_v47, 0.0  ;;  %v3589_v46 = vmax.f32 %v3573_v58, 0.0 }
 0x248   :  { %v3413_v34 = vmax.f32 %v3397_v37, 0.0  ;;  %v3414_v11 = vmax.f32 %v3398_v2, 0.0  ;;  %v3590_v20 = vmax.f32 %v3574_v4, 0.0  ;;  %v3591_v23 = vmax.f32 %v3575_v13, 0.0 }
 0x249   :  { %v3383_v59 = vmul.f32 %v6893_v19, %v6506_v24  ;;  %v3384_v1 = vmul.f32 %v6893_v19, %v6528_v51  ;;  %v3422_v22 = vpack.c.bf16 %v3412_v8, %v3411_v21  ;;  %v3599_v31 = vpack.c.bf16 %v3589_v46, %v3588_v38 }
 0x24a   :  { %v3423_v52 = vpack.c.bf16 %v3414_v11, %v3413_v34  ;;  %v3600_v25 = vpack.c.bf16 %v3591_v23, %v3590_v20 }
 0x24b   :  { %5120 = vmatmul.mubr.msk.bf16.gmra.mxu0 %vm2597_vm0, %v3420_v28  ;;  %5144 = vmatmul.mubr.msk.bf16.gmra.mxu1 %vm2597_vm0, %v3597_v27  ;;  %v3399_v39 = vadd.f32 %v3383_v59, %v6895_v50  ;;  %v3400_v40 = vadd.f32 %v3384_v1, %v6895_v50 }
 0x24c   :  { %5123 = vmatprep.mubr.msk.bf16.mxu0 %vm2597_vm0, %v3421_v35  ;;  %5147 = vmatprep.mubr.msk.bf16.mxu1 %vm2597_vm0, %v3598_v43 }
 0x24d   :  { %v3415_v24 = vmax.f32 %v3399_v39, 0.0  ;;  %v3416_v63 = vmax.f32 %v3400_v40, 0.0 }
 0x24f   :  { %v3424_v10 = vpack.c.bf16 %v3416_v63, %v3415_v24 }
 0x253   :  { %5124 = vmatmul.mubr.msk.bf16.gmra.mxu0 %vm2597_vm0, %v3422_v22  ;;  %5148 = vmatmul.mubr.msk.bf16.gmra.mxu1 %vm2597_vm0, %v3599_v31 }
 0x254   :  { %5127 = vmatprep.mubr.msk.bf16.mxu0 %vm2597_vm0, %v3423_v52  ;;  %5151 = vmatprep.mubr.msk.bf16.mxu1 %vm2597_vm0, %v3600_v25 }
 0x25b   :  { %5128 = vmatmul.mubr.msk.bf16.gmra.mxu0 %vm2597_vm0, %v3424_v10  ;;  %5152 = vmatmul.mubr.msk.bf16.gmra.mxu1 %vm2597_vm0, %v6903_v30 }
 0x2e3   :  { %v5093_v51 = vpop.f32.mrf.mxu1  ;;  %v5069_v29 = vpop.f32.mrf.mxu0 }
 0x2e4   :  { %3743 = vrot.lane.b32.xlu1 %v5093_v51, %s5484_s4 }
 0x2e5   :  { %v3306_v19 = vpop.f32.mrf.mxu1  ;;  %v3129_v12 = vpop.f32.mrf.mxu0 }
 0x2e6   :  { %3739 = vrot.lane.b32.xlu0 %v3306_v19, %s5484_s4 }
 0x2e7   :  { %v5094_v50 = vpop.f32.mrf.mxu1  ;;  %v5070_v16 = vpop.f32.mrf.mxu0 }
 0x2e8   :  { %3745 = vrot.lane.b32.xlu1 %v5094_v50, %s5484_s4 }
 0x2e9   :  { %v3309_v6 = vpop.f32.mrf.mxu1  ;;  %v3132_v37 = vpop.f32.mrf.mxu0 }
 0x2ea   :  { %3741 = vrot.lane.b32.xlu0 %v3309_v6, %s5484_s4 }
 0x2eb   :  { %v5097_v17 = vpop.f32.mrf.mxu1  ;;  %v5073_v2 = vpop.f32.mrf.mxu0 }
 0x2ed   :  { %v3322_v7 = vpop.f32.mrf.mxu1  ;;  %v3145_v47 = vpop.f32.mrf.mxu0 }
 0x2ee   :  { %3751 = vrot.lane.b32.xlu0 %v5097_v17, %s5484_s4 }
 0x2ef   :  { %v5098_v42 = vpop.f32.mrf.mxu1  ;;  %v5074_v58 = vpop.f32.mrf.mxu0 }
 0x2f0   :  { %3753 = vrot.lane.b32.xlu1 %v5098_v42, %s5484_s4 }
 0x2f1   :  { %v3325_v30 = vpop.f32.mrf.mxu1  ;;  %v3148_v28 = vpop.f32.mrf.mxu0 }
 0x2f2   :  { %3747 = vrot.lane.b32.xlu0 %v3322_v7, %s5484_s4 }
 0x2f3   :  { %v5101_v61 = vpop.f32.mrf.mxu1  ;;  %v5077_v27 = vpop.f32.mrf.mxu0 }
 0x2f4   :  { %3749 = vrot.lane.b32.xlu1 %v3325_v30, %s5484_s4 }
 0x2f5   :  { %v3338_v60 = vpop.f32.mrf.mxu1  ;;  %v3161_v4 = vpop.f32.mrf.mxu0 }
 0x2f6   :  { %3759 = vrot.lane.b32.xlu0 %v5101_v61, %s5484_s4 }
 0x2f7   :  { %v5102_v36 = vpop.f32.mrf.mxu1  ;;  %v5078_v13 = vpop.f32.mrf.mxu0 }
 0x2f8   :  { %3761 = vrot.lane.b32.xlu1 %v5102_v36, %s5484_s4 }
 0x2f9   :  { %v3341_v0 = vpop.f32.mrf.mxu1  ;;  %v3164_v35 = vpop.f32.mrf.mxu0 }
 0x2fa   :  { %3755 = vrot.lane.b32.xlu0 %v3338_v60, %s5484_s4 }
 0x2fb   :  { %v5105_v49 = vpop.f32.mrf.mxu1  ;;  %v5081_v43 = vpop.f32.mrf.mxu0 }
 0x2fc   :  { %3757 = vrot.lane.b32.xlu1 %v3341_v0, %s5484_s4 }
 0x2fd   :  { %v3354_v9 = vpop.f32.mrf.mxu1  ;;  %v3177_v21 = vpop.f32.mrf.mxu0 }
 0x2fe   :  { %3767 = vrot.lane.b32.xlu0 %v5105_v49, %s5484_s4 }
 0x2ff   :  { %v5106_v18 = vpop.f32.mrf.mxu1  ;;  %v5082_v8 = vpop.f32.mrf.mxu0 }
 0x300   :  { %3769 = vrot.lane.b32.xlu1 %v5106_v18, %s5484_s4 }
 0x301   :  { %v3357_v32 = vpop.f32.mrf.mxu1  ;;  %v3180_v38 = vpop.f32.mrf.mxu0 }
 0x302   :  { %3763 = vrot.lane.b32.xlu0 %v3354_v9, %s5484_s4 }
 0x303   :  { %v5141_v14 = vpop.f32.mrf.mxu1  ;;  %v5117_v34 = vpop.f32.mrf.mxu0 }
 0x304   :  { %3765 = vrot.lane.b32.xlu1 %v3357_v32, %s5484_s4 }
 0x305   :  { %v3660_v53 = vpop.f32.mrf.mxu1  ;;  %v3483_v1 = vpop.f32.mrf.mxu0 }
 0x306   :  { %3807 = vrot.lane.b32.xlu0 %v5141_v14, %s5484_s4 }
 0x307   :  { %v5142_v41 = vpop.f32.mrf.mxu1  ;;  %v5118_v31 = vpop.f32.mrf.mxu0 }
 0x308   :  { %3809 = vrot.lane.b32.xlu1 %v5142_v41, %s5484_s4 }
 0x309   :  { %v3663_v26 = vpop.f32.mrf.mxu1  ;;  %v3486_v63 = vpop.f32.mrf.mxu0 }
 0x30a   :  { %3803 = vrot.lane.b32.xlu0 %v3660_v53, %s5484_s4 }
 0x30b   :  { %v5145_v33 = vpop.f32.mrf.mxu1  ;;  %v5121_v6 = vpop.f32.mrf.mxu0 }
 0x30c   :  { %3805 = vrot.lane.b32.xlu1 %v3663_v26, %s5484_s4 }
 0x30d   :  { %v3676_v44 = vpop.f32.mrf.mxu1  ;;  %v3499_v61 = vpop.f32.mrf.mxu0 }
 0x30e   :  { %3815 = vrot.lane.b32.xlu0 %v5145_v33, %s5484_s4 }
 0x30f   :  { %v5146_v54 = vpop.f32.mrf.mxu1  ;;  %v5122_v9 = vpop.f32.mrf.mxu0 }
 0x310   :  { %3817 = vrot.lane.b32.xlu1 %v5146_v54, %s5484_s4 }
 0x311   :  { %v3679_v62 = vpop.f32.mrf.mxu1  ;;  %v3502_v41 = vpop.f32.mrf.mxu0 }
 0x312   :  { %3811 = vrot.lane.b32.xlu0 %v3676_v44, %s5484_s4 }
 0x313   :  { %v5149_v57 = vpop.f32.mrf.mxu1 }
 0x314   :  { %3813 = vrot.lane.b32.xlu1 %v3679_v62, %s5484_s4  ;;  %v5125_v62 = vpop.f32.mrf.mxu0 }
 0x315   :  { %v3692_v3 = vpop.f32.mrf.mxu1 }
 0x316   :  { %3823 = vrot.lane.b32.xlu0 %v5149_v57, %s5484_s4 }
 0x317   :  { %v5150_v5 = vpop.f32.mrf.mxu1 }
 0x318   :  { %3825 = vrot.lane.b32.xlu1 %v5150_v5, %s5484_s4 }
 0x319   :  { %v3695_v55 = vpop.f32.mrf.mxu1 }
 0x31a   :  { %3819 = vrot.lane.b32.xlu0 %v3692_v3, %s5484_s4 }
 0x31b   :  { %v5153_v15 = vpop.f32.mrf.mxu1 }
 0x31c   :  { %3821 = vrot.lane.b32.xlu1 %v3695_v55, %s5484_s4  ;;  %v3515_v55 = vpop.f32.mrf.mxu0 }
 0x31d   :  { %v3708_v45 = vpop.f32.mrf.mxu1 }
 0x31e   :  { %3827 = vrot.lane.b32.xlu0 %v3708_v45, %s5484_s4 }
 0x31f   :  { %v5154_v48 = vpop.f32.mrf.mxu1 }
 0x321   :  { %v3711_v56 = vpop.f32.mrf.mxu1 }
 0x322   :  { %3831 = vrot.lane.b32.xlu0 %v5153_v15, %s5484_s4  ;;  %3829 = vrot.lane.b32.xlu1 %v3711_v56, %s5484_s4 }
 0x326   :  { %3833 = vrot.lane.b32.xlu1 %v5154_v48, %s5484_s4  ;;  %v5126_v48 = vpop.f32.mrf.mxu0 }
 0x356   :  { %v3744_v46 = vpop.permute.xlu1 %3743 }
 0x357   :  { %v3853_v11 = vsel %vm2597_vm0, %v5069_v29, %v3744_v46 }
 0x358   :  { %3887 = vst [vmem:[%s7305_s5 + $0x20] sm:$0xff] %v3853_v11  ;;  %v3740_v20 = vpop.permute.xlu0 %3739 }
 0x359   :  { %v3851_v23 = vsel %vm2597_vm0, %v3129_v12, %v3740_v20 }
 0x35a   :  { %3883 = vst [vmem:[%s7305_s5] sm:$0xff] %v3851_v23  ;;  %v3746_v59 = vpop.permute.xlu1 %3745 }
 0x35b   :  { %v3854_v39 = vsel %vm2597_vm0, %v5070_v16, %v3746_v59 }
 0x35c   :  { %3889 = vst [vmem:[%s7305_s5 + $0x30] sm:$0xff] %v3854_v39  ;;  %v3742_v40 = vpop.permute.xlu0 %3741 }
 0x35d   :  { %v3852_v22 = vsel %vm2597_vm0, %v3132_v37, %v3742_v40 }
 0x35e   :  { %3885 = vst [vmem:[%s7305_s5 + $0x10] sm:$0xff] %v3852_v22 }
 0x360   :  { %v3752_v52 = vpop.permute.xlu0 %3751 }
 0x361   :  { %v3857_v25 = vsel %vm2597_vm0, %v5073_v2, %v3752_v52 }
 0x362   :  { %3895 = vst [vmem:[%s7305_s5 + $0x60] sm:$0xff] %v3857_v25  ;;  %v3754_v24 = vpop.permute.xlu1 %3753 }
 0x363   :  { %v3858_v10 = vsel %vm2597_vm0, %v5074_v58, %v3754_v24  ;;  %v3518_v58 = vpop.f32.mrf.mxu0 }
 0x364   :  { %3897 = vst [vmem:[%s7305_s5 + $0x70] sm:$0xff] %v3858_v10  ;;  %v3748_v51 = vpop.permute.xlu0 %3747 }
 0x365   :  { %v3855_v19 = vsel %vm2597_vm0, %v3145_v47, %v3748_v51 }
 0x366   :  { %3891 = vst [vmem:[%s7305_s5 + $0x40] sm:$0xff] %v3855_v19  ;;  %v3750_v50 = vpop.permute.xlu1 %3749 }
 0x367   :  { %v3856_v17 = vsel %vm2597_vm0, %v3148_v28, %v3750_v50 }
 0x368   :  { %3893 = vst [vmem:[%s7305_s5 + $0x50] sm:$0xff] %v3856_v17  ;;  %v3760_v7 = vpop.permute.xlu0 %3759 }
 0x369   :  { %v3861_v42 = vsel %vm2597_vm0, %v5077_v27, %v3760_v7 }
 0x36a   :  { %3903 = vst [vmem:[%s7305_s5 + $0xa0] sm:$0xff] %v3861_v42  ;;  %v3762_v30 = vpop.permute.xlu1 %3761 }
 0x36b   :  { %v3862_v60 = vsel %vm2597_vm0, %v5078_v13, %v3762_v30 }
 0x36c   :  { %3905 = vst [vmem:[%s7305_s5 + $0xb0] sm:$0xff] %v3862_v60  ;;  %v3756_v36 = vpop.permute.xlu0 %3755 }
 0x36d   :  { %v3859_v0 = vsel %vm2597_vm0, %v3161_v4, %v3756_v36 }
 0x36e   :  { %3899 = vst [vmem:[%s7305_s5 + $0x80] sm:$0xff] %v3859_v0  ;;  %v3758_v49 = vpop.permute.xlu1 %3757 }
 0x36f   :  { %v3860_v18 = vsel %vm2597_vm0, %v3164_v35, %v3758_v49  ;;  %v5129_v35 = vpop.f32.mrf.mxu0 }
 0x370   :  { %3901 = vst [vmem:[%s7305_s5 + $0x90] sm:$0xff] %v3860_v18  ;;  %v3768_v32 = vpop.permute.xlu0 %3767 }
 0x371   :  { %v3865_v14 = vsel %vm2597_vm0, %v5081_v43, %v3768_v32  ;;  %v3531_v46 = vpop.f32.mrf.mxu0 }
 0x372   :  { %3911 = vst [vmem:[%s7305_s5 + $0xe0] sm:$0xff] %v3865_v14  ;;  %v3770_v53 = vpop.permute.xlu1 %3769 }
 0x373   :  { %v3866_v26 = vsel %vm2597_vm0, %v5082_v8, %v3770_v53  ;;  %v5130_v59 = vpop.f32.mrf.mxu0 }
 0x374   :  { %3913 = vst [vmem:[%s7305_s5 + $0xf0] sm:$0xff] %v3866_v26  ;;  %v3764_v33 = vpop.permute.xlu0 %3763 }
 0x375   :  { %v3863_v44 = vsel %vm2597_vm0, %v3177_v21, %v3764_v33  ;;  %v3534_v22 = vpop.f32.mrf.mxu0 }
 0x376   :  { %3907 = vst [vmem:[%s7305_s5 + $0xc0] sm:$0xff] %v3863_v44  ;;  %v3766_v54 = vpop.permute.xlu1 %3765 }
 0x377   :  { %v3864_v57 = vsel %vm2597_vm0, %v3180_v38, %v3766_v54 }
 0x378   :  { %3909 = vst [vmem:[%s7305_s5 + $0xd0] sm:$0xff] %v3864_v57  ;;  %v3808_v3 = vpop.permute.xlu0 %3807 }
 0x379   :  { %v3869_v29 = vsel %vm2597_vm0, %v5117_v34, %v3808_v3 }
 0x37a   :  { %3888 = vst [vmem:[%s7305_s5 + $0x28] sm:$0xff] %v3869_v29  ;;  %v3810_v5 = vpop.permute.xlu1 %3809 }
 0x37b   :  { %v3870_v12 = vsel %vm2597_vm0, %v5118_v31, %v3810_v5 }
 0x37c   :  { %3890 = vst [vmem:[%s7305_s5 + $0x38] sm:$0xff] %v3870_v12  ;;  %v3804_v15 = vpop.permute.xlu0 %3803 }
 0x37d   :  { %v3867_v45 = vsel %vm2597_vm0, %v3483_v1, %v3804_v15 }
 0x37e   :  { %3884 = vst [vmem:[%s7305_s5 + $0x8] sm:$0xff] %v3867_v45  ;;  %v3806_v16 = vpop.permute.xlu1 %3805 }
 0x37f   :  { %v3868_v56 = vsel %vm2597_vm0, %v3486_v63, %v3806_v16 }
 0x380   :  { %3886 = vst [vmem:[%s7305_s5 + $0x18] sm:$0xff] %v3868_v56  ;;  %v3816_v37 = vpop.permute.xlu0 %3815 }
 0x381   :  { %v3873_v2 = vsel %vm2597_vm0, %v5121_v6, %v3816_v37 }
 0x382   :  { %3896 = vst [vmem:[%s7305_s5 + $0x68] sm:$0xff] %v3873_v2  ;;  %v3818_v47 = vpop.permute.xlu1 %3817 }
 0x383   :  { %v3874_v28 = vsel %vm2597_vm0, %v5122_v9, %v3818_v47 }
 0x384   :  { %3898 = vst [vmem:[%s7305_s5 + $0x78] sm:$0xff] %v3874_v28  ;;  %v3812_v27 = vpop.permute.xlu0 %3811 }
 0x385   :  { %v3871_v4 = vsel %vm2597_vm0, %v3499_v61, %v3812_v27 }
 0x386   :  { %3892 = vst [vmem:[%s7305_s5 + $0x48] sm:$0xff] %v3871_v4  ;;  %v3814_v13 = vpop.permute.xlu1 %3813 }
 0x387   :  { %v3872_v43 = vsel %vm2597_vm0, %v3502_v41, %v3814_v13 }
 0x388   :  { %3894 = vst [vmem:[%s7305_s5 + $0x58] sm:$0xff] %v3872_v43  ;;  %v3824_v21 = vpop.permute.xlu0 %3823 }
 0x389   :  { %v3877_v8 = vsel %vm2597_vm0, %v5125_v62, %v3824_v21 }
 0x38a   :  { %3904 = vst [vmem:[%s7305_s5 + $0xa8] sm:$0xff] %v3877_v8  ;;  %v3826_v38 = vpop.permute.xlu1 %3825 }
 0x38b   :  { %v3878_v34 = vsel %vm2597_vm0, %v5126_v48, %v3826_v38 }
 0x38c   :  { %3906 = vst [vmem:[%s7305_s5 + $0xb8] sm:$0xff] %v3878_v34  ;;  %v3820_v11 = vpop.permute.xlu0 %3819 }
 0x38d   :  { %v3875_v20 = vsel %vm2597_vm0, %v3515_v55, %v3820_v11 }
 0x38e   :  { %3900 = vst [vmem:[%s7305_s5 + $0x88] sm:$0xff] %v3875_v20  ;;  %v3822_v23 = vpop.permute.xlu1 %3821 }
 0x38f   :  { %v3876_v1 = vsel %vm2597_vm0, %v3518_v58, %v3822_v23 }
 0x390   :  { %3902 = vst [vmem:[%s7305_s5 + $0x98] sm:$0xff] %v3876_v1  ;;  %v3828_v39 = vpop.permute.xlu0 %3827 }
 0x391   :  { %v3879_v40 = vsel %vm2597_vm0, %v3531_v46, %v3828_v39 }
 0x392   :  { %3908 = vst [vmem:[%s7305_s5 + $0xc8] sm:$0xff] %v3879_v40 }
 0x394   :  { %v3832_v31 = vpop.permute.xlu0 %3831  ;;  %v3830_v52 = vpop.permute.xlu1 %3829 }
 0x395   :  { %v3881_v25 = vsel %vm2597_vm0, %v5129_v35, %v3832_v31  ;;  %v3880_v24 = vsel %vm2597_vm0, %v3534_v22, %v3830_v52 }
 0x396   :  { %3912 = vst [vmem:[%s7305_s5 + $0xe8] sm:$0xff] %v3881_v25  ;;  %3910 = vst [vmem:[%s7305_s5 + $0xd8] sm:$0xff] %v3880_v24 }
 0x398   :  { %v3834_v63 = vpop.permute.xlu1 %3833 }
 0x399   :  { %v3882_v10 = vsel %vm2597_vm0, %v5130_v59, %v3834_v63 }
 0x39a   :  { %3914 = vst [vmem:[%s7305_s5 + $0xf8] sm:$0xff] %v3882_v10 }

</bundles_post_ra>
